<compile_context>
chip_gen: v7x
topology: tpu7x:2x2x1
jax: 0.10.0
libtpu: 0.0.40
codegen_flags: <defaults>
</compile_context>

<pallas_src>
import functools

import jax
import jax.numpy as jnp
import numpy as np
from jax import lax
from jax.experimental import pallas as pl
from jax.experimental.pallas import tpu as pltpu


def _round_up(x, m):
    return ((x + m - 1) // m) * m


_NEG = -1e30  # -inf-safe mask for padded vocab columns / padded T positions


def _make_decoder_kernel(Bp, T, Tc, Tn, Hp, Vp, max_len, energy_dtype, approx_recip):
    Tp = Tn * Tc
    f32 = jnp.float32

    def kernel(enc_ref, eproj_ref, v_ref, whf_ref, bh_ref, wic_ref, bi_ref,
               outw_ref, outb_ref, embwie_ref, gix0_ref,
               lp_hbm, hid_ref, lp_buf, dma_sem):
        mm = whf_ref.dtype
        e_dt = energy_dtype
        # Only the tiny loop-invariants are hoisted; the large operands
        # (enc, e_proj, out_w, emb_wie) are read from their VMEM refs at the
        # point of use so no second f32 copy lives across the decode loop.
        v_e = v_ref[...].astype(e_dt)[None, :, :]     # (1, 1, Hp)
        bh = bh_ref[...].astype(f32)                  # (1, 3Hp)
        bi = bi_ref[...].astype(f32)                  # (1, 3Hp)
        outb = outb_ref[...].astype(f32)              # (1, Vp)  padded cols = -1e30

        def step_fn(step, carry):
            h, gix = carry                            # (Bp, Hp), (Bp, 3Hp) f32

            # ---- fused h-projection: [attention hidden half | GRU hidden gates] ----
            h_proj = jnp.dot(h.astype(mm), whf_ref[...], preferred_element_type=f32)
            h_part = h_proj[:, :Hp]                   # (Bp, Hp)
            gh = h_proj[:, Hp:] + bh                  # (Bp, 3Hp)

            # ---- attention: online softmax over T chunks (bounded live footprint) ----
            h_part_e = h_part.astype(e_dt)[:, None, :]
            m = jnp.full((Bp, 1), _NEG, f32)
            l = jnp.zeros((Bp, 1), f32)
            ctx = jnp.zeros((Bp, Hp), f32)
            for c in range(Tn):                       # static, small chunk count
                energy = jnp.tanh(h_part_e + eproj_ref[c].astype(e_dt))   # (Bp, Tc, Hp)
                scores = jnp.sum((energy * v_e).astype(f32), axis=-1)     # (Bp, Tc)
                if Tp != T:                           # mask padded T positions
                    t_idx = lax.broadcasted_iota(jnp.int32, (Bp, Tc), 1) + c * Tc
                    scores = jnp.where(t_idx < T, scores, _NEG)
                m_new = jnp.maximum(m, jnp.max(scores, axis=-1, keepdims=True))
                alpha = jnp.exp(m - m_new)
                p = jnp.exp(scores - m_new)
                l = alpha * l + jnp.sum(p, axis=-1, keepdims=True)
                prod = p.astype(e_dt)[:, :, None] * enc_ref[c].astype(e_dt)
                ctx = alpha * ctx + jnp.sum(prod.astype(f32), axis=1)
                m = m_new
            context = ctx * pl.reciprocal(l, approx=approx_recip)          # (Bp, Hp)

            # ---- GRU step (PyTorch gate order r, z, n); x_emb @ W_ie carried as gix ----
            gi = gix + jnp.dot(context.astype(mm), wic_ref[...],
                               preferred_element_type=f32) + bi
            r = jax.nn.sigmoid(gi[:, :Hp] + gh[:, :Hp])
            z = jax.nn.sigmoid(gi[:, Hp:2 * Hp] + gh[:, Hp:2 * Hp])
            n = jnp.tanh(gi[:, 2 * Hp:] + r * gh[:, 2 * Hp:])
            h_new = (1.0 - z) * n + z * h

            # ---- output projection + log_softmax (padded vocab masked by -1e30 bias) ----
            logits = jnp.dot(h_new.astype(mm), outw_ref[...],
                             preferred_element_type=f32) + outb
            lmax = jnp.max(logits, axis=-1, keepdims=True)
            lse = lmax + jnp.log(jnp.sum(jnp.exp(logits - lmax), axis=-1, keepdims=True))
            lp = logits - lse                                               # (Bp, Vp)

            # ---- stream log-probs to HBM: double-buffered scratch + async copy ----
            slot = step % 2

            @pl.when(step >= 2)
            def _():
                # Slot is reused every 2 steps: wait for its in-flight copy first.
                # (descriptor is only used for its byte count / semaphore)
                pltpu.make_async_copy(lp_buf.at[slot], lp_hbm.at[0],
                                      dma_sem.at[slot]).wait()

            lp_buf[slot] = lp
            pltpu.make_async_copy(lp_buf.at[slot], lp_hbm.at[step],
                                  dma_sem.at[slot]).start()

            # ---- greedy argmax (reuses lmax; no extra cross-lane reduce) -> next gix ----
            iota = lax.broadcasted_iota(jnp.int32, (Bp, Vp), 1)
            idx = jnp.min(jnp.where(logits >= lmax, iota, Vp), axis=-1, keepdims=True)
            one_hot = (iota == idx).astype(mm)
            gix_next = jnp.dot(one_hot, embwie_ref[...], preferred_element_type=f32)
            return h_new, gix_next

        h0 = jnp.zeros((Bp, Hp), f32)
        g0 = gix0_ref[...].astype(f32)
        h_fin, _ = lax.fori_loop(0, max_len, step_fn, (h0, g0),
                                 unroll=True if max_len <= 8 else 2)
        hid_ref[...] = h_fin

        # Drain the last (up to 2) outstanding log-prob DMAs before the kernel ends.
        for s in range(max(0, max_len - 2), max_len):
            pltpu.make_async_copy(lp_buf.at[s % 2], lp_hbm.at[s], dma_sem.at[s % 2]).wait()

    return kernel


def decoder_forward(encoder_outputs, params, *, max_len, sos_id,
                    matmul_dtype=jnp.float32, energy_dtype=None, t_chunk=256):
    """Pallas TPU equivalent of Decoder.forward (greedy, no teacher forcing).

    matmul_dtype : dtype of the MXU operands (bf16 is valid on v5e/v6e/v7x).
    energy_dtype : dtype of the attention tanh / score elementwise math.
                   Keep f32 on v5e (no bf16 VPU/EUP); bf16 on v6e/v7x.
    t_chunk      : attention chunk length over T (online softmax tile).
    """
    B, T, H = encoder_outputs.shape
    V = params["emb"].shape[0]
    Bp = _round_up(B, 8)       # sublane alignment
    Hp = _round_up(H, 128)     # lane alignment for hidden dim
    Vp = _round_up(V, 128)     # lane-dense log-prob stores
    Tc = min(_round_up(T, 8), _round_up(max(int(t_chunk), 8), 8))
    Tn = -(-T // Tc)
    Tp = Tn * Tc

    f32 = jnp.float32
    mm = matmul_dtype
    e_dt = jnp.float32 if energy_dtype is None else energy_dtype
    # Approx (EUP) reciprocal for the softmax denominator only in the reduced-
    # precision path; the f32 path stays bit-tight for strict verification.
    approx_recip = bool(np.dtype(mm) != np.dtype(np.float32))

    enc = encoder_outputs.astype(f32)
    # Hoisted encoder-side attention projection (identical every decode step).
    e_proj = (enc.reshape(B * T, H) @ params["attn_we"].astype(f32)).reshape(B, T, H)
    e_proj = e_proj + params["attn_b"].astype(f32)[None, :, :]

    def pad_chunks(x):         # (B, T, H) -> (Tn, Bp, Tc, Hp)
        x = jnp.pad(x.astype(f32), ((0, Bp - B), (0, Tp - T), (0, Hp - H)))
        return x.reshape(Bp, Tn, Tc, Hp).transpose(1, 0, 2, 3)

    def zpad(x, shape):
        x = x.astype(f32)
        return jnp.pad(x, [(0, s - d) for d, s in zip(x.shape, shape)])

    def pad_gates(w, rows_to):
        # (rows, 3H) in PyTorch gate layout [r|z|n] -> (rows_to, 3Hp), gate-blockwise.
        rows = w.shape[0]
        blocks = [jnp.pad(w[:, g * H:(g + 1) * H].astype(f32),
                          ((0, rows_to - rows), (0, Hp - H))) for g in range(3)]
        return jnp.concatenate(blocks, axis=1)

    enc_p = pad_chunks(enc)
    eproj_p = pad_chunks(e_proj)
    v_p = zpad(params["attn_v"], (1, Hp))
    w_hfused = jnp.concatenate([zpad(params["attn_wh"], (Hp, Hp)),
                                pad_gates(params["gru_whT"], Hp)], axis=1)   # (Hp, 4Hp)
    bh_p = pad_gates(params["gru_bh"], 1)
    w_ic_p = pad_gates(params["gru_wic"], Hp)
    bi_p = pad_gates(params["gru_bi"], 1)
    out_wT_p = zpad(params["out_wT"], (Hp, Vp))
    out_b_p = jnp.pad(params["out_b"].astype(f32), ((0, 0), (0, Vp - V)),
                      constant_values=_NEG)                  # mask padded vocab columns
    # Embedding pre-multiplied by the GRU input weights: the next-token gate input
    # is one_hot @ emb_wie, removing a serial dot + concat from the recurrence.
    emb_wie_p = pad_gates(params["emb"].astype(f32) @ params["gru_wie"].astype(f32), Vp)
    gix0 = jnp.broadcast_to(
        pad_gates(params["emb"][sos_id].astype(f32)[None, :]
                  @ params["gru_wie"].astype(f32), 1),
        (Bp, 3 * Hp))

    # Optional low-precision matmul operands; all accumulation stays f32.
    enc_p, eproj_p, w_hfused, w_ic_p, out_wT_p, emb_wie_p = (
        x.astype(mm) for x in (enc_p, eproj_p, w_hfused, w_ic_p, out_wT_p, emb_wie_p))

    operands = (enc_p, eproj_p, v_p, w_hfused, bh_p, w_ic_p, bi_p,
                out_wT_p, out_b_p, emb_wie_p, gix0)

    # Explicit scoped-VMEM budget (defaults are 16/32 MiB and too small at prod shapes).
    resident = sum(int(a.size) * a.dtype.itemsize for a in operands)
    resident += 2 * Bp * Vp * 4            # lp double-buffer scratch
    resident += Bp * Hp * 4                # hidden-state output
    resident += 4 * Bp * Tc * Hp * 4       # transient per-chunk attention temporaries
    vmem_limit = int(min(resident + (8 << 20), 100 << 20))

    kernel = _make_decoder_kernel(Bp, T, Tc, Tn, Hp, Vp, max_len, e_dt, approx_recip)
    vmem = lambda: pl.BlockSpec(memory_space=pltpu.MemorySpace.VMEM)

    lp_pad, hid_pad = pl.pallas_call(
        kernel,
        out_shape=[jax.ShapeDtypeStruct((max_len, Bp, Vp), jnp.float32),
                   jax.ShapeDtypeStruct((Bp, Hp), jnp.float32)],
        in_specs=[vmem() for _ in range(len(operands))],
        out_specs=[pl.BlockSpec(memory_space=pl.ANY),   # log-probs streamed via DMA
                   vmem()],
        scratch_shapes=[pltpu.VMEM((2, Bp, Vp), jnp.float32),
                        pltpu.SemaphoreType.DMA((2,))],
        compiler_params=pltpu.CompilerParams(vmem_limit_bytes=vmem_limit),
    )(*operands)

    outputs = jnp.transpose(lp_pad[:, :B, :V], (1, 0, 2))   # (B, max_len, V) == permute(1,0,2)
    decoder_hidden = hid_pad[:B, :H][None, :, :]            # (1, B, H)
    return outputs, decoder_hidden


def decoder_reference(enc, params, *, max_len, sos_id):
    """Pure-JAX reference matching the PyTorch forward (greedy, no teacher forcing)."""
    B, T, H = enc.shape
    h = jnp.zeros((B, H), jnp.float32)
    x_emb = jnp.broadcast_to(params["emb"][sos_id], (B, H))
    outs = []
    for _ in range(max_len):
        h_part = h @ params["attn_wh"]
        e_part = (enc.reshape(B * T, H) @ params["attn_we"]).reshape(B, T, H)
        energy = jnp.tanh(h_part[:, None, :] + e_part + params["attn_b"][None])
        scores = jnp.sum(energy * params["attn_v"][None], axis=-1)
        attn = jax.nn.softmax(scores, axis=-1)
        context = jnp.einsum("bt,bth->bh", attn, enc)
        gi = x_emb @ params["gru_wie"] + context @ params["gru_wic"] + params["gru_bi"]
        gh = h @ params["gru_whT"] + params["gru_bh"]
        r = jax.nn.sigmoid(gi[:, :H] + gh[:, :H])
        z = jax.nn.sigmoid(gi[:, H:2 * H] + gh[:, H:2 * H])
        n = jnp.tanh(gi[:, 2 * H:] + r * gh[:, 2 * H:])
        h = (1.0 - z) * n + z * h
        lp = jax.nn.log_softmax(h @ params["out_wT"] + params["out_b"], axis=-1)
        outs.append(lp)
        x_emb = params["emb"][jnp.argmax(lp, axis=-1)]
    return jnp.stack(outs, axis=1), h[None]


def init_params(key, vocab_size, hidden_size):
    H, V = hidden_size, vocab_size
    ks = jax.random.split(key, 13)
    s = 0.2
    return {
        "emb":     jax.random.normal(ks[0], (V, H), jnp.float32) * s,
        "attn_wh": jax.random.normal(ks[1], (H, H), jnp.float32) * s,   # W_attn^T (hidden half)
        "attn_we": jax.random.normal(ks[2], (H, H), jnp.float32) * s,   # W_attn^T (encoder half)
        "attn_b":  jax.random.normal(ks[3], (1, H), jnp.float32) * s,
        "attn_v":  jax.random.normal(ks[4], (1, H), jnp.float32) * s,
        "gru_wie": jax.random.normal(ks[5], (H, 3 * H), jnp.float32) * s,  # W_ih^T (emb part)
        "gru_wic": jax.random.normal(ks[6], (H, 3 * H), jnp.float32) * s,  # W_ih^T (context part)
        "gru_bi":  jax.random.normal(ks[7], (1, 3 * H), jnp.float32) * s,
        "gru_bh":  jax.random.normal(ks[9], (1, 3 * H), jnp.float32) * s,
        "gru_whT": jax.random.normal(ks[8], (H, 3 * H), jnp.float32) * s,  # W_hh^T
        "out_wT":  jax.random.normal(ks[10], (H, V), jnp.float32) * s,
        "out_b":   jax.random.normal(ks[11], (1, V), jnp.float32) * s,
    }


if __name__ == "__main__":
    B, T, H, V = 2, 8, 32, 32
    MAX_LEN, SOS_ID, EOS_ID = 6, 1, 2   # eos is unused by Decoder.forward

    key = jax.random.PRNGKey(0)
    k_enc, k_par, k_enc2 = jax.random.split(key, 3)
    encoder_outputs = jax.random.normal(k_enc, (B, T, H), jnp.float32)
    params = init_params(k_par, V, H)

    # --- base path (single attention chunk, f32) ---
    run = jax.jit(functools.partial(decoder_forward, max_len=MAX_LEN, sos_id=SOS_ID))
    outputs, decoder_hidden = run(encoder_outputs, params)
    jax.block_until_ready((outputs, decoder_hidden))

    ref_out, ref_hid = decoder_reference(encoder_outputs, params, max_len=MAX_LEN, sos_id=SOS_ID)
    np.testing.assert_allclose(np.asarray(outputs), np.asarray(ref_out), rtol=2e-4, atol=2e-4)
    np.testing.assert_allclose(np.asarray(decoder_hidden), np.asarray(ref_hid), rtol=2e-4, atol=2e-4)
    assert outputs.shape == (B, MAX_LEN, V) and decoder_hidden.shape == (1, B, H)

    # --- multi-chunk online-softmax path (T not a chunk multiple -> masked tail) ---
    T2 = 20
    enc2 = jax.random.normal(k_enc2, (B, T2, H), jnp.float32)
    run2 = jax.jit(functools.partial(decoder_forward, max_len=MAX_LEN, sos_id=SOS_ID, t_chunk=8))
    out2, hid2 = run2(enc2, params)
    jax.block_until_ready((out2, hid2))
    ref_out2, ref_hid2 = decoder_reference(enc2, params, max_len=MAX_LEN, sos_id=SOS_ID)
    np.testing.assert_allclose(np.asarray(out2), np.asarray(ref_out2), rtol=2e-4, atol=2e-4)
    np.testing.assert_allclose(np.asarray(hid2), np.asarray(ref_hid2), rtol=2e-4, atol=2e-4)

    # --- bf16 matmul-operand + bf16 energy path (v6e/v7x; keep energy f32 on v5e) ---
    # Greedy decoding may legitimately pick different tokens under reduced precision,
    # so only a finiteness check here.
    run_bf16 = jax.jit(functools.partial(decoder_forward, max_len=MAX_LEN, sos_id=SOS_ID,
                                         matmul_dtype=jnp.bfloat16,
                                         energy_dtype=jnp.bfloat16))
    out_bf16, hid_bf16 = run_bf16(encoder_outputs, params)
    jax.block_until_ready((out_bf16, hid_bf16))
    assert bool(jnp.all(jnp.isfinite(out_bf16))) and bool(jnp.all(jnp.isfinite(hid_bf16)))

    print("KERNEL_OK")
</pallas_src>

<mosaic_0001>
module attributes {stable_mosaic.version = 11 : i64} {
  func.func @kernel(%arg0: memref<1x8x8x128xf32, #tpu.memory_space<vmem>>, %arg1: memref<1x8x8x128xf32, #tpu.memory_space<vmem>>, %arg2: memref<1x128xf32, #tpu.memory_space<vmem>>, %arg3: memref<128x512xf32, #tpu.memory_space<vmem>>, %arg4: memref<1x384xf32, #tpu.memory_space<vmem>>, %arg5: memref<128x384xf32, #tpu.memory_space<vmem>>, %arg6: memref<1x384xf32, #tpu.memory_space<vmem>>, %arg7: memref<128x128xf32, #tpu.memory_space<vmem>>, %arg8: memref<1x128xf32, #tpu.memory_space<vmem>>, %arg9: memref<128x384xf32, #tpu.memory_space<vmem>>, %arg10: memref<8x384xf32, #tpu.memory_space<vmem>>, %arg11: memref<6x8x128xf32, #tpu.memory_space<any>>, %arg12: memref<8x128xf32, #tpu.memory_space<vmem>>, %arg13: memref<2x8x128xf32, #tpu.memory_space<vmem>>, %arg14: memref<2x!tpu.dma_semaphore, #tpu.memory_space<semaphore_mem>>) attributes {dimension_semantics = [], scalar_prefetch = 0 : i64, scratch_operands = 2 : i64, tpu.core_type = #tpu.core_type<tc>} {
    %c0 = arith.constant 0 : index
    %c0_0 = arith.constant 0 : index
    %0 = vector.load %arg2[%c0, %c0_0] : memref<1x128xf32, #tpu.memory_space<vmem>>, vector<1x128xf32>
    %1 = vector.shape_cast %0 : vector<1x128xf32> to vector<1x1x128xf32>
    %c0_1 = arith.constant 0 : index
    %c0_2 = arith.constant 0 : index
    %2 = vector.load %arg4[%c0_1, %c0_2] : memref<1x384xf32, #tpu.memory_space<vmem>>, vector<1x384xf32>
    %c0_3 = arith.constant 0 : index
    %c0_4 = arith.constant 0 : index
    %3 = vector.load %arg6[%c0_3, %c0_4] : memref<1x384xf32, #tpu.memory_space<vmem>>, vector<1x384xf32>
    %c0_5 = arith.constant 0 : index
    %c0_6 = arith.constant 0 : index
    %4 = vector.load %arg8[%c0_5, %c0_6] : memref<1x128xf32, #tpu.memory_space<vmem>>, vector<1x128xf32>
    %cst = arith.constant 0.000000e+00 : f32
    %5 = vector.broadcast %cst : f32 to vector<8x128xf32>
    %c0_7 = arith.constant 0 : index
    %c0_8 = arith.constant 0 : index
    %6 = vector.load %arg10[%c0_7, %c0_8] : memref<8x384xf32, #tpu.memory_space<vmem>>, vector<8x384xf32>
    %c0_i32 = arith.constant 0 : i32
    %c0_9 = arith.constant 0 : index
    %c0_10 = arith.constant 0 : index
    %7 = vector.load %arg3[%c0_9, %c0_10] : memref<128x512xf32, #tpu.memory_space<vmem>>, vector<128x512xf32>
    %cst_11 = arith.constant dense<0.000000e+00> : vector<8x512xf32>
    %8 = tpu.matmul %5, %7, %cst_11 {dimension_numbers = #tpu.dot_dimension_numbers<[1], [0], [0], [1], [0, 0, 1, 1], [], []>} : vector<8x128xf32>, vector<128x512xf32>, vector<8x512xf32> -> vector<8x512xf32>
    %9 = vector.extract_strided_slice %8 {offsets = [0, 0], sizes = [8, 128], strides = [1, 1]} : vector<8x512xf32> to vector<8x128xf32>
    %10 = vector.extract_strided_slice %8 {offsets = [0, 128], sizes = [8, 384], strides = [1, 1]} : vector<8x512xf32> to vector<8x384xf32>
    %11 = vector.broadcast %2 : vector<1x384xf32> to vector<8x384xf32>
    %12 = arith.addf %10, %11 : vector<8x384xf32>
    %13 = vector.shape_cast %9 : vector<8x128xf32> to vector<8x1x128xf32>
    %cst_12 = arith.constant -1.000000e+30 : f32
    %14 = vector.broadcast %cst_12 : f32 to vector<8x1xf32>
    %cst_13 = arith.constant 0.000000e+00 : f32
    %15 = vector.broadcast %cst_13 : f32 to vector<8x1xf32>
    %cst_14 = arith.constant 0.000000e+00 : f32
    %16 = vector.broadcast %cst_14 : f32 to vector<8x128xf32>
    %c0_15 = arith.constant 0 : index
    %c0_16 = arith.constant 0 : index
    %c0_17 = arith.constant 0 : index
    %c0_18 = arith.constant 0 : index
    %17 = vector.load %arg1[%c0_15, %c0_16, %c0_17, %c0_18] : memref<1x8x8x128xf32, #tpu.memory_space<vmem>>, vector<1x8x8x128xf32>
    %18 = vector.shape_cast %17 : vector<1x8x8x128xf32> to vector<8x8x128xf32>
    %19 = vector.broadcast %13 : vector<8x1x128xf32> to vector<8x8x128xf32>
    %20 = arith.addf %19, %18 : vector<8x8x128xf32>
    %21 = math.tanh %20 : vector<8x8x128xf32>
    %22 = vector.broadcast %1 : vector<1x1x128xf32> to vector<8x8x128xf32>
    %23 = arith.mulf %21, %22 : vector<8x8x128xf32>
    %cst_19 = arith.constant dense<0.000000e+00> : vector<8x8xf32>
    %24 = vector.multi_reduction <add>, %23, %cst_19 [2] : vector<8x8x128xf32> to vector<8x8xf32>
    %cst_20 = arith.constant dense<0xFF800000> : vector<8xf32>
    %25 = vector.multi_reduction <maximumf>, %24, %cst_20 [1] : vector<8x8xf32> to vector<8xf32>
    %26 = vector.shape_cast %25 : vector<8xf32> to vector<8x1xf32>
    %27 = arith.maximumf %14, %26 : vector<8x1xf32>
    %28 = arith.subf %14, %27 : vector<8x1xf32>
    %29 = math.exp %28 : vector<8x1xf32>
    %30 = vector.broadcast %27 : vector<8x1xf32> to vector<8x8xf32>
    %31 = arith.subf %24, %30 : vector<8x8xf32>
    %32 = math.exp %31 : vector<8x8xf32>
    %33 = arith.mulf %29, %15 : vector<8x1xf32>
    %cst_21 = arith.constant dense<0.000000e+00> : vector<8xf32>
    %34 = vector.multi_reduction <add>, %32, %cst_21 [1] : vector<8x8xf32> to vector<8xf32>
    %35 = vector.shape_cast %34 : vector<8xf32> to vector<8x1xf32>
    %36 = arith.addf %33, %35 : vector<8x1xf32>
    %37 = vector.shape_cast %32 : vector<8x8xf32> to vector<8x8x1xf32>
    %c0_22 = arith.constant 0 : index
    %c0_23 = arith.constant 0 : index
    %c0_24 = arith.constant 0 : index
    %c0_25 = arith.constant 0 : index
    %38 = vector.load %arg0[%c0_22, %c0_23, %c0_24, %c0_25] : memref<1x8x8x128xf32, #tpu.memory_space<vmem>>, vector<1x8x8x128xf32>
    %39 = vector.shape_cast %38 : vector<1x8x8x128xf32> to vector<8x8x128xf32>
    %40 = vector.broadcast %37 : vector<8x8x1xf32> to vector<8x8x128xf32>
    %41 = arith.mulf %40, %39 : vector<8x8x128xf32>
    %42 = vector.broadcast %29 : vector<8x1xf32> to vector<8x128xf32>
    %43 = arith.mulf %42, %16 : vector<8x128xf32>
    %cst_26 = arith.constant dense<0.000000e+00> : vector<8x128xf32>
    %44 = vector.multi_reduction <add>, %41, %cst_26 [1] : vector<8x8x128xf32> to vector<8x128xf32>
    %45 = arith.addf %43, %44 : vector<8x128xf32>
    %46 = tpu.reciprocal %36 : vector<8x1xf32> -> vector<8x1xf32>
    %47 = vector.broadcast %46 : vector<8x1xf32> to vector<8x128xf32>
    %48 = arith.mulf %45, %47 : vector<8x128xf32>
    %c0_27 = arith.constant 0 : index
    %c0_28 = arith.constant 0 : index
    %49 = vector.load %arg5[%c0_27, %c0_28] : memref<128x384xf32, #tpu.memory_space<vmem>>, vector<128x384xf32>
    %cst_29 = arith.constant dense<0.000000e+00> : vector<8x384xf32>
    %50 = tpu.matmul %48, %49, %cst_29 {dimension_numbers = #tpu.dot_dimension_numbers<[1], [0], [0], [1], [0, 0, 1, 1], [], []>} : vector<8x128xf32>, vector<128x384xf32>, vector<8x384xf32> -> vector<8x384xf32>
    %51 = arith.addf %6, %50 : vector<8x384xf32>
    %52 = vector.broadcast %3 : vector<1x384xf32> to vector<8x384xf32>
    %53 = arith.addf %51, %52 : vector<8x384xf32>
    %54 = vector.extract_strided_slice %53 {offsets = [0, 0], sizes = [8, 128], strides = [1, 1]} : vector<8x384xf32> to vector<8x128xf32>
    %55 = vector.extract_strided_slice %12 {offsets = [0, 0], sizes = [8, 128], strides = [1, 1]} : vector<8x384xf32> to vector<8x128xf32>
    %56 = arith.addf %54, %55 : vector<8x128xf32>
    %57 = arith.negf %56 : vector<8x128xf32>
    %58 = math.exp %57 : vector<8x128xf32>
    %cst_30 = arith.constant 1.000000e+00 : f32
    %59 = vector.broadcast %cst_30 : f32 to vector<8x128xf32>
    %60 = arith.addf %59, %58 : vector<8x128xf32>
    %61 = arith.divf %59, %60 : vector<8x128xf32>
    %62 = vector.extract_strided_slice %53 {offsets = [0, 128], sizes = [8, 128], strides = [1, 1]} : vector<8x384xf32> to vector<8x128xf32>
    %63 = vector.extract_strided_slice %12 {offsets = [0, 128], sizes = [8, 128], strides = [1, 1]} : vector<8x384xf32> to vector<8x128xf32>
    %64 = arith.addf %62, %63 : vector<8x128xf32>
    %65 = arith.negf %64 : vector<8x128xf32>
    %66 = math.exp %65 : vector<8x128xf32>
    %cst_31 = arith.constant 1.000000e+00 : f32
    %67 = vector.broadcast %cst_31 : f32 to vector<8x128xf32>
    %68 = arith.addf %67, %66 : vector<8x128xf32>
    %69 = arith.divf %67, %68 : vector<8x128xf32>
    %70 = vector.extract_strided_slice %53 {offsets = [0, 256], sizes = [8, 128], strides = [1, 1]} : vector<8x384xf32> to vector<8x128xf32>
    %71 = vector.extract_strided_slice %12 {offsets = [0, 256], sizes = [8, 128], strides = [1, 1]} : vector<8x384xf32> to vector<8x128xf32>
    %72 = arith.mulf %61, %71 : vector<8x128xf32>
    %73 = arith.addf %70, %72 : vector<8x128xf32>
    %74 = math.tanh %73 : vector<8x128xf32>
    %cst_32 = arith.constant 1.000000e+00 : f32
    %75 = vector.broadcast %cst_32 : f32 to vector<8x128xf32>
    %76 = arith.subf %75, %69 : vector<8x128xf32>
    %77 = arith.mulf %76, %74 : vector<8x128xf32>
    %78 = arith.mulf %69, %5 : vector<8x128xf32>
    %79 = arith.addf %77, %78 : vector<8x128xf32>
    %c0_33 = arith.constant 0 : index
    %c0_34 = arith.constant 0 : index
    %80 = vector.load %arg7[%c0_33, %c0_34] : memref<128x128xf32, #tpu.memory_space<vmem>>, vector<128x128xf32>
    %cst_35 = arith.constant dense<0.000000e+00> : vector<8x128xf32>
    %81 = tpu.matmul %79, %80, %cst_35 {dimension_numbers = #tpu.dot_dimension_numbers<[1], [0], [0], [1], [0, 0, 1, 1], [], []>} : vector<8x128xf32>, vector<128x128xf32>, vector<8x128xf32> -> vector<8x128xf32>
    %82 = vector.broadcast %4 : vector<1x128xf32> to vector<8x128xf32>
    %83 = arith.addf %81, %82 : vector<8x128xf32>
    %cst_36 = arith.constant dense<0xFF800000> : vector<8xf32>
    %84 = vector.multi_reduction <maximumf>, %83, %cst_36 [1] : vector<8x128xf32> to vector<8xf32>
    %85 = vector.shape_cast %84 : vector<8xf32> to vector<8x1xf32>
    %86 = vector.broadcast %85 : vector<8x1xf32> to vector<8x128xf32>
    %87 = arith.subf %83, %86 : vector<8x128xf32>
    %88 = math.exp %87 : vector<8x128xf32>
    %cst_37 = arith.constant dense<0.000000e+00> : vector<8xf32>
    %89 = vector.multi_reduction <add>, %88, %cst_37 [1] : vector<8x128xf32> to vector<8xf32>
    %90 = vector.shape_cast %89 : vector<8xf32> to vector<8x1xf32>
    %91 = math.log %90 : vector<8x1xf32>
    %92 = arith.addf %85, %91 : vector<8x1xf32>
    %93 = vector.broadcast %92 : vector<8x1xf32> to vector<8x128xf32>
    %94 = arith.subf %83, %93 : vector<8x128xf32>
    %c2_i32 = arith.constant 2 : i32
    %c0_i32_38 = arith.constant 0 : i32
    %95 = arith.cmpi eq, %c2_i32, %c0_i32_38 : i32
    %c1_i32 = arith.constant 1 : i32
    %96 = arith.select %95, %c1_i32, %c2_i32 : i32
    %97 = arith.remsi %c0_i32, %96 : i32
    %c0_i32_39 = arith.constant 0 : i32
    %98 = arith.cmpi ne, %97, %c0_i32_39 : i32
    %c0_i32_40 = arith.constant 0 : i32
    %99 = arith.cmpi slt, %97, %c0_i32_40 : i32
    %c0_i32_41 = arith.constant 0 : i32
    %100 = arith.cmpi slt, %96, %c0_i32_41 : i32
    %101 = arith.xori %99, %100 : i1
    %102 = arith.andi %101, %98 : i1
    %103 = arith.addi %97, %96 : i32
    %104 = arith.select %102, %103, %97 : i32
    %c2_i32_42 = arith.constant 2 : i32
    %105 = arith.cmpi sge, %c0_i32, %c2_i32_42 : i32
    %106 = arith.extui %105 : i1 to i32
    %c0_i32_43 = arith.constant 0 : i32
    %107 = arith.cmpi ne, %106, %c0_i32_43 : i32
    scf.if %107 {
      %c0_i32_312 = arith.constant 0 : i32
      %c0_i32_313 = arith.constant 0 : i32
      %c0_i32_314 = arith.constant 0 : i32
      %764 = tpu.memref_slice %arg13[%104, %c0_i32_313, %c0_i32_314] : memref<2x8x128xf32, #tpu.memory_space<vmem>> -> memref<1x8x128xf32, #tpu.memory_space<vmem>>
      %765 = tpu.memref_squeeze %764 : memref<1x8x128xf32, #tpu.memory_space<vmem>> -> memref<8x128xf32, #tpu.memory_space<vmem>>
      %c0_i32_315 = arith.constant 0 : i32
      %c0_i32_316 = arith.constant 0 : i32
      %766 = tpu.memref_slice %arg11[%c0_i32_312, %c0_i32_315, %c0_i32_316] : memref<6x8x128xf32, #tpu.memory_space<any>> -> memref<1x8x128xf32, #tpu.memory_space<any>>
      %767 = tpu.memref_squeeze %766 : memref<1x8x128xf32, #tpu.memory_space<any>> -> memref<8x128xf32, #tpu.memory_space<any>>
      %768 = tpu.memref_slice %arg14[%104] : memref<2x!tpu.dma_semaphore, #tpu.memory_space<semaphore_mem>> -> memref<1x!tpu.dma_semaphore, #tpu.memory_space<semaphore_mem>>
      %769 = tpu.memref_squeeze %768 : memref<1x!tpu.dma_semaphore, #tpu.memory_space<semaphore_mem>> -> memref<!tpu.dma_semaphore, #tpu.memory_space<semaphore_mem>>
      tpu.wait_dma2 semaphore(%769 : memref<!tpu.dma_semaphore, #tpu.memory_space<semaphore_mem>>) src(%765 : memref<8x128xf32, #tpu.memory_space<vmem>>) dst(%767 : memref<8x128xf32, #tpu.memory_space<any>>)
    } else {
    }
    %108 = arith.index_cast %104 : i32 to index
    %c0_44 = arith.constant 0 : index
    %c0_45 = arith.constant 0 : index
    %109 = vector.load %arg13[%108, %c0_44, %c0_45] : memref<2x8x128xf32, #tpu.memory_space<vmem>>, vector<1x8x128xf32>
    %110 = vector.shape_cast %109 : vector<1x8x128xf32> to vector<8x128xf32>
    %111 = vector.shape_cast %94 : vector<8x128xf32> to vector<1x8x128xf32>
    tpu.vector_store %arg13[%108, %c0_44, %c0_45], %111 {strides = array<i32>} : memref<2x8x128xf32, #tpu.memory_space<vmem>>, vector<1x8x128xf32>,
    %c0_i32_46 = arith.constant 0 : i32
    %c0_i32_47 = arith.constant 0 : i32
    %112 = tpu.memref_slice %arg13[%104, %c0_i32_46, %c0_i32_47] : memref<2x8x128xf32, #tpu.memory_space<vmem>> -> memref<1x8x128xf32, #tpu.memory_space<vmem>>
    %113 = tpu.memref_squeeze %112 : memref<1x8x128xf32, #tpu.memory_space<vmem>> -> memref<8x128xf32, #tpu.memory_space<vmem>>
    %c0_i32_48 = arith.constant 0 : i32
    %c0_i32_49 = arith.constant 0 : i32
    %114 = tpu.memref_slice %arg11[%c0_i32, %c0_i32_48, %c0_i32_49] : memref<6x8x128xf32, #tpu.memory_space<any>> -> memref<1x8x128xf32, #tpu.memory_space<any>>
    %115 = tpu.memref_squeeze %114 : memref<1x8x128xf32, #tpu.memory_space<any>> -> memref<8x128xf32, #tpu.memory_space<any>>
    %116 = tpu.memref_slice %arg14[%104] : memref<2x!tpu.dma_semaphore, #tpu.memory_space<semaphore_mem>> -> memref<1x!tpu.dma_semaphore, #tpu.memory_space<semaphore_mem>>
    %117 = tpu.memref_squeeze %116 : memref<1x!tpu.dma_semaphore, #tpu.memory_space<semaphore_mem>> -> memref<!tpu.dma_semaphore, #tpu.memory_space<semaphore_mem>>
    tpu.enqueue_dma source(%113 : memref<8x128xf32, #tpu.memory_space<vmem>>) target(%115 : memref<8x128xf32, #tpu.memory_space<any>>) target_semaphore(%117 : memref<!tpu.dma_semaphore, #tpu.memory_space<semaphore_mem>>)
    %118 = tpu.iota {dimensions = array<i32: 1>} : vector<8x128xi32>
    %119 = vector.broadcast %85 : vector<8x1xf32> to vector<8x128xf32>
    %120 = arith.cmpf oge, %83, %119 : vector<8x128xf32>
    %c128_i32 = arith.constant 128 : i32
    %121 = vector.broadcast %c128_i32 : i32 to vector<8x128xi32>
    %122 = arith.select %120, %118, %121 : vector<8x128xi1>, vector<8x128xi32>
    %cst_50 = arith.constant dense<2147483647> : vector<8xi32>
    %123 = vector.multi_reduction <minsi>, %122, %cst_50 [1] : vector<8x128xi32> to vector<8xi32>
    %124 = vector.shape_cast %123 : vector<8xi32> to vector<8x1xi32>
    %125 = vector.broadcast %124 : vector<8x1xi32> to vector<8x128xi32>
    %126 = arith.cmpi eq, %118, %125 : vector<8x128xi32>
    %127 = arith.extui %126 : vector<8x128xi1> to vector<8x128xi32>
    %128 = arith.sitofp %127 : vector<8x128xi32> to vector<8x128xf32>
    %c0_51 = arith.constant 0 : index
    %c0_52 = arith.constant 0 : index
    %129 = vector.load %arg9[%c0_51, %c0_52] : memref<128x384xf32, #tpu.memory_space<vmem>>, vector<128x384xf32>
    %cst_53 = arith.constant dense<0.000000e+00> : vector<8x384xf32>
    %130 = tpu.matmul %128, %129, %cst_53 {dimension_numbers = #tpu.dot_dimension_numbers<[1], [0], [0], [1], [0, 0, 1, 1], [], []>} : vector<8x128xf32>, vector<128x384xf32>, vector<8x384xf32> -> vector<8x384xf32>
    %c1_i32_54 = arith.constant 1 : i32
    %c0_55 = arith.constant 0 : index
    %c0_56 = arith.constant 0 : index
    %131 = vector.load %arg3[%c0_55, %c0_56] : memref<128x512xf32, #tpu.memory_space<vmem>>, vector<128x512xf32>
    %cst_57 = arith.constant dense<0.000000e+00> : vector<8x512xf32>
    %132 = tpu.matmul %79, %131, %cst_57 {dimension_numbers = #tpu.dot_dimension_numbers<[1], [0], [0], [1], [0, 0, 1, 1], [], []>} : vector<8x128xf32>, vector<128x512xf32>, vector<8x512xf32> -> vector<8x512xf32>
    %133 = vector.extract_strided_slice %132 {offsets = [0, 0], sizes = [8, 128], strides = [1, 1]} : vector<8x512xf32> to vector<8x128xf32>
    %134 = vector.extract_strided_slice %132 {offsets = [0, 128], sizes = [8, 384], strides = [1, 1]} : vector<8x512xf32> to vector<8x384xf32>
    %135 = vector.broadcast %2 : vector<1x384xf32> to vector<8x384xf32>
    %136 = arith.addf %134, %135 : vector<8x384xf32>
    %137 = vector.shape_cast %133 : vector<8x128xf32> to vector<8x1x128xf32>
    %cst_58 = arith.constant -1.000000e+30 : f32
    %138 = vector.broadcast %cst_58 : f32 to vector<8x1xf32>
    %cst_59 = arith.constant 0.000000e+00 : f32
    %139 = vector.broadcast %cst_59 : f32 to vector<8x1xf32>
    %cst_60 = arith.constant 0.000000e+00 : f32
    %140 = vector.broadcast %cst_60 : f32 to vector<8x128xf32>
    %c0_61 = arith.constant 0 : index
    %c0_62 = arith.constant 0 : index
    %c0_63 = arith.constant 0 : index
    %c0_64 = arith.constant 0 : index
    %141 = vector.load %arg1[%c0_61, %c0_62, %c0_63, %c0_64] : memref<1x8x8x128xf32, #tpu.memory_space<vmem>>, vector<1x8x8x128xf32>
    %142 = vector.shape_cast %141 : vector<1x8x8x128xf32> to vector<8x8x128xf32>
    %143 = vector.broadcast %137 : vector<8x1x128xf32> to vector<8x8x128xf32>
    %144 = arith.addf %143, %142 : vector<8x8x128xf32>
    %145 = math.tanh %144 : vector<8x8x128xf32>
    %146 = vector.broadcast %1 : vector<1x1x128xf32> to vector<8x8x128xf32>
    %147 = arith.mulf %145, %146 : vector<8x8x128xf32>
    %cst_65 = arith.constant dense<0.000000e+00> : vector<8x8xf32>
    %148 = vector.multi_reduction <add>, %147, %cst_65 [2] : vector<8x8x128xf32> to vector<8x8xf32>
    %cst_66 = arith.constant dense<0xFF800000> : vector<8xf32>
    %149 = vector.multi_reduction <maximumf>, %148, %cst_66 [1] : vector<8x8xf32> to vector<8xf32>
    %150 = vector.shape_cast %149 : vector<8xf32> to vector<8x1xf32>
    %151 = arith.maximumf %138, %150 : vector<8x1xf32>
    %152 = arith.subf %138, %151 : vector<8x1xf32>
    %153 = math.exp %152 : vector<8x1xf32>
    %154 = vector.broadcast %151 : vector<8x1xf32> to vector<8x8xf32>
    %155 = arith.subf %148, %154 : vector<8x8xf32>
    %156 = math.exp %155 : vector<8x8xf32>
    %157 = arith.mulf %153, %139 : vector<8x1xf32>
    %cst_67 = arith.constant dense<0.000000e+00> : vector<8xf32>
    %158 = vector.multi_reduction <add>, %156, %cst_67 [1] : vector<8x8xf32> to vector<8xf32>
    %159 = vector.shape_cast %158 : vector<8xf32> to vector<8x1xf32>
    %160 = arith.addf %157, %159 : vector<8x1xf32>
    %161 = vector.shape_cast %156 : vector<8x8xf32> to vector<8x8x1xf32>
    %c0_68 = arith.constant 0 : index
    %c0_69 = arith.constant 0 : index
    %c0_70 = arith.constant 0 : index
    %c0_71 = arith.constant 0 : index
    %162 = vector.load %arg0[%c0_68, %c0_69, %c0_70, %c0_71] : memref<1x8x8x128xf32, #tpu.memory_space<vmem>>, vector<1x8x8x128xf32>
    %163 = vector.shape_cast %162 : vector<1x8x8x128xf32> to vector<8x8x128xf32>
    %164 = vector.broadcast %161 : vector<8x8x1xf32> to vector<8x8x128xf32>
    %165 = arith.mulf %164, %163 : vector<8x8x128xf32>
    %166 = vector.broadcast %153 : vector<8x1xf32> to vector<8x128xf32>
    %167 = arith.mulf %166, %140 : vector<8x128xf32>
    %cst_72 = arith.constant dense<0.000000e+00> : vector<8x128xf32>
    %168 = vector.multi_reduction <add>, %165, %cst_72 [1] : vector<8x8x128xf32> to vector<8x128xf32>
    %169 = arith.addf %167, %168 : vector<8x128xf32>
    %170 = tpu.reciprocal %160 : vector<8x1xf32> -> vector<8x1xf32>
    %171 = vector.broadcast %170 : vector<8x1xf32> to vector<8x128xf32>
    %172 = arith.mulf %169, %171 : vector<8x128xf32>
    %c0_73 = arith.constant 0 : index
    %c0_74 = arith.constant 0 : index
    %173 = vector.load %arg5[%c0_73, %c0_74] : memref<128x384xf32, #tpu.memory_space<vmem>>, vector<128x384xf32>
    %cst_75 = arith.constant dense<0.000000e+00> : vector<8x384xf32>
    %174 = tpu.matmul %172, %173, %cst_75 {dimension_numbers = #tpu.dot_dimension_numbers<[1], [0], [0], [1], [0, 0, 1, 1], [], []>} : vector<8x128xf32>, vector<128x384xf32>, vector<8x384xf32> -> vector<8x384xf32>
    %175 = arith.addf %130, %174 : vector<8x384xf32>
    %176 = vector.broadcast %3 : vector<1x384xf32> to vector<8x384xf32>
    %177 = arith.addf %175, %176 : vector<8x384xf32>
    %178 = vector.extract_strided_slice %177 {offsets = [0, 0], sizes = [8, 128], strides = [1, 1]} : vector<8x384xf32> to vector<8x128xf32>
    %179 = vector.extract_strided_slice %136 {offsets = [0, 0], sizes = [8, 128], strides = [1, 1]} : vector<8x384xf32> to vector<8x128xf32>
    %180 = arith.addf %178, %179 : vector<8x128xf32>
    %181 = arith.negf %180 : vector<8x128xf32>
    %182 = math.exp %181 : vector<8x128xf32>
    %cst_76 = arith.constant 1.000000e+00 : f32
    %183 = vector.broadcast %cst_76 : f32 to vector<8x128xf32>
    %184 = arith.addf %183, %182 : vector<8x128xf32>
    %185 = arith.divf %183, %184 : vector<8x128xf32>
    %186 = vector.extract_strided_slice %177 {offsets = [0, 128], sizes = [8, 128], strides = [1, 1]} : vector<8x384xf32> to vector<8x128xf32>
    %187 = vector.extract_strided_slice %136 {offsets = [0, 128], sizes = [8, 128], strides = [1, 1]} : vector<8x384xf32> to vector<8x128xf32>
    %188 = arith.addf %186, %187 : vector<8x128xf32>
    %189 = arith.negf %188 : vector<8x128xf32>
    %190 = math.exp %189 : vector<8x128xf32>
    %cst_77 = arith.constant 1.000000e+00 : f32
    %191 = vector.broadcast %cst_77 : f32 to vector<8x128xf32>
    %192 = arith.addf %191, %190 : vector<8x128xf32>
    %193 = arith.divf %191, %192 : vector<8x128xf32>
    %194 = vector.extract_strided_slice %177 {offsets = [0, 256], sizes = [8, 128], strides = [1, 1]} : vector<8x384xf32> to vector<8x128xf32>
    %195 = vector.extract_strided_slice %136 {offsets = [0, 256], sizes = [8, 128], strides = [1, 1]} : vector<8x384xf32> to vector<8x128xf32>
    %196 = arith.mulf %185, %195 : vector<8x128xf32>
    %197 = arith.addf %194, %196 : vector<8x128xf32>
    %198 = math.tanh %197 : vector<8x128xf32>
    %cst_78 = arith.constant 1.000000e+00 : f32
    %199 = vector.broadcast %cst_78 : f32 to vector<8x128xf32>
    %200 = arith.subf %199, %193 : vector<8x128xf32>
    %201 = arith.mulf %200, %198 : vector<8x128xf32>
    %202 = arith.mulf %193, %79 : vector<8x128xf32>
    %203 = arith.addf %201, %202 : vector<8x128xf32>
    %c0_79 = arith.constant 0 : index
    %c0_80 = arith.constant 0 : index
    %204 = vector.load %arg7[%c0_79, %c0_80] : memref<128x128xf32, #tpu.memory_space<vmem>>, vector<128x128xf32>
    %cst_81 = arith.constant dense<0.000000e+00> : vector<8x128xf32>
    %205 = tpu.matmul %203, %204, %cst_81 {dimension_numbers = #tpu.dot_dimension_numbers<[1], [0], [0], [1], [0, 0, 1, 1], [], []>} : vector<8x128xf32>, vector<128x128xf32>, vector<8x128xf32> -> vector<8x128xf32>
    %206 = vector.broadcast %4 : vector<1x128xf32> to vector<8x128xf32>
    %207 = arith.addf %205, %206 : vector<8x128xf32>
    %cst_82 = arith.constant dense<0xFF800000> : vector<8xf32>
    %208 = vector.multi_reduction <maximumf>, %207, %cst_82 [1] : vector<8x128xf32> to vector<8xf32>
    %209 = vector.shape_cast %208 : vector<8xf32> to vector<8x1xf32>
    %210 = vector.broadcast %209 : vector<8x1xf32> to vector<8x128xf32>
    %211 = arith.subf %207, %210 : vector<8x128xf32>
    %212 = math.exp %211 : vector<8x128xf32>
    %cst_83 = arith.constant dense<0.000000e+00> : vector<8xf32>
    %213 = vector.multi_reduction <add>, %212, %cst_83 [1] : vector<8x128xf32> to vector<8xf32>
    %214 = vector.shape_cast %213 : vector<8xf32> to vector<8x1xf32>
    %215 = math.log %214 : vector<8x1xf32>
    %216 = arith.addf %209, %215 : vector<8x1xf32>
    %217 = vector.broadcast %216 : vector<8x1xf32> to vector<8x128xf32>
    %218 = arith.subf %207, %217 : vector<8x128xf32>
    %c2_i32_84 = arith.constant 2 : i32
    %c0_i32_85 = arith.constant 0 : i32
    %219 = arith.cmpi eq, %c2_i32_84, %c0_i32_85 : i32
    %c1_i32_86 = arith.constant 1 : i32
    %220 = arith.select %219, %c1_i32_86, %c2_i32_84 : i32
    %221 = arith.remsi %c1_i32_54, %220 : i32
    %c0_i32_87 = arith.constant 0 : i32
    %222 = arith.cmpi ne, %221, %c0_i32_87 : i32
    %c0_i32_88 = arith.constant 0 : i32
    %223 = arith.cmpi slt, %221, %c0_i32_88 : i32
    %c0_i32_89 = arith.constant 0 : i32
    %224 = arith.cmpi slt, %220, %c0_i32_89 : i32
    %225 = arith.xori %223, %224 : i1
    %226 = arith.andi %225, %222 : i1
    %227 = arith.addi %221, %220 : i32
    %228 = arith.select %226, %227, %221 : i32
    %c2_i32_90 = arith.constant 2 : i32
    %229 = arith.cmpi sge, %c1_i32_54, %c2_i32_90 : i32
    %230 = arith.extui %229 : i1 to i32
    %c0_i32_91 = arith.constant 0 : i32
    %231 = arith.cmpi ne, %230, %c0_i32_91 : i32
    scf.if %231 {
      %c0_i32_312 = arith.constant 0 : i32
      %c0_i32_313 = arith.constant 0 : i32
      %c0_i32_314 = arith.constant 0 : i32
      %764 = tpu.memref_slice %arg13[%228, %c0_i32_313, %c0_i32_314] : memref<2x8x128xf32, #tpu.memory_space<vmem>> -> memref<1x8x128xf32, #tpu.memory_space<vmem>>
      %765 = tpu.memref_squeeze %764 : memref<1x8x128xf32, #tpu.memory_space<vmem>> -> memref<8x128xf32, #tpu.memory_space<vmem>>
      %c0_i32_315 = arith.constant 0 : i32
      %c0_i32_316 = arith.constant 0 : i32
      %766 = tpu.memref_slice %arg11[%c0_i32_312, %c0_i32_315, %c0_i32_316] : memref<6x8x128xf32, #tpu.memory_space<any>> -> memref<1x8x128xf32, #tpu.memory_space<any>>
      %767 = tpu.memref_squeeze %766 : memref<1x8x128xf32, #tpu.memory_space<any>> -> memref<8x128xf32, #tpu.memory_space<any>>
      %768 = tpu.memref_slice %arg14[%228] : memref<2x!tpu.dma_semaphore, #tpu.memory_space<semaphore_mem>> -> memref<1x!tpu.dma_semaphore, #tpu.memory_space<semaphore_mem>>
      %769 = tpu.memref_squeeze %768 : memref<1x!tpu.dma_semaphore, #tpu.memory_space<semaphore_mem>> -> memref<!tpu.dma_semaphore, #tpu.memory_space<semaphore_mem>>
      tpu.wait_dma2 semaphore(%769 : memref<!tpu.dma_semaphore, #tpu.memory_space<semaphore_mem>>) src(%765 : memref<8x128xf32, #tpu.memory_space<vmem>>) dst(%767 : memref<8x128xf32, #tpu.memory_space<any>>)
    } else {
    }
    %232 = arith.index_cast %228 : i32 to index
    %c0_92 = arith.constant 0 : index
    %c0_93 = arith.constant 0 : index
    %233 = vector.load %arg13[%232, %c0_92, %c0_93] : memref<2x8x128xf32, #tpu.memory_space<vmem>>, vector<1x8x128xf32>
    %234 = vector.shape_cast %233 : vector<1x8x128xf32> to vector<8x128xf32>
    %235 = vector.shape_cast %218 : vector<8x128xf32> to vector<1x8x128xf32>
    tpu.vector_store %arg13[%232, %c0_92, %c0_93], %235 {strides = array<i32>} : memref<2x8x128xf32, #tpu.memory_space<vmem>>, vector<1x8x128xf32>,
    %c0_i32_94 = arith.constant 0 : i32
    %c0_i32_95 = arith.constant 0 : i32
    %236 = tpu.memref_slice %arg13[%228, %c0_i32_94, %c0_i32_95] : memref<2x8x128xf32, #tpu.memory_space<vmem>> -> memref<1x8x128xf32, #tpu.memory_space<vmem>>
    %237 = tpu.memref_squeeze %236 : memref<1x8x128xf32, #tpu.memory_space<vmem>> -> memref<8x128xf32, #tpu.memory_space<vmem>>
    %c0_i32_96 = arith.constant 0 : i32
    %c0_i32_97 = arith.constant 0 : i32
    %238 = tpu.memref_slice %arg11[%c1_i32_54, %c0_i32_96, %c0_i32_97] : memref<6x8x128xf32, #tpu.memory_space<any>> -> memref<1x8x128xf32, #tpu.memory_space<any>>
    %239 = tpu.memref_squeeze %238 : memref<1x8x128xf32, #tpu.memory_space<any>> -> memref<8x128xf32, #tpu.memory_space<any>>
    %240 = tpu.memref_slice %arg14[%228] : memref<2x!tpu.dma_semaphore, #tpu.memory_space<semaphore_mem>> -> memref<1x!tpu.dma_semaphore, #tpu.memory_space<semaphore_mem>>
    %241 = tpu.memref_squeeze %240 : memref<1x!tpu.dma_semaphore, #tpu.memory_space<semaphore_mem>> -> memref<!tpu.dma_semaphore, #tpu.memory_space<semaphore_mem>>
    tpu.enqueue_dma source(%237 : memref<8x128xf32, #tpu.memory_space<vmem>>) target(%239 : memref<8x128xf32, #tpu.memory_space<any>>) target_semaphore(%241 : memref<!tpu.dma_semaphore, #tpu.memory_space<semaphore_mem>>)
    %242 = tpu.iota {dimensions = array<i32: 1>} : vector<8x128xi32>
    %243 = vector.broadcast %209 : vector<8x1xf32> to vector<8x128xf32>
    %244 = arith.cmpf oge, %207, %243 : vector<8x128xf32>
    %c128_i32_98 = arith.constant 128 : i32
    %245 = vector.broadcast %c128_i32_98 : i32 to vector<8x128xi32>
    %246 = arith.select %244, %242, %245 : vector<8x128xi1>, vector<8x128xi32>
    %cst_99 = arith.constant dense<2147483647> : vector<8xi32>
    %247 = vector.multi_reduction <minsi>, %246, %cst_99 [1] : vector<8x128xi32> to vector<8xi32>
    %248 = vector.shape_cast %247 : vector<8xi32> to vector<8x1xi32>
    %249 = vector.broadcast %248 : vector<8x1xi32> to vector<8x128xi32>
    %250 = arith.cmpi eq, %242, %249 : vector<8x128xi32>
    %251 = arith.extui %250 : vector<8x128xi1> to vector<8x128xi32>
    %252 = arith.sitofp %251 : vector<8x128xi32> to vector<8x128xf32>
    %c0_100 = arith.constant 0 : index
    %c0_101 = arith.constant 0 : index
    %253 = vector.load %arg9[%c0_100, %c0_101] : memref<128x384xf32, #tpu.memory_space<vmem>>, vector<128x384xf32>
    %cst_102 = arith.constant dense<0.000000e+00> : vector<8x384xf32>
    %254 = tpu.matmul %252, %253, %cst_102 {dimension_numbers = #tpu.dot_dimension_numbers<[1], [0], [0], [1], [0, 0, 1, 1], [], []>} : vector<8x128xf32>, vector<128x384xf32>, vector<8x384xf32> -> vector<8x384xf32>
    %c2_i32_103 = arith.constant 2 : i32
    %c0_104 = arith.constant 0 : index
    %c0_105 = arith.constant 0 : index
    %255 = vector.load %arg3[%c0_104, %c0_105] : memref<128x512xf32, #tpu.memory_space<vmem>>, vector<128x512xf32>
    %cst_106 = arith.constant dense<0.000000e+00> : vector<8x512xf32>
    %256 = tpu.matmul %203, %255, %cst_106 {dimension_numbers = #tpu.dot_dimension_numbers<[1], [0], [0], [1], [0, 0, 1, 1], [], []>} : vector<8x128xf32>, vector<128x512xf32>, vector<8x512xf32> -> vector<8x512xf32>
    %257 = vector.extract_strided_slice %256 {offsets = [0, 0], sizes = [8, 128], strides = [1, 1]} : vector<8x512xf32> to vector<8x128xf32>
    %258 = vector.extract_strided_slice %256 {offsets = [0, 128], sizes = [8, 384], strides = [1, 1]} : vector<8x512xf32> to vector<8x384xf32>
    %259 = vector.broadcast %2 : vector<1x384xf32> to vector<8x384xf32>
    %260 = arith.addf %258, %259 : vector<8x384xf32>
    %261 = vector.shape_cast %257 : vector<8x128xf32> to vector<8x1x128xf32>
    %cst_107 = arith.constant -1.000000e+30 : f32
    %262 = vector.broadcast %cst_107 : f32 to vector<8x1xf32>
    %cst_108 = arith.constant 0.000000e+00 : f32
    %263 = vector.broadcast %cst_108 : f32 to vector<8x1xf32>
    %cst_109 = arith.constant 0.000000e+00 : f32
    %264 = vector.broadcast %cst_109 : f32 to vector<8x128xf32>
    %c0_110 = arith.constant 0 : index
    %c0_111 = arith.constant 0 : index
    %c0_112 = arith.constant 0 : index
    %c0_113 = arith.constant 0 : index
    %265 = vector.load %arg1[%c0_110, %c0_111, %c0_112, %c0_113] : memref<1x8x8x128xf32, #tpu.memory_space<vmem>>, vector<1x8x8x128xf32>
    %266 = vector.shape_cast %265 : vector<1x8x8x128xf32> to vector<8x8x128xf32>
    %267 = vector.broadcast %261 : vector<8x1x128xf32> to vector<8x8x128xf32>
    %268 = arith.addf %267, %266 : vector<8x8x128xf32>
    %269 = math.tanh %268 : vector<8x8x128xf32>
    %270 = vector.broadcast %1 : vector<1x1x128xf32> to vector<8x8x128xf32>
    %271 = arith.mulf %269, %270 : vector<8x8x128xf32>
    %cst_114 = arith.constant dense<0.000000e+00> : vector<8x8xf32>
    %272 = vector.multi_reduction <add>, %271, %cst_114 [2] : vector<8x8x128xf32> to vector<8x8xf32>
    %cst_115 = arith.constant dense<0xFF800000> : vector<8xf32>
    %273 = vector.multi_reduction <maximumf>, %272, %cst_115 [1] : vector<8x8xf32> to vector<8xf32>
    %274 = vector.shape_cast %273 : vector<8xf32> to vector<8x1xf32>
    %275 = arith.maximumf %262, %274 : vector<8x1xf32>
    %276 = arith.subf %262, %275 : vector<8x1xf32>
    %277 = math.exp %276 : vector<8x1xf32>
    %278 = vector.broadcast %275 : vector<8x1xf32> to vector<8x8xf32>
    %279 = arith.subf %272, %278 : vector<8x8xf32>
    %280 = math.exp %279 : vector<8x8xf32>
    %281 = arith.mulf %277, %263 : vector<8x1xf32>
    %cst_116 = arith.constant dense<0.000000e+00> : vector<8xf32>
    %282 = vector.multi_reduction <add>, %280, %cst_116 [1] : vector<8x8xf32> to vector<8xf32>
    %283 = vector.shape_cast %282 : vector<8xf32> to vector<8x1xf32>
    %284 = arith.addf %281, %283 : vector<8x1xf32>
    %285 = vector.shape_cast %280 : vector<8x8xf32> to vector<8x8x1xf32>
    %c0_117 = arith.constant 0 : index
    %c0_118 = arith.constant 0 : index
    %c0_119 = arith.constant 0 : index
    %c0_120 = arith.constant 0 : index
    %286 = vector.load %arg0[%c0_117, %c0_118, %c0_119, %c0_120] : memref<1x8x8x128xf32, #tpu.memory_space<vmem>>, vector<1x8x8x128xf32>
    %287 = vector.shape_cast %286 : vector<1x8x8x128xf32> to vector<8x8x128xf32>
    %288 = vector.broadcast %285 : vector<8x8x1xf32> to vector<8x8x128xf32>
    %289 = arith.mulf %288, %287 : vector<8x8x128xf32>
    %290 = vector.broadcast %277 : vector<8x1xf32> to vector<8x128xf32>
    %291 = arith.mulf %290, %264 : vector<8x128xf32>
    %cst_121 = arith.constant dense<0.000000e+00> : vector<8x128xf32>
    %292 = vector.multi_reduction <add>, %289, %cst_121 [1] : vector<8x8x128xf32> to vector<8x128xf32>
    %293 = arith.addf %291, %292 : vector<8x128xf32>
    %294 = tpu.reciprocal %284 : vector<8x1xf32> -> vector<8x1xf32>
    %295 = vector.broadcast %294 : vector<8x1xf32> to vector<8x128xf32>
    %296 = arith.mulf %293, %295 : vector<8x128xf32>
    %c0_122 = arith.constant 0 : index
    %c0_123 = arith.constant 0 : index
    %297 = vector.load %arg5[%c0_122, %c0_123] : memref<128x384xf32, #tpu.memory_space<vmem>>, vector<128x384xf32>
    %cst_124 = arith.constant dense<0.000000e+00> : vector<8x384xf32>
    %298 = tpu.matmul %296, %297, %cst_124 {dimension_numbers = #tpu.dot_dimension_numbers<[1], [0], [0], [1], [0, 0, 1, 1], [], []>} : vector<8x128xf32>, vector<128x384xf32>, vector<8x384xf32> -> vector<8x384xf32>
    %299 = arith.addf %254, %298 : vector<8x384xf32>
    %300 = vector.broadcast %3 : vector<1x384xf32> to vector<8x384xf32>
    %301 = arith.addf %299, %300 : vector<8x384xf32>
    %302 = vector.extract_strided_slice %301 {offsets = [0, 0], sizes = [8, 128], strides = [1, 1]} : vector<8x384xf32> to vector<8x128xf32>
    %303 = vector.extract_strided_slice %260 {offsets = [0, 0], sizes = [8, 128], strides = [1, 1]} : vector<8x384xf32> to vector<8x128xf32>
    %304 = arith.addf %302, %303 : vector<8x128xf32>
    %305 = arith.negf %304 : vector<8x128xf32>
    %306 = math.exp %305 : vector<8x128xf32>
    %cst_125 = arith.constant 1.000000e+00 : f32
    %307 = vector.broadcast %cst_125 : f32 to vector<8x128xf32>
    %308 = arith.addf %307, %306 : vector<8x128xf32>
    %309 = arith.divf %307, %308 : vector<8x128xf32>
    %310 = vector.extract_strided_slice %301 {offsets = [0, 128], sizes = [8, 128], strides = [1, 1]} : vector<8x384xf32> to vector<8x128xf32>
    %311 = vector.extract_strided_slice %260 {offsets = [0, 128], sizes = [8, 128], strides = [1, 1]} : vector<8x384xf32> to vector<8x128xf32>
    %312 = arith.addf %310, %311 : vector<8x128xf32>
    %313 = arith.negf %312 : vector<8x128xf32>
    %314 = math.exp %313 : vector<8x128xf32>
    %cst_126 = arith.constant 1.000000e+00 : f32
    %315 = vector.broadcast %cst_126 : f32 to vector<8x128xf32>
    %316 = arith.addf %315, %314 : vector<8x128xf32>
    %317 = arith.divf %315, %316 : vector<8x128xf32>
    %318 = vector.extract_strided_slice %301 {offsets = [0, 256], sizes = [8, 128], strides = [1, 1]} : vector<8x384xf32> to vector<8x128xf32>
    %319 = vector.extract_strided_slice %260 {offsets = [0, 256], sizes = [8, 128], strides = [1, 1]} : vector<8x384xf32> to vector<8x128xf32>
    %320 = arith.mulf %309, %319 : vector<8x128xf32>
    %321 = arith.addf %318, %320 : vector<8x128xf32>
    %322 = math.tanh %321 : vector<8x128xf32>
    %cst_127 = arith.constant 1.000000e+00 : f32
    %323 = vector.broadcast %cst_127 : f32 to vector<8x128xf32>
    %324 = arith.subf %323, %317 : vector<8x128xf32>
    %325 = arith.mulf %324, %322 : vector<8x128xf32>
    %326 = arith.mulf %317, %203 : vector<8x128xf32>
    %327 = arith.addf %325, %326 : vector<8x128xf32>
    %c0_128 = arith.constant 0 : index
    %c0_129 = arith.constant 0 : index
    %328 = vector.load %arg7[%c0_128, %c0_129] : memref<128x128xf32, #tpu.memory_space<vmem>>, vector<128x128xf32>
    %cst_130 = arith.constant dense<0.000000e+00> : vector<8x128xf32>
    %329 = tpu.matmul %327, %328, %cst_130 {dimension_numbers = #tpu.dot_dimension_numbers<[1], [0], [0], [1], [0, 0, 1, 1], [], []>} : vector<8x128xf32>, vector<128x128xf32>, vector<8x128xf32> -> vector<8x128xf32>
    %330 = vector.broadcast %4 : vector<1x128xf32> to vector<8x128xf32>
    %331 = arith.addf %329, %330 : vector<8x128xf32>
    %cst_131 = arith.constant dense<0xFF800000> : vector<8xf32>
    %332 = vector.multi_reduction <maximumf>, %331, %cst_131 [1] : vector<8x128xf32> to vector<8xf32>
    %333 = vector.shape_cast %332 : vector<8xf32> to vector<8x1xf32>
    %334 = vector.broadcast %333 : vector<8x1xf32> to vector<8x128xf32>
    %335 = arith.subf %331, %334 : vector<8x128xf32>
    %336 = math.exp %335 : vector<8x128xf32>
    %cst_132 = arith.constant dense<0.000000e+00> : vector<8xf32>
    %337 = vector.multi_reduction <add>, %336, %cst_132 [1] : vector<8x128xf32> to vector<8xf32>
    %338 = vector.shape_cast %337 : vector<8xf32> to vector<8x1xf32>
    %339 = math.log %338 : vector<8x1xf32>
    %340 = arith.addf %333, %339 : vector<8x1xf32>
    %341 = vector.broadcast %340 : vector<8x1xf32> to vector<8x128xf32>
    %342 = arith.subf %331, %341 : vector<8x128xf32>
    %c2_i32_133 = arith.constant 2 : i32
    %c0_i32_134 = arith.constant 0 : i32
    %343 = arith.cmpi eq, %c2_i32_133, %c0_i32_134 : i32
    %c1_i32_135 = arith.constant 1 : i32
    %344 = arith.select %343, %c1_i32_135, %c2_i32_133 : i32
    %345 = arith.remsi %c2_i32_103, %344 : i32
    %c0_i32_136 = arith.constant 0 : i32
    %346 = arith.cmpi ne, %345, %c0_i32_136 : i32
    %c0_i32_137 = arith.constant 0 : i32
    %347 = arith.cmpi slt, %345, %c0_i32_137 : i32
    %c0_i32_138 = arith.constant 0 : i32
    %348 = arith.cmpi slt, %344, %c0_i32_138 : i32
    %349 = arith.xori %347, %348 : i1
    %350 = arith.andi %349, %346 : i1
    %351 = arith.addi %345, %344 : i32
    %352 = arith.select %350, %351, %345 : i32
    %c2_i32_139 = arith.constant 2 : i32
    %353 = arith.cmpi sge, %c2_i32_103, %c2_i32_139 : i32
    %354 = arith.extui %353 : i1 to i32
    %c0_i32_140 = arith.constant 0 : i32
    %355 = arith.cmpi ne, %354, %c0_i32_140 : i32
    scf.if %355 {
      %c0_i32_312 = arith.constant 0 : i32
      %c0_i32_313 = arith.constant 0 : i32
      %c0_i32_314 = arith.constant 0 : i32
      %764 = tpu.memref_slice %arg13[%352, %c0_i32_313, %c0_i32_314] : memref<2x8x128xf32, #tpu.memory_space<vmem>> -> memref<1x8x128xf32, #tpu.memory_space<vmem>>
      %765 = tpu.memref_squeeze %764 : memref<1x8x128xf32, #tpu.memory_space<vmem>> -> memref<8x128xf32, #tpu.memory_space<vmem>>
      %c0_i32_315 = arith.constant 0 : i32
      %c0_i32_316 = arith.constant 0 : i32
      %766 = tpu.memref_slice %arg11[%c0_i32_312, %c0_i32_315, %c0_i32_316] : memref<6x8x128xf32, #tpu.memory_space<any>> -> memref<1x8x128xf32, #tpu.memory_space<any>>
      %767 = tpu.memref_squeeze %766 : memref<1x8x128xf32, #tpu.memory_space<any>> -> memref<8x128xf32, #tpu.memory_space<any>>
      %768 = tpu.memref_slice %arg14[%352] : memref<2x!tpu.dma_semaphore, #tpu.memory_space<semaphore_mem>> -> memref<1x!tpu.dma_semaphore, #tpu.memory_space<semaphore_mem>>
      %769 = tpu.memref_squeeze %768 : memref<1x!tpu.dma_semaphore, #tpu.memory_space<semaphore_mem>> -> memref<!tpu.dma_semaphore, #tpu.memory_space<semaphore_mem>>
      tpu.wait_dma2 semaphore(%769 : memref<!tpu.dma_semaphore, #tpu.memory_space<semaphore_mem>>) src(%765 : memref<8x128xf32, #tpu.memory_space<vmem>>) dst(%767 : memref<8x128xf32, #tpu.memory_space<any>>)
    } else {
    }
    %356 = arith.index_cast %352 : i32 to index
    %c0_141 = arith.constant 0 : index
    %c0_142 = arith.constant 0 : index
    %357 = vector.load %arg13[%356, %c0_141, %c0_142] : memref<2x8x128xf32, #tpu.memory_space<vmem>>, vector<1x8x128xf32>
    %358 = vector.shape_cast %357 : vector<1x8x128xf32> to vector<8x128xf32>
    %359 = vector.shape_cast %342 : vector<8x128xf32> to vector<1x8x128xf32>
    tpu.vector_store %arg13[%356, %c0_141, %c0_142], %359 {strides = array<i32>} : memref<2x8x128xf32, #tpu.memory_space<vmem>>, vector<1x8x128xf32>,
    %c0_i32_143 = arith.constant 0 : i32
    %c0_i32_144 = arith.constant 0 : i32
    %360 = tpu.memref_slice %arg13[%352, %c0_i32_143, %c0_i32_144] : memref<2x8x128xf32, #tpu.memory_space<vmem>> -> memref<1x8x128xf32, #tpu.memory_space<vmem>>
    %361 = tpu.memref_squeeze %360 : memref<1x8x128xf32, #tpu.memory_space<vmem>> -> memref<8x128xf32, #tpu.memory_space<vmem>>
    %c0_i32_145 = arith.constant 0 : i32
    %c0_i32_146 = arith.constant 0 : i32
    %362 = tpu.memref_slice %arg11[%c2_i32_103, %c0_i32_145, %c0_i32_146] : memref<6x8x128xf32, #tpu.memory_space<any>> -> memref<1x8x128xf32, #tpu.memory_space<any>>
    %363 = tpu.memref_squeeze %362 : memref<1x8x128xf32, #tpu.memory_space<any>> -> memref<8x128xf32, #tpu.memory_space<any>>
    %364 = tpu.memref_slice %arg14[%352] : memref<2x!tpu.dma_semaphore, #tpu.memory_space<semaphore_mem>> -> memref<1x!tpu.dma_semaphore, #tpu.memory_space<semaphore_mem>>
    %365 = tpu.memref_squeeze %364 : memref<1x!tpu.dma_semaphore, #tpu.memory_space<semaphore_mem>> -> memref<!tpu.dma_semaphore, #tpu.memory_space<semaphore_mem>>
    tpu.enqueue_dma source(%361 : memref<8x128xf32, #tpu.memory_space<vmem>>) target(%363 : memref<8x128xf32, #tpu.memory_space<any>>) target_semaphore(%365 : memref<!tpu.dma_semaphore, #tpu.memory_space<semaphore_mem>>)
    %366 = tpu.iota {dimensions = array<i32: 1>} : vector<8x128xi32>
    %367 = vector.broadcast %333 : vector<8x1xf32> to vector<8x128xf32>
    %368 = arith.cmpf oge, %331, %367 : vector<8x128xf32>
    %c128_i32_147 = arith.constant 128 : i32
    %369 = vector.broadcast %c128_i32_147 : i32 to vector<8x128xi32>
    %370 = arith.select %368, %366, %369 : vector<8x128xi1>, vector<8x128xi32>
    %cst_148 = arith.constant dense<2147483647> : vector<8xi32>
    %371 = vector.multi_reduction <minsi>, %370, %cst_148 [1] : vector<8x128xi32> to vector<8xi32>
    %372 = vector.shape_cast %371 : vector<8xi32> to vector<8x1xi32>
    %373 = vector.broadcast %372 : vector<8x1xi32> to vector<8x128xi32>
    %374 = arith.cmpi eq, %366, %373 : vector<8x128xi32>
    %375 = arith.extui %374 : vector<8x128xi1> to vector<8x128xi32>
    %376 = arith.sitofp %375 : vector<8x128xi32> to vector<8x128xf32>
    %c0_149 = arith.constant 0 : index
    %c0_150 = arith.constant 0 : index
    %377 = vector.load %arg9[%c0_149, %c0_150] : memref<128x384xf32, #tpu.memory_space<vmem>>, vector<128x384xf32>
    %cst_151 = arith.constant dense<0.000000e+00> : vector<8x384xf32>
    %378 = tpu.matmul %376, %377, %cst_151 {dimension_numbers = #tpu.dot_dimension_numbers<[1], [0], [0], [1], [0, 0, 1, 1], [], []>} : vector<8x128xf32>, vector<128x384xf32>, vector<8x384xf32> -> vector<8x384xf32>
    %c3_i32 = arith.constant 3 : i32
    %c0_152 = arith.constant 0 : index
    %c0_153 = arith.constant 0 : index
    %379 = vector.load %arg3[%c0_152, %c0_153] : memref<128x512xf32, #tpu.memory_space<vmem>>, vector<128x512xf32>
    %cst_154 = arith.constant dense<0.000000e+00> : vector<8x512xf32>
    %380 = tpu.matmul %327, %379, %cst_154 {dimension_numbers = #tpu.dot_dimension_numbers<[1], [0], [0], [1], [0, 0, 1, 1], [], []>} : vector<8x128xf32>, vector<128x512xf32>, vector<8x512xf32> -> vector<8x512xf32>
    %381 = vector.extract_strided_slice %380 {offsets = [0, 0], sizes = [8, 128], strides = [1, 1]} : vector<8x512xf32> to vector<8x128xf32>
    %382 = vector.extract_strided_slice %380 {offsets = [0, 128], sizes = [8, 384], strides = [1, 1]} : vector<8x512xf32> to vector<8x384xf32>
    %383 = vector.broadcast %2 : vector<1x384xf32> to vector<8x384xf32>
    %384 = arith.addf %382, %383 : vector<8x384xf32>
    %385 = vector.shape_cast %381 : vector<8x128xf32> to vector<8x1x128xf32>
    %cst_155 = arith.constant -1.000000e+30 : f32
    %386 = vector.broadcast %cst_155 : f32 to vector<8x1xf32>
    %cst_156 = arith.constant 0.000000e+00 : f32
    %387 = vector.broadcast %cst_156 : f32 to vector<8x1xf32>
    %cst_157 = arith.constant 0.000000e+00 : f32
    %388 = vector.broadcast %cst_157 : f32 to vector<8x128xf32>
    %c0_158 = arith.constant 0 : index
    %c0_159 = arith.constant 0 : index
    %c0_160 = arith.constant 0 : index
    %c0_161 = arith.constant 0 : index
    %389 = vector.load %arg1[%c0_158, %c0_159, %c0_160, %c0_161] : memref<1x8x8x128xf32, #tpu.memory_space<vmem>>, vector<1x8x8x128xf32>
    %390 = vector.shape_cast %389 : vector<1x8x8x128xf32> to vector<8x8x128xf32>
    %391 = vector.broadcast %385 : vector<8x1x128xf32> to vector<8x8x128xf32>
    %392 = arith.addf %391, %390 : vector<8x8x128xf32>
    %393 = math.tanh %392 : vector<8x8x128xf32>
    %394 = vector.broadcast %1 : vector<1x1x128xf32> to vector<8x8x128xf32>
    %395 = arith.mulf %393, %394 : vector<8x8x128xf32>
    %cst_162 = arith.constant dense<0.000000e+00> : vector<8x8xf32>
    %396 = vector.multi_reduction <add>, %395, %cst_162 [2] : vector<8x8x128xf32> to vector<8x8xf32>
    %cst_163 = arith.constant dense<0xFF800000> : vector<8xf32>
    %397 = vector.multi_reduction <maximumf>, %396, %cst_163 [1] : vector<8x8xf32> to vector<8xf32>
    %398 = vector.shape_cast %397 : vector<8xf32> to vector<8x1xf32>
    %399 = arith.maximumf %386, %398 : vector<8x1xf32>
    %400 = arith.subf %386, %399 : vector<8x1xf32>
    %401 = math.exp %400 : vector<8x1xf32>
    %402 = vector.broadcast %399 : vector<8x1xf32> to vector<8x8xf32>
    %403 = arith.subf %396, %402 : vector<8x8xf32>
    %404 = math.exp %403 : vector<8x8xf32>
    %405 = arith.mulf %401, %387 : vector<8x1xf32>
    %cst_164 = arith.constant dense<0.000000e+00> : vector<8xf32>
    %406 = vector.multi_reduction <add>, %404, %cst_164 [1] : vector<8x8xf32> to vector<8xf32>
    %407 = vector.shape_cast %406 : vector<8xf32> to vector<8x1xf32>
    %408 = arith.addf %405, %407 : vector<8x1xf32>
    %409 = vector.shape_cast %404 : vector<8x8xf32> to vector<8x8x1xf32>
    %c0_165 = arith.constant 0 : index
    %c0_166 = arith.constant 0 : index
    %c0_167 = arith.constant 0 : index
    %c0_168 = arith.constant 0 : index
    %410 = vector.load %arg0[%c0_165, %c0_166, %c0_167, %c0_168] : memref<1x8x8x128xf32, #tpu.memory_space<vmem>>, vector<1x8x8x128xf32>
    %411 = vector.shape_cast %410 : vector<1x8x8x128xf32> to vector<8x8x128xf32>
    %412 = vector.broadcast %409 : vector<8x8x1xf32> to vector<8x8x128xf32>
    %413 = arith.mulf %412, %411 : vector<8x8x128xf32>
    %414 = vector.broadcast %401 : vector<8x1xf32> to vector<8x128xf32>
    %415 = arith.mulf %414, %388 : vector<8x128xf32>
    %cst_169 = arith.constant dense<0.000000e+00> : vector<8x128xf32>
    %416 = vector.multi_reduction <add>, %413, %cst_169 [1] : vector<8x8x128xf32> to vector<8x128xf32>
    %417 = arith.addf %415, %416 : vector<8x128xf32>
    %418 = tpu.reciprocal %408 : vector<8x1xf32> -> vector<8x1xf32>
    %419 = vector.broadcast %418 : vector<8x1xf32> to vector<8x128xf32>
    %420 = arith.mulf %417, %419 : vector<8x128xf32>
    %c0_170 = arith.constant 0 : index
    %c0_171 = arith.constant 0 : index
    %421 = vector.load %arg5[%c0_170, %c0_171] : memref<128x384xf32, #tpu.memory_space<vmem>>, vector<128x384xf32>
    %cst_172 = arith.constant dense<0.000000e+00> : vector<8x384xf32>
    %422 = tpu.matmul %420, %421, %cst_172 {dimension_numbers = #tpu.dot_dimension_numbers<[1], [0], [0], [1], [0, 0, 1, 1], [], []>} : vector<8x128xf32>, vector<128x384xf32>, vector<8x384xf32> -> vector<8x384xf32>
    %423 = arith.addf %378, %422 : vector<8x384xf32>
    %424 = vector.broadcast %3 : vector<1x384xf32> to vector<8x384xf32>
    %425 = arith.addf %423, %424 : vector<8x384xf32>
    %426 = vector.extract_strided_slice %425 {offsets = [0, 0], sizes = [8, 128], strides = [1, 1]} : vector<8x384xf32> to vector<8x128xf32>
    %427 = vector.extract_strided_slice %384 {offsets = [0, 0], sizes = [8, 128], strides = [1, 1]} : vector<8x384xf32> to vector<8x128xf32>
    %428 = arith.addf %426, %427 : vector<8x128xf32>
    %429 = arith.negf %428 : vector<8x128xf32>
    %430 = math.exp %429 : vector<8x128xf32>
    %cst_173 = arith.constant 1.000000e+00 : f32
    %431 = vector.broadcast %cst_173 : f32 to vector<8x128xf32>
    %432 = arith.addf %431, %430 : vector<8x128xf32>
    %433 = arith.divf %431, %432 : vector<8x128xf32>
    %434 = vector.extract_strided_slice %425 {offsets = [0, 128], sizes = [8, 128], strides = [1, 1]} : vector<8x384xf32> to vector<8x128xf32>
    %435 = vector.extract_strided_slice %384 {offsets = [0, 128], sizes = [8, 128], strides = [1, 1]} : vector<8x384xf32> to vector<8x128xf32>
    %436 = arith.addf %434, %435 : vector<8x128xf32>
    %437 = arith.negf %436 : vector<8x128xf32>
    %438 = math.exp %437 : vector<8x128xf32>
    %cst_174 = arith.constant 1.000000e+00 : f32
    %439 = vector.broadcast %cst_174 : f32 to vector<8x128xf32>
    %440 = arith.addf %439, %438 : vector<8x128xf32>
    %441 = arith.divf %439, %440 : vector<8x128xf32>
    %442 = vector.extract_strided_slice %425 {offsets = [0, 256], sizes = [8, 128], strides = [1, 1]} : vector<8x384xf32> to vector<8x128xf32>
    %443 = vector.extract_strided_slice %384 {offsets = [0, 256], sizes = [8, 128], strides = [1, 1]} : vector<8x384xf32> to vector<8x128xf32>
    %444 = arith.mulf %433, %443 : vector<8x128xf32>
    %445 = arith.addf %442, %444 : vector<8x128xf32>
    %446 = math.tanh %445 : vector<8x128xf32>
    %cst_175 = arith.constant 1.000000e+00 : f32
    %447 = vector.broadcast %cst_175 : f32 to vector<8x128xf32>
    %448 = arith.subf %447, %441 : vector<8x128xf32>
    %449 = arith.mulf %448, %446 : vector<8x128xf32>
    %450 = arith.mulf %441, %327 : vector<8x128xf32>
    %451 = arith.addf %449, %450 : vector<8x128xf32>
    %c0_176 = arith.constant 0 : index
    %c0_177 = arith.constant 0 : index
    %452 = vector.load %arg7[%c0_176, %c0_177] : memref<128x128xf32, #tpu.memory_space<vmem>>, vector<128x128xf32>
    %cst_178 = arith.constant dense<0.000000e+00> : vector<8x128xf32>
    %453 = tpu.matmul %451, %452, %cst_178 {dimension_numbers = #tpu.dot_dimension_numbers<[1], [0], [0], [1], [0, 0, 1, 1], [], []>} : vector<8x128xf32>, vector<128x128xf32>, vector<8x128xf32> -> vector<8x128xf32>
    %454 = vector.broadcast %4 : vector<1x128xf32> to vector<8x128xf32>
    %455 = arith.addf %453, %454 : vector<8x128xf32>
    %cst_179 = arith.constant dense<0xFF800000> : vector<8xf32>
    %456 = vector.multi_reduction <maximumf>, %455, %cst_179 [1] : vector<8x128xf32> to vector<8xf32>
    %457 = vector.shape_cast %456 : vector<8xf32> to vector<8x1xf32>
    %458 = vector.broadcast %457 : vector<8x1xf32> to vector<8x128xf32>
    %459 = arith.subf %455, %458 : vector<8x128xf32>
    %460 = math.exp %459 : vector<8x128xf32>
    %cst_180 = arith.constant dense<0.000000e+00> : vector<8xf32>
    %461 = vector.multi_reduction <add>, %460, %cst_180 [1] : vector<8x128xf32> to vector<8xf32>
    %462 = vector.shape_cast %461 : vector<8xf32> to vector<8x1xf32>
    %463 = math.log %462 : vector<8x1xf32>
    %464 = arith.addf %457, %463 : vector<8x1xf32>
    %465 = vector.broadcast %464 : vector<8x1xf32> to vector<8x128xf32>
    %466 = arith.subf %455, %465 : vector<8x128xf32>
    %c2_i32_181 = arith.constant 2 : i32
    %c0_i32_182 = arith.constant 0 : i32
    %467 = arith.cmpi eq, %c2_i32_181, %c0_i32_182 : i32
    %c1_i32_183 = arith.constant 1 : i32
    %468 = arith.select %467, %c1_i32_183, %c2_i32_181 : i32
    %469 = arith.remsi %c3_i32, %468 : i32
    %c0_i32_184 = arith.constant 0 : i32
    %470 = arith.cmpi ne, %469, %c0_i32_184 : i32
    %c0_i32_185 = arith.constant 0 : i32
    %471 = arith.cmpi slt, %469, %c0_i32_185 : i32
    %c0_i32_186 = arith.constant 0 : i32
    %472 = arith.cmpi slt, %468, %c0_i32_186 : i32
    %473 = arith.xori %471, %472 : i1
    %474 = arith.andi %473, %470 : i1
    %475 = arith.addi %469, %468 : i32
    %476 = arith.select %474, %475, %469 : i32
    %c2_i32_187 = arith.constant 2 : i32
    %477 = arith.cmpi sge, %c3_i32, %c2_i32_187 : i32
    %478 = arith.extui %477 : i1 to i32
    %c0_i32_188 = arith.constant 0 : i32
    %479 = arith.cmpi ne, %478, %c0_i32_188 : i32
    scf.if %479 {
      %c0_i32_312 = arith.constant 0 : i32
      %c0_i32_313 = arith.constant 0 : i32
      %c0_i32_314 = arith.constant 0 : i32
      %764 = tpu.memref_slice %arg13[%476, %c0_i32_313, %c0_i32_314] : memref<2x8x128xf32, #tpu.memory_space<vmem>> -> memref<1x8x128xf32, #tpu.memory_space<vmem>>
      %765 = tpu.memref_squeeze %764 : memref<1x8x128xf32, #tpu.memory_space<vmem>> -> memref<8x128xf32, #tpu.memory_space<vmem>>
      %c0_i32_315 = arith.constant 0 : i32
      %c0_i32_316 = arith.constant 0 : i32
      %766 = tpu.memref_slice %arg11[%c0_i32_312, %c0_i32_315, %c0_i32_316] : memref<6x8x128xf32, #tpu.memory_space<any>> -> memref<1x8x128xf32, #tpu.memory_space<any>>
      %767 = tpu.memref_squeeze %766 : memref<1x8x128xf32, #tpu.memory_space<any>> -> memref<8x128xf32, #tpu.memory_space<any>>
      %768 = tpu.memref_slice %arg14[%476] : memref<2x!tpu.dma_semaphore, #tpu.memory_space<semaphore_mem>> -> memref<1x!tpu.dma_semaphore, #tpu.memory_space<semaphore_mem>>
      %769 = tpu.memref_squeeze %768 : memref<1x!tpu.dma_semaphore, #tpu.memory_space<semaphore_mem>> -> memref<!tpu.dma_semaphore, #tpu.memory_space<semaphore_mem>>
      tpu.wait_dma2 semaphore(%769 : memref<!tpu.dma_semaphore, #tpu.memory_space<semaphore_mem>>) src(%765 : memref<8x128xf32, #tpu.memory_space<vmem>>) dst(%767 : memref<8x128xf32, #tpu.memory_space<any>>)
    } else {
    }
    %480 = arith.index_cast %476 : i32 to index
    %c0_189 = arith.constant 0 : index
    %c0_190 = arith.constant 0 : index
    %481 = vector.load %arg13[%480, %c0_189, %c0_190] : memref<2x8x128xf32, #tpu.memory_space<vmem>>, vector<1x8x128xf32>
    %482 = vector.shape_cast %481 : vector<1x8x128xf32> to vector<8x128xf32>
    %483 = vector.shape_cast %466 : vector<8x128xf32> to vector<1x8x128xf32>
    tpu.vector_store %arg13[%480, %c0_189, %c0_190], %483 {strides = array<i32>} : memref<2x8x128xf32, #tpu.memory_space<vmem>>, vector<1x8x128xf32>,
    %c0_i32_191 = arith.constant 0 : i32
    %c0_i32_192 = arith.constant 0 : i32
    %484 = tpu.memref_slice %arg13[%476, %c0_i32_191, %c0_i32_192] : memref<2x8x128xf32, #tpu.memory_space<vmem>> -> memref<1x8x128xf32, #tpu.memory_space<vmem>>
    %485 = tpu.memref_squeeze %484 : memref<1x8x128xf32, #tpu.memory_space<vmem>> -> memref<8x128xf32, #tpu.memory_space<vmem>>
    %c0_i32_193 = arith.constant 0 : i32
    %c0_i32_194 = arith.constant 0 : i32
    %486 = tpu.memref_slice %arg11[%c3_i32, %c0_i32_193, %c0_i32_194] : memref<6x8x128xf32, #tpu.memory_space<any>> -> memref<1x8x128xf32, #tpu.memory_space<any>>
    %487 = tpu.memref_squeeze %486 : memref<1x8x128xf32, #tpu.memory_space<any>> -> memref<8x128xf32, #tpu.memory_space<any>>
    %488 = tpu.memref_slice %arg14[%476] : memref<2x!tpu.dma_semaphore, #tpu.memory_space<semaphore_mem>> -> memref<1x!tpu.dma_semaphore, #tpu.memory_space<semaphore_mem>>
    %489 = tpu.memref_squeeze %488 : memref<1x!tpu.dma_semaphore, #tpu.memory_space<semaphore_mem>> -> memref<!tpu.dma_semaphore, #tpu.memory_space<semaphore_mem>>
    tpu.enqueue_dma source(%485 : memref<8x128xf32, #tpu.memory_space<vmem>>) target(%487 : memref<8x128xf32, #tpu.memory_space<any>>) target_semaphore(%489 : memref<!tpu.dma_semaphore, #tpu.memory_space<semaphore_mem>>)
    %490 = tpu.iota {dimensions = array<i32: 1>} : vector<8x128xi32>
    %491 = vector.broadcast %457 : vector<8x1xf32> to vector<8x128xf32>
    %492 = arith.cmpf oge, %455, %491 : vector<8x128xf32>
    %c128_i32_195 = arith.constant 128 : i32
    %493 = vector.broadcast %c128_i32_195 : i32 to vector<8x128xi32>
    %494 = arith.select %492, %490, %493 : vector<8x128xi1>, vector<8x128xi32>
    %cst_196 = arith.constant dense<2147483647> : vector<8xi32>
    %495 = vector.multi_reduction <minsi>, %494, %cst_196 [1] : vector<8x128xi32> to vector<8xi32>
    %496 = vector.shape_cast %495 : vector<8xi32> to vector<8x1xi32>
    %497 = vector.broadcast %496 : vector<8x1xi32> to vector<8x128xi32>
    %498 = arith.cmpi eq, %490, %497 : vector<8x128xi32>
    %499 = arith.extui %498 : vector<8x128xi1> to vector<8x128xi32>
    %500 = arith.sitofp %499 : vector<8x128xi32> to vector<8x128xf32>
    %c0_197 = arith.constant 0 : index
    %c0_198 = arith.constant 0 : index
    %501 = vector.load %arg9[%c0_197, %c0_198] : memref<128x384xf32, #tpu.memory_space<vmem>>, vector<128x384xf32>
    %cst_199 = arith.constant dense<0.000000e+00> : vector<8x384xf32>
    %502 = tpu.matmul %500, %501, %cst_199 {dimension_numbers = #tpu.dot_dimension_numbers<[1], [0], [0], [1], [0, 0, 1, 1], [], []>} : vector<8x128xf32>, vector<128x384xf32>, vector<8x384xf32> -> vector<8x384xf32>
    %c4_i32 = arith.constant 4 : i32
    %c0_200 = arith.constant 0 : index
    %c0_201 = arith.constant 0 : index
    %503 = vector.load %arg3[%c0_200, %c0_201] : memref<128x512xf32, #tpu.memory_space<vmem>>, vector<128x512xf32>
    %cst_202 = arith.constant dense<0.000000e+00> : vector<8x512xf32>
    %504 = tpu.matmul %451, %503, %cst_202 {dimension_numbers = #tpu.dot_dimension_numbers<[1], [0], [0], [1], [0, 0, 1, 1], [], []>} : vector<8x128xf32>, vector<128x512xf32>, vector<8x512xf32> -> vector<8x512xf32>
    %505 = vector.extract_strided_slice %504 {offsets = [0, 0], sizes = [8, 128], strides = [1, 1]} : vector<8x512xf32> to vector<8x128xf32>
    %506 = vector.extract_strided_slice %504 {offsets = [0, 128], sizes = [8, 384], strides = [1, 1]} : vector<8x512xf32> to vector<8x384xf32>
    %507 = vector.broadcast %2 : vector<1x384xf32> to vector<8x384xf32>
    %508 = arith.addf %506, %507 : vector<8x384xf32>
    %509 = vector.shape_cast %505 : vector<8x128xf32> to vector<8x1x128xf32>
    %cst_203 = arith.constant -1.000000e+30 : f32
    %510 = vector.broadcast %cst_203 : f32 to vector<8x1xf32>
    %cst_204 = arith.constant 0.000000e+00 : f32
    %511 = vector.broadcast %cst_204 : f32 to vector<8x1xf32>
    %cst_205 = arith.constant 0.000000e+00 : f32
    %512 = vector.broadcast %cst_205 : f32 to vector<8x128xf32>
    %c0_206 = arith.constant 0 : index
    %c0_207 = arith.constant 0 : index
    %c0_208 = arith.constant 0 : index
    %c0_209 = arith.constant 0 : index
    %513 = vector.load %arg1[%c0_206, %c0_207, %c0_208, %c0_209] : memref<1x8x8x128xf32, #tpu.memory_space<vmem>>, vector<1x8x8x128xf32>
    %514 = vector.shape_cast %513 : vector<1x8x8x128xf32> to vector<8x8x128xf32>
    %515 = vector.broadcast %509 : vector<8x1x128xf32> to vector<8x8x128xf32>
    %516 = arith.addf %515, %514 : vector<8x8x128xf32>
    %517 = math.tanh %516 : vector<8x8x128xf32>
    %518 = vector.broadcast %1 : vector<1x1x128xf32> to vector<8x8x128xf32>
    %519 = arith.mulf %517, %518 : vector<8x8x128xf32>
    %cst_210 = arith.constant dense<0.000000e+00> : vector<8x8xf32>
    %520 = vector.multi_reduction <add>, %519, %cst_210 [2] : vector<8x8x128xf32> to vector<8x8xf32>
    %cst_211 = arith.constant dense<0xFF800000> : vector<8xf32>
    %521 = vector.multi_reduction <maximumf>, %520, %cst_211 [1] : vector<8x8xf32> to vector<8xf32>
    %522 = vector.shape_cast %521 : vector<8xf32> to vector<8x1xf32>
    %523 = arith.maximumf %510, %522 : vector<8x1xf32>
    %524 = arith.subf %510, %523 : vector<8x1xf32>
    %525 = math.exp %524 : vector<8x1xf32>
    %526 = vector.broadcast %523 : vector<8x1xf32> to vector<8x8xf32>
    %527 = arith.subf %520, %526 : vector<8x8xf32>
    %528 = math.exp %527 : vector<8x8xf32>
    %529 = arith.mulf %525, %511 : vector<8x1xf32>
    %cst_212 = arith.constant dense<0.000000e+00> : vector<8xf32>
    %530 = vector.multi_reduction <add>, %528, %cst_212 [1] : vector<8x8xf32> to vector<8xf32>
    %531 = vector.shape_cast %530 : vector<8xf32> to vector<8x1xf32>
    %532 = arith.addf %529, %531 : vector<8x1xf32>
    %533 = vector.shape_cast %528 : vector<8x8xf32> to vector<8x8x1xf32>
    %c0_213 = arith.constant 0 : index
    %c0_214 = arith.constant 0 : index
    %c0_215 = arith.constant 0 : index
    %c0_216 = arith.constant 0 : index
    %534 = vector.load %arg0[%c0_213, %c0_214, %c0_215, %c0_216] : memref<1x8x8x128xf32, #tpu.memory_space<vmem>>, vector<1x8x8x128xf32>
    %535 = vector.shape_cast %534 : vector<1x8x8x128xf32> to vector<8x8x128xf32>
    %536 = vector.broadcast %533 : vector<8x8x1xf32> to vector<8x8x128xf32>
    %537 = arith.mulf %536, %535 : vector<8x8x128xf32>
    %538 = vector.broadcast %525 : vector<8x1xf32> to vector<8x128xf32>
    %539 = arith.mulf %538, %512 : vector<8x128xf32>
    %cst_217 = arith.constant dense<0.000000e+00> : vector<8x128xf32>
    %540 = vector.multi_reduction <add>, %537, %cst_217 [1] : vector<8x8x128xf32> to vector<8x128xf32>
    %541 = arith.addf %539, %540 : vector<8x128xf32>
    %542 = tpu.reciprocal %532 : vector<8x1xf32> -> vector<8x1xf32>
    %543 = vector.broadcast %542 : vector<8x1xf32> to vector<8x128xf32>
    %544 = arith.mulf %541, %543 : vector<8x128xf32>
    %c0_218 = arith.constant 0 : index
    %c0_219 = arith.constant 0 : index
    %545 = vector.load %arg5[%c0_218, %c0_219] : memref<128x384xf32, #tpu.memory_space<vmem>>, vector<128x384xf32>
    %cst_220 = arith.constant dense<0.000000e+00> : vector<8x384xf32>
    %546 = tpu.matmul %544, %545, %cst_220 {dimension_numbers = #tpu.dot_dimension_numbers<[1], [0], [0], [1], [0, 0, 1, 1], [], []>} : vector<8x128xf32>, vector<128x384xf32>, vector<8x384xf32> -> vector<8x384xf32>
    %547 = arith.addf %502, %546 : vector<8x384xf32>
    %548 = vector.broadcast %3 : vector<1x384xf32> to vector<8x384xf32>
    %549 = arith.addf %547, %548 : vector<8x384xf32>
    %550 = vector.extract_strided_slice %549 {offsets = [0, 0], sizes = [8, 128], strides = [1, 1]} : vector<8x384xf32> to vector<8x128xf32>
    %551 = vector.extract_strided_slice %508 {offsets = [0, 0], sizes = [8, 128], strides = [1, 1]} : vector<8x384xf32> to vector<8x128xf32>
    %552 = arith.addf %550, %551 : vector<8x128xf32>
    %553 = arith.negf %552 : vector<8x128xf32>
    %554 = math.exp %553 : vector<8x128xf32>
    %cst_221 = arith.constant 1.000000e+00 : f32
    %555 = vector.broadcast %cst_221 : f32 to vector<8x128xf32>
    %556 = arith.addf %555, %554 : vector<8x128xf32>
    %557 = arith.divf %555, %556 : vector<8x128xf32>
    %558 = vector.extract_strided_slice %549 {offsets = [0, 128], sizes = [8, 128], strides = [1, 1]} : vector<8x384xf32> to vector<8x128xf32>
    %559 = vector.extract_strided_slice %508 {offsets = [0, 128], sizes = [8, 128], strides = [1, 1]} : vector<8x384xf32> to vector<8x128xf32>
    %560 = arith.addf %558, %559 : vector<8x128xf32>
    %561 = arith.negf %560 : vector<8x128xf32>
    %562 = math.exp %561 : vector<8x128xf32>
    %cst_222 = arith.constant 1.000000e+00 : f32
    %563 = vector.broadcast %cst_222 : f32 to vector<8x128xf32>
    %564 = arith.addf %563, %562 : vector<8x128xf32>
    %565 = arith.divf %563, %564 : vector<8x128xf32>
    %566 = vector.extract_strided_slice %549 {offsets = [0, 256], sizes = [8, 128], strides = [1, 1]} : vector<8x384xf32> to vector<8x128xf32>
    %567 = vector.extract_strided_slice %508 {offsets = [0, 256], sizes = [8, 128], strides = [1, 1]} : vector<8x384xf32> to vector<8x128xf32>
    %568 = arith.mulf %557, %567 : vector<8x128xf32>
    %569 = arith.addf %566, %568 : vector<8x128xf32>
    %570 = math.tanh %569 : vector<8x128xf32>
    %cst_223 = arith.constant 1.000000e+00 : f32
    %571 = vector.broadcast %cst_223 : f32 to vector<8x128xf32>
    %572 = arith.subf %571, %565 : vector<8x128xf32>
    %573 = arith.mulf %572, %570 : vector<8x128xf32>
    %574 = arith.mulf %565, %451 : vector<8x128xf32>
    %575 = arith.addf %573, %574 : vector<8x128xf32>
    %c0_224 = arith.constant 0 : index
    %c0_225 = arith.constant 0 : index
    %576 = vector.load %arg7[%c0_224, %c0_225] : memref<128x128xf32, #tpu.memory_space<vmem>>, vector<128x128xf32>
    %cst_226 = arith.constant dense<0.000000e+00> : vector<8x128xf32>
    %577 = tpu.matmul %575, %576, %cst_226 {dimension_numbers = #tpu.dot_dimension_numbers<[1], [0], [0], [1], [0, 0, 1, 1], [], []>} : vector<8x128xf32>, vector<128x128xf32>, vector<8x128xf32> -> vector<8x128xf32>
    %578 = vector.broadcast %4 : vector<1x128xf32> to vector<8x128xf32>
    %579 = arith.addf %577, %578 : vector<8x128xf32>
    %cst_227 = arith.constant dense<0xFF800000> : vector<8xf32>
    %580 = vector.multi_reduction <maximumf>, %579, %cst_227 [1] : vector<8x128xf32> to vector<8xf32>
    %581 = vector.shape_cast %580 : vector<8xf32> to vector<8x1xf32>
    %582 = vector.broadcast %581 : vector<8x1xf32> to vector<8x128xf32>
    %583 = arith.subf %579, %582 : vector<8x128xf32>
    %584 = math.exp %583 : vector<8x128xf32>
    %cst_228 = arith.constant dense<0.000000e+00> : vector<8xf32>
    %585 = vector.multi_reduction <add>, %584, %cst_228 [1] : vector<8x128xf32> to vector<8xf32>
    %586 = vector.shape_cast %585 : vector<8xf32> to vector<8x1xf32>
    %587 = math.log %586 : vector<8x1xf32>
    %588 = arith.addf %581, %587 : vector<8x1xf32>
    %589 = vector.broadcast %588 : vector<8x1xf32> to vector<8x128xf32>
    %590 = arith.subf %579, %589 : vector<8x128xf32>
    %c2_i32_229 = arith.constant 2 : i32
    %c0_i32_230 = arith.constant 0 : i32
    %591 = arith.cmpi eq, %c2_i32_229, %c0_i32_230 : i32
    %c1_i32_231 = arith.constant 1 : i32
    %592 = arith.select %591, %c1_i32_231, %c2_i32_229 : i32
    %593 = arith.remsi %c4_i32, %592 : i32
    %c0_i32_232 = arith.constant 0 : i32
    %594 = arith.cmpi ne, %593, %c0_i32_232 : i32
    %c0_i32_233 = arith.constant 0 : i32
    %595 = arith.cmpi slt, %593, %c0_i32_233 : i32
    %c0_i32_234 = arith.constant 0 : i32
    %596 = arith.cmpi slt, %592, %c0_i32_234 : i32
    %597 = arith.xori %595, %596 : i1
    %598 = arith.andi %597, %594 : i1
    %599 = arith.addi %593, %592 : i32
    %600 = arith.select %598, %599, %593 : i32
    %c2_i32_235 = arith.constant 2 : i32
    %601 = arith.cmpi sge, %c4_i32, %c2_i32_235 : i32
    %602 = arith.extui %601 : i1 to i32
    %c0_i32_236 = arith.constant 0 : i32
    %603 = arith.cmpi ne, %602, %c0_i32_236 : i32
    scf.if %603 {
      %c0_i32_312 = arith.constant 0 : i32
      %c0_i32_313 = arith.constant 0 : i32
      %c0_i32_314 = arith.constant 0 : i32
      %764 = tpu.memref_slice %arg13[%600, %c0_i32_313, %c0_i32_314] : memref<2x8x128xf32, #tpu.memory_space<vmem>> -> memref<1x8x128xf32, #tpu.memory_space<vmem>>
      %765 = tpu.memref_squeeze %764 : memref<1x8x128xf32, #tpu.memory_space<vmem>> -> memref<8x128xf32, #tpu.memory_space<vmem>>
      %c0_i32_315 = arith.constant 0 : i32
      %c0_i32_316 = arith.constant 0 : i32
      %766 = tpu.memref_slice %arg11[%c0_i32_312, %c0_i32_315, %c0_i32_316] : memref<6x8x128xf32, #tpu.memory_space<any>> -> memref<1x8x128xf32, #tpu.memory_space<any>>
      %767 = tpu.memref_squeeze %766 : memref<1x8x128xf32, #tpu.memory_space<any>> -> memref<8x128xf32, #tpu.memory_space<any>>
      %768 = tpu.memref_slice %arg14[%600] : memref<2x!tpu.dma_semaphore, #tpu.memory_space<semaphore_mem>> -> memref<1x!tpu.dma_semaphore, #tpu.memory_space<semaphore_mem>>
      %769 = tpu.memref_squeeze %768 : memref<1x!tpu.dma_semaphore, #tpu.memory_space<semaphore_mem>> -> memref<!tpu.dma_semaphore, #tpu.memory_space<semaphore_mem>>
      tpu.wait_dma2 semaphore(%769 : memref<!tpu.dma_semaphore, #tpu.memory_space<semaphore_mem>>) src(%765 : memref<8x128xf32, #tpu.memory_space<vmem>>) dst(%767 : memref<8x128xf32, #tpu.memory_space<any>>)
    } else {
    }
    %604 = arith.index_cast %600 : i32 to index
    %c0_237 = arith.constant 0 : index
    %c0_238 = arith.constant 0 : index
    %605 = vector.load %arg13[%604, %c0_237, %c0_238] : memref<2x8x128xf32, #tpu.memory_space<vmem>>, vector<1x8x128xf32>
    %606 = vector.shape_cast %605 : vector<1x8x128xf32> to vector<8x128xf32>
    %607 = vector.shape_cast %590 : vector<8x128xf32> to vector<1x8x128xf32>
    tpu.vector_store %arg13[%604, %c0_237, %c0_238], %607 {strides = array<i32>} : memref<2x8x128xf32, #tpu.memory_space<vmem>>, vector<1x8x128xf32>,
    %c0_i32_239 = arith.constant 0 : i32
    %c0_i32_240 = arith.constant 0 : i32
    %608 = tpu.memref_slice %arg13[%600, %c0_i32_239, %c0_i32_240] : memref<2x8x128xf32, #tpu.memory_space<vmem>> -> memref<1x8x128xf32, #tpu.memory_space<vmem>>
    %609 = tpu.memref_squeeze %608 : memref<1x8x128xf32, #tpu.memory_space<vmem>> -> memref<8x128xf32, #tpu.memory_space<vmem>>
    %c0_i32_241 = arith.constant 0 : i32
    %c0_i32_242 = arith.constant 0 : i32
    %610 = tpu.memref_slice %arg11[%c4_i32, %c0_i32_241, %c0_i32_242] : memref<6x8x128xf32, #tpu.memory_space<any>> -> memref<1x8x128xf32, #tpu.memory_space<any>>
    %611 = tpu.memref_squeeze %610 : memref<1x8x128xf32, #tpu.memory_space<any>> -> memref<8x128xf32, #tpu.memory_space<any>>
    %612 = tpu.memref_slice %arg14[%600] : memref<2x!tpu.dma_semaphore, #tpu.memory_space<semaphore_mem>> -> memref<1x!tpu.dma_semaphore, #tpu.memory_space<semaphore_mem>>
    %613 = tpu.memref_squeeze %612 : memref<1x!tpu.dma_semaphore, #tpu.memory_space<semaphore_mem>> -> memref<!tpu.dma_semaphore, #tpu.memory_space<semaphore_mem>>
    tpu.enqueue_dma source(%609 : memref<8x128xf32, #tpu.memory_space<vmem>>) target(%611 : memref<8x128xf32, #tpu.memory_space<any>>) target_semaphore(%613 : memref<!tpu.dma_semaphore, #tpu.memory_space<semaphore_mem>>)
    %614 = tpu.iota {dimensions = array<i32: 1>} : vector<8x128xi32>
    %615 = vector.broadcast %581 : vector<8x1xf32> to vector<8x128xf32>
    %616 = arith.cmpf oge, %579, %615 : vector<8x128xf32>
    %c128_i32_243 = arith.constant 128 : i32
    %617 = vector.broadcast %c128_i32_243 : i32 to vector<8x128xi32>
    %618 = arith.select %616, %614, %617 : vector<8x128xi1>, vector<8x128xi32>
    %cst_244 = arith.constant dense<2147483647> : vector<8xi32>
    %619 = vector.multi_reduction <minsi>, %618, %cst_244 [1] : vector<8x128xi32> to vector<8xi32>
    %620 = vector.shape_cast %619 : vector<8xi32> to vector<8x1xi32>
    %621 = vector.broadcast %620 : vector<8x1xi32> to vector<8x128xi32>
    %622 = arith.cmpi eq, %614, %621 : vector<8x128xi32>
    %623 = arith.extui %622 : vector<8x128xi1> to vector<8x128xi32>
    %624 = arith.sitofp %623 : vector<8x128xi32> to vector<8x128xf32>
    %c0_245 = arith.constant 0 : index
    %c0_246 = arith.constant 0 : index
    %625 = vector.load %arg9[%c0_245, %c0_246] : memref<128x384xf32, #tpu.memory_space<vmem>>, vector<128x384xf32>
    %cst_247 = arith.constant dense<0.000000e+00> : vector<8x384xf32>
    %626 = tpu.matmul %624, %625, %cst_247 {dimension_numbers = #tpu.dot_dimension_numbers<[1], [0], [0], [1], [0, 0, 1, 1], [], []>} : vector<8x128xf32>, vector<128x384xf32>, vector<8x384xf32> -> vector<8x384xf32>
    %c5_i32 = arith.constant 5 : i32
    %c0_248 = arith.constant 0 : index
    %c0_249 = arith.constant 0 : index
    %627 = vector.load %arg3[%c0_248, %c0_249] : memref<128x512xf32, #tpu.memory_space<vmem>>, vector<128x512xf32>
    %cst_250 = arith.constant dense<0.000000e+00> : vector<8x512xf32>
    %628 = tpu.matmul %575, %627, %cst_250 {dimension_numbers = #tpu.dot_dimension_numbers<[1], [0], [0], [1], [0, 0, 1, 1], [], []>} : vector<8x128xf32>, vector<128x512xf32>, vector<8x512xf32> -> vector<8x512xf32>
    %629 = vector.extract_strided_slice %628 {offsets = [0, 0], sizes = [8, 128], strides = [1, 1]} : vector<8x512xf32> to vector<8x128xf32>
    %630 = vector.extract_strided_slice %628 {offsets = [0, 128], sizes = [8, 384], strides = [1, 1]} : vector<8x512xf32> to vector<8x384xf32>
    %631 = vector.broadcast %2 : vector<1x384xf32> to vector<8x384xf32>
    %632 = arith.addf %630, %631 : vector<8x384xf32>
    %633 = vector.shape_cast %629 : vector<8x128xf32> to vector<8x1x128xf32>
    %cst_251 = arith.constant -1.000000e+30 : f32
    %634 = vector.broadcast %cst_251 : f32 to vector<8x1xf32>
    %cst_252 = arith.constant 0.000000e+00 : f32
    %635 = vector.broadcast %cst_252 : f32 to vector<8x1xf32>
    %cst_253 = arith.constant 0.000000e+00 : f32
    %636 = vector.broadcast %cst_253 : f32 to vector<8x128xf32>
    %c0_254 = arith.constant 0 : index
    %c0_255 = arith.constant 0 : index
    %c0_256 = arith.constant 0 : index
    %c0_257 = arith.constant 0 : index
    %637 = vector.load %arg1[%c0_254, %c0_255, %c0_256, %c0_257] : memref<1x8x8x128xf32, #tpu.memory_space<vmem>>, vector<1x8x8x128xf32>
    %638 = vector.shape_cast %637 : vector<1x8x8x128xf32> to vector<8x8x128xf32>
    %639 = vector.broadcast %633 : vector<8x1x128xf32> to vector<8x8x128xf32>
    %640 = arith.addf %639, %638 : vector<8x8x128xf32>
    %641 = math.tanh %640 : vector<8x8x128xf32>
    %642 = vector.broadcast %1 : vector<1x1x128xf32> to vector<8x8x128xf32>
    %643 = arith.mulf %641, %642 : vector<8x8x128xf32>
    %cst_258 = arith.constant dense<0.000000e+00> : vector<8x8xf32>
    %644 = vector.multi_reduction <add>, %643, %cst_258 [2] : vector<8x8x128xf32> to vector<8x8xf32>
    %cst_259 = arith.constant dense<0xFF800000> : vector<8xf32>
    %645 = vector.multi_reduction <maximumf>, %644, %cst_259 [1] : vector<8x8xf32> to vector<8xf32>
    %646 = vector.shape_cast %645 : vector<8xf32> to vector<8x1xf32>
    %647 = arith.maximumf %634, %646 : vector<8x1xf32>
    %648 = arith.subf %634, %647 : vector<8x1xf32>
    %649 = math.exp %648 : vector<8x1xf32>
    %650 = vector.broadcast %647 : vector<8x1xf32> to vector<8x8xf32>
    %651 = arith.subf %644, %650 : vector<8x8xf32>
    %652 = math.exp %651 : vector<8x8xf32>
    %653 = arith.mulf %649, %635 : vector<8x1xf32>
    %cst_260 = arith.constant dense<0.000000e+00> : vector<8xf32>
    %654 = vector.multi_reduction <add>, %652, %cst_260 [1] : vector<8x8xf32> to vector<8xf32>
    %655 = vector.shape_cast %654 : vector<8xf32> to vector<8x1xf32>
    %656 = arith.addf %653, %655 : vector<8x1xf32>
    %657 = vector.shape_cast %652 : vector<8x8xf32> to vector<8x8x1xf32>
    %c0_261 = arith.constant 0 : index
    %c0_262 = arith.constant 0 : index
    %c0_263 = arith.constant 0 : index
    %c0_264 = arith.constant 0 : index
    %658 = vector.load %arg0[%c0_261, %c0_262, %c0_263, %c0_264] : memref<1x8x8x128xf32, #tpu.memory_space<vmem>>, vector<1x8x8x128xf32>
    %659 = vector.shape_cast %658 : vector<1x8x8x128xf32> to vector<8x8x128xf32>
    %660 = vector.broadcast %657 : vector<8x8x1xf32> to vector<8x8x128xf32>
    %661 = arith.mulf %660, %659 : vector<8x8x128xf32>
    %662 = vector.broadcast %649 : vector<8x1xf32> to vector<8x128xf32>
    %663 = arith.mulf %662, %636 : vector<8x128xf32>
    %cst_265 = arith.constant dense<0.000000e+00> : vector<8x128xf32>
    %664 = vector.multi_reduction <add>, %661, %cst_265 [1] : vector<8x8x128xf32> to vector<8x128xf32>
    %665 = arith.addf %663, %664 : vector<8x128xf32>
    %666 = tpu.reciprocal %656 : vector<8x1xf32> -> vector<8x1xf32>
    %667 = vector.broadcast %666 : vector<8x1xf32> to vector<8x128xf32>
    %668 = arith.mulf %665, %667 : vector<8x128xf32>
    %c0_266 = arith.constant 0 : index
    %c0_267 = arith.constant 0 : index
    %669 = vector.load %arg5[%c0_266, %c0_267] : memref<128x384xf32, #tpu.memory_space<vmem>>, vector<128x384xf32>
    %cst_268 = arith.constant dense<0.000000e+00> : vector<8x384xf32>
    %670 = tpu.matmul %668, %669, %cst_268 {dimension_numbers = #tpu.dot_dimension_numbers<[1], [0], [0], [1], [0, 0, 1, 1], [], []>} : vector<8x128xf32>, vector<128x384xf32>, vector<8x384xf32> -> vector<8x384xf32>
    %671 = arith.addf %626, %670 : vector<8x384xf32>
    %672 = vector.broadcast %3 : vector<1x384xf32> to vector<8x384xf32>
    %673 = arith.addf %671, %672 : vector<8x384xf32>
    %674 = vector.extract_strided_slice %673 {offsets = [0, 0], sizes = [8, 128], strides = [1, 1]} : vector<8x384xf32> to vector<8x128xf32>
    %675 = vector.extract_strided_slice %632 {offsets = [0, 0], sizes = [8, 128], strides = [1, 1]} : vector<8x384xf32> to vector<8x128xf32>
    %676 = arith.addf %674, %675 : vector<8x128xf32>
    %677 = arith.negf %676 : vector<8x128xf32>
    %678 = math.exp %677 : vector<8x128xf32>
    %cst_269 = arith.constant 1.000000e+00 : f32
    %679 = vector.broadcast %cst_269 : f32 to vector<8x128xf32>
    %680 = arith.addf %679, %678 : vector<8x128xf32>
    %681 = arith.divf %679, %680 : vector<8x128xf32>
    %682 = vector.extract_strided_slice %673 {offsets = [0, 128], sizes = [8, 128], strides = [1, 1]} : vector<8x384xf32> to vector<8x128xf32>
    %683 = vector.extract_strided_slice %632 {offsets = [0, 128], sizes = [8, 128], strides = [1, 1]} : vector<8x384xf32> to vector<8x128xf32>
    %684 = arith.addf %682, %683 : vector<8x128xf32>
    %685 = arith.negf %684 : vector<8x128xf32>
    %686 = math.exp %685 : vector<8x128xf32>
    %cst_270 = arith.constant 1.000000e+00 : f32
    %687 = vector.broadcast %cst_270 : f32 to vector<8x128xf32>
    %688 = arith.addf %687, %686 : vector<8x128xf32>
    %689 = arith.divf %687, %688 : vector<8x128xf32>
    %690 = vector.extract_strided_slice %673 {offsets = [0, 256], sizes = [8, 128], strides = [1, 1]} : vector<8x384xf32> to vector<8x128xf32>
    %691 = vector.extract_strided_slice %632 {offsets = [0, 256], sizes = [8, 128], strides = [1, 1]} : vector<8x384xf32> to vector<8x128xf32>
    %692 = arith.mulf %681, %691 : vector<8x128xf32>
    %693 = arith.addf %690, %692 : vector<8x128xf32>
    %694 = math.tanh %693 : vector<8x128xf32>
    %cst_271 = arith.constant 1.000000e+00 : f32
    %695 = vector.broadcast %cst_271 : f32 to vector<8x128xf32>
    %696 = arith.subf %695, %689 : vector<8x128xf32>
    %697 = arith.mulf %696, %694 : vector<8x128xf32>
    %698 = arith.mulf %689, %575 : vector<8x128xf32>
    %699 = arith.addf %697, %698 : vector<8x128xf32>
    %c0_272 = arith.constant 0 : index
    %c0_273 = arith.constant 0 : index
    %700 = vector.load %arg7[%c0_272, %c0_273] : memref<128x128xf32, #tpu.memory_space<vmem>>, vector<128x128xf32>
    %cst_274 = arith.constant dense<0.000000e+00> : vector<8x128xf32>
    %701 = tpu.matmul %699, %700, %cst_274 {dimension_numbers = #tpu.dot_dimension_numbers<[1], [0], [0], [1], [0, 0, 1, 1], [], []>} : vector<8x128xf32>, vector<128x128xf32>, vector<8x128xf32> -> vector<8x128xf32>
    %702 = vector.broadcast %4 : vector<1x128xf32> to vector<8x128xf32>
    %703 = arith.addf %701, %702 : vector<8x128xf32>
    %cst_275 = arith.constant dense<0xFF800000> : vector<8xf32>
    %704 = vector.multi_reduction <maximumf>, %703, %cst_275 [1] : vector<8x128xf32> to vector<8xf32>
    %705 = vector.shape_cast %704 : vector<8xf32> to vector<8x1xf32>
    %706 = vector.broadcast %705 : vector<8x1xf32> to vector<8x128xf32>
    %707 = arith.subf %703, %706 : vector<8x128xf32>
    %708 = math.exp %707 : vector<8x128xf32>
    %cst_276 = arith.constant dense<0.000000e+00> : vector<8xf32>
    %709 = vector.multi_reduction <add>, %708, %cst_276 [1] : vector<8x128xf32> to vector<8xf32>
    %710 = vector.shape_cast %709 : vector<8xf32> to vector<8x1xf32>
    %711 = math.log %710 : vector<8x1xf32>
    %712 = arith.addf %705, %711 : vector<8x1xf32>
    %713 = vector.broadcast %712 : vector<8x1xf32> to vector<8x128xf32>
    %714 = arith.subf %703, %713 : vector<8x128xf32>
    %c2_i32_277 = arith.constant 2 : i32
    %c0_i32_278 = arith.constant 0 : i32
    %715 = arith.cmpi eq, %c2_i32_277, %c0_i32_278 : i32
    %c1_i32_279 = arith.constant 1 : i32
    %716 = arith.select %715, %c1_i32_279, %c2_i32_277 : i32
    %717 = arith.remsi %c5_i32, %716 : i32
    %c0_i32_280 = arith.constant 0 : i32
    %718 = arith.cmpi ne, %717, %c0_i32_280 : i32
    %c0_i32_281 = arith.constant 0 : i32
    %719 = arith.cmpi slt, %717, %c0_i32_281 : i32
    %c0_i32_282 = arith.constant 0 : i32
    %720 = arith.cmpi slt, %716, %c0_i32_282 : i32
    %721 = arith.xori %719, %720 : i1
    %722 = arith.andi %721, %718 : i1
    %723 = arith.addi %717, %716 : i32
    %724 = arith.select %722, %723, %717 : i32
    %c2_i32_283 = arith.constant 2 : i32
    %725 = arith.cmpi sge, %c5_i32, %c2_i32_283 : i32
    %726 = arith.extui %725 : i1 to i32
    %c0_i32_284 = arith.constant 0 : i32
    %727 = arith.cmpi ne, %726, %c0_i32_284 : i32
    scf.if %727 {
      %c0_i32_312 = arith.constant 0 : i32
      %c0_i32_313 = arith.constant 0 : i32
      %c0_i32_314 = arith.constant 0 : i32
      %764 = tpu.memref_slice %arg13[%724, %c0_i32_313, %c0_i32_314] : memref<2x8x128xf32, #tpu.memory_space<vmem>> -> memref<1x8x128xf32, #tpu.memory_space<vmem>>
      %765 = tpu.memref_squeeze %764 : memref<1x8x128xf32, #tpu.memory_space<vmem>> -> memref<8x128xf32, #tpu.memory_space<vmem>>
      %c0_i32_315 = arith.constant 0 : i32
      %c0_i32_316 = arith.constant 0 : i32
      %766 = tpu.memref_slice %arg11[%c0_i32_312, %c0_i32_315, %c0_i32_316] : memref<6x8x128xf32, #tpu.memory_space<any>> -> memref<1x8x128xf32, #tpu.memory_space<any>>
      %767 = tpu.memref_squeeze %766 : memref<1x8x128xf32, #tpu.memory_space<any>> -> memref<8x128xf32, #tpu.memory_space<any>>
      %768 = tpu.memref_slice %arg14[%724] : memref<2x!tpu.dma_semaphore, #tpu.memory_space<semaphore_mem>> -> memref<1x!tpu.dma_semaphore, #tpu.memory_space<semaphore_mem>>
      %769 = tpu.memref_squeeze %768 : memref<1x!tpu.dma_semaphore, #tpu.memory_space<semaphore_mem>> -> memref<!tpu.dma_semaphore, #tpu.memory_space<semaphore_mem>>
      tpu.wait_dma2 semaphore(%769 : memref<!tpu.dma_semaphore, #tpu.memory_space<semaphore_mem>>) src(%765 : memref<8x128xf32, #tpu.memory_space<vmem>>) dst(%767 : memref<8x128xf32, #tpu.memory_space<any>>)
    } else {
    }
    %728 = arith.index_cast %724 : i32 to index
    %c0_285 = arith.constant 0 : index
    %c0_286 = arith.constant 0 : index
    %729 = vector.load %arg13[%728, %c0_285, %c0_286] : memref<2x8x128xf32, #tpu.memory_space<vmem>>, vector<1x8x128xf32>
    %730 = vector.shape_cast %729 : vector<1x8x128xf32> to vector<8x128xf32>
    %731 = vector.shape_cast %714 : vector<8x128xf32> to vector<1x8x128xf32>
    tpu.vector_store %arg13[%728, %c0_285, %c0_286], %731 {strides = array<i32>} : memref<2x8x128xf32, #tpu.memory_space<vmem>>, vector<1x8x128xf32>,
    %c0_i32_287 = arith.constant 0 : i32
    %c0_i32_288 = arith.constant 0 : i32
    %732 = tpu.memref_slice %arg13[%724, %c0_i32_287, %c0_i32_288] : memref<2x8x128xf32, #tpu.memory_space<vmem>> -> memref<1x8x128xf32, #tpu.memory_space<vmem>>
    %733 = tpu.memref_squeeze %732 : memref<1x8x128xf32, #tpu.memory_space<vmem>> -> memref<8x128xf32, #tpu.memory_space<vmem>>
    %c0_i32_289 = arith.constant 0 : i32
    %c0_i32_290 = arith.constant 0 : i32
    %734 = tpu.memref_slice %arg11[%c5_i32, %c0_i32_289, %c0_i32_290] : memref<6x8x128xf32, #tpu.memory_space<any>> -> memref<1x8x128xf32, #tpu.memory_space<any>>
    %735 = tpu.memref_squeeze %734 : memref<1x8x128xf32, #tpu.memory_space<any>> -> memref<8x128xf32, #tpu.memory_space<any>>
    %736 = tpu.memref_slice %arg14[%724] : memref<2x!tpu.dma_semaphore, #tpu.memory_space<semaphore_mem>> -> memref<1x!tpu.dma_semaphore, #tpu.memory_space<semaphore_mem>>
    %737 = tpu.memref_squeeze %736 : memref<1x!tpu.dma_semaphore, #tpu.memory_space<semaphore_mem>> -> memref<!tpu.dma_semaphore, #tpu.memory_space<semaphore_mem>>
    tpu.enqueue_dma source(%733 : memref<8x128xf32, #tpu.memory_space<vmem>>) target(%735 : memref<8x128xf32, #tpu.memory_space<any>>) target_semaphore(%737 : memref<!tpu.dma_semaphore, #tpu.memory_space<semaphore_mem>>)
    %738 = tpu.iota {dimensions = array<i32: 1>} : vector<8x128xi32>
    %739 = vector.broadcast %705 : vector<8x1xf32> to vector<8x128xf32>
    %740 = arith.cmpf oge, %703, %739 : vector<8x128xf32>
    %c128_i32_291 = arith.constant 128 : i32
    %741 = vector.broadcast %c128_i32_291 : i32 to vector<8x128xi32>
    %742 = arith.select %740, %738, %741 : vector<8x128xi1>, vector<8x128xi32>
    %cst_292 = arith.constant dense<2147483647> : vector<8xi32>
    %743 = vector.multi_reduction <minsi>, %742, %cst_292 [1] : vector<8x128xi32> to vector<8xi32>
    %744 = vector.shape_cast %743 : vector<8xi32> to vector<8x1xi32>
    %745 = vector.broadcast %744 : vector<8x1xi32> to vector<8x128xi32>
    %746 = arith.cmpi eq, %738, %745 : vector<8x128xi32>
    %747 = arith.extui %746 : vector<8x128xi1> to vector<8x128xi32>
    %748 = arith.sitofp %747 : vector<8x128xi32> to vector<8x128xf32>
    %c0_293 = arith.constant 0 : index
    %c0_294 = arith.constant 0 : index
    %749 = vector.load %arg9[%c0_293, %c0_294] : memref<128x384xf32, #tpu.memory_space<vmem>>, vector<128x384xf32>
    %cst_295 = arith.constant dense<0.000000e+00> : vector<8x384xf32>
    %750 = tpu.matmul %748, %749, %cst_295 {dimension_numbers = #tpu.dot_dimension_numbers<[1], [0], [0], [1], [0, 0, 1, 1], [], []>} : vector<8x128xf32>, vector<128x384xf32>, vector<8x384xf32> -> vector<8x384xf32>
    %c6_i32 = arith.constant 6 : i32
    %c0_296 = arith.constant 0 : index
    %c0_297 = arith.constant 0 : index
    %751 = vector.load %arg12[%c0_296, %c0_297] : memref<8x128xf32, #tpu.memory_space<vmem>>, vector<8x128xf32>
    tpu.vector_store %arg12[%c0_296, %c0_297], %699 {strides = array<i32>} : memref<8x128xf32, #tpu.memory_space<vmem>>, vector<8x128xf32>,
    %c0_i32_298 = arith.constant 0 : i32
    %c4_i32_299 = arith.constant 4 : i32
    %c0_i32_300 = arith.constant 0 : i32
    %c0_i32_301 = arith.constant 0 : i32
    %c0_i32_302 = arith.constant 0 : i32
    %752 = tpu.memref_slice %arg13[%c0_i32_298, %c0_i32_301, %c0_i32_302] : memref<2x8x128xf32, #tpu.memory_space<vmem>> -> memref<1x8x128xf32, #tpu.memory_space<vmem>>
    %753 = tpu.memref_squeeze %752 : memref<1x8x128xf32, #tpu.memory_space<vmem>> -> memref<8x128xf32, #tpu.memory_space<vmem>>
    %c0_i32_303 = arith.constant 0 : i32
    %c0_i32_304 = arith.constant 0 : i32
    %754 = tpu.memref_slice %arg11[%c4_i32_299, %c0_i32_303, %c0_i32_304] : memref<6x8x128xf32, #tpu.memory_space<any>> -> memref<1x8x128xf32, #tpu.memory_space<any>>
    %755 = tpu.memref_squeeze %754 : memref<1x8x128xf32, #tpu.memory_space<any>> -> memref<8x128xf32, #tpu.memory_space<any>>
    %756 = tpu.memref_slice %arg14[%c0_i32_300] : memref<2x!tpu.dma_semaphore, #tpu.memory_space<semaphore_mem>> -> memref<1x!tpu.dma_semaphore, #tpu.memory_space<semaphore_mem>>
    %757 = tpu.memref_squeeze %756 : memref<1x!tpu.dma_semaphore, #tpu.memory_space<semaphore_mem>> -> memref<!tpu.dma_semaphore, #tpu.memory_space<semaphore_mem>>
    tpu.wait_dma2 semaphore(%757 : memref<!tpu.dma_semaphore, #tpu.memory_space<semaphore_mem>>) src(%753 : memref<8x128xf32, #tpu.memory_space<vmem>>) dst(%755 : memref<8x128xf32, #tpu.memory_space<any>>)
    %c1_i32_305 = arith.constant 1 : i32
    %c5_i32_306 = arith.constant 5 : i32
    %c1_i32_307 = arith.constant 1 : i32
    %c0_i32_308 = arith.constant 0 : i32
    %c0_i32_309 = arith.constant 0 : i32
    %758 = tpu.memref_slice %arg13[%c1_i32_305, %c0_i32_308, %c0_i32_309] : memref<2x8x128xf32, #tpu.memory_space<vmem>> -> memref<1x8x128xf32, #tpu.memory_space<vmem>>
    %759 = tpu.memref_squeeze %758 : memref<1x8x128xf32, #tpu.memory_space<vmem>> -> memref<8x128xf32, #tpu.memory_space<vmem>>
    %c0_i32_310 = arith.constant 0 : i32
    %c0_i32_311 = arith.constant 0 : i32
    %760 = tpu.memref_slice %arg11[%c5_i32_306, %c0_i32_310, %c0_i32_311] : memref<6x8x128xf32, #tpu.memory_space<any>> -> memref<1x8x128xf32, #tpu.memory_space<any>>
    %761 = tpu.memref_squeeze %760 : memref<1x8x128xf32, #tpu.memory_space<any>> -> memref<8x128xf32, #tpu.memory_space<any>>
    %762 = tpu.memref_slice %arg14[%c1_i32_307] : memref<2x!tpu.dma_semaphore, #tpu.memory_space<semaphore_mem>> -> memref<1x!tpu.dma_semaphore, #tpu.memory_space<semaphore_mem>>
    %763 = tpu.memref_squeeze %762 : memref<1x!tpu.dma_semaphore, #tpu.memory_space<semaphore_mem>> -> memref<!tpu.dma_semaphore, #tpu.memory_space<semaphore_mem>>
    tpu.wait_dma2 semaphore(%763 : memref<!tpu.dma_semaphore, #tpu.memory_space<semaphore_mem>>) src(%759 : memref<8x128xf32, #tpu.memory_space<vmem>>) dst(%761 : memref<8x128xf32, #tpu.memory_space<any>>)
    return
  }
}

</mosaic_0001>

<bundles_post_ra>
// kernel: decoder_forward.1
= control target key start
LH: loop header
LB: loop body
LE: loop exit
PB: predicated region body
PF: predicated region fallthrough
CT: control target
= control target key end

     0   :  { %v9567_v3 = vmov 0.0   ;;  %v254_v49 = vlaneseq  ;;  %v9568_v50 = vmov 1966171168   ;;  %vm458_vm0 = vcmask 1041409   ;;  %s14014_s3 = inlined_call_operand.vmem [shape: f32[128,512], index: 3, kind: input, shape index: {}]   ;;  %s14015_s9 = inlined_call_operand.vmem [shape: f32[128,384], index: 9, kind: input, shape index: {}]   ;;  %s14016_s12 = inlined_call_operand.vmem [shape: f32[8,128], index: 12, kind: output, shape index: {1}]   ;;  %s14017_s1 = inlined_call_operand.vmem [shape: f32[1,8,8,128], index: 1, kind: input, shape index: {}]   ;;  %s14018_s2 = inlined_call_operand.vmem [shape: f32[1,128], index: 2, kind: input, shape index: {}]   ;;  %s14019_s5 = inlined_call_operand.vmem [shape: f32[128,384], index: 5, kind: input, shape index: {}]   ;;  %s14020_s0 = inlined_call_operand.vmem [shape: f32[1,8,8,128], index: 0, kind: input, shape index: {}]   ;;  %s14021_s7 = inlined_call_operand.vmem [shape: f32[128,128], index: 7, kind: input, shape index: {}]   ;;  %s14022_s4 = inlined_call_operand.vmem [shape: f32[1,384], index: 4, kind: input, shape index: {}]   ;;  %s14023_s6 = inlined_call_operand.vmem [shape: f32[1,384], index: 6, kind: input, shape index: {}]   ;;  %s14024_s10 = inlined_call_operand.vmem [shape: f32[8,384], index: 10, kind: input, shape index: {}]   ;;  %s14025_s8 = inlined_call_operand.vmem [shape: f32[1,128], index: 8, kind: input, shape index: {}]   ;;  %s14026_s11 = inlined_call_operand.vmem [shape: f32[6,8,128], index: 11, kind: output, shape index: {0}]  }
   0x1   :  { %v48_v0 = vld [vmem:[%s14014_s3 + $0x8] sm:$0xff]  ;;  %v47_v2 = vld [vmem:[%s14014_s3] sm:$0xff]  ;;  %175 = vmatprep.mubr.f32.mxu0 %v9567_v3  ;;  %246 = vmatprep.mubr.f32.mxu1 %v9567_v3  ;;  %v275_v51 = vunpack.c.l.s4 %v9568_v50  ;;  %vm460_vm1 = vcmask 1042434   ;;  %vm462_vm2 = vcmask 1043459   ;;  %vm464_vm3 = vcmask 1044484  }
   0x2   :  { %v52_v1 = vld [vmem:[%s14014_s3 + $0x28] sm:$0xff]  ;;  %v51_v5 = vld [vmem:[%s14014_s3 + $0x20] sm:$0xff]  ;;  %v9739_v52 = vshrl.u32 %v254_v49, 7  ;;  %v9801_v50 = vand.u32 127, %v254_v49  ;;  %vm466_vm4 = vcmask 1045509   ;;  %vm468_vm5 = vcmask 1046534  }
   0x3   :  { %v8083_v4 = vpack.c.bf16 %v52_v1, %v48_v0  ;;  %v56_v6 = vld [vmem:[%s14014_s3 + $0x48] sm:$0xff]  ;;  %v8085_v8 = vpack.c.bf16 %v51_v5, %v47_v2  ;;  %v55_v10 = vld [vmem:[%s14014_s3 + $0x40] sm:$0xff]  ;;  %v276_v53 = vunpack.c.0.s8 %v275_v51  ;;  %vm470_vm6 = vcmask 1047559  }
   0x4   :  { %v60_v7 = vld [vmem:[%s14014_s3 + $0x68] sm:$0xff]  ;;  %v59_v11 = vld [vmem:[%s14014_s3 + $0x60] sm:$0xff]  ;;  %v9750_v62 = vsub.s32 0, %v9739_v52  ;;  %vm473_vm7 = vcmask 64512   ;;  %vm9571_vm8 = vmmov 0  }
   0x5   :  { %v8087_v9 = vpack.c.bf16 %v60_v7, %v56_v6  ;;  %v64_v12 = vld [vmem:[%s14014_s3 + $0x88] sm:$0xff]  ;;  %8084 = vmatprep.subr.bf16.mxu0 %v8083_v4  ;;  %v8089_v14 = vpack.c.bf16 %v59_v11, %v55_v10  ;;  %v63_v16 = vld [vmem:[%s14014_s3 + $0x80] sm:$0xff]  ;;  %v9742_v54 = vsub.s32 %v276_v53, %v9739_v52  ;;  %v9805_v53 = vsub.s32 %v9801_v50, %v9739_v52 }
   0x6   :  { %v68_v13 = vld [vmem:[%s14014_s3 + $0xa8] sm:$0xff]  ;;  %8086 = vmatpush1.bf16.msra.mxu0 %v8085_v8  ;;  %v67_v17 = vld [vmem:[%s14014_s3 + $0xa0] sm:$0xff] }
   0x7   :  { %8088 = vmatprep.subr.bf16.mxu0 %v8087_v9  ;;  %v8091_v15 = vpack.c.bf16 %v68_v13, %v64_v12  ;;  %v72_v18 = vld [vmem:[%s14014_s3 + $0xc8] sm:$0xff]  ;;  %v8093_v20 = vpack.c.bf16 %v67_v17, %v63_v16  ;;  %v71_v22 = vld [vmem:[%s14014_s3 + $0xc0] sm:$0xff]  ;;  %v324_v9 = vld [vmem:[%s14017_s1 + $0x10] sm:$0xff] }
   0x8   :  { %v76_v19 = vld [vmem:[%s14014_s3 + $0xe8] sm:$0xff]  ;;  %v75_v23 = vld [vmem:[%s14014_s3 + $0xe0] sm:$0xff]  ;;  %v325_v12 = vld [vmem:[%s14017_s1 + $0x18] sm:$0xff] }
   0x9   :  { %v8095_v21 = vpack.c.bf16 %v76_v19, %v72_v18  ;;  %v80_v24 = vld [vmem:[%s14014_s3 + $0x108] sm:$0xff]  ;;  %v8097_v26 = vpack.c.bf16 %v75_v23, %v71_v22  ;;  %v79_v28 = vld [vmem:[%s14014_s3 + $0x100] sm:$0xff] }
   0xa   :  { %8090 = vmatpush1.bf16.msra.mxu0 %v8089_v14  ;;  %v84_v25 = vld [vmem:[%s14014_s3 + $0x128] sm:$0xff]  ;;  %v83_v29 = vld [vmem:[%s14014_s3 + $0x120] sm:$0xff] }
   0xb   :  { %8092 = vmatprep.subr.bf16.mxu0 %v8091_v15  ;;  %v8099_v27 = vpack.c.bf16 %v84_v25, %v80_v24  ;;  %v88_v30 = vld [vmem:[%s14014_s3 + $0x148] sm:$0xff]  ;;  %v8101_v32 = vpack.c.bf16 %v83_v29, %v79_v28  ;;  %v87_v34 = vld [vmem:[%s14014_s3 + $0x140] sm:$0xff] }
   0xc   :  { %v92_v31 = vld [vmem:[%s14014_s3 + $0x168] sm:$0xff]  ;;  %v91_v35 = vld [vmem:[%s14014_s3 + $0x160] sm:$0xff] }
   0xd   :  { %v8103_v33 = vpack.c.bf16 %v92_v31, %v88_v30  ;;  %v96_v36 = vld [vmem:[%s14014_s3 + $0x188] sm:$0xff]  ;;  %v8105_v38 = vpack.c.bf16 %v91_v35, %v87_v34  ;;  %v95_v40 = vld [vmem:[%s14014_s3 + $0x180] sm:$0xff]  ;;  %v329_v30 = vld [vmem:[%s14017_s1 + $0x38] sm:$0xff] }
   0xe   :  { %8094 = vmatpush1.bf16.msra.mxu0 %v8093_v20  ;;  %v100_v37 = vld [vmem:[%s14014_s3 + $0x1a8] sm:$0xff]  ;;  %v99_v41 = vld [vmem:[%s14014_s3 + $0x1a0] sm:$0xff] }
   0xf   :  { %8096 = vmatprep.subr.bf16.mxu0 %v8095_v21  ;;  %v8107_v39 = vpack.c.bf16 %v100_v37, %v96_v36  ;;  %v104_v42 = vld [vmem:[%s14014_s3 + $0x1c8] sm:$0xff]  ;;  %v8109_v44 = vpack.c.bf16 %v99_v41, %v95_v40  ;;  %v103_v46 = vld [vmem:[%s14014_s3 + $0x1c0] sm:$0xff] }
  0x10   :  { %v108_v43 = vld [vmem:[%s14014_s3 + $0x1e8] sm:$0xff]  ;;  %v107_v47 = vld [vmem:[%s14014_s3 + $0x1e0] sm:$0xff] }
  0x11   :  { %v8111_v45 = vpack.c.bf16 %v108_v43, %v104_v42  ;;  %v8113_v48 = vpack.c.bf16 %v107_v47, %v103_v46  ;;  %v322_v4 = vld [vmem:[%s14017_s1] sm:$0xff]  ;;  %v323_v8 = vld [vmem:[%s14017_s1 + $0x8] sm:$0xff] }
  0x12   :  { %8098 = vmatpush1.bf16.msra.mxu0 %v8097_v26  ;;  %v326_v16 = vld [vmem:[%s14017_s1 + $0x20] sm:$0xff]  ;;  %v327_v23 = vld [vmem:[%s14017_s1 + $0x28] sm:$0xff]  ;;  %v328_v26 = vld [vmem:[%s14017_s1 + $0x30] sm:$0xff] }
  0x13   :  { %8100 = vmatprep.subr.bf16.mxu0 %v8099_v27  ;;  %v9790_v31 = vld [vmem:[%s14018_s2] ss:$0 sm:$0xff] }
  0x16   :  { %8102 = vmatpush1.bf16.msra.mxu0 %v8101_v32 }
  0x17   :  { %8104 = vmatprep.subr.bf16.mxu0 %v8103_v33 }
  0x1a   :  { %8106 = vmatpush1.bf16.msra.mxu0 %v8105_v38 }
  0x1b   :  { %8108 = vmatprep.subr.bf16.mxu0 %v8107_v39 }
  0x1e   :  { %8110 = vmatpush1.bf16.msra.mxu0 %v8109_v44 }
  0x1f   :  { %8112 = vmatprep.subr.bf16.mxu0 %v8111_v45 }
  0x22   :  { %8114 = vmatpush1.bf16.msra.mxu0 %v8113_v48 }
  0x25   :  { %176 = vmatmul.mubr.f32.vlgmr.msra.gmra.mrb[0].mxu0 %v9567_v3 }
  0x26   :  { %826 = vmatprep.mubr.f32.mxu0 %v9567_v3 }
  0xf8   :  { %v177_v55 = vpop.f32.mrb[0].mxu0 }
  0xf9   :  { %v273_v56 = vcombine.high %v177_v55, %v177_v55  ;;  %v280_v57 = vrot.slane %v177_v55, %v9742_v54  ;;  %v9745_v58 = vpop.f32.mrb[1].mxu0 }
  0xfb   :  { %v287_v59 = vrot.slane %v273_v56, %v9742_v54  ;;  %v288_v60 = vcombine.high %v280_v57, %v280_v57  ;;  %v296_v61 = vrot.slane %v280_v57, %v9742_v54 }
  0xfd   :  { %v289_v63 = vcombine.high %v287_v59, %v287_v59  ;;  %v303_v0 = vrot.slane %v287_v59, %v9742_v54  ;;  %v310_v1 = vrot.slane %v288_v60, %v9742_v54  ;;  %v318_v2 = vcombine.high %v296_v61, %v296_v61 }
  0xfe   :  { %v333_v5 = vrot.slane %v296_v61, %v9750_v62 }
  0xff   :  { %v317_v6 = vrot.slane %v289_v63, %v9742_v54  ;;  %v320_v7 = vcombine.high %v310_v1, %v310_v1  ;;  %v337_v10 = vrot.slane %v310_v1, %v9750_v62  ;;  %v319_v11 = vcombine.high %v303_v0, %v303_v0 }
 0x100   :  { %v341_v13 = vrot.slane %v318_v2, %v9750_v62  ;;  %v349_v14 = vrot.slane %v303_v0, %v9750_v62  ;;  %v370_v15 = vadd.f32 %v333_v5, %v322_v4 }
 0x101   :  { %v345_v17 = vrot.slane %v320_v7, %v9750_v62  ;;  %v371_v18 = vadd.f32 %v337_v10, %v323_v8  ;;  %v321_v20 = vcombine.high %v317_v6, %v317_v6  ;;  %v353_v21 = vrot.slane %v317_v6, %v9750_v62 }
 0x102   :  { %v372_v19 = vadd.f32 %v341_v13, %v324_v9  ;;  %9245 = vtanh.f32 %v370_v15  ;;  %v357_v24 = vrot.slane %v319_v11, %v9750_v62  ;;  %v374_v25 = vadd.f32 %v349_v14, %v326_v16 }
 0x103   :  { %v373_v22 = vadd.f32 %v345_v17, %v325_v12  ;;  %9247 = vtanh.f32 %v371_v18  ;;  %v361_v27 = vrot.slane %v321_v20, %v9750_v62  ;;  %v375_v28 = vadd.f32 %v353_v21, %v327_v23 }
 0x104   :  { %9249 = vtanh.f32 %v372_v19  ;;  %v376_v29 = vadd.f32 %v357_v24, %v328_v26  ;;  %v9569_v16 = vmov 0   ;;  %v9826_v17 = vsub.s32 1, %v9739_v52 }
 0x105   :  { %9251 = vtanh.f32 %v373_v22  ;;  %v377_v32 = vadd.f32 %v361_v27, %v329_v30  ;;  %9244 = vset.pattern.permute.xlu0 %v9569_v16  ;;  %9243 = vset.pattern.permute.xlu1 %v9569_v16  ;;  %v9829_v18 = vsub.s32 2, %v9739_v52  ;;  %v9834_v21 = vsub.s32 3, %v9739_v52 }
 0x106   :  { %9253 = vtanh.f32 %v374_v25 }
 0x107   :  { %9255 = vtanh.f32 %v375_v28 }
 0x108   :  { %9257 = vtanh.f32 %v376_v29  ;;  %v9845_v29 = vsub.s32 4, %v9739_v52 }
 0x109   :  { %9259 = vtanh.f32 %v377_v32 }
 0x10c   :  { %v9246_v33 = vpop.eup %9245 }
 0x10d   :  { %v392_v34 = vmul.f32 %v9246_v33, %v9790_v31  ;;  %v9248_v35 = vpop.eup %9247  ;;  %v9848_v33 = vsub.s32 5, %v9739_v52 }
 0x10e   :  { %v9250_v36 = vpop.eup %9249  ;;  %v393_v39 = vmul.f32 %v9248_v35, %v9790_v31 }
 0x10f   :  { %400 = vadd.xlane.f32.xlu0 %v392_v34  ;;  %v394_v37 = vmul.f32 %v9250_v36, %v9790_v31  ;;  %v9252_v38 = vpop.eup %9251 }
 0x110   :  { %v9254_v40 = vpop.eup %9253  ;;  %v395_v41 = vmul.f32 %v9252_v38, %v9790_v31 }
 0x111   :  { %404 = vadd.xlane.f32.xlu1 %v394_v37  ;;  %v9256_v42 = vpop.eup %9255  ;;  %v396_v43 = vmul.f32 %v9254_v40, %v9790_v31  ;;  %v9853_v37 = vsub.s32 6, %v9739_v52 }
 0x112   :  { %v9258_v44 = vpop.eup %9257  ;;  %v397_v45 = vmul.f32 %v9256_v42, %v9790_v31 }
 0x113   :  { %402 = vadd.xlane.f32.xlu0 %v393_v39  ;;  %v9260_v46 = vpop.eup %9259  ;;  %v398_v47 = vmul.f32 %v9258_v44, %v9790_v31 }
 0x114   :  { %v399_v48 = vmul.f32 %v9260_v46, %v9790_v31 }
 0x115   :  { %406 = vadd.xlane.f32.xlu1 %v395_v41  ;;  %v9858_v41 = vsub.s32 7, %v9739_v52 }
 0x117   :  { %408 = vadd.xlane.f32.xlu0 %v396_v43 }
 0x119   :  { %410 = vadd.xlane.f32.xlu1 %v397_v45 }
 0x11b   :  { %412 = vadd.xlane.f32.xlu0 %v398_v47 }
 0x11d   :  { %414 = vadd.xlane.f32.xlu1 %v399_v48 }
 0x19c   :  { %v401_v51 = vpop.xlane.xlu0 %400 }
 0x19d   :  { %v429_v57 = vrot.slane %v401_v51, %v9805_v53 }
 0x19e   :  { %v405_v55 = vpop.xlane.xlu1 %404 }
 0x19f   :  { %v437_v60 = vrot.slane %v405_v55, %v9805_v53 }
 0x1a0   :  { %v403_v56 = vpop.xlane.xlu0 %402 }
 0x1a1   :  { %v433_v59 = vrot.slane %v403_v56, %v9805_v53 }
 0x1a2   :  { %v407_v49 = vpop.xlane.xlu1 %406 }
 0x1a3   :  { %v459_v61 = vsel %vm458_vm0, %v433_v59, %v429_v57  ;;  %v441_v63 = vrot.slane %v407_v49, %v9805_v53 }
 0x1a4   :  { %v461_v0 = vsel %vm460_vm1, %v437_v60, %v459_v61  ;;  %v409_v1 = vpop.xlane.xlu0 %408 }
 0x1a5   :  { %v445_v2 = vrot.slane %v409_v1, %v9805_v53  ;;  %v463_v4 = vsel %vm462_vm2, %v441_v63, %v461_v0  ;;  %v50_v0 = vld [vmem:[%s14014_s3 + $0x18] sm:$0xff] }
 0x1a6   :  { %v411_v6 = vpop.xlane.xlu1 %410 }
 0x1a7   :  { %v465_v5 = vsel %vm464_vm3, %v445_v2, %v463_v4  ;;  %v449_v7 = vrot.slane %v411_v6, %v9805_v53  ;;  %v49_v2 = vld [vmem:[%s14014_s3 + $0x10] sm:$0xff] }
 0x1a8   :  { %v413_v8 = vpop.xlane.xlu0 %412 }
 0x1a9   :  { %v453_v9 = vrot.slane %v413_v8, %v9805_v53  ;;  %v467_v10 = vsel %vm466_vm4, %v449_v7, %v465_v5  ;;  %v53_v5 = vld [vmem:[%s14014_s3 + $0x30] sm:$0xff]  ;;  %v62_v7 = vld [vmem:[%s14014_s3 + $0x78] sm:$0xff] }
 0x1aa   :  { %v415_v11 = vpop.xlane.xlu1 %414 }
 0x1ab   :  { %v469_v12 = vsel %vm468_vm5, %v453_v9, %v467_v10  ;;  %v457_v13 = vrot.slane %v415_v11, %v9805_v53  ;;  %v57_v10 = vld [vmem:[%s14014_s3 + $0x50] sm:$0xff] }
 0x1ad   :  { %v471_v14 = vsel %vm470_vm6, %v457_v13, %v469_v12  ;;  %v66_v12 = vld [vmem:[%s14014_s3 + $0x98] sm:$0xff] }
 0x1ae   :  { %v474_v15 = vsel %vm473_vm7, %v471_v14, -inf  ;;  %v70_v13 = vld [vmem:[%s14014_s3 + $0xb8] sm:$0xff] }
 0x1af   :  { %475 = vmax.xlane.f32.xlu0 %v474_v15  ;;  %v8123_v15 = vpack.c.bf16 %v70_v13, %v66_v12  ;;  %v732_v13 = vld [vmem:[%s14019_s5 + $0x90] sm:$0xff] }
 0x23c   :  { %v476_v19 = vpop.xlane.xlu0 %475 }
 0x23d   :  { %v9831_v20 = vmax.f32 %v476_v19, -1e+30  ;;  %v65_v19 = vld [vmem:[%s14014_s3 + $0x90] sm:$0xff] }
 0x23f   :  { %v489_v22 = vrot.slane %v9831_v20, %v9826_v17  ;;  %v485_v23 = vrot.slane %v9831_v20, %v9750_v62  ;;  %v493_v24 = vrot.slane %v9831_v20, %v9829_v18  ;;  %v497_v28 = vrot.slane %v9831_v20, %v9834_v21 }
 0x240   :  { %v501_v36 = vrot.slane %v9831_v20, %v9845_v29  ;;  %v505_v40 = vrot.slane %v9831_v20, %v9848_v33  ;;  %v509_v44 = vrot.slane %v9831_v20, %v9853_v37 }
 0x241   :  { %v523_v25 = vsub.f32 %v403_v56, %v489_v22  ;;  %v522_v26 = vsub.f32 %v401_v51, %v485_v23  ;;  %v524_v27 = vsub.f32 %v405_v55, %v493_v24  ;;  %v525_v35 = vsub.f32 %v407_v49, %v497_v28  ;;  %v69_v22 = vld [vmem:[%s14014_s3 + $0xb0] sm:$0xff]  ;;  %v74_v23 = vld [vmem:[%s14014_s3 + $0xd8] sm:$0xff] }
 0x242   :  { %v526_v39 = vsub.f32 %v409_v1, %v501_v36  ;;  %v527_v43 = vsub.f32 %v411_v6, %v505_v40  ;;  %v528_v48 = vsub.f32 %v413_v8, %v509_v44  ;;  %v513_v51 = vrot.slane %v9831_v20, %v9858_v41  ;;  %v54_v1 = vld [vmem:[%s14014_s3 + $0x38] sm:$0xff]  ;;  %v77_v28 = vld [vmem:[%s14014_s3 + $0xf0] sm:$0xff]  ;;  %v714_v36 = vld [vmem:[%s14019_s5] sm:$0xff] }
 0x243   :  { %v532_v30 = vmul.f32 1.442695, %v523_v25  ;;  %v530_v32 = vmul.f32 1.442695, %v522_v26  ;;  %v534_v34 = vmul.f32 1.442695, %v524_v27  ;;  %v8115_v4 = vpack.c.bf16 %v54_v1, %v50_v0 }
 0x244   :  { %v536_v38 = vmul.f32 1.442695, %v525_v35  ;;  %v538_v42 = vmul.f32 1.442695, %v526_v39  ;;  %v540_v47 = vmul.f32 1.442695, %v527_v43  ;;  %v529_v56 = vsub.f32 %v415_v11, %v513_v51 }
 0x245   :  { %9261 = vpow2.f32 %v532_v30  ;;  %v542_v52 = vmul.f32 1.442695, %v528_v48  ;;  %v58_v6 = vld [vmem:[%s14014_s3 + $0x58] sm:$0xff]  ;;  %v8117_v8 = vpack.c.bf16 %v53_v5, %v49_v2  ;;  %v61_v11 = vld [vmem:[%s14014_s3 + $0x70] sm:$0xff]  ;;  %8116 = vmatprep.subr.bf16.mxu1 %v8115_v4  ;;  %v8125_v25 = vpack.c.bf16 %v69_v22, %v65_v19  ;;  %v718_v35 = vld [vmem:[%s14019_s5 + $0x20] sm:$0xff] }
 0x246   :  { %9263 = vpow2.f32 %v530_v32  ;;  %v544_v59 = vmul.f32 1.442695, %v529_v56  ;;  %v8119_v9 = vpack.c.bf16 %v62_v7, %v58_v6  ;;  %v8121_v14 = vpack.c.bf16 %v61_v11, %v57_v10  ;;  %v78_v24 = vld [vmem:[%s14014_s3 + $0xf8] sm:$0xff]  ;;  %v73_v27 = vld [vmem:[%s14014_s3 + $0xd0] sm:$0xff]  ;;  %v723_v51 = vld [vmem:[%s14019_s5 + $0x48] sm:$0xff] }
 0x247   :  { %9265 = vpow2.f32 %v534_v34  ;;  %8118 = vmatpush1.bf16.msra.mxu1 %v8117_v8  ;;  %v8127_v26 = vpack.c.bf16 %v78_v24, %v74_v23  ;;  %v82_v30 = vld [vmem:[%s14014_s3 + $0x118] sm:$0xff]  ;;  %v715_v34 = vld [vmem:[%s14019_s5 + $0x8] sm:$0xff]  ;;  %v8129_v39 = vpack.c.bf16 %v77_v28, %v73_v27  ;;  %v81_v40 = vld [vmem:[%s14014_s3 + $0x110] sm:$0xff] }
 0x248   :  { %9267 = vpow2.f32 %v536_v38  ;;  %8120 = vmatprep.subr.bf16.mxu1 %v8119_v9  ;;  %v86_v32 = vld [vmem:[%s14014_s3 + $0x138] sm:$0xff]  ;;  %v8147_v43 = vpack.c.bf16 %v718_v35, %v715_v34  ;;  %v720_v48 = vld [vmem:[%s14019_s5 + $0x30] sm:$0xff]  ;;  %v726_v0 = vld [vmem:[%s14019_s5 + $0x60] sm:$0xff] }
 0x249   :  { %9269 = vpow2.f32 %v538_v42  ;;  %v717_v38 = vld [vmem:[%s14019_s5 + $0x18] sm:$0xff]  ;;  %v85_v42 = vld [vmem:[%s14014_s3 + $0x130] sm:$0xff]  ;;  %v739_v22 = vld [vmem:[%s14019_s5 + $0xc8] sm:$0xff] }
 0x24a   :  { %9271 = vpow2.f32 %v540_v47  ;;  %v8149_v44 = vpack.c.bf16 %v717_v38, %v714_v36  ;;  %v724_v47 = vld [vmem:[%s14019_s5 + $0x50] sm:$0xff]  ;;  %8148 = vmatprep.subr.bf16.mxu0 %v8147_v43  ;;  %v729_v1 = vld [vmem:[%s14019_s5 + $0x78] sm:$0xff]  ;;  %v742_v23 = vld [vmem:[%s14019_s5 + $0xe0] sm:$0xff] }
 0x24b   :  { %9273 = vpow2.f32 %v542_v52  ;;  %8122 = vmatpush1.bf16.msra.mxu1 %v8121_v14  ;;  %v94_v52 = vld [vmem:[%s14014_s3 + $0x178] sm:$0xff]  ;;  %v93_v4 = vld [vmem:[%s14014_s3 + $0x170] sm:$0xff]  ;;  %v8157_v9 = vpack.c.bf16 %v729_v1, %v726_v0  ;;  %v735_v14 = vld [vmem:[%s14019_s5 + $0xa8] sm:$0xff]  ;;  %v8163_v28 = vpack.c.bf16 %v742_v23, %v739_v22 }
 0x24c   :  { %9275 = vpow2.f32 %v544_v59  ;;  %8124 = vmatprep.subr.bf16.mxu1 %v8123_v15  ;;  %8150 = vmatpush1.bf16.msra.mxu0 %v8149_v44  ;;  %v8153_v59 = vpack.c.bf16 %v723_v51, %v720_v48  ;;  %v733_v5 = vld [vmem:[%s14019_s5 + $0x98] sm:$0xff]  ;;  %v736_v6 = vld [vmem:[%s14019_s5 + $0xb0] sm:$0xff]  ;;  %v719_v38 = vld [vmem:[%s14019_s5 + $0x28] sm:$0xff] }
 0x24d   :  { %v98_v7 = vld [vmem:[%s14014_s3 + $0x198] sm:$0xff]  ;;  %v97_v11 = vld [vmem:[%s14014_s3 + $0x190] sm:$0xff]  ;;  %v8159_v12 = vpack.c.bf16 %v736_v6, %v733_v5  ;;  %v734_v48 = vld [vmem:[%s14019_s5 + $0xa0] sm:$0xff] }
 0x24e   :  { %v102_v8 = vld [vmem:[%s14014_s3 + $0x1b8] sm:$0xff]  ;;  %v101_v19 = vld [vmem:[%s14014_s3 + $0x1b0] sm:$0xff] }
 0x24f   :  { %v9262_v45 = vpop.eup %9261  ;;  %8126 = vmatpush1.bf16.msra.mxu1 %v8125_v25  ;;  %v8139_v15 = vpack.c.bf16 %v102_v8, %v98_v7  ;;  %v106_v24 = vld [vmem:[%s14014_s3 + $0x1d8] sm:$0xff]  ;;  %v8141_v27 = vpack.c.bf16 %v101_v19, %v97_v11  ;;  %v109_v34 = vld [vmem:[%s14014_s3 + $0x1f0] sm:$0xff] }
 0x250   :  { %v9264_v46 = vpop.eup %9263  ;;  %559 = vperm.xlu0 %9244, %v9262_v45   ;;  %v721_v45 = vld [vmem:[%s14019_s5 + $0x38] sm:$0xff]  ;;  %8128 = vmatprep.subr.bf16.mxu1 %v8127_v26  ;;  %v8161_v26 = vpack.c.bf16 %v735_v14, %v732_v13  ;;  %v716_v36 = vld [vmem:[%s14019_s5 + $0x10] sm:$0xff] }
 0x251   :  { %556 = vperm.xlu1 %9243, %v9264_v46   ;;  %v9266_v55 = vpop.eup %9265  ;;  %v8131_v46 = vpack.c.bf16 %v86_v32, %v82_v30  ;;  %v8151_v56 = vpack.c.bf16 %v724_v47, %v721_v45  ;;  %v110_v25 = vld [vmem:[%s14014_s3 + $0x1f8] sm:$0xff]  ;;  %v105_v32 = vld [vmem:[%s14014_s3 + $0x1d0] sm:$0xff] }
 0x252   :  { %v9268_v57 = vpop.eup %9267  ;;  %v8143_v30 = vpack.c.bf16 %v110_v25, %v106_v24  ;;  %v8145_v35 = vpack.c.bf16 %v109_v34, %v105_v32  ;;  %v725_v43 = vld [vmem:[%s14019_s5 + $0x58] sm:$0xff]  ;;  %v728_v45 = vld [vmem:[%s14019_s5 + $0x70] sm:$0xff]  ;;  %v627_v24 = vld [vmem:[%s14020_s0 + $0x20] sm:$0xff] }
 0x253   :  { %v9270_v60 = vpop.eup %9269  ;;  %8130 = vmatpush1.bf16.msra.mxu1 %v8129_v39  ;;  %8152 = vmatprep.subr.bf16.mxu0 %v8151_v56  ;;  %v8180_v39 = vpack.c.bf16 %v719_v38, %v716_v36  ;;  %v737_v51 = vld [vmem:[%s14019_s5 + $0xb8] sm:$0xff]  ;;  %v623_v56 = vld [vmem:[%s14020_s0] sm:$0xff]  ;;  %v628_v34 = vld [vmem:[%s14020_s0 + $0x28] sm:$0xff] }
 0x254   :  { %v9272_v61 = vpop.eup %9271  ;;  %8132 = vmatprep.subr.bf16.mxu1 %v8131_v46  ;;  %8154 = vmatpush1.bf16.msra.mxu0 %v8153_v59  ;;  %v731_v46 = vld [vmem:[%s14019_s5 + $0x88] sm:$0xff]  ;;  %v626_v7 = vld [vmem:[%s14020_s0 + $0x18] sm:$0xff] }
 0x255   :  { %562 = vperm.xlu1 %9243, %v9266_v55   ;;  %v9274_v49 = vpop.eup %9273  ;;  %v90_v55 = vld [vmem:[%s14014_s3 + $0x158] sm:$0xff]  ;;  %v8186_v47 = vpack.c.bf16 %v731_v46, %v728_v45 }
 0x256   :  { %v9276_v63 = vpop.eup %9275  ;;  %v8135_v2 = vpack.c.bf16 %v94_v52, %v90_v55  ;;  %v8189_v55 = vpack.c.bf16 %v737_v51, %v734_v48  ;;  %v624_v52 = vld [vmem:[%s14020_s0 + $0x8] sm:$0xff] }
 0x259   :  { %565 = vperm.xlu1 %9243, %v9268_v57   ;;  %v727_v57 = vld [vmem:[%s14019_s5 + $0x68] sm:$0xff] }
 0x25d   :  { %568 = vperm.xlu1 %9243, %v9270_v60   ;;  %v730_v60 = vld [vmem:[%s14019_s5 + $0x80] sm:$0xff] }
 0x261   :  { %571 = vperm.xlu1 %9243, %v9272_v61   ;;  %v8133_v61 = vpack.c.bf16 %v85_v42, %v81_v40  ;;  %v9570_v40 = vmov 0.0|0.0   ;;  %v722_v42 = vld [vmem:[%s14019_s5 + $0x40] sm:$0xff] }
 0x262   :  { %v8183_v44 = vpack.c.bf16 %v725_v43, %v722_v42 }
 0x263   :  { %8134 = vmatpush1.bf16.msra.mxu1 %v8133_v61 }
 0x264   :  { %8136 = vmatprep.subr.bf16.mxu1 %v8135_v2 }
 0x265   :  { %574 = vperm.xlu1 %9243, %v9274_v49   ;;  %v89_v49 = vld [vmem:[%s14014_s3 + $0x150] sm:$0xff] }
 0x266   :  { %v8137_v10 = vpack.c.bf16 %v93_v4, %v89_v49 }
 0x268   :  { %8138 = vmatpush1.bf16.msra.mxu1 %v8137_v10 }
 0x269   :  { %577 = vperm.xlu1 %9243, %v9276_v63   ;;  %v8155_v63 = vpack.c.bf16 %v730_v60, %v727_v57  ;;  %8140 = vmatprep.subr.bf16.mxu1 %v8139_v15 }
 0x26b   :  { %8156 = vmatprep.subr.bf16.mxu0 %v8155_v63  ;;  %v625_v63 = vld [vmem:[%s14020_s0 + $0x10] sm:$0xff] }
 0x26c   :  { %8158 = vmatpush1.bf16.msra.mxu0 %v8157_v9  ;;  %8142 = vmatpush1.bf16.msra.mxu1 %v8141_v27 }
 0x26d   :  { %8160 = vmatprep.subr.bf16.mxu0 %v8159_v12  ;;  %8144 = vmatprep.subr.bf16.mxu1 %v8143_v30 }
 0x270   :  { %8162 = vmatpush1.bf16.msra.mxu0 %v8161_v26  ;;  %8146 = vmatpush1.bf16.msra.mxu1 %v8145_v35 }
 0x271   :  { %8164 = vmatprep.subr.bf16.mxu0 %v8163_v28  ;;  %8179 = vmatprep.subr.bf16.mxu1 %v9570_v40 }
 0x273   :  { %247 = vmatmul.mubr.f32.vlgmr.msra.gmra.mrb[0].mxu1 %v9567_v3 }
 0x274   :  { %8181 = vmatpush3.bf16.msra.mxu1 %v8180_v39  ;;  %7520 = vmatprep.mubr.msk.f32.mxu1 %vm9571_vm8, %v9567_v3 }
 0x275   :  { %8182 = vmatprep.subr.bf16.mxu1 %v9570_v40 }
 0x278   :  { %8184 = vmatpush3.bf16.msra.mxu1 %v8183_v44  ;;  %v478_v44 = vsub.f32 -1e+30, %v9831_v20 }
 0x279   :  { %8185 = vmatprep.subr.bf16.mxu1 %v9570_v40 }
 0x27c   :  { %8187 = vmatpush3.bf16.msra.mxu1 %v8186_v47 }
 0x27d   :  { %8188 = vmatprep.subr.bf16.mxu1 %v9570_v40 }
 0x280   :  { %8190 = vmatpush3.bf16.msra.mxu1 %v8189_v55 }
 0x281   :  { %8191 = vmatprep.subr.bf16.mxu1 %v9570_v40 }
 0x2cf   :  { %v560_v57 = vpop.permute.xlu0 %559 }
 0x2d0   :  { %v640_v59 = vmul.f32 %v624_v52, %v560_v57  ;;  %v557_v60 = vpop.permute.xlu1 %556  ;;  %v586_v38 = vrot.slane %v560_v57, %v9805_v53 }
 0x2d1   :  { %v639_v61 = vmul.f32 %v623_v56, %v557_v60  ;;  %v582_v39 = vrot.slane %v557_v60, %v9805_v53  ;;  %v629_v56 = vld [vmem:[%s14020_s0 + $0x30] sm:$0xff] }
 0x2d2   :  { %v653_v49 = vrot.slane %v640_v59, 4 }
 0x2d3   :  { %v647_v0 = vrot.slane %v639_v61, 4 }
 0x2d4   :  { %v654_v1 = vadd.f32 %v653_v49, %v640_v59  ;;  %v563_v2 = vpop.permute.xlu1 %562 }
 0x2d5   :  { %v648_v4 = vadd.f32 %v647_v0, %v639_v61  ;;  %v641_v5 = vmul.f32 %v625_v63, %v563_v2  ;;  %v590_v45 = vrot.slane %v563_v2, %v9805_v53  ;;  %v611_v61 = vsel %vm458_vm0, %v586_v38, %v582_v39 }
 0x2d6   :  { %v655_v6 = vrot.slane %v654_v1, 2 }
 0x2d7   :  { %v649_v8 = vrot.slane %v648_v4, 2  ;;  %v659_v9 = vrot.slane %v641_v5, 4  ;;  %v612_v2 = vsel %vm460_vm1, %v590_v45, %v611_v61  ;;  %v741_v61 = vld [vmem:[%s14019_s5 + $0xd8] sm:$0xff] }
 0x2d8   :  { %v656_v10 = vadd.f32 %v655_v6, %v654_v1  ;;  %v566_v11 = vpop.permute.xlu1 %565  ;;  %v479_v1 = vmul.f32 1.442695, %v478_v44 }
 0x2d9   :  { %v650_v12 = vadd.f32 %v649_v8, %v648_v4  ;;  %v660_v13 = vadd.f32 %v659_v9, %v641_v5  ;;  %v642_v14 = vmul.f32 %v626_v7, %v566_v11  ;;  %v594_v55 = vrot.slane %v566_v11, %v9805_v53 }
 0x2da   :  { %v657_v15 = vrot.slane %v656_v10, 1  ;;  %9277 = vpow2.f32 %v479_v1 }
 0x2db   :  { %v651_v19 = vrot.slane %v650_v12, 1  ;;  %v661_v22 = vrot.slane %v660_v13, 2  ;;  %v665_v23 = vrot.slane %v642_v14, 4  ;;  %v613_v7 = vsel %vm462_vm2, %v594_v55, %v612_v2  ;;  %v745_v2 = vld [vmem:[%s14019_s5 + $0xf8] sm:$0xff] }
 0x2dc   :  { %v569_v25 = vpop.permute.xlu1 %568  ;;  %v658_v28 = vadd.f32 %v657_v15, %v656_v10  ;;  %v630_v10 = vld [vmem:[%s14020_s0 + $0x38] sm:$0xff] }
 0x2dd   :  { %v662_v26 = vadd.f32 %v661_v22, %v660_v13  ;;  %v666_v27 = vadd.f32 %v665_v23, %v642_v14  ;;  %v652_v30 = vadd.f32 %v651_v19, %v650_v12  ;;  %v643_v32 = vmul.f32 %v627_v24, %v569_v25 }
 0x2de   :  { %v598_v60 = vrot.slane %v569_v25, %v9805_v53 }
 0x2df   :  { %v663_v35 = vrot.slane %v662_v26, 1  ;;  %v667_v36 = vrot.slane %v666_v27, 2  ;;  %v671_v42 = vrot.slane %v643_v32, 4  ;;  %v703_v51 = vsel %vm458_vm0, %v658_v28, %v652_v30 }
 0x2e0   :  { %v572_v43 = vpop.permute.xlu1 %571  ;;  %v614_v12 = vsel %vm464_vm3, %v598_v60, %v613_v7  ;;  %v747_v7 = vld [vmem:[%s14019_s5 + $0x108] sm:$0xff] }
 0x2e1   :  { %v664_v46 = vadd.f32 %v663_v35, %v662_v26  ;;  %v668_v47 = vadd.f32 %v667_v36, %v666_v27  ;;  %v644_v48 = vmul.f32 %v628_v34, %v572_v43  ;;  %v672_v52 = vadd.f32 %v671_v42, %v643_v32 }
 0x2e2   :  { %v602_v63 = vrot.slane %v572_v43, %v9805_v53 }
 0x2e3   :  { %v704_v57 = vsel %vm460_vm1, %v664_v46, %v703_v51  ;;  %v669_v59 = vrot.slane %v668_v47, 1  ;;  %v677_v20 = vrot.slane %v644_v48, 4  ;;  %v673_v49 = vrot.slane %v672_v52, 2 }
 0x2e4   :  { %v575_v0 = vpop.permute.xlu1 %574  ;;  %v615_v22 = vsel %vm466_vm4, %v602_v63, %v614_v12  ;;  %v9278_v51 = vpop.eup %9277  ;;  %v751_v12 = vld [vmem:[%s14019_s5 + $0x128] sm:$0xff] }
 0x2e5   :  { %v670_v4 = vadd.f32 %v669_v59, %v668_v47  ;;  %v678_v5 = vadd.f32 %v677_v20, %v644_v48  ;;  %v645_v6 = vmul.f32 %v629_v56, %v575_v0  ;;  %v674_v8 = vadd.f32 %v673_v49, %v672_v52  ;;  %v738_v20 = vld [vmem:[%s14019_s5 + $0xc0] sm:$0xff]  ;;  %v740_v49 = vld [vmem:[%s14019_s5 + $0xd0] sm:$0xff] }
 0x2e6   :  { %v606_v9 = vrot.slane %v575_v0, %v9805_v53  ;;  %v8165_v63 = vpack.c.bf16 %v741_v61, %v738_v20  ;;  %v743_v0 = vld [vmem:[%s14019_s5 + $0xe8] sm:$0xff]  ;;  %v952_v20 = vld [vmem:[%s14021_s7 + $0x30] sm:$0xff]  ;;  %v953_v61 = vld [vmem:[%s14021_s7 + $0x38] sm:$0xff] }
 0x2e7   :  { %v705_v11 = vsel %vm462_vm2, %v670_v4, %v704_v57  ;;  %v679_v13 = vrot.slane %v678_v5, 2  ;;  %v683_v14 = vrot.slane %v645_v6, 4  ;;  %v675_v15 = vrot.slane %v674_v8, 1  ;;  %v748_v4 = vld [vmem:[%s14019_s5 + $0x110] sm:$0xff] }
 0x2e8   :  { %v578_v19 = vpop.permute.xlu1 %577  ;;  %v616_v28 = vsel %vm468_vm5, %v606_v9, %v615_v22  ;;  %v546_v57 = vmul.f32 0.0, %v9278_v51  ;;  %v8192_v1 = vpack.c.bf16 %v743_v0, %v740_v49  ;;  %8166 = vmatpush1.bf16.msra.mxu0 %v8165_v63  ;;  %v752_v22 = vld [vmem:[%s14019_s5 + $0x130] sm:$0xff]  ;;  %v8213_v49 = vpack.c.bf16 %v953_v61, %v952_v20  ;;  %v954_v63 = vld [vmem:[%s14021_s7 + $0x40] sm:$0xff]  ;;  %v955_v0 = vld [vmem:[%s14021_s7 + $0x48] sm:$0xff] }
 0x2e9   :  { %v680_v23 = vadd.f32 %v679_v13, %v678_v5  ;;  %v684_v24 = vadd.f32 %v683_v14, %v645_v6  ;;  %v610_v25 = vrot.slane %v578_v19, %v9805_v53  ;;  %v646_v26 = vmul.f32 %v630_v10, %v578_v19  ;;  %v744_v6 = vld [vmem:[%s14019_s5 + $0xf0] sm:$0xff]  ;;  %v749_v10 = vld [vmem:[%s14019_s5 + $0x118] sm:$0xff]  ;;  %v754_v13 = vld [vmem:[%s14019_s5 + $0x140] sm:$0xff] }
 0x2ea   :  { %v676_v27 = vadd.f32 %v675_v15, %v674_v8  ;;  %8193 = vmatpush3.bf16.msra.mxu1 %v8192_v1  ;;  %v8167_v5 = vpack.c.bf16 %v748_v4, %v745_v2  ;;  %v746_v8 = vld [vmem:[%s14019_s5 + $0x100] sm:$0xff]  ;;  %v8169_v9 = vpack.c.bf16 %v747_v7, %v744_v6  ;;  %v8171_v15 = vpack.c.bf16 %v754_v13, %v751_v12  ;;  %v753_v19 = vld [vmem:[%s14019_s5 + $0x138] sm:$0xff]  ;;  %v956_v2 = vld [vmem:[%s14021_s7 + $0x50] sm:$0xff] }
 0x2eb   :  { %v681_v30 = vrot.slane %v680_v23, 1  ;;  %v685_v32 = vrot.slane %v684_v24, 2  ;;  %v689_v34 = vrot.slane %v646_v26, 4  ;;  %v617_v35 = vsel %vm470_vm6, %v610_v25, %v616_v28  ;;  %8194 = vmatprep.subr.bf16.mxu1 %v9570_v40  ;;  %v750_v14 = vld [vmem:[%s14019_s5 + $0x120] sm:$0xff]  ;;  %v756_v28 = vld [vmem:[%s14019_s5 + $0x150] sm:$0xff]  ;;  %v957_v4 = vld [vmem:[%s14021_s7 + $0x58] sm:$0xff] }
 0x2ec   :  { %v619_v36 = vsel %vm473_vm7, %v617_v35, 0.0  ;;  %v706_v38 = vsel %vm464_vm3, %v676_v27, %v705_v11  ;;  %8168 = vmatprep.subr.bf16.mxu0 %v8167_v5  ;;  %v8195_v11 = vpack.c.bf16 %v749_v10, %v746_v8  ;;  %v760_v27 = vld [vmem:[%s14019_s5 + $0x170] sm:$0xff]  ;;  %v761_v35 = vld [vmem:[%s14019_s5 + $0x178] sm:$0xff]  ;;  %v8216_v1 = vpack.c.bf16 %v955_v0, %v954_v63  ;;  %v958_v6 = vld [vmem:[%s14021_s7 + $0x60] sm:$0xff] }
 0x2ed   :  { %v682_v39 = vadd.f32 %v681_v30, %v680_v23  ;;  %v686_v42 = vadd.f32 %v685_v32, %v684_v24  ;;  %v690_v43 = vadd.f32 %v689_v34, %v646_v26  ;;  %620 = vadd.xlane.f32.xlu1 %v619_v36  ;;  %8170 = vmatpush1.bf16.msra.mxu0 %v8169_v9  ;;  %v755_v23 = vld [vmem:[%s14019_s5 + $0x148] sm:$0xff]  ;;  %v757_v26 = vld [vmem:[%s14019_s5 + $0x158] sm:$0xff]  ;;  %v758_v34 = vld [vmem:[%s14019_s5 + $0x160] sm:$0xff] }
 0x2ee   :  { %8196 = vmatpush3.bf16.msra.mxu1 %v8195_v11  ;;  %v8173_v24 = vpack.c.bf16 %v753_v19, %v750_v14  ;;  %v8198_v25 = vpack.c.bf16 %v755_v23, %v752_v22  ;;  %8172 = vmatprep.subr.bf16.mxu0 %v8171_v15  ;;  %v8175_v30 = vpack.c.bf16 %v760_v27, %v757_v26  ;;  %v759_v32 = vld [vmem:[%s14019_s5 + $0x168] sm:$0xff]  ;;  %v960_v9 = vld [vmem:[%s14021_s7 + $0x70] sm:$0xff]  ;;  %v961_v10 = vld [vmem:[%s14021_s7 + $0x78] sm:$0xff] }
 0x2ef   :  { %v687_v44 = vrot.slane %v686_v42, 1  ;;  %v691_v45 = vrot.slane %v690_v43, 2  ;;  %v707_v46 = vsel %vm466_vm4, %v682_v39, %v706_v38  ;;  %8197 = vmatprep.subr.bf16.mxu1 %v9570_v40  ;;  %v8177_v36 = vpack.c.bf16 %v759_v32, %v756_v28  ;;  %v959_v7 = vld [vmem:[%s14021_s7 + $0x68] sm:$0xff]  ;;  %v41_v12 = vld [vmem:[%s14022_s4] sm:$0x7] }
 0x2f0   :  { %v8201_v38 = vpack.c.bf16 %v761_v35, %v758_v34  ;;  %v8219_v5 = vpack.c.bf16 %v957_v4, %v956_v2  ;;  %v8222_v8 = vpack.c.bf16 %v959_v7, %v958_v6  ;;  %v8225_v11 = vpack.c.bf16 %v961_v10, %v960_v9  ;;  %v42_v13 = vld [vmem:[%s14023_s6] sm:$0x7]  ;;  %v45_v22 = vld [vmem:[%s14024_s10 + $0x8] sm:$0xff] }
 0x2f1   :  { %v688_v47 = vadd.f32 %v687_v44, %v686_v42  ;;  %v692_v48 = vadd.f32 %v691_v45, %v690_v43  ;;  %8174 = vmatpush1.bf16.msra.mxu0 %v8173_v24  ;;  %v44_v14 = vld [vmem:[%s14024_s10] sm:$0xff]  ;;  %v10235_v15 = vrot.slane %v41_v12, %v9750_v62  ;;  %v10238_v19 = vrot.slane %v42_v13, %v9750_v62 }
 0x2f2   :  { %8199 = vmatpush3.bf16.msra.mxu1 %v8198_v25  ;;  %8176 = vmatprep.subr.bf16.mxu0 %v8175_v30  ;;  %v10244_v23 = vrot.slane %v41_v12, %v9826_v17  ;;  %v10247_v26 = vrot.slane %v42_v13, %v9826_v17 }
 0x2f3   :  { %v693_v55 = vrot.slane %v692_v48, 1  ;;  %v708_v52 = vsel %vm468_vm5, %v688_v47, %v707_v46  ;;  %8200 = vmatprep.subr.bf16.mxu1 %v9570_v40  ;;  %v946_v47 = vld [vmem:[%s14021_s7] sm:$0xff]  ;;  %v269_v34 = vadd.f32 %v10235_v15, %v9745_v58  ;;  %v46_v58 = vld [vmem:[%s14024_s10 + $0x10] sm:$0xff] }
 0x2f5   :  { %v694_v56 = vadd.f32 %v693_v55, %v692_v48  ;;  %8178 = vmatpush1.bf16.msra.mxu0 %v8177_v36  ;;  %v947_v48 = vld [vmem:[%s14021_s7 + $0x8] sm:$0xff]  ;;  %v948_v55 = vld [vmem:[%s14021_s7 + $0x10] sm:$0xff] }
 0x2f6   :  { %8202 = vmatpush3.bf16.msra.mxu1 %v8201_v38  ;;  %8203 = vmatprep.subr.bf16.mxu0 %v9570_v40  ;;  %v8204_v51 = vpack.c.bf16 %v947_v48, %v946_v47 }
 0x2f7   :  { %v709_v59 = vsel %vm470_vm6, %v694_v56, %v708_v52  ;;  %v949_v52 = vld [vmem:[%s14021_s7 + $0x18] sm:$0xff] }
 0x2f8   :  { %v711_v60 = vadd.f32 %v709_v59, %v546_v57  ;;  %v8207_v56 = vpack.c.bf16 %v949_v52, %v948_v55  ;;  %v951_v59 = vld [vmem:[%s14021_s7 + $0x28] sm:$0xff]  ;;  %v10259_v55 = vrot.slane %v41_v12, %v9829_v18  ;;  %v10262_v52 = vrot.slane %v42_v13, %v9829_v18 }
 0x346   :  { %v10164_v39 = vpop.f32.mrb[0].mxu1 }
 0x347   :  { %v10166_v42 = vpop.f32.mrb[1].mxu1  ;;  %v270_v36 = vadd.f32 %v10244_v23, %v10164_v39 }
 0x37a   :  { %v621_v43 = vpop.xlane.xlu1 %620 }
 0x37b   :  { %v622_v44 = vadd.f32 %v621_v43, %v546_v57  ;;  %v950_v57 = vld [vmem:[%s14021_s7 + $0x20] sm:$0xff] }
 0x37d   :  { %9279 = vrcp.f32 %v622_v44 }
 0x387   :  { %v9280_v45 = vpop.eup %9279 }
 0x388   :  { %v713_v46 = vmul.f32 %v9280_v45, %v711_v60  ;;  %v8210_v60 = vpack.c.bf16 %v951_v59, %v950_v57  ;;  %v271_v57 = vadd.f32 %v10259_v55, %v10166_v42  ;;  %v10273_v42 = vld [vmem:[%s14025_s8] ss:$0 sm:$0xff] }
 0x38a   :  { %827 = vmatmul.mubr.f32.vlgmr.msra.gmra.mrb[2].mxu0 %v713_v46  ;;  %7521 = vmatmul.mubr.f32.vlgmr.msra.gmra.mrb[2].mxu1 %v713_v46 }
 0x38b   :  { %7555 = vmatprep.mubr.msk.f32.mxu0 %vm9571_vm8, %v9567_v3  ;;  %8205 = vmatpush3.bf16.msra.mxu0 %v8204_v51 }
 0x38c   :  { %8206 = vmatprep.subr.bf16.mxu0 %v9570_v40 }
 0x38f   :  { %8208 = vmatpush3.bf16.msra.mxu0 %v8207_v56 }
 0x390   :  { %8209 = vmatprep.subr.bf16.mxu0 %v9570_v40 }
 0x393   :  { %8211 = vmatpush3.bf16.msra.mxu0 %v8210_v60 }
 0x394   :  { %8212 = vmatprep.subr.bf16.mxu0 %v9570_v40 }
 0x397   :  { %8214 = vmatpush3.bf16.msra.mxu0 %v8213_v49 }
 0x398   :  { %8215 = vmatprep.subr.bf16.mxu0 %v9570_v40 }
 0x39b   :  { %8217 = vmatpush3.bf16.msra.mxu0 %v8216_v1 }
 0x39c   :  { %8218 = vmatprep.subr.bf16.mxu0 %v9570_v40 }
 0x39f   :  { %8220 = vmatpush3.bf16.msra.mxu0 %v8219_v5 }
 0x3a0   :  { %8221 = vmatprep.subr.bf16.mxu0 %v9570_v40 }
 0x3a3   :  { %8223 = vmatpush3.bf16.msra.mxu0 %v8222_v8 }
 0x3a4   :  { %8224 = vmatprep.subr.bf16.mxu0 %v9570_v40 }
 0x3a7   :  { %8226 = vmatpush3.bf16.msra.mxu0 %v8225_v11 }
 0x45d   :  { %v828_v24 = vpop.f32.mrb[2].mxu0  ;;  %v899_v25 = vpop.f32.mrb[2].mxu1 }
 0x45e   :  { %v903_v27 = vadd.f32 %v828_v24, %v44_v14  ;;  %v830_v28 = vpop.f32.mrb[3].mxu0  ;;  %v7522_v30 = vpop.f32.mrb[3].mxu1  ;;  %v905_v39 = vadd.f32 %v899_v25, %v46_v58 }
 0x45f   :  { %v904_v32 = vadd.f32 %v830_v28, %v45_v22 }
 0x460   :  { %v922_v35 = vadd.f32 %v10238_v19, %v903_v27  ;;  %v924_v60 = vadd.f32 %v10262_v52, %v905_v39 }
 0x461   :  { %v923_v38 = vadd.f32 %v10247_v26, %v904_v32 }
 0x462   :  { %v925_v43 = vadd.f32 %v922_v35, %v269_v34 }
 0x463   :  { %v932_v44 = vadd.f32 %v923_v38, %v270_v36 }
 0x464   :  { %v7159_v45 = vmul.f32 -1.442695, %v925_v43 }
 0x465   :  { %v7160_v46 = vmul.f32 -1.442695, %v932_v44 }
 0x466   :  { %9281 = vpow2.f32 %v7159_v45 }
 0x467   :  { %9283 = vpow2.f32 %v7160_v46 }
 0x470   :  { %v9282_v47 = vpop.eup %9281 }
 0x471   :  { %v929_v48 = vadd.f32 1.0, %v9282_v47  ;;  %v9284_v51 = vpop.eup %9283 }
 0x472   :  { %v936_v56 = vadd.f32 1.0, %v9284_v51 }
 0x473   :  { %9285 = vrcp.f32 %v929_v48 }
 0x474   :  { %9287 = vrcp.f32 %v936_v56 }
 0x47d   :  { %v9286_v59 = vpop.eup %9285 }
 0x47e   :  { %v939_v20 = vmul.f32 %v9286_v59, %v271_v57  ;;  %v9288_v49 = vpop.eup %9287 }
 0x47f   :  { %v942_v63 = vsub.f32 1.0, %v9288_v49  ;;  %v944_v2 = vmul.f32 0.0, %v9288_v49 }
 0x480   :  { %v940_v61 = vadd.f32 %v939_v20, %v924_v60 }
 0x482   :  { %9289 = vtanh.f32 %v940_v61 }
 0x48c   :  { %v9290_v0 = vpop.eup %9289 }
 0x48d   :  { %v943_v1 = vmul.f32 %v9290_v0, %v942_v63 }
 0x48f   :  { %v10267_v4 = vadd.f32 %v944_v2, %v943_v1 }
 0x491   :  { %7556 = vmatmul.mubr.f32.vlgmr.msra.gmra.mrb[4].mxu0 %v10267_v4 }
 0x564   :  { %v1034_v5 = vpop.f32.mrb[4].mxu0 }
 0x565   :  { %v10276_v6 = vadd.f32 %v10273_v42, %v1034_v5  ;;  %v7557_v7 = vpop.f32.mrb[5].mxu0 }
 0x567   :  { %1038 = vmax.xlane.f32.xlu0 %v10276_v6 }
 0x5f4   :  { %v10279_v8 = vpop.xlane.xlu0 %1038 }
 0x5f5   :  { %v1040_v9 = vsub.f32 %v10276_v6, %v10279_v8 }
 0x5f7   :  { %v1041_v10 = vmul.f32 1.442695, %v1040_v9 }
 0x5f9   :  { %9291 = vpow2.f32 %v1041_v10 }
 0x603   :  { %v9292_v11 = vpop.eup %9291 }
 0x604   :  { %1043 = vadd.xlane.f32.xlu1 %v9292_v11 }
 0x691   :  { %v1044_v12 = vpop.xlane.xlu1 %1043 }
 0x692   :  { %9293 = vlog2.f32 %v1044_v12 }
 0x69c   :  { %v9294_v13 = vpop.eup %9293 }
 0x69d   :  { %v1046_v14 = vmul.f32 0.6931472, %v9294_v13 }
 0x69f   :  { %v1047_v22 = vadd.f32 %v1046_v14, %v10279_v8 }
 0x6a1   :  { %v1048_v24 = vsub.f32 %v10276_v6, %v1047_v22 }
 0x6a3   :  { %1083 = vst [vmem:[%s14026_s11] sm:$0xff] %v1048_v24 }
 0x6a4   :  { %1091 = vsyncadd [#allocation3], 128  ;;  %v1160_v25 = vld [vmem:[%s14014_s3 + $0x8] sm:$0xff]  ;;  %1287 = vmatprep.mubr.f32.mxu1 %v9567_v3  ;;  %9296 = vset.pattern.permute.xlu0 %v9569_v16  ;;  %v1159_v30 = vld [vmem:[%s14014_s3] sm:$0xff]  ;;  %vm1092_vm9 = vcmp.ge.f32.partialorder %v10276_v6, %v10279_v8 }
 0x6a5   :  { %v1164_v27 = vld [vmem:[%s14014_s3 + $0x28] sm:$0xff]  ;;  %v1163_v32 = vld [vmem:[%s14014_s3 + $0x20] sm:$0xff]  ;;  %9295 = vset.pattern.permute.xlu1 %v9569_v16  ;;  %1358 = vmatprep.mubr.f32.mxu0 %v9567_v3  ;;  %v1161_v6 = vld [vmem:[%s14014_s3 + $0x10] sm:$0xff] }
 0x6a6   :  { %v8227_v28 = vpack.c.bf16 %v1164_v27, %v1160_v25  ;;  %v1168_v34 = vld [vmem:[%s14014_s3 + $0x48] sm:$0xff]  ;;  %v8229_v35 = vpack.c.bf16 %v1163_v32, %v1159_v30  ;;  %v1167_v38 = vld [vmem:[%s14014_s3 + $0x40] sm:$0xff] }
 0x6a7   :  { %v1172_v36 = vld [vmem:[%s14014_s3 + $0x68] sm:$0xff]  ;;  %v1171_v43 = vld [vmem:[%s14014_s3 + $0x60] sm:$0xff] }
 0x6a8   :  { %8228 = vmatprep.subr.bf16.mxu1 %v8227_v28  ;;  %v8231_v44 = vpack.c.bf16 %v1172_v36, %v1168_v34  ;;  %v1176_v45 = vld [vmem:[%s14014_s3 + $0x88] sm:$0xff]  ;;  %v8233_v47 = vpack.c.bf16 %v1171_v43, %v1167_v38  ;;  %v1175_v51 = vld [vmem:[%s14014_s3 + $0x80] sm:$0xff] }
 0x6a9   :  { %v1180_v46 = vld [vmem:[%s14014_s3 + $0xa8] sm:$0xff]  ;;  %8230 = vmatpush1.bf16.msra.mxu1 %v8229_v35  ;;  %v1179_v58 = vld [vmem:[%s14014_s3 + $0xa0] sm:$0xff] }
 0x6aa   :  { %8232 = vmatprep.subr.bf16.mxu1 %v8231_v44  ;;  %v8235_v48 = vpack.c.bf16 %v1180_v46, %v1176_v45  ;;  %v1184_v39 = vld [vmem:[%s14014_s3 + $0xc8] sm:$0xff]  ;;  %v8237_v57 = vpack.c.bf16 %v1179_v58, %v1175_v51  ;;  %v1183_v60 = vld [vmem:[%s14014_s3 + $0xc0] sm:$0xff] }
 0x6ab   :  { %v1188_v56 = vld [vmem:[%s14014_s3 + $0xe8] sm:$0xff]  ;;  %v1187_v20 = vld [vmem:[%s14014_s3 + $0xe0] sm:$0xff] }
 0x6ac   :  { %v8239_v59 = vpack.c.bf16 %v1188_v56, %v1184_v39  ;;  %v1192_v61 = vld [vmem:[%s14014_s3 + $0x108] sm:$0xff]  ;;  %v8241_v63 = vpack.c.bf16 %v1187_v20, %v1183_v60  ;;  %v1191_v1 = vld [vmem:[%s14014_s3 + $0x100] sm:$0xff] }
 0x6ad   :  { %8234 = vmatpush1.bf16.msra.mxu1 %v8233_v47  ;;  %v1196_v49 = vld [vmem:[%s14014_s3 + $0x128] sm:$0xff]  ;;  %v1195_v2 = vld [vmem:[%s14014_s3 + $0x120] sm:$0xff] }
 0x6ae   :  { %8236 = vmatprep.subr.bf16.mxu1 %v8235_v48  ;;  %v8243_v0 = vpack.c.bf16 %v1196_v49, %v1192_v61  ;;  %v1200_v5 = vld [vmem:[%s14014_s3 + $0x148] sm:$0xff]  ;;  %v8245_v9 = vpack.c.bf16 %v1195_v2, %v1191_v1  ;;  %v1199_v11 = vld [vmem:[%s14014_s3 + $0x140] sm:$0xff] }
 0x6af   :  { %v1204_v7 = vld [vmem:[%s14014_s3 + $0x168] sm:$0xff]  ;;  %v1203_v12 = vld [vmem:[%s14014_s3 + $0x160] sm:$0xff] }
 0x6b0   :  { %v8247_v10 = vpack.c.bf16 %v1204_v7, %v1200_v5  ;;  %v1208_v13 = vld [vmem:[%s14014_s3 + $0x188] sm:$0xff]  ;;  %v8249_v22 = vpack.c.bf16 %v1203_v12, %v1199_v11  ;;  %v1207_v25 = vld [vmem:[%s14014_s3 + $0x180] sm:$0xff] }
 0x6b1   :  { %8238 = vmatpush1.bf16.msra.mxu1 %v8237_v57  ;;  %v1212_v14 = vld [vmem:[%s14014_s3 + $0x1a8] sm:$0xff]  ;;  %v1211_v27 = vld [vmem:[%s14014_s3 + $0x1a0] sm:$0xff] }
 0x6b2   :  { %8240 = vmatprep.subr.bf16.mxu1 %v8239_v59  ;;  %v8251_v24 = vpack.c.bf16 %v1212_v14, %v1208_v13  ;;  %v1216_v28 = vld [vmem:[%s14014_s3 + $0x1c8] sm:$0xff]  ;;  %v8253_v32 = vpack.c.bf16 %v1211_v27, %v1207_v25  ;;  %v1215_v35 = vld [vmem:[%s14014_s3 + $0x1c0] sm:$0xff] }
 0x6b3   :  { %v1220_v30 = vld [vmem:[%s14014_s3 + $0x1e8] sm:$0xff]  ;;  %v1219_v36 = vld [vmem:[%s14014_s3 + $0x1e0] sm:$0xff] }
 0x6b4   :  { %v8255_v34 = vpack.c.bf16 %v1220_v30, %v1216_v28  ;;  %v8257_v38 = vpack.c.bf16 %v1219_v36, %v1215_v35  ;;  %v1418_v57 = vld [vmem:[%s14017_s1] sm:$0xff]  ;;  %v1419_v20 = vld [vmem:[%s14017_s1 + $0x8] sm:$0xff]  ;;  %v1424_v30 = vld [vmem:[%s14017_s1 + $0x30] sm:$0xff] }
 0x6b5   :  { %8242 = vmatpush1.bf16.msra.mxu1 %v8241_v63  ;;  %v1422_v12 = vld [vmem:[%s14017_s1 + $0x20] sm:$0xff]  ;;  %v1423_v25 = vld [vmem:[%s14017_s1 + $0x28] sm:$0xff]  ;;  %v1425_v35 = vld [vmem:[%s14017_s1 + $0x38] sm:$0xff] }
 0x6b6   :  { %8244 = vmatprep.subr.bf16.mxu1 %v8243_v0  ;;  %v1420_v0 = vld [vmem:[%s14017_s1 + $0x10] sm:$0xff] }
 0x6b9   :  { %8246 = vmatpush1.bf16.msra.mxu1 %v8245_v9  ;;  %v1421_v9 = vld [vmem:[%s14017_s1 + $0x18] sm:$0xff] }
 0x6ba   :  { %8248 = vmatprep.subr.bf16.mxu1 %v8247_v10 }
 0x6bd   :  { %8250 = vmatpush1.bf16.msra.mxu1 %v8249_v22 }
 0x6be   :  { %8252 = vmatprep.subr.bf16.mxu1 %v8251_v24 }
 0x6c1   :  { %8254 = vmatpush1.bf16.msra.mxu1 %v8253_v32 }
 0x6c2   :  { %8256 = vmatprep.subr.bf16.mxu1 %v8255_v34 }
 0x6c5   :  { %8258 = vmatpush1.bf16.msra.mxu1 %v8257_v38 }
 0x6c8   :  { %1288 = vmatmul.mubr.f32.vlgmr.msra.gmra.mrb[4].mxu1 %v10267_v4 }
 0x6c9   :  { %1906 = vmatprep.mubr.f32.mxu1 %v9567_v3 }
 0x79b   :  { %v1289_v43 = vpop.f32.mrb[4].mxu1 }
 0x79c   :  { %v1369_v44 = vcombine.high %v1289_v43, %v1289_v43  ;;  %v1376_v45 = vrot.slane %v1289_v43, %v9742_v54  ;;  %v10391_v46 = vpop.f32.mrb[5].mxu1 }
 0x79e   :  { %v1383_v47 = vrot.slane %v1369_v44, %v9742_v54  ;;  %v1384_v48 = vcombine.high %v1376_v45, %v1376_v45  ;;  %v1392_v51 = vrot.slane %v1376_v45, %v9742_v54 }
 0x7a0   :  { %v1385_v58 = vcombine.high %v1383_v47, %v1383_v47  ;;  %v1399_v39 = vrot.slane %v1383_v47, %v9742_v54  ;;  %v1406_v56 = vrot.slane %v1384_v48, %v9742_v54  ;;  %v1429_v59 = vrot.slane %v1392_v51, %v9750_v62 }
 0x7a1   :  { %v1414_v60 = vcombine.high %v1392_v51, %v1392_v51 }
 0x7a2   :  { %v1413_v61 = vrot.slane %v1385_v58, %v9742_v54  ;;  %v1416_v49 = vcombine.high %v1406_v56, %v1406_v56  ;;  %v1433_v63 = vrot.slane %v1406_v56, %v9750_v62  ;;  %v1415_v1 = vcombine.high %v1399_v39, %v1399_v39 }
 0x7a3   :  { %v1445_v2 = vrot.slane %v1399_v39, %v9750_v62  ;;  %v1466_v5 = vadd.f32 %v1429_v59, %v1418_v57  ;;  %v1437_v7 = vrot.slane %v1414_v60, %v9750_v62 }
 0x7a4   :  { %v1467_v10 = vadd.f32 %v1433_v63, %v1419_v20  ;;  %v1441_v11 = vrot.slane %v1416_v49, %v9750_v62  ;;  %v1417_v13 = vcombine.high %v1413_v61, %v1413_v61  ;;  %v1449_v22 = vrot.slane %v1413_v61, %v9750_v62 }
 0x7a5   :  { %9297 = vtanh.f32 %v1466_v5  ;;  %v1468_v14 = vadd.f32 %v1437_v7, %v1420_v0  ;;  %v1470_v27 = vadd.f32 %v1445_v2, %v1422_v12  ;;  %v1453_v28 = vrot.slane %v1415_v1, %v9750_v62 }
 0x7a6   :  { %9299 = vtanh.f32 %v1467_v10  ;;  %v1469_v24 = vadd.f32 %v1441_v11, %v1421_v9  ;;  %v1471_v32 = vadd.f32 %v1449_v22, %v1423_v25  ;;  %v1457_v34 = vrot.slane %v1417_v13, %v9750_v62 }
 0x7a7   :  { %9301 = vtanh.f32 %v1468_v14  ;;  %v1472_v36 = vadd.f32 %v1453_v28, %v1424_v30 }
 0x7a8   :  { %9303 = vtanh.f32 %v1469_v24  ;;  %v1473_v38 = vadd.f32 %v1457_v34, %v1425_v35 }
 0x7a9   :  { %9305 = vtanh.f32 %v1470_v27 }
 0x7aa   :  { %9307 = vtanh.f32 %v1471_v32 }
 0x7ab   :  { %9309 = vtanh.f32 %v1472_v36 }
 0x7ac   :  { %9311 = vtanh.f32 %v1473_v38 }
 0x7af   :  { %v9298_v43 = vpop.eup %9297 }
 0x7b0   :  { %v9300_v44 = vpop.eup %9299  ;;  %v1482_v45 = vmul.f32 %v9298_v43, %v9790_v31 }
 0x7b1   :  { %v9302_v47 = vpop.eup %9301  ;;  %v1483_v58 = vmul.f32 %v9300_v44, %v9790_v31 }
 0x7b2   :  { %1490 = vadd.xlane.f32.xlu0 %v1482_v45  ;;  %v1484_v48 = vmul.f32 %v9302_v47, %v9790_v31  ;;  %v9304_v51 = vpop.eup %9303 }
 0x7b3   :  { %v9306_v39 = vpop.eup %9305  ;;  %v1485_v56 = vmul.f32 %v9304_v51, %v9790_v31 }
 0x7b4   :  { %1494 = vadd.xlane.f32.xlu1 %v1484_v48  ;;  %v9308_v57 = vpop.eup %9307  ;;  %v1486_v59 = vmul.f32 %v9306_v39, %v9790_v31 }
 0x7b5   :  { %v9310_v60 = vpop.eup %9309  ;;  %v1487_v20 = vmul.f32 %v9308_v57, %v9790_v31 }
 0x7b6   :  { %1492 = vadd.xlane.f32.xlu0 %v1483_v58  ;;  %v9312_v61 = vpop.eup %9311  ;;  %v1488_v49 = vmul.f32 %v9310_v60, %v9790_v31 }
 0x7b7   :  { %v1489_v63 = vmul.f32 %v9312_v61, %v9790_v31 }
 0x7b8   :  { %1496 = vadd.xlane.f32.xlu1 %v1485_v56 }
 0x7ba   :  { %1498 = vadd.xlane.f32.xlu0 %v1486_v59 }
 0x7bc   :  { %1500 = vadd.xlane.f32.xlu1 %v1487_v20 }
 0x7be   :  { %1502 = vadd.xlane.f32.xlu0 %v1488_v49 }
 0x7c0   :  { %1504 = vadd.xlane.f32.xlu1 %v1489_v63 }
 0x83f   :  { %v1491_v0 = vpop.xlane.xlu0 %1490 }
 0x840   :  { %v1517_v5 = vrot.slane %v1491_v0, %v9805_v53 }
 0x841   :  { %v1495_v1 = vpop.xlane.xlu1 %1494 }
 0x842   :  { %v1525_v9 = vrot.slane %v1495_v1, %v9805_v53 }
 0x843   :  { %v1493_v2 = vpop.xlane.xlu0 %1492 }
 0x844   :  { %v1521_v7 = vrot.slane %v1493_v2, %v9805_v53 }
 0x845   :  { %v1497_v10 = vpop.xlane.xlu1 %1496 }
 0x846   :  { %v1546_v11 = vsel %vm458_vm0, %v1521_v7, %v1517_v5  ;;  %v1529_v12 = vrot.slane %v1497_v10, %v9805_v53 }
 0x847   :  { %v1547_v13 = vsel %vm460_vm1, %v1525_v9, %v1546_v11  ;;  %v1499_v14 = vpop.xlane.xlu0 %1498 }
 0x848   :  { %v1548_v22 = vsel %vm462_vm2, %v1529_v12, %v1547_v13  ;;  %v1533_v24 = vrot.slane %v1499_v14, %v9805_v53 }
 0x849   :  { %v1501_v25 = vpop.xlane.xlu1 %1500 }
 0x84a   :  { %v1537_v27 = vrot.slane %v1501_v25, %v9805_v53  ;;  %v1549_v28 = vsel %vm464_vm3, %v1533_v24, %v1548_v22 }
 0x84b   :  { %v1503_v30 = vpop.xlane.xlu0 %1502 }
 0x84c   :  { %v1541_v32 = vrot.slane %v1503_v30, %v9805_v53  ;;  %v1550_v34 = vsel %vm466_vm4, %v1537_v27, %v1549_v28 }
 0x84d   :  { %v1505_v35 = vpop.xlane.xlu1 %1504 }
 0x84e   :  { %v1545_v36 = vrot.slane %v1505_v35, %v9805_v53  ;;  %v1551_v38 = vsel %vm468_vm5, %v1541_v32, %v1550_v34 }
 0x850   :  { %v1552_v43 = vsel %vm470_vm6, %v1545_v36, %v1551_v38  ;;  %v10475_v38 = vsel %vm1092_vm9, %v9801_v50, 128 }
 0x851   :  { %v1554_v44 = vsel %vm473_vm7, %v1552_v43, -inf }
 0x852   :  { %1555 = vmax.xlane.f32.xlu0 %v1554_v44  ;;  %v1162_v44 = vld [vmem:[%s14014_s3 + $0x18] sm:$0xff] }
 0x8df   :  { %v1556_v45 = vpop.xlane.xlu0 %1555 }
 0x8e0   :  { %v10454_v47 = vmax.f32 %v1556_v45, -1e+30  ;;  %v1166_v45 = vld [vmem:[%s14014_s3 + $0x38] sm:$0xff] }
 0x8e1   :  { %v8259_v8 = vpack.c.bf16 %v1166_v45, %v1162_v44  ;;  %v1800_v44 = vld [vmem:[%s14019_s5 + $0x30] sm:$0xff]  ;;  %v1803_v45 = vld [vmem:[%s14019_s5 + $0x48] sm:$0xff] }
 0x8e2   :  { %v1569_v48 = vrot.slane %v10454_v47, %v9826_v17  ;;  %v1565_v51 = vrot.slane %v10454_v47, %v9750_v62  ;;  %v1573_v58 = vrot.slane %v10454_v47, %v9829_v18  ;;  %v1577_v59 = vrot.slane %v10454_v47, %v9834_v21 }
 0x8e3   :  { %v1581_v63 = vrot.slane %v10454_v47, %v9845_v29  ;;  %v1589_v9 = vrot.slane %v10454_v47, %v9853_v37  ;;  %v1593_v22 = vrot.slane %v10454_v47, %v9858_v41  ;;  %8260 = vmatprep.subr.bf16.mxu0 %v8259_v8  ;;  %v1206_v8 = vld [vmem:[%s14014_s3 + $0x178] sm:$0xff] }
 0x8e4   :  { %v1603_v39 = vsub.f32 %v1493_v2, %v1569_v48  ;;  %v1602_v56 = vsub.f32 %v1491_v0, %v1565_v51  ;;  %v1604_v57 = vsub.f32 %v1495_v1, %v1573_v58  ;;  %v1605_v49 = vsub.f32 %v1497_v10, %v1577_v59  ;;  %v1165_v48 = vld [vmem:[%s14014_s3 + $0x30] sm:$0xff]  ;;  %v1170_v51 = vld [vmem:[%s14014_s3 + $0x58] sm:$0xff] }
 0x8e5   :  { %v1606_v7 = vsub.f32 %v1499_v14, %v1581_v63  ;;  %v1585_v2 = vrot.slane %v10454_v47, %v9848_v33  ;;  %v1608_v13 = vsub.f32 %v1503_v30, %v1589_v9  ;;  %v1609_v27 = vsub.f32 %v1505_v35, %v1593_v22  ;;  %v1174_v58 = vld [vmem:[%s14014_s3 + $0x78] sm:$0xff]  ;;  %v1173_v59 = vld [vmem:[%s14014_s3 + $0x70] sm:$0xff]  ;;  %v1798_v22 = vld [vmem:[%s14019_s5 + $0x20] sm:$0xff] }
 0x8e6   :  { %v1612_v60 = vmul.f32 1.442695, %v1603_v39  ;;  %v1610_v20 = vmul.f32 1.442695, %v1602_v56  ;;  %v1614_v61 = vmul.f32 1.442695, %v1604_v57  ;;  %v8261_v39 = vpack.c.bf16 %v1165_v48, %v1161_v6 }
 0x8e7   :  { %v1616_v5 = vmul.f32 1.442695, %v1605_v49  ;;  %v1618_v0 = vmul.f32 1.442695, %v1606_v7  ;;  %v1607_v1 = vsub.f32 %v1501_v25, %v1585_v2  ;;  %v1622_v24 = vmul.f32 1.442695, %v1608_v13 }
 0x8e8   :  { %9313 = vpow2.f32 %v1612_v60  ;;  %v1624_v25 = vmul.f32 1.442695, %v1609_v27  ;;  %v1095_v35 = vshra.s32 %v10475_v38, 16  ;;  %v8263_v56 = vpack.c.bf16 %v1174_v58, %v1170_v51  ;;  %v1169_v57 = vld [vmem:[%s14014_s3 + $0x50] sm:$0xff]  ;;  %v1178_v60 = vld [vmem:[%s14014_s3 + $0x98] sm:$0xff]  ;;  %8262 = vmatpush1.bf16.msra.mxu0 %v8261_v39  ;;  %v1795_v13 = vld [vmem:[%s14019_s5 + $0x8] sm:$0xff] }
 0x8e9   :  { %9315 = vpow2.f32 %v1610_v20  ;;  %v1620_v10 = vmul.f32 1.442695, %v1607_v1  ;;  %v1182_v20 = vld [vmem:[%s14014_s3 + $0xb8] sm:$0xff]  ;;  %v1177_v63 = vld [vmem:[%s14014_s3 + $0x90] sm:$0xff]  ;;  %v1807_v51 = vld [vmem:[%s14019_s5 + $0x68] sm:$0xff]  ;;  %v8297_v58 = vpack.c.bf16 %v1803_v45, %v1800_v44 }
 0x8ea   :  { %9317 = vpow2.f32 %v1614_v61  ;;  %v10478_v43 = vcvt.s32.f32 %v1095_v35  ;;  %v8265_v61 = vpack.c.bf16 %v1173_v59, %v1169_v57  ;;  %8264 = vmatprep.subr.bf16.mxu0 %v8263_v56  ;;  %v8267_v49 = vpack.c.bf16 %v1182_v20, %v1178_v60  ;;  %v1186_v7 = vld [vmem:[%s14014_s3 + $0xd8] sm:$0xff]  ;;  %v1185_v9 = vld [vmem:[%s14014_s3 + $0xd0] sm:$0xff]  ;;  %v1810_v39 = vld [vmem:[%s14019_s5 + $0x80] sm:$0xff] }
 0x8eb   :  { %9319 = vpow2.f32 %v1616_v5  ;;  %v1181_v5 = vld [vmem:[%s14014_s3 + $0xb0] sm:$0xff]  ;;  %v1190_v2 = vld [vmem:[%s14014_s3 + $0xf8] sm:$0xff]  ;;  %v8299_v59 = vpack.c.bf16 %v1810_v39, %v1807_v51  ;;  %v1806_v60 = vld [vmem:[%s14019_s5 + $0x60] sm:$0xff] }
 0x8ec   :  { %9321 = vpow2.f32 %v1618_v0  ;;  %8266 = vmatpush1.bf16.msra.mxu0 %v8265_v61  ;;  %v8269_v0 = vpack.c.bf16 %v1181_v5, %v1177_v63  ;;  %v8271_v1 = vpack.c.bf16 %v1190_v2, %v1186_v7  ;;  %v1804_v35 = vld [vmem:[%s14019_s5 + $0x50] sm:$0xff]  ;;  %v1202_v6 = vld [vmem:[%s14014_s3 + $0x158] sm:$0xff] }
 0x8ed   :  { %9323 = vpow2.f32 %v1620_v10  ;;  %8268 = vmatprep.subr.bf16.mxu0 %v8267_v49  ;;  %v1198_v10 = vld [vmem:[%s14014_s3 + $0x138] sm:$0xff]  ;;  %v1201_v57 = vld [vmem:[%s14014_s3 + $0x150] sm:$0xff]  ;;  %v8279_v61 = vpack.c.bf16 %v1206_v8, %v1202_v6  ;;  %v1799_v6 = vld [vmem:[%s14019_s5 + $0x28] sm:$0xff] }
 0x8ee   :  { %9325 = vpow2.f32 %v1622_v24  ;;  %v1797_v24 = vld [vmem:[%s14019_s5 + $0x18] sm:$0xff]  ;;  %v1205_v49 = vld [vmem:[%s14014_s3 + $0x170] sm:$0xff] }
 0x8ef   :  { %9327 = vpow2.f32 %v1624_v25  ;;  %v1197_v25 = vld [vmem:[%s14014_s3 + $0x130] sm:$0xff]  ;;  %v1809_v20 = vld [vmem:[%s14019_s5 + $0x78] sm:$0xff] }
 0x8f0   :  { %8270 = vmatpush1.bf16.msra.mxu0 %v8269_v0  ;;  %v1813_v63 = vld [vmem:[%s14019_s5 + $0x98] sm:$0xff]  ;;  %v1816_v5 = vld [vmem:[%s14019_s5 + $0xb0] sm:$0xff]  ;;  %v8301_v0 = vpack.c.bf16 %v1809_v20, %v1806_v60 }
 0x8f1   :  { %8272 = vmatprep.subr.bf16.mxu0 %v8271_v1  ;;  %v1210_v7 = vld [vmem:[%s14014_s3 + $0x198] sm:$0xff]  ;;  %v8281_v1 = vpack.c.bf16 %v1205_v49, %v1201_v57  ;;  %v1796_v45 = vld [vmem:[%s14019_s5 + $0x10] sm:$0xff]  ;;  %v1703_v49 = vld [vmem:[%s14020_s0] sm:$0xff] }
 0x8f2   :  { %v9314_v11 = vpop.eup %9313  ;;  %v1214_v2 = vld [vmem:[%s14014_s3 + $0x1b8] sm:$0xff]  ;;  %v8324_v8 = vpack.c.bf16 %v1799_v6, %v1796_v45  ;;  %v1808_v39 = vld [vmem:[%s14019_s5 + $0x70] sm:$0xff]  ;;  %v1707_v6 = vld [vmem:[%s14020_s0 + $0x20] sm:$0xff] }
 0x8f3   :  { %v9316_v12 = vpop.eup %9315  ;;  %1639 = vperm.xlu0 %9296, %v9314_v11   ;;  %v1189_v11 = vld [vmem:[%s14014_s3 + $0xf0] sm:$0xff]  ;;  %v1805_v51 = vld [vmem:[%s14019_s5 + $0x58] sm:$0xff] }
 0x8f4   :  { %1636 = vperm.xlu1 %9295, %v9316_v12   ;;  %v9318_v14 = vpop.eup %9317  ;;  %v1194_v12 = vld [vmem:[%s14014_s3 + $0x118] sm:$0xff]  ;;  %v8273_v27 = vpack.c.bf16 %v1189_v11, %v1185_v9  ;;  %v1209_v9 = vld [vmem:[%s14014_s3 + $0x190] sm:$0xff]  ;;  %v8303_v11 = vpack.c.bf16 %v1816_v5, %v1813_v63 }
 0x8f5   :  { %v9320_v28 = vpop.eup %9319  ;;  %v1817_v60 = vld [vmem:[%s14019_s5 + $0xb8] sm:$0xff] }
 0x8f6   :  { %v9322_v32 = vpop.eup %9321  ;;  %8274 = vmatpush1.bf16.msra.mxu0 %v8273_v27  ;;  %v1218_v27 = vld [vmem:[%s14014_s3 + $0x1d8] sm:$0xff] }
 0x8f7   :  { %v9324_v34 = vpop.eup %9323 }
 0x8f8   :  { %1642 = vperm.xlu1 %9295, %v9318_v14   ;;  %v9326_v36 = vpop.eup %9325  ;;  %v1794_v14 = vld [vmem:[%s14019_s5] sm:$0xff] }
 0x8f9   :  { %v9328_v30 = vpop.eup %9327 }
 0x8fc   :  { %1645 = vperm.xlu1 %9295, %v9320_v28   ;;  %v1193_v28 = vld [vmem:[%s14014_s3 + $0x110] sm:$0xff] }
 0x8fd   :  { %v8277_v56 = vpack.c.bf16 %v1197_v25, %v1193_v28  ;;  %v1222_v28 = vld [vmem:[%s14014_s3 + $0x1f8] sm:$0xff] }
 0x900   :  { %1648 = vperm.xlu1 %9295, %v9322_v32   ;;  %v8291_v32 = vpack.c.bf16 %v1798_v22, %v1795_v13  ;;  %v8283_v13 = vpack.c.bf16 %v1214_v2, %v1210_v7  ;;  %v1213_v22 = vld [vmem:[%s14014_s3 + $0x1b0] sm:$0xff] }
 0x902   :  { %8292 = vmatprep.subr.bf16.mxu1 %v8291_v32  ;;  %v8285_v32 = vpack.c.bf16 %v1213_v22, %v1209_v9 }
 0x904   :  { %1651 = vperm.xlu1 %9295, %v9324_v34   ;;  %v8293_v34 = vpack.c.bf16 %v1797_v24, %v1794_v14  ;;  %v1819_v14 = vld [vmem:[%s14019_s5 + $0xc8] sm:$0xff]  ;;  %v1822_v24 = vld [vmem:[%s14019_s5 + $0xe0] sm:$0xff] }
 0x906   :  { %8294 = vmatpush1.bf16.msra.mxu1 %v8293_v34  ;;  %v8307_v34 = vpack.c.bf16 %v1822_v24, %v1819_v14  ;;  %v1706_v14 = vld [vmem:[%s14020_s0 + $0x18] sm:$0xff] }
 0x908   :  { %1654 = vperm.xlu1 %9295, %v9326_v36   ;;  %v1801_v36 = vld [vmem:[%s14019_s5 + $0x38] sm:$0xff] }
 0x909   :  { %v8295_v48 = vpack.c.bf16 %v1804_v35, %v1801_v36  ;;  %v8287_v36 = vpack.c.bf16 %v1222_v28, %v1218_v27  ;;  %v1221_v35 = vld [vmem:[%s14014_s3 + $0x1f0] sm:$0xff] }
 0x90b   :  { %8296 = vmatprep.subr.bf16.mxu1 %v8295_v48  ;;  %v1802_v48 = vld [vmem:[%s14019_s5 + $0x40] sm:$0xff] }
 0x90c   :  { %1657 = vperm.xlu1 %9295, %v9328_v30   ;;  %v8275_v30 = vpack.c.bf16 %v1198_v10, %v1194_v12  ;;  %8298 = vmatpush1.bf16.msra.mxu1 %v8297_v58  ;;  %v1812_v12 = vld [vmem:[%s14019_s5 + $0x90] sm:$0xff]  ;;  %v1815_v10 = vld [vmem:[%s14019_s5 + $0xa8] sm:$0xff]  ;;  %v8327_v58 = vpack.c.bf16 %v1805_v51, %v1802_v48 }
 0x90d   :  { %8300 = vmatprep.subr.bf16.mxu1 %v8299_v59  ;;  %v8305_v25 = vpack.c.bf16 %v1815_v10, %v1812_v12  ;;  %v1814_v59 = vld [vmem:[%s14019_s5 + $0xa0] sm:$0xff] }
 0x90e   :  { %8276 = vmatprep.subr.bf16.mxu0 %v8275_v30  ;;  %v1217_v30 = vld [vmem:[%s14014_s3 + $0x1d0] sm:$0xff]  ;;  %v8333_v20 = vpack.c.bf16 %v1817_v60, %v1814_v59 }
 0x90f   :  { %8278 = vmatpush1.bf16.msra.mxu0 %v8277_v56  ;;  %v8289_v44 = vpack.c.bf16 %v1221_v35, %v1217_v30  ;;  %v1811_v56 = vld [vmem:[%s14019_s5 + $0x88] sm:$0xff] }
 0x910   :  { %8280 = vmatprep.subr.bf16.mxu0 %v8279_v61  ;;  %8302 = vmatpush1.bf16.msra.mxu1 %v8301_v0  ;;  %v8330_v57 = vpack.c.bf16 %v1811_v56, %v1808_v39  ;;  %v1704_v61 = vld [vmem:[%s14020_s0 + $0x8] sm:$0xff] }
 0x911   :  { %8304 = vmatprep.subr.bf16.mxu1 %v8303_v11 }
 0x913   :  { %8282 = vmatpush1.bf16.msra.mxu0 %v8281_v1  ;;  %v1705_v1 = vld [vmem:[%s14020_s0 + $0x10] sm:$0xff] }
 0x914   :  { %8284 = vmatprep.subr.bf16.mxu0 %v8283_v13  ;;  %8306 = vmatpush1.bf16.msra.mxu1 %v8305_v25 }
 0x915   :  { %8308 = vmatprep.subr.bf16.mxu1 %v8307_v34 }
 0x917   :  { %8286 = vmatpush1.bf16.msra.mxu0 %v8285_v32 }
 0x918   :  { %8288 = vmatprep.subr.bf16.mxu0 %v8287_v36 }
 0x91b   :  { %8290 = vmatpush1.bf16.msra.mxu0 %v8289_v44 }
 0x91c   :  { %8323 = vmatprep.subr.bf16.mxu0 %v9570_v40 }
 0x91e   :  { %1359 = vmatmul.mubr.f32.vlgmr.msra.gmra.mrb[6].mxu0 %v10267_v4 }
 0x91f   :  { %8325 = vmatpush3.bf16.msra.mxu0 %v8324_v8  ;;  %7590 = vmatprep.mubr.msk.f32.mxu0 %vm9571_vm8, %v9567_v3 }
 0x920   :  { %8326 = vmatprep.subr.bf16.mxu0 %v9570_v40 }
 0x923   :  { %8328 = vmatpush3.bf16.msra.mxu0 %v8327_v58 }
 0x924   :  { %8329 = vmatprep.subr.bf16.mxu0 %v9570_v40 }
 0x927   :  { %8331 = vmatpush3.bf16.msra.mxu0 %v8330_v57  ;;  %v1708_v57 = vld [vmem:[%s14020_s0 + $0x28] sm:$0xff] }
 0x928   :  { %8332 = vmatprep.subr.bf16.mxu0 %v9570_v40 }
 0x92b   :  { %8334 = vmatpush3.bf16.msra.mxu0 %v8333_v20 }
 0x92c   :  { %8335 = vmatprep.subr.bf16.mxu0 %v9570_v40 }
 0x930   :  { %1098 = vmin.xlane.f32.xlu1 %v10478_v43 }
 0x972   :  { %v1640_v63 = vpop.permute.xlu0 %1639 }
 0x973   :  { %v1720_v5 = vmul.f32 %v1704_v61, %v1640_v63  ;;  %v1637_v7 = vpop.permute.xlu1 %1636  ;;  %v1666_v20 = vrot.slane %v1640_v63, %v9805_v53  ;;  %v1709_v63 = vld [vmem:[%s14020_s0 + $0x30] sm:$0xff] }
 0x974   :  { %v1719_v2 = vmul.f32 %v1703_v49, %v1637_v7  ;;  %v1662_v61 = vrot.slane %v1637_v7, %v9805_v53 }
 0x975   :  { %v1733_v0 = vrot.slane %v1720_v5, 4 }
 0x976   :  { %v1727_v9 = vrot.slane %v1719_v2, 4 }
 0x977   :  { %v1734_v11 = vadd.f32 %v1733_v0, %v1720_v5  ;;  %v1643_v12 = vpop.permute.xlu1 %1642 }
 0x978   :  { %v1728_v10 = vadd.f32 %v1727_v9, %v1719_v2  ;;  %v1721_v13 = vmul.f32 %v1705_v1, %v1643_v12  ;;  %v1558_v2 = vsub.f32 -1e+30, %v10454_v47  ;;  %v1670_v0 = vrot.slane %v1643_v12, %v9805_v53 }
 0x979   :  { %v1735_v22 = vrot.slane %v1734_v11, 2  ;;  %v1691_v12 = vsel %vm458_vm0, %v1666_v20, %v1662_v61 }
 0x97a   :  { %v1729_v24 = vrot.slane %v1728_v10, 2  ;;  %v1739_v27 = vrot.slane %v1721_v13, 4 }
 0x97b   :  { %v1736_v28 = vadd.f32 %v1735_v22, %v1734_v11  ;;  %v1646_v25 = vpop.permute.xlu1 %1645 }
 0x97c   :  { %v1730_v32 = vadd.f32 %v1729_v24, %v1728_v10  ;;  %v1740_v34 = vadd.f32 %v1739_v27, %v1721_v13  ;;  %v1722_v36 = vmul.f32 %v1706_v14, %v1646_v25  ;;  %v1674_v13 = vrot.slane %v1646_v25, %v9805_v53 }
 0x97d   :  { %v1737_v30 = vrot.slane %v1736_v28, 1  ;;  %v1692_v25 = vsel %vm460_vm1, %v1670_v0, %v1691_v12 }
 0x97e   :  { %v1731_v35 = vrot.slane %v1730_v32, 1  ;;  %v1741_v44 = vrot.slane %v1740_v34, 2  ;;  %v1745_v45 = vrot.slane %v1722_v36, 4 }
 0x97f   :  { %v1649_v8 = vpop.permute.xlu1 %1648  ;;  %v1738_v58 = vadd.f32 %v1737_v30, %v1736_v28 }
 0x980   :  { %v1742_v48 = vadd.f32 %v1741_v44, %v1740_v34  ;;  %v1746_v51 = vadd.f32 %v1745_v45, %v1722_v36  ;;  %v1732_v39 = vadd.f32 %v1731_v35, %v1730_v32  ;;  %v1723_v56 = vmul.f32 %v1707_v6, %v1649_v8 }
 0x981   :  { %v1678_v24 = vrot.slane %v1649_v8, %v9805_v53  ;;  %v1559_v34 = vmul.f32 1.442695, %v1558_v2  ;;  %v1693_v44 = vsel %vm462_vm2, %v1674_v13, %v1692_v25  ;;  %v1710_v8 = vld [vmem:[%s14020_s0 + $0x38] sm:$0xff] }
 0x982   :  { %v1743_v59 = vrot.slane %v1742_v48, 1  ;;  %v1747_v60 = vrot.slane %v1746_v51, 2  ;;  %v1751_v49 = vrot.slane %v1723_v56, 4  ;;  %v1783_v10 = vsel %vm458_vm0, %v1738_v58, %v1732_v39 }
 0x983   :  { %v1652_v5 = vpop.permute.xlu1 %1651  ;;  %v1694_v58 = vsel %vm464_vm3, %v1678_v24, %v1693_v44  ;;  %9329 = vpow2.f32 %v1559_v34  ;;  %v1818_v44 = vld [vmem:[%s14019_s5 + $0xc0] sm:$0xff] }
 0x984   :  { %v1744_v1 = vadd.f32 %v1743_v59, %v1742_v48  ;;  %v1748_v9 = vadd.f32 %v1747_v60, %v1746_v51  ;;  %v1724_v11 = vmul.f32 %v1708_v57, %v1652_v5  ;;  %v1752_v22 = vadd.f32 %v1751_v49, %v1723_v56 }
 0x985   :  { %v1682_v28 = vrot.slane %v1652_v5, %v9805_v53 }
 0x986   :  { %v1784_v7 = vsel %vm460_vm1, %v1744_v1, %v1783_v10  ;;  %v1749_v14 = vrot.slane %v1748_v9, 1  ;;  %v1757_v47 = vrot.slane %v1724_v11, 4  ;;  %v1753_v27 = vrot.slane %v1752_v22, 2 }
 0x987   :  { %v1655_v32 = vpop.permute.xlu1 %1654  ;;  %v1695_v59 = vsel %vm466_vm4, %v1682_v28, %v1694_v58  ;;  %v1825_v58 = vld [vmem:[%s14019_s5 + $0xf8] sm:$0xff] }
 0x988   :  { %v1750_v36 = vadd.f32 %v1749_v14, %v1748_v9  ;;  %v1758_v30 = vadd.f32 %v1757_v47, %v1724_v11  ;;  %v1725_v35 = vmul.f32 %v1709_v63, %v1655_v32  ;;  %v1754_v45 = vadd.f32 %v1753_v27, %v1752_v22 }
 0x989   :  { %v1686_v6 = vrot.slane %v1655_v32, %v9805_v53 }
 0x98a   :  { %v1759_v48 = vrot.slane %v1758_v30, 2  ;;  %v1763_v51 = vrot.slane %v1725_v35, 4  ;;  %v1785_v39 = vsel %vm462_vm2, %v1750_v36, %v1784_v7  ;;  %v1755_v56 = vrot.slane %v1754_v45, 1 }
 0x98b   :  { %v1658_v57 = vpop.permute.xlu1 %1657  ;;  %v1696_v2 = vsel %vm468_vm5, %v1686_v6, %v1695_v59  ;;  %v1820_v6 = vld [vmem:[%s14019_s5 + $0xd0] sm:$0xff]  ;;  %v1827_v59 = vld [vmem:[%s14019_s5 + $0x108] sm:$0xff] }
 0x98c   :  { %v1760_v60 = vadd.f32 %v1759_v48, %v1758_v30  ;;  %v1764_v20 = vadd.f32 %v1763_v51, %v1725_v35  ;;  %v1690_v61 = vrot.slane %v1658_v57, %v9805_v53  ;;  %v1726_v49 = vmul.f32 %v1710_v8, %v1658_v57  ;;  %v1823_v48 = vld [vmem:[%s14019_s5 + $0xe8] sm:$0xff]  ;;  %v1824_v57 = vld [vmem:[%s14019_s5 + $0xf0] sm:$0xff] }
 0x98d   :  { %v1756_v5 = vadd.f32 %v1755_v56, %v1754_v45  ;;  %v9330_v28 = vpop.eup %9329  ;;  %v1821_v45 = vld [vmem:[%s14019_s5 + $0xd8] sm:$0xff]  ;;  %v8336_v51 = vpack.c.bf16 %v1823_v48, %v1820_v6 }
 0x98e   :  { %v1761_v0 = vrot.slane %v1760_v60, 1  ;;  %v1765_v1 = vrot.slane %v1764_v20, 2  ;;  %v1769_v9 = vrot.slane %v1726_v49, 4  ;;  %v1697_v11 = vsel %vm470_vm6, %v1690_v61, %v1696_v2  ;;  %v1829_v61 = vld [vmem:[%s14019_s5 + $0x118] sm:$0xff]  ;;  %v1834_v2 = vld [vmem:[%s14019_s5 + $0x140] sm:$0xff] }
 0x98f   :  { %v1699_v10 = vsel %vm473_vm7, %v1697_v11, 0.0  ;;  %v1786_v13 = vsel %vm464_vm3, %v1756_v5, %v1785_v39  ;;  %v1626_v36 = vmul.f32 0.0, %v9330_v28  ;;  %v8309_v8 = vpack.c.bf16 %v1821_v45, %v1818_v44  ;;  %v1828_v39 = vld [vmem:[%s14019_s5 + $0x110] sm:$0xff]  ;;  %8337 = vmatpush3.bf16.msra.mxu0 %v8336_v51  ;;  %v1831_v5 = vld [vmem:[%s14019_s5 + $0x128] sm:$0xff] }
 0x990   :  { %v1762_v22 = vadd.f32 %v1761_v0, %v1760_v60  ;;  %v1766_v63 = vadd.f32 %v1765_v1, %v1764_v20  ;;  %v1770_v7 = vadd.f32 %v1769_v9, %v1726_v49  ;;  %1700 = vadd.xlane.f32.xlu0 %v1699_v10  ;;  %v8311_v56 = vpack.c.bf16 %v1828_v39, %v1825_v58  ;;  %v1826_v60 = vld [vmem:[%s14019_s5 + $0x100] sm:$0xff]  ;;  %v1833_v9 = vld [vmem:[%s14019_s5 + $0x138] sm:$0xff]  ;;  %v1832_v11 = vld [vmem:[%s14019_s5 + $0x130] sm:$0xff] }
 0x991   :  { %8310 = vmatpush1.bf16.msra.mxu1 %v8309_v8  ;;  %8338 = vmatprep.subr.bf16.mxu0 %v9570_v40  ;;  %v8313_v20 = vpack.c.bf16 %v1827_v59, %v1824_v57  ;;  %v8339_v49 = vpack.c.bf16 %v1829_v61, %v1826_v60  ;;  %v1830_v0 = vld [vmem:[%s14019_s5 + $0x120] sm:$0xff]  ;;  %v8315_v1 = vpack.c.bf16 %v1834_v2, %v1831_v5  ;;  %v1835_v10 = vld [vmem:[%s14019_s5 + $0x148] sm:$0xff]  ;;  %v1094_v44 = vand.u32 65535, %v10475_v38  ;;  %v1114_v39 = vld [vmem:[%s14015_s9 + $0x18] sm:$0xff] }
 0x992   :  { %v1767_v14 = vrot.slane %v1766_v63, 1  ;;  %v1771_v24 = vrot.slane %v1770_v7, 2  ;;  %v1787_v47 = vsel %vm466_vm4, %v1762_v22, %v1786_v13  ;;  %8312 = vmatprep.subr.bf16.mxu1 %v8311_v56  ;;  %v8317_v13 = vpack.c.bf16 %v1833_v9, %v1830_v0  ;;  %v1111_v58 = vld [vmem:[%s14015_s9] sm:$0xff]  ;;  %v1113_v38 = vld [vmem:[%s14015_s9 + $0x10] sm:$0xff]  ;;  %v1120_v5 = vld [vmem:[%s14015_s9 + $0x48] sm:$0xff] }
 0x993   :  { %8340 = vmatpush3.bf16.msra.mxu0 %v8339_v49  ;;  %v8342_v22 = vpack.c.bf16 %v1835_v10, %v1832_v11  ;;  %v1096_v45 = vcvt.s32.f32 %v1094_v44  ;;  %v1121_v56 = vld [vmem:[%s14015_s9 + $0x50] sm:$0xff]  ;;  %v8349_v59 = vpack.c.bf16 %v1114_v39, %v1111_v58  ;;  %v1119_v2 = vld [vmem:[%s14015_s9 + $0x40] sm:$0xff]  ;;  %v1122_v0 = vld [vmem:[%s14015_s9 + $0x58] sm:$0xff] }
 0x994   :  { %v1768_v12 = vadd.f32 %v1767_v14, %v1766_v63  ;;  %v1772_v27 = vadd.f32 %v1771_v24, %v1770_v7  ;;  %8341 = vmatprep.subr.bf16.mxu0 %v9570_v40  ;;  %v1837_v63 = vld [vmem:[%s14019_s5 + $0x158] sm:$0xff]  ;;  %v1840_v7 = vld [vmem:[%s14019_s5 + $0x170] sm:$0xff]  ;;  %v8383_v11 = vpack.c.bf16 %v1122_v0, %v1119_v2  ;;  %v1123_v10 = vld [vmem:[%s14015_s9 + $0x60] sm:$0xff] }
 0x995   :  { %8314 = vmatpush1.bf16.msra.mxu1 %v8313_v20  ;;  %v1836_v14 = vld [vmem:[%s14019_s5 + $0x150] sm:$0xff]  ;;  %v8319_v24 = vpack.c.bf16 %v1840_v7, %v1837_v63  ;;  %v1128_v7 = vld [vmem:[%s14015_s9 + $0x88] sm:$0xff]  ;;  %v1139_v44 = vld [vmem:[%s14015_s9 + $0xe0] sm:$0xff] }
 0x996   :  { %v1773_v32 = vrot.slane %v1772_v27, 1  ;;  %v1788_v34 = vsel %vm468_vm5, %v1768_v12, %v1787_v47  ;;  %8316 = vmatprep.subr.bf16.mxu1 %v8315_v1  ;;  %v1839_v47 = vld [vmem:[%s14019_s5 + $0x168] sm:$0xff]  ;;  %v1838_v12 = vld [vmem:[%s14019_s5 + $0x160] sm:$0xff]  ;;  %v1117_v20 = vld [vmem:[%s14015_s9 + $0x30] sm:$0xff] }
 0x997   :  { %v8321_v28 = vpack.c.bf16 %v1839_v47, %v1836_v14  ;;  %8343 = vmatpush3.bf16.msra.mxu0 %v8342_v22  ;;  %v1124_v1 = vld [vmem:[%s14015_s9 + $0x68] sm:$0xff]  ;;  %v8353_v9 = vpack.c.bf16 %v1120_v5, %v1117_v20  ;;  %v1126_v22 = vld [vmem:[%s14015_s9 + $0x78] sm:$0xff]  ;;  %v1125_v63 = vld [vmem:[%s14015_s9 + $0x70] sm:$0xff] }
 0x998   :  { %v1774_v25 = vadd.f32 %v1773_v32, %v1772_v27  ;;  %v1841_v27 = vld [vmem:[%s14019_s5 + $0x178] sm:$0xff]  ;;  %v1112_v32 = vld [vmem:[%s14015_s9 + $0x8] sm:$0xff]  ;;  %8344 = vmatprep.subr.bf16.mxu0 %v9570_v40  ;;  %v8357_v47 = vpack.c.bf16 %v1126_v22, %v1123_v10  ;;  %v1141_v20 = vld [vmem:[%s14015_s9 + $0xf0] sm:$0xff] }
 0x999   :  { %8318 = vmatpush1.bf16.msra.mxu1 %v8317_v13  ;;  %v1130_v14 = vld [vmem:[%s14015_s9 + $0x98] sm:$0xff]  ;;  %v1143_v5 = vld [vmem:[%s14015_s9 + $0x100] sm:$0xff]  ;;  %v1148_v0 = vld [vmem:[%s14015_s9 + $0x128] sm:$0xff] }
 0x99a   :  { %v1789_v30 = vsel %vm470_vm6, %v1774_v25, %v1788_v34  ;;  %v1115_v34 = vld [vmem:[%s14015_s9 + $0x20] sm:$0xff]  ;;  %8320 = vmatprep.subr.bf16.mxu1 %v8319_v24  ;;  %v8345_v25 = vpack.c.bf16 %v1841_v27, %v1838_v12  ;;  %v1133_v24 = vld [vmem:[%s14015_s9 + $0xb0] sm:$0xff]  ;;  %v8386_v12 = vpack.c.bf16 %v1128_v7, %v1125_v63  ;;  %v1138_v39 = vld [vmem:[%s14015_s9 + $0xd8] sm:$0xff] }
 0x99b   :  { %v10711_v35 = vadd.f32 %v1789_v30, %v1626_v36  ;;  %v8347_v30 = vpack.c.bf16 %v1115_v34, %v1112_v32  ;;  %v1129_v27 = vld [vmem:[%s14015_s9 + $0x90] sm:$0xff]  ;;  %v1132_v32 = vld [vmem:[%s14015_s9 + $0xa8] sm:$0xff]  ;;  %v1131_v34 = vld [vmem:[%s14015_s9 + $0xa0] sm:$0xff] }
 0x99c   :  { %8346 = vmatpush3.bf16.msra.mxu0 %v8345_v25  ;;  %v1134_v25 = vld [vmem:[%s14015_s9 + $0xb8] sm:$0xff]  ;;  %v1149_v22 = vld [vmem:[%s14015_s9 + $0x130] sm:$0xff]  ;;  %v1152_v63 = vld [vmem:[%s14015_s9 + $0x148] sm:$0xff] }
 0x99d   :  { %8322 = vmatpush1.bf16.msra.mxu1 %v8321_v28  ;;  %8379 = vmatprep.subr.bf16.mxu0 %v9570_v40  ;;  %v8359_v28 = vpack.c.bf16 %v1133_v24, %v1130_v14  ;;  %v1146_v2 = vld [vmem:[%s14015_s9 + $0x118] sm:$0xff]  ;;  %v1157_v14 = vld [vmem:[%s14015_s9 + $0x170] sm:$0xff] }
 0x99e   :  { %8348 = vmatprep.subr.bf16.mxu1 %v8347_v30  ;;  %v1136_v30 = vld [vmem:[%s14015_s9 + $0xc8] sm:$0xff]  ;;  %v1154_v7 = vld [vmem:[%s14015_s9 + $0x158] sm:$0xff] }
 0x99f   :  { %v8363_v58 = vpack.c.bf16 %v1139_v44, %v1136_v30 }
 0x9bd   :  { %v10790_v6 = vpop.xlane.xlu1 %1098 }
 0x9be   :  { %vm1100_vm10 = vcmp.eq.f32.partialorder %v10478_v43, %v10790_v6  ;;  %v1116_v43 = vld [vmem:[%s14015_s9 + $0x28] sm:$0xff]  ;;  %v1105_v44 = vcvt.f32.s32 %v10790_v6  ;;  %v2148_v6 = vld [vmem:[%s14021_s7] sm:$0xff] }
 0x9bf   :  { %v1101_v8 = vsel %vm1100_vm10, %v1096_v45, inf  ;;  %v8380_v60 = vpack.c.bf16 %v1116_v43, %v1113_v38  ;;  %v8361_v45 = vpack.c.bf16 %v1132_v32, %v1129_v27  ;;  %v1137_v38 = vld [vmem:[%s14015_s9 + $0xd0] sm:$0xff]  ;;  %v1140_v43 = vld [vmem:[%s14015_s9 + $0xe8] sm:$0xff]  ;;  %v8375_v27 = vpack.c.bf16 %v1157_v14, %v1154_v7  ;;  %v1155_v32 = vld [vmem:[%s14015_s9 + $0x160] sm:$0xff] }
 0x9c0   :  { %1102 = vmin.xlane.f32.xlu1 %v1101_v8  ;;  %v8389_v8 = vpack.c.bf16 %v1134_v25, %v1131_v34  ;;  %v1158_v34 = vld [vmem:[%s14015_s9 + $0x178] sm:$0xff]  ;;  %v2162_v7 = vld [vmem:[%s14021_s7 + $0x70] sm:$0xff] }
 0x9c1   :  { %v8401_v30 = vpack.c.bf16 %v1158_v34, %v1155_v32  ;;  %v2163_v14 = vld [vmem:[%s14021_s7 + $0x78] sm:$0xff]  ;;  %v1365_v32 = vadd.f32 %v10391_v46, %v10235_v15 }
 0xa1d   :  { %v1701_v48 = vpop.xlane.xlu0 %1700 }
 0xa1e   :  { %v1702_v51 = vadd.f32 %v1701_v48, %v1626_v36  ;;  %v1118_v36 = vld [vmem:[%s14015_s9 + $0x38] sm:$0xff]  ;;  %v1135_v48 = vld [vmem:[%s14015_s9 + $0xc0] sm:$0xff] }
 0xa1f   :  { %v8351_v49 = vpack.c.bf16 %v1121_v56, %v1118_v36  ;;  %v1142_v56 = vld [vmem:[%s14015_s9 + $0xf8] sm:$0xff] }
 0xa20   :  { %9331 = vrcp.f32 %v1702_v51  ;;  %v10875_v51 = vpop.f32.mrb[6].mxu0 }
 0xa21   :  { %v10887_v36 = vpop.f32.mrb[7].mxu0 }
 0xa2a   :  { %v9332_v57 = vpop.eup %9331 }
 0xa2b   :  { %v1793_v61 = vmul.f32 %v9332_v57, %v10711_v35  ;;  %v1127_v35 = vld [vmem:[%s14015_s9 + $0x80] sm:$0xff]  ;;  %v1145_v57 = vld [vmem:[%s14015_s9 + $0x110] sm:$0xff] }
 0xa2c   :  { %v8355_v13 = vpack.c.bf16 %v1127_v35, %v1124_v1  ;;  %v1151_v1 = vld [vmem:[%s14015_s9 + $0x140] sm:$0xff] }
 0xa2d   :  { %1907 = vmatmul.mubr.f32.vlgmr.msra.gmra.mrb[6].mxu1 %v1793_v61  ;;  %7591 = vmatmul.mubr.f32.vlgmr.msra.gmra.mrb[8].mxu0 %v1793_v61  ;;  %v8367_v61 = vpack.c.bf16 %v1145_v57, %v1142_v56  ;;  %v8371_v10 = vpack.c.bf16 %v1151_v1, %v1148_v0  ;;  %v2150_v56 = vld [vmem:[%s14021_s7 + $0x10] sm:$0xff]  ;;  %v2151_v57 = vld [vmem:[%s14021_s7 + $0x18] sm:$0xff]  ;;  %v2156_v0 = vld [vmem:[%s14021_s7 + $0x40] sm:$0xff] }
 0xa2e   :  { %8350 = vmatpush1.bf16.msra.mxu1 %v8349_v59  ;;  %8381 = vmatpush3.bf16.msra.mxu0 %v8380_v60  ;;  %v8365_v59 = vpack.c.bf16 %v1138_v39, %v1135_v48  ;;  %v8392_v60 = vpack.c.bf16 %v1140_v43, %v1137_v38  ;;  %v9572_v39 = vmov 1.0   ;;  %v2149_v38 = vld [vmem:[%s14021_s7 + $0x8] sm:$0xff] }
 0xa2f   :  { %8352 = vmatprep.subr.bf16.mxu1 %v8351_v49  ;;  %8382 = vmatprep.subr.bf16.mxu0 %v9570_v40  ;;  %v1144_v49 = vld [vmem:[%s14015_s9 + $0x108] sm:$0xff]  ;;  %v8404_v43 = vpack.c.bf16 %v2149_v38, %v2148_v6 }
 0xa30   :  { %2047 = vmatprep.mubr.f32.mxu1 %v9567_v3  ;;  %7625 = vmatprep.mubr.msk.f32.mxu0 %vm9571_vm8, %v9567_v3  ;;  %v8369_v35 = vpack.c.bf16 %v1144_v49, %v1141_v20  ;;  %v2153_v20 = vld [vmem:[%s14021_s7 + $0x28] sm:$0xff]  ;;  %v2154_v49 = vld [vmem:[%s14021_s7 + $0x30] sm:$0xff] }
 0xa31   :  { %v2157_v1 = vld [vmem:[%s14021_s7 + $0x48] sm:$0xff] }
 0xa32   :  { %8354 = vmatpush1.bf16.msra.mxu1 %v8353_v9  ;;  %8384 = vmatpush3.bf16.msra.mxu0 %v8383_v11  ;;  %v8395_v9 = vpack.c.bf16 %v1146_v2, %v1143_v5  ;;  %v1147_v11 = vld [vmem:[%s14015_s9 + $0x120] sm:$0xff]  ;;  %v2155_v5 = vld [vmem:[%s14021_s7 + $0x38] sm:$0xff] }
 0xa33   :  { %8356 = vmatprep.subr.bf16.mxu1 %v8355_v13  ;;  %8385 = vmatprep.subr.bf16.mxu0 %v9570_v40  ;;  %v1150_v13 = vld [vmem:[%s14015_s9 + $0x138] sm:$0xff]  ;;  %v8413_v2 = vpack.c.bf16 %v2155_v5, %v2154_v49 }
 0xa34   :  { %v8373_v24 = vpack.c.bf16 %v1150_v13, %v1147_v11  ;;  %v2159_v11 = vld [vmem:[%s14021_s7 + $0x58] sm:$0xff]  ;;  %v2160_v13 = vld [vmem:[%s14021_s7 + $0x60] sm:$0xff] }
 0xa36   :  { %8358 = vmatpush1.bf16.msra.mxu1 %v8357_v47  ;;  %8387 = vmatpush3.bf16.msra.mxu0 %v8386_v12  ;;  %v8398_v47 = vpack.c.bf16 %v1152_v63, %v1149_v22  ;;  %v1153_v12 = vld [vmem:[%s14015_s9 + $0x150] sm:$0xff]  ;;  %v2161_v22 = vld [vmem:[%s14021_s7 + $0x68] sm:$0xff] }
 0xa37   :  { %8360 = vmatprep.subr.bf16.mxu1 %v8359_v28  ;;  %8388 = vmatprep.subr.bf16.mxu0 %v9570_v40  ;;  %v1156_v28 = vld [vmem:[%s14015_s9 + $0x168] sm:$0xff]  ;;  %v8422_v63 = vpack.c.bf16 %v2161_v22, %v2160_v13 }
 0xa38   :  { %v8377_v25 = vpack.c.bf16 %v1156_v28, %v1153_v12 }
 0xa3a   :  { %8362 = vmatpush1.bf16.msra.mxu1 %v8361_v45  ;;  %8390 = vmatpush3.bf16.msra.mxu0 %v8389_v8  ;;  %v1106_v8 = vshll.u32 %v1105_v44, 16 }
 0xa3b   :  { %8364 = vmatprep.subr.bf16.mxu1 %v8363_v58  ;;  %8391 = vmatprep.subr.bf16.mxu0 %v9570_v40 }
 0xa3e   :  { %8366 = vmatpush1.bf16.msra.mxu1 %v8365_v59  ;;  %8393 = vmatpush3.bf16.msra.mxu0 %v8392_v60  ;;  %v8407_v59 = vpack.c.bf16 %v2151_v57, %v2150_v56  ;;  %v2152_v60 = vld [vmem:[%s14021_s7 + $0x20] sm:$0xff] }
 0xa3f   :  { %8368 = vmatprep.subr.bf16.mxu1 %v8367_v61  ;;  %8394 = vmatprep.subr.bf16.mxu0 %v9570_v40  ;;  %v8410_v61 = vpack.c.bf16 %v2153_v20, %v2152_v60 }
 0xa42   :  { %8370 = vmatpush1.bf16.msra.mxu1 %v8369_v35  ;;  %8396 = vmatpush3.bf16.msra.mxu0 %v8395_v9  ;;  %v8416_v35 = vpack.c.bf16 %v2157_v1, %v2156_v0  ;;  %v2158_v9 = vld [vmem:[%s14021_s7 + $0x50] sm:$0xff] }
 0xa43   :  { %8372 = vmatprep.subr.bf16.mxu1 %v8371_v10  ;;  %8397 = vmatprep.subr.bf16.mxu0 %v9570_v40  ;;  %v8419_v10 = vpack.c.bf16 %v2159_v11, %v2158_v9 }
 0xa46   :  { %8374 = vmatpush1.bf16.msra.mxu1 %v8373_v24  ;;  %8399 = vmatpush3.bf16.msra.mxu0 %v8398_v47  ;;  %v8425_v24 = vpack.c.bf16 %v2163_v14, %v2162_v7 }
 0xa47   :  { %8376 = vmatprep.subr.bf16.mxu1 %v8375_v27  ;;  %8400 = vmatprep.subr.bf16.mxu0 %v9570_v40 }
 0xa4a   :  { %8378 = vmatpush1.bf16.msra.mxu1 %v8377_v25  ;;  %8402 = vmatpush3.bf16.msra.mxu0 %v8401_v30 }
 0xa4b   :  { %8403 = vmatprep.subr.bf16.mxu1 %v9570_v40 }
 0xa4d   :  { %v1103_v45 = vpop.xlane.xlu1 %1102 }
 0xa4e   :  { %v1104_v48 = vcvt.f32.s32 %v1103_v45  ;;  %v1366_v45 = vadd.f32 %v10875_v51, %v10244_v23 }
 0xa50   :  { %v1107_v58 = vadd.s32 %v1106_v8, %v1104_v48 }
 0xa52   :  { %vm1108_vm11 = vcmp.eq.s32.totalorder %v9801_v50, %v1107_v58 }
 0xa53   :  { %7163 = vmatmul.mubr.msk.f32.vlgmr.msra.gmra.mrb[6].mxu1 %vm1108_vm11, %v9572_v39  ;;  %7626 = vmatmul.mubr.msk.f32.vlgmr.msra.gmra.mrb[10].mxu0 %vm1108_vm11, %v9572_v39 }
 0xa54   :  { %7660 = vmatprep.mubr.msk.f32.mxu1 %vm9571_vm8, %v9567_v3  ;;  %8405 = vmatpush3.bf16.msra.mxu1 %v8404_v43 }
 0xa55   :  { %8406 = vmatprep.subr.bf16.mxu1 %v9570_v40 }
 0xa58   :  { %8408 = vmatpush3.bf16.msra.mxu1 %v8407_v59  ;;  %v1367_v59 = vadd.f32 %v10887_v36, %v10259_v55 }
 0xa59   :  { %8409 = vmatprep.subr.bf16.mxu1 %v9570_v40 }
 0xa5c   :  { %8411 = vmatpush3.bf16.msra.mxu1 %v8410_v61 }
 0xa5d   :  { %8412 = vmatprep.subr.bf16.mxu1 %v9570_v40 }
 0xa60   :  { %8414 = vmatpush3.bf16.msra.mxu1 %v8413_v2 }
 0xa61   :  { %8415 = vmatprep.subr.bf16.mxu1 %v9570_v40 }
 0xa64   :  { %8417 = vmatpush3.bf16.msra.mxu1 %v8416_v35 }
 0xa65   :  { %8418 = vmatprep.subr.bf16.mxu1 %v9570_v40 }
 0xa68   :  { %8420 = vmatpush3.bf16.msra.mxu1 %v8419_v10 }
 0xa69   :  { %8421 = vmatprep.subr.bf16.mxu1 %v9570_v40 }
 0xa6c   :  { %8423 = vmatpush3.bf16.msra.mxu1 %v8422_v63 }
 0xa6d   :  { %8424 = vmatprep.subr.bf16.mxu1 %v9570_v40 }
 0xa70   :  { %8426 = vmatpush3.bf16.msra.mxu1 %v8425_v24 }
 0xb00   :  { %v1979_v47 = vpop.f32.mrb[8].mxu0 }
 0xb01   :  { %v7592_v12 = vpop.f32.mrb[9].mxu0 }
 0xb26   :  { %v2049_v27 = vpop.f32.mrb[6].mxu1  ;;  %v2120_v28 = vpop.f32.mrb[10].mxu0 }
 0xb27   :  { %v2124_v34 = vadd.f32 %v2049_v27, %v10238_v19  ;;  %v2121_v25 = vadd.f32 %v2120_v28, %v1979_v47  ;;  %v2051_v30 = vpop.f32.mrb[7].mxu1  ;;  %v7627_v44 = vpop.f32.mrb[11].mxu0 }
 0xb28   :  { %v2125_v8 = vadd.f32 %v2051_v30, %v10247_v26 }
 0xb29   :  { %v2127_v48 = vadd.f32 %v2124_v34, %v1365_v32  ;;  %v2126_v20 = vadd.f32 %v2121_v25, %v10262_v52 }
 0xb2a   :  { %v2134_v58 = vadd.f32 %v2125_v8, %v1366_v45 }
 0xb2b   :  { %v7165_v6 = vmul.f32 -1.442695, %v2127_v48 }
 0xb2c   :  { %v7166_v38 = vmul.f32 -1.442695, %v2134_v58 }
 0xb2d   :  { %9333 = vpow2.f32 %v7165_v6 }
 0xb2e   :  { %9335 = vpow2.f32 %v7166_v38 }
 0xb37   :  { %v9334_v43 = vpop.eup %9333 }
 0xb38   :  { %v2131_v56 = vadd.f32 1.0, %v9334_v43  ;;  %v9336_v46 = vpop.eup %9335 }
 0xb39   :  { %v2138_v57 = vadd.f32 1.0, %v9336_v46 }
 0xb3a   :  { %9337 = vrcp.f32 %v2131_v56 }
 0xb3b   :  { %9339 = vrcp.f32 %v2138_v57 }
 0xb44   :  { %v9338_v60 = vpop.eup %9337 }
 0xb45   :  { %v2141_v51 = vmul.f32 %v9338_v60, %v1367_v59  ;;  %v9340_v49 = vpop.eup %9339 }
 0xb46   :  { %v2144_v5 = vsub.f32 1.0, %v9340_v49  ;;  %v2146_v1 = vmul.f32 %v9340_v49, %v10267_v4 }
 0xb47   :  { %v2142_v61 = vadd.f32 %v2141_v51, %v2126_v20 }
 0xb49   :  { %9341 = vtanh.f32 %v2142_v61 }
 0xb53   :  { %v9342_v2 = vpop.eup %9341 }
 0xb54   :  { %v2145_v0 = vmul.f32 %v9342_v2, %v2144_v5 }
 0xb56   :  { %v11019_v35 = vadd.f32 %v2146_v1, %v2145_v0 }
 0xb58   :  { %7661 = vmatmul.mubr.f32.vlgmr.msra.gmra.mrb[8].mxu1 %v11019_v35 }
 0xc2b   :  { %v2230_v9 = vpop.f32.mrb[8].mxu1 }
 0xc2c   :  { %v11023_v36 = vadd.f32 %v10273_v42, %v2230_v9  ;;  %v7662_v11 = vpop.f32.mrb[9].mxu1 }
 0xc2e   :  { %2234 = vmax.xlane.f32.xlu0 %v11023_v36 }
 0xcbb   :  { %v11026_v10 = vpop.xlane.xlu0 %2234 }
 0xcbc   :  { %v2236_v13 = vsub.f32 %v11023_v36, %v11026_v10 }
 0xcbe   :  { %v2237_v22 = vmul.f32 1.442695, %v2236_v13 }
 0xcc0   :  { %9343 = vpow2.f32 %v2237_v22 }
 0xcca   :  { %v9344_v63 = vpop.eup %9343 }
 0xccb   :  { %2239 = vadd.xlane.f32.xlu1 %v9344_v63 }
 0xd58   :  { %v2240_v4 = vpop.xlane.xlu1 %2239 }
 0xd59   :  { %9345 = vlog2.f32 %v2240_v4 }
 0xd63   :  { %v9346_v7 = vpop.eup %9345 }
 0xd64   :  { %v2242_v14 = vmul.f32 0.6931472, %v9346_v7 }
 0xd66   :  { %v2243_v24 = vadd.f32 %v2242_v14, %v11026_v10 }
 0xd68   :  { %v2244_v47 = vsub.f32 %v11023_v36, %v2243_v24 }
 0xd6a   :  { %7167 = vst [vmem:[%s14026_s11 + $0x8] sm:$0xff] %v2244_v47 }
 0xd6b   :  { %2290 = vsyncadd [#allocation3 + $0x1], 128  ;;  %v2359_v12 = vld [vmem:[%s14014_s3 + $0x8] sm:$0xff]  ;;  %2486 = vmatprep.mubr.f32.mxu0 %v9567_v3  ;;  %9348 = vset.pattern.permute.xlu0 %v9569_v16  ;;  %v2358_v32 = vld [vmem:[%s14014_s3] sm:$0xff]  ;;  %vm2291_vm12 = vcmp.ge.f32.partialorder %v11023_v36, %v11026_v10 }
 0xd6c   :  { %v2363_v27 = vld [vmem:[%s14014_s3 + $0x28] sm:$0xff]  ;;  %v2362_v34 = vld [vmem:[%s14014_s3 + $0x20] sm:$0xff]  ;;  %9347 = vset.pattern.permute.xlu1 %v9569_v16  ;;  %2557 = vmatprep.mubr.f32.mxu1 %v9567_v3  ;;  %v2360_v36 = vld [vmem:[%s14014_s3 + $0x10] sm:$0xff] }
 0xd6d   :  { %v8427_v28 = vpack.c.bf16 %v2363_v27, %v2359_v12  ;;  %v2367_v25 = vld [vmem:[%s14014_s3 + $0x48] sm:$0xff]  ;;  %v8429_v30 = vpack.c.bf16 %v2362_v34, %v2358_v32  ;;  %v2366_v45 = vld [vmem:[%s14014_s3 + $0x40] sm:$0xff] }
 0xd6e   :  { %v2371_v44 = vld [vmem:[%s14014_s3 + $0x68] sm:$0xff]  ;;  %v2370_v8 = vld [vmem:[%s14014_s3 + $0x60] sm:$0xff] }
 0xd6f   :  { %8428 = vmatprep.subr.bf16.mxu0 %v8427_v28  ;;  %v8431_v48 = vpack.c.bf16 %v2371_v44, %v2367_v25  ;;  %v2375_v58 = vld [vmem:[%s14014_s3 + $0x88] sm:$0xff]  ;;  %v8433_v38 = vpack.c.bf16 %v2370_v8, %v2366_v45  ;;  %v2374_v56 = vld [vmem:[%s14014_s3 + $0x80] sm:$0xff] }
 0xd70   :  { %v2379_v6 = vld [vmem:[%s14014_s3 + $0xa8] sm:$0xff]  ;;  %8430 = vmatpush1.bf16.msra.mxu0 %v8429_v30  ;;  %v2378_v46 = vld [vmem:[%s14014_s3 + $0xa0] sm:$0xff] }
 0xd71   :  { %8432 = vmatprep.subr.bf16.mxu0 %v8431_v48  ;;  %v8435_v43 = vpack.c.bf16 %v2379_v6, %v2375_v58  ;;  %v2383_v57 = vld [vmem:[%s14014_s3 + $0xc8] sm:$0xff]  ;;  %v8437_v60 = vpack.c.bf16 %v2378_v46, %v2374_v56  ;;  %v2382_v51 = vld [vmem:[%s14014_s3 + $0xc0] sm:$0xff] }
 0xd72   :  { %v2387_v59 = vld [vmem:[%s14014_s3 + $0xe8] sm:$0xff]  ;;  %v2386_v61 = vld [vmem:[%s14014_s3 + $0xe0] sm:$0xff] }
 0xd73   :  { %v8439_v20 = vpack.c.bf16 %v2387_v59, %v2383_v57  ;;  %v2391_v49 = vld [vmem:[%s14014_s3 + $0x108] sm:$0xff]  ;;  %v8441_v2 = vpack.c.bf16 %v2386_v61, %v2382_v51  ;;  %v2390_v1 = vld [vmem:[%s14014_s3 + $0x100] sm:$0xff] }
 0xd74   :  { %8434 = vmatpush1.bf16.msra.mxu0 %v8433_v38  ;;  %v2395_v5 = vld [vmem:[%s14014_s3 + $0x128] sm:$0xff]  ;;  %v2394_v9 = vld [vmem:[%s14014_s3 + $0x120] sm:$0xff] }
 0xd75   :  { %8436 = vmatprep.subr.bf16.mxu0 %v8435_v43  ;;  %v8443_v0 = vpack.c.bf16 %v2395_v5, %v2391_v49  ;;  %v2399_v11 = vld [vmem:[%s14014_s3 + $0x148] sm:$0xff]  ;;  %v8445_v22 = vpack.c.bf16 %v2394_v9, %v2390_v1  ;;  %v2398_v4 = vld [vmem:[%s14014_s3 + $0x140] sm:$0xff]  ;;  %v2619_v1 = vld [vmem:[%s14017_s1 + $0x10] sm:$0xff] }
 0xd76   :  { %v2403_v13 = vld [vmem:[%s14014_s3 + $0x168] sm:$0xff]  ;;  %v2402_v7 = vld [vmem:[%s14014_s3 + $0x160] sm:$0xff] }
 0xd77   :  { %v8447_v63 = vpack.c.bf16 %v2403_v13, %v2399_v11  ;;  %v2407_v14 = vld [vmem:[%s14014_s3 + $0x188] sm:$0xff]  ;;  %v8449_v47 = vpack.c.bf16 %v2402_v7, %v2398_v4  ;;  %v2406_v27 = vld [vmem:[%s14014_s3 + $0x180] sm:$0xff] }
 0xd78   :  { %8438 = vmatpush1.bf16.msra.mxu0 %v8437_v60  ;;  %v2411_v24 = vld [vmem:[%s14014_s3 + $0x1a8] sm:$0xff]  ;;  %v2410_v28 = vld [vmem:[%s14014_s3 + $0x1a0] sm:$0xff] }
 0xd79   :  { %8440 = vmatprep.subr.bf16.mxu0 %v8439_v20  ;;  %v8451_v12 = vpack.c.bf16 %v2411_v24, %v2407_v14  ;;  %v2415_v32 = vld [vmem:[%s14014_s3 + $0x1c8] sm:$0xff]  ;;  %v8453_v25 = vpack.c.bf16 %v2410_v28, %v2406_v27  ;;  %v2414_v44 = vld [vmem:[%s14014_s3 + $0x1c0] sm:$0xff] }
 0xd7a   :  { %v2419_v34 = vld [vmem:[%s14014_s3 + $0x1e8] sm:$0xff]  ;;  %v2418_v45 = vld [vmem:[%s14014_s3 + $0x1e0] sm:$0xff] }
 0xd7b   :  { %v8455_v30 = vpack.c.bf16 %v2419_v34, %v2415_v32  ;;  %v8457_v8 = vpack.c.bf16 %v2418_v45, %v2414_v44  ;;  %v2617_v20 = vld [vmem:[%s14017_s1] sm:$0xff]  ;;  %v2618_v49 = vld [vmem:[%s14017_s1 + $0x8] sm:$0xff]  ;;  %v2624_v45 = vld [vmem:[%s14017_s1 + $0x38] sm:$0xff] }
 0xd7c   :  { %8442 = vmatpush1.bf16.msra.mxu0 %v8441_v2  ;;  %v2621_v14 = vld [vmem:[%s14017_s1 + $0x20] sm:$0xff]  ;;  %v2622_v28 = vld [vmem:[%s14017_s1 + $0x28] sm:$0xff] }
 0xd7d   :  { %8444 = vmatprep.subr.bf16.mxu0 %v8443_v0 }
 0xd80   :  { %8446 = vmatpush1.bf16.msra.mxu0 %v8445_v22 }
 0xd81   :  { %8448 = vmatprep.subr.bf16.mxu0 %v8447_v63  ;;  %v2620_v63 = vld [vmem:[%s14017_s1 + $0x18] sm:$0xff] }
 0xd84   :  { %8450 = vmatpush1.bf16.msra.mxu0 %v8449_v47 }
 0xd85   :  { %8452 = vmatprep.subr.bf16.mxu0 %v8451_v12 }
 0xd88   :  { %8454 = vmatpush1.bf16.msra.mxu0 %v8453_v25  ;;  %v2623_v25 = vld [vmem:[%s14017_s1 + $0x30] sm:$0xff] }
 0xd89   :  { %8456 = vmatprep.subr.bf16.mxu0 %v8455_v30 }
 0xd8c   :  { %8458 = vmatpush1.bf16.msra.mxu0 %v8457_v8 }
 0xd8f   :  { %2487 = vmatmul.mubr.f32.vlgmr.msra.gmra.mrb[12].mxu0 %v11019_v35 }
 0xd90   :  { %3105 = vmatprep.mubr.f32.mxu0 %v9567_v3 }
 0xe62   :  { %v2488_v48 = vpop.f32.mrb[12].mxu0 }
 0xe63   :  { %v2568_v58 = vcombine.high %v2488_v48, %v2488_v48  ;;  %v2575_v6 = vrot.slane %v2488_v48, %v9742_v54  ;;  %v11138_v38 = vpop.f32.mrb[13].mxu0 }
 0xe65   :  { %v2582_v43 = vrot.slane %v2568_v58, %v9742_v54  ;;  %v2583_v56 = vcombine.high %v2575_v6, %v2575_v6  ;;  %v2591_v46 = vrot.slane %v2575_v6, %v9742_v54 }
 0xe67   :  { %v2584_v57 = vcombine.high %v2582_v43, %v2582_v43  ;;  %v2598_v59 = vrot.slane %v2582_v43, %v9742_v54  ;;  %v2605_v60 = vrot.slane %v2583_v56, %v9742_v54  ;;  %v2628_v51 = vrot.slane %v2591_v46, %v9750_v62 }
 0xe68   :  { %v2613_v61 = vcombine.high %v2591_v46, %v2591_v46 }
 0xe69   :  { %v2612_v5 = vrot.slane %v2584_v57, %v9742_v54  ;;  %v2615_v2 = vcombine.high %v2605_v60, %v2605_v60  ;;  %v2632_v0 = vrot.slane %v2605_v60, %v9750_v62  ;;  %v2614_v9 = vcombine.high %v2598_v59, %v2598_v59 }
 0xe6a   :  { %v2644_v11 = vrot.slane %v2598_v59, %v9750_v62  ;;  %v2665_v13 = vadd.f32 %v2628_v51, %v2617_v20  ;;  %v2636_v22 = vrot.slane %v2613_v61, %v9750_v62 }
 0xe6b   :  { %v2666_v4 = vadd.f32 %v2632_v0, %v2618_v49  ;;  %v2640_v7 = vrot.slane %v2615_v2, %v9750_v62  ;;  %v2616_v24 = vcombine.high %v2612_v5, %v2612_v5  ;;  %v2648_v12 = vrot.slane %v2612_v5, %v9750_v62 }
 0xe6c   :  { %9349 = vtanh.f32 %v2665_v13  ;;  %v2667_v47 = vadd.f32 %v2636_v22, %v2619_v1  ;;  %v2669_v32 = vadd.f32 %v2644_v11, %v2621_v14  ;;  %v2652_v34 = vrot.slane %v2614_v9, %v9750_v62 }
 0xe6d   :  { %9351 = vtanh.f32 %v2666_v4  ;;  %v2668_v27 = vadd.f32 %v2640_v7, %v2620_v63  ;;  %v2670_v30 = vadd.f32 %v2648_v12, %v2622_v28  ;;  %v2656_v44 = vrot.slane %v2616_v24, %v9750_v62 }
 0xe6e   :  { %9353 = vtanh.f32 %v2667_v47  ;;  %v2671_v8 = vadd.f32 %v2652_v34, %v2623_v25 }
 0xe6f   :  { %9355 = vtanh.f32 %v2668_v27  ;;  %v2672_v48 = vadd.f32 %v2656_v44, %v2624_v45 }
 0xe70   :  { %9357 = vtanh.f32 %v2669_v32 }
 0xe71   :  { %9359 = vtanh.f32 %v2670_v30 }
 0xe72   :  { %9361 = vtanh.f32 %v2671_v8 }
 0xe73   :  { %9363 = vtanh.f32 %v2672_v48 }
 0xe76   :  { %v9350_v58 = vpop.eup %9349 }
 0xe77   :  { %v9352_v6 = vpop.eup %9351  ;;  %v2681_v43 = vmul.f32 %v9350_v58, %v9790_v31 }
 0xe78   :  { %v9354_v56 = vpop.eup %9353  ;;  %v2682_v59 = vmul.f32 %v9352_v6, %v9790_v31 }
 0xe79   :  { %2689 = vadd.xlane.f32.xlu0 %v2681_v43  ;;  %v2683_v46 = vmul.f32 %v9354_v56, %v9790_v31  ;;  %v9356_v57 = vpop.eup %9355 }
 0xe7a   :  { %v9358_v60 = vpop.eup %9357  ;;  %v2684_v20 = vmul.f32 %v9356_v57, %v9790_v31 }
 0xe7b   :  { %2693 = vadd.xlane.f32.xlu1 %v2683_v46  ;;  %v9360_v51 = vpop.eup %9359  ;;  %v2685_v61 = vmul.f32 %v9358_v60, %v9790_v31 }
 0xe7c   :  { %v9362_v49 = vpop.eup %9361  ;;  %v2686_v5 = vmul.f32 %v9360_v51, %v9790_v31 }
 0xe7d   :  { %2691 = vadd.xlane.f32.xlu0 %v2682_v59  ;;  %v9364_v2 = vpop.eup %9363  ;;  %v2687_v0 = vmul.f32 %v9362_v49, %v9790_v31 }
 0xe7e   :  { %v2688_v1 = vmul.f32 %v9364_v2, %v9790_v31 }
 0xe7f   :  { %2695 = vadd.xlane.f32.xlu1 %v2684_v20 }
 0xe81   :  { %2697 = vadd.xlane.f32.xlu0 %v2685_v61 }
 0xe83   :  { %2699 = vadd.xlane.f32.xlu1 %v2686_v5 }
 0xe85   :  { %2701 = vadd.xlane.f32.xlu0 %v2687_v0 }
 0xe87   :  { %2703 = vadd.xlane.f32.xlu1 %v2688_v1 }
 0xf06   :  { %v2690_v9 = vpop.xlane.xlu0 %2689 }
 0xf07   :  { %v2716_v22 = vrot.slane %v2690_v9, %v9805_v53 }
 0xf08   :  { %v2694_v11 = vpop.xlane.xlu1 %2693 }
 0xf09   :  { %v2724_v4 = vrot.slane %v2694_v11, %v9805_v53 }
 0xf0a   :  { %v2692_v13 = vpop.xlane.xlu0 %2691 }
 0xf0b   :  { %v2720_v63 = vrot.slane %v2692_v13, %v9805_v53 }
 0xf0c   :  { %v2696_v7 = vpop.xlane.xlu1 %2695 }
 0xf0d   :  { %v2745_v14 = vsel %vm458_vm0, %v2720_v63, %v2716_v22  ;;  %v2728_v24 = vrot.slane %v2696_v7, %v9805_v53 }
 0xf0e   :  { %v2746_v47 = vsel %vm460_vm1, %v2724_v4, %v2745_v14  ;;  %v2698_v12 = vpop.xlane.xlu0 %2697 }
 0xf0f   :  { %v2747_v27 = vsel %vm462_vm2, %v2728_v24, %v2746_v47  ;;  %v2732_v28 = vrot.slane %v2698_v12, %v9805_v53 }
 0xf10   :  { %v2700_v32 = vpop.xlane.xlu1 %2699 }
 0xf11   :  { %v2736_v34 = vrot.slane %v2700_v32, %v9805_v53  ;;  %v2748_v25 = vsel %vm464_vm3, %v2732_v28, %v2747_v27 }
 0xf12   :  { %v2702_v30 = vpop.xlane.xlu0 %2701 }
 0xf13   :  { %v2740_v44 = vrot.slane %v2702_v30, %v9805_v53  ;;  %v2749_v45 = vsel %vm466_vm4, %v2736_v34, %v2748_v25 }
 0xf14   :  { %v2704_v8 = vpop.xlane.xlu1 %2703 }
 0xf15   :  { %v2744_v48 = vrot.slane %v2704_v8, %v9805_v53  ;;  %v2750_v58 = vsel %vm468_vm5, %v2740_v44, %v2749_v45 }
 0xf17   :  { %v2751_v6 = vsel %vm470_vm6, %v2744_v48, %v2750_v58 }
 0xf18   :  { %v2753_v43 = vsel %vm473_vm7, %v2751_v6, -inf  ;;  %v11222_v6 = vsel %vm2291_vm12, %v9801_v50, 128 }
 0xf19   :  { %2754 = vmax.xlane.f32.xlu0 %v2753_v43 }
 0xfa6   :  { %v2755_v56 = vpop.xlane.xlu0 %2754 }
 0xfa7   :  { %v11201_v46 = vmax.f32 %v2755_v56, -1e+30  ;;  %v2361_v56 = vld [vmem:[%s14014_s3 + $0x18] sm:$0xff] }
 0xfa9   :  { %v2768_v57 = vrot.slane %v11201_v46, %v9826_v17  ;;  %v2764_v59 = vrot.slane %v11201_v46, %v9750_v62  ;;  %v2772_v60 = vrot.slane %v11201_v46, %v9829_v18  ;;  %v2776_v49 = vrot.slane %v11201_v46, %v9834_v21 }
 0xfaa   :  { %v2780_v22 = vrot.slane %v11201_v46, %v9845_v29  ;;  %v2788_v14 = vrot.slane %v11201_v46, %v9853_v37  ;;  %v2792_v28 = vrot.slane %v11201_v46, %v9858_v41 }
 0xfab   :  { %v2802_v20 = vsub.f32 %v2692_v13, %v2768_v57  ;;  %v2801_v51 = vsub.f32 %v2690_v9, %v2764_v59  ;;  %v2803_v61 = vsub.f32 %v2694_v11, %v2772_v60  ;;  %v2804_v1 = vsub.f32 %v2696_v7, %v2776_v49  ;;  %v2365_v57 = vld [vmem:[%s14014_s3 + $0x38] sm:$0xff]  ;;  %v2364_v59 = vld [vmem:[%s14014_s3 + $0x30] sm:$0xff] }
 0xfac   :  { %v2805_v4 = vsub.f32 %v2698_v12, %v2780_v22  ;;  %v2784_v13 = vrot.slane %v11201_v46, %v9848_v33  ;;  %v2807_v27 = vsub.f32 %v2702_v30, %v2788_v14  ;;  %v2808_v25 = vsub.f32 %v2704_v8, %v2792_v28  ;;  %v2369_v60 = vld [vmem:[%s14014_s3 + $0x58] sm:$0xff]  ;;  %v2368_v49 = vld [vmem:[%s14014_s3 + $0x50] sm:$0xff]  ;;  %v2994_v28 = vld [vmem:[%s14019_s5 + $0x8] sm:$0xff] }
 0xfad   :  { %v2811_v5 = vmul.f32 1.442695, %v2802_v20  ;;  %v2809_v2 = vmul.f32 1.442695, %v2801_v51  ;;  %v2813_v0 = vmul.f32 1.442695, %v2803_v61  ;;  %v8459_v10 = vpack.c.bf16 %v2365_v57, %v2361_v56 }
 0xfae   :  { %v2815_v63 = vmul.f32 1.442695, %v2804_v1  ;;  %v2817_v9 = vmul.f32 1.442695, %v2805_v4  ;;  %v2806_v11 = vsub.f32 %v2700_v32, %v2784_v13  ;;  %v2821_v34 = vmul.f32 1.442695, %v2807_v27 }
 0xfaf   :  { %9365 = vpow2.f32 %v2811_v5  ;;  %v2823_v32 = vmul.f32 1.442695, %v2808_v25  ;;  %v2294_v8 = vshra.s32 %v11222_v6, 16  ;;  %v2373_v20 = vld [vmem:[%s14014_s3 + $0x78] sm:$0xff]  ;;  %v8461_v51 = vpack.c.bf16 %v2364_v59, %v2360_v36  ;;  %v2372_v5 = vld [vmem:[%s14014_s3 + $0x70] sm:$0xff]  ;;  %8460 = vmatprep.subr.bf16.mxu1 %v8459_v10  ;;  %v3002_v36 = vld [vmem:[%s14019_s5 + $0x48] sm:$0xff] }
 0xfb0   :  { %9367 = vpow2.f32 %v2809_v2  ;;  %v2819_v7 = vmul.f32 1.442695, %v2806_v11  ;;  %v8463_v61 = vpack.c.bf16 %v2373_v20, %v2369_v60  ;;  %v2377_v2 = vld [vmem:[%s14014_s3 + $0x98] sm:$0xff]  ;;  %v8465_v1 = vpack.c.bf16 %v2372_v5, %v2368_v49  ;;  %v2380_v4 = vld [vmem:[%s14014_s3 + $0xb0] sm:$0xff]  ;;  %v3006_v20 = vld [vmem:[%s14019_s5 + $0x68] sm:$0xff] }
 0xfb1   :  { %9369 = vpow2.f32 %v2813_v0  ;;  %v11225_v43 = vcvt.s32.f32 %v2294_v8  ;;  %v2381_v0 = vld [vmem:[%s14014_s3 + $0xb8] sm:$0xff]  ;;  %8462 = vmatpush1.bf16.msra.mxu1 %v8461_v51  ;;  %v3003_v56 = vld [vmem:[%s14019_s5 + $0x50] sm:$0xff] }
 0xfb2   :  { %9371 = vpow2.f32 %v2815_v63  ;;  %8464 = vmatprep.subr.bf16.mxu1 %v8463_v61  ;;  %v8467_v22 = vpack.c.bf16 %v2381_v0, %v2377_v2  ;;  %v2376_v63 = vld [vmem:[%s14014_s3 + $0x90] sm:$0xff]  ;;  %v2385_v13 = vld [vmem:[%s14014_s3 + $0xd8] sm:$0xff]  ;;  %v3009_v61 = vld [vmem:[%s14019_s5 + $0x80] sm:$0xff] }
 0xfb3   :  { %9373 = vpow2.f32 %v2817_v9  ;;  %v2389_v9 = vld [vmem:[%s14014_s3 + $0xf8] sm:$0xff]  ;;  %v8469_v11 = vpack.c.bf16 %v2380_v4, %v2376_v63  ;;  %v2999_v57 = vld [vmem:[%s14019_s5 + $0x30] sm:$0xff]  ;;  %v8499_v2 = vpack.c.bf16 %v3009_v61, %v3006_v20  ;;  %v3005_v0 = vld [vmem:[%s14019_s5 + $0x60] sm:$0xff] }
 0xfb4   :  { %9375 = vpow2.f32 %v2819_v7  ;;  %v8471_v14 = vpack.c.bf16 %v2389_v9, %v2385_v13  ;;  %v2393_v7 = vld [vmem:[%s14014_s3 + $0x118] sm:$0xff]  ;;  %v8497_v51 = vpack.c.bf16 %v3002_v36, %v2999_v57  ;;  %v2400_v5 = vld [vmem:[%s14014_s3 + $0x150] sm:$0xff]  ;;  %v3001_v20 = vld [vmem:[%s14019_s5 + $0x40] sm:$0xff] }
 0xfb5   :  { %9377 = vpow2.f32 %v2821_v34  ;;  %8466 = vmatpush1.bf16.msra.mxu1 %v8465_v1  ;;  %v2397_v27 = vld [vmem:[%s14014_s3 + $0x138] sm:$0xff]  ;;  %v2993_v34 = vld [vmem:[%s14019_s5] sm:$0xff]  ;;  %v2404_v63 = vld [vmem:[%s14014_s3 + $0x170] sm:$0xff] }
 0xfb6   :  { %9379 = vpow2.f32 %v2823_v32  ;;  %8468 = vmatprep.subr.bf16.mxu1 %v8467_v22  ;;  %v2996_v25 = vld [vmem:[%s14019_s5 + $0x18] sm:$0xff]  ;;  %v2392_v32 = vld [vmem:[%s14014_s3 + $0x110] sm:$0xff]  ;;  %v8475_v8 = vpack.c.bf16 %v2397_v27, %v2393_v7 }
 0xfb7   :  { %v2401_v10 = vld [vmem:[%s14014_s3 + $0x158] sm:$0xff]  ;;  %v3015_v13 = vld [vmem:[%s14019_s5 + $0xb0] sm:$0xff] }
 0xfb8   :  { %v2405_v59 = vld [vmem:[%s14014_s3 + $0x178] sm:$0xff]  ;;  %v3011_v27 = vld [vmem:[%s14019_s5 + $0x90] sm:$0xff] }
 0xfb9   :  { %v9366_v24 = vpop.eup %9365  ;;  %8470 = vmatpush1.bf16.msra.mxu1 %v8469_v11  ;;  %v3008_v1 = vld [vmem:[%s14019_s5 + $0x78] sm:$0xff]  ;;  %v8479_v22 = vpack.c.bf16 %v2405_v59, %v2401_v10  ;;  %v2420_v57 = vld [vmem:[%s14014_s3 + $0x1f0] sm:$0xff]  ;;  %v2998_v59 = vld [vmem:[%s14019_s5 + $0x28] sm:$0xff] }
 0xfba   :  { %v9368_v47 = vpop.eup %9367  ;;  %2838 = vperm.xlu0 %9348, %v9366_v24   ;;  %v2384_v24 = vld [vmem:[%s14014_s3 + $0xd0] sm:$0xff]  ;;  %8472 = vmatprep.subr.bf16.mxu1 %v8471_v14  ;;  %v3012_v4 = vld [vmem:[%s14019_s5 + $0x98] sm:$0xff]  ;;  %v8501_v14 = vpack.c.bf16 %v3008_v1, %v3005_v0  ;;  %v3013_v0 = vld [vmem:[%s14019_s5 + $0xa0] sm:$0xff] }
 0xfbb   :  { %2835 = vperm.xlu1 %9347, %v9368_v47   ;;  %v9370_v12 = vpop.eup %9369  ;;  %v2388_v47 = vld [vmem:[%s14014_s3 + $0xf0] sm:$0xff]  ;;  %v2409_v9 = vld [vmem:[%s14014_s3 + $0x198] sm:$0xff]  ;;  %v8503_v7 = vpack.c.bf16 %v3015_v13, %v3012_v4  ;;  %v2902_v4 = vld [vmem:[%s14020_s0] sm:$0xff] }
 0xfbc   :  { %v9372_v44 = vpop.eup %9371  ;;  %v2413_v11 = vld [vmem:[%s14014_s3 + $0x1b8] sm:$0xff]  ;;  %v2995_v10 = vld [vmem:[%s14019_s5 + $0x10] sm:$0xff] }
 0xfbd   :  { %v9374_v45 = vpop.eup %9373  ;;  %v3016_v1 = vld [vmem:[%s14019_s5 + $0xb8] sm:$0xff] }
 0xfbe   :  { %v9376_v48 = vpop.eup %9375 }
 0xfbf   :  { %2841 = vperm.xlu1 %9347, %v9370_v12   ;;  %v9378_v58 = vpop.eup %9377  ;;  %v2997_v12 = vld [vmem:[%s14019_s5 + $0x20] sm:$0xff] }
 0xfc0   :  { %v9380_v30 = vpop.eup %9379 }
 0xfc3   :  { %2844 = vperm.xlu1 %9347, %v9372_v44   ;;  %v8473_v44 = vpack.c.bf16 %v2388_v47, %v2384_v24  ;;  %v8481_v24 = vpack.c.bf16 %v2404_v63, %v2400_v5  ;;  %v2408_v47 = vld [vmem:[%s14014_s3 + $0x190] sm:$0xff]  ;;  %v3010_v5 = vld [vmem:[%s14019_s5 + $0x88] sm:$0xff] }
 0xfc4   :  { %v2903_v63 = vld [vmem:[%s14020_s0 + $0x8] sm:$0xff] }
 0xfc5   :  { %8474 = vmatpush1.bf16.msra.mxu1 %v8473_v44  ;;  %v3021_v44 = vld [vmem:[%s14019_s5 + $0xe0] sm:$0xff] }
 0xfc6   :  { %8476 = vmatprep.subr.bf16.mxu1 %v8475_v8 }
 0xfc7   :  { %2847 = vperm.xlu1 %9347, %v9374_v45   ;;  %v2396_v45 = vld [vmem:[%s14014_s3 + $0x130] sm:$0xff] }
 0xfc8   :  { %v8477_v49 = vpack.c.bf16 %v2396_v45, %v2392_v32  ;;  %v2417_v32 = vld [vmem:[%s14014_s3 + $0x1d8] sm:$0xff] }
 0xfc9   :  { %v2421_v45 = vld [vmem:[%s14014_s3 + $0x1f8] sm:$0xff] }
 0xfca   :  { %8478 = vmatpush1.bf16.msra.mxu1 %v8477_v49  ;;  %v8487_v8 = vpack.c.bf16 %v2421_v45, %v2417_v32  ;;  %v3007_v49 = vld [vmem:[%s14019_s5 + $0x70] sm:$0xff] }
 0xfcb   :  { %2850 = vperm.xlu1 %9347, %v9376_v48   ;;  %v8491_v48 = vpack.c.bf16 %v2997_v12, %v2994_v28  ;;  %v3014_v28 = vld [vmem:[%s14019_s5 + $0xa8] sm:$0xff]  ;;  %8480 = vmatprep.subr.bf16.mxu1 %v8479_v22  ;;  %v8483_v12 = vpack.c.bf16 %v2413_v11, %v2409_v9  ;;  %v8533_v22 = vpack.c.bf16 %v3016_v1, %v3013_v0 }
 0xfcc   :  { %v2907_v0 = vld [vmem:[%s14020_s0 + $0x28] sm:$0xff] }
 0xfcd   :  { %8492 = vmatprep.subr.bf16.mxu0 %v8491_v48  ;;  %v8505_v48 = vpack.c.bf16 %v3014_v28, %v3011_v27 }
 0xfce   :  { %8482 = vmatpush1.bf16.msra.mxu1 %v8481_v24 }
 0xfcf   :  { %2853 = vperm.xlu1 %9347, %v9378_v58   ;;  %v8493_v58 = vpack.c.bf16 %v2996_v25, %v2993_v34  ;;  %v2412_v34 = vld [vmem:[%s14014_s3 + $0x1b0] sm:$0xff]  ;;  %v3018_v25 = vld [vmem:[%s14019_s5 + $0xc8] sm:$0xff]  ;;  %8484 = vmatprep.subr.bf16.mxu1 %v8483_v12 }
 0xfd1   :  { %8494 = vmatpush1.bf16.msra.mxu0 %v8493_v58  ;;  %v8485_v58 = vpack.c.bf16 %v2412_v34, %v2408_v47  ;;  %v2904_v47 = vld [vmem:[%s14020_s0 + $0x10] sm:$0xff] }
 0xfd3   :  { %2856 = vperm.xlu1 %9347, %v9380_v30   ;;  %v3000_v30 = vld [vmem:[%s14019_s5 + $0x38] sm:$0xff]  ;;  %8486 = vmatpush1.bf16.msra.mxu1 %v8485_v58 }
 0xfd4   :  { %v8495_v60 = vpack.c.bf16 %v3003_v56, %v3000_v30  ;;  %v8507_v30 = vpack.c.bf16 %v3021_v44, %v3018_v25  ;;  %v2416_v56 = vld [vmem:[%s14014_s3 + $0x1d0] sm:$0xff]  ;;  %8488 = vmatprep.subr.bf16.mxu1 %v8487_v8  ;;  %v2905_v44 = vld [vmem:[%s14020_s0 + $0x18] sm:$0xff] }
 0xfd5   :  { %v8489_v36 = vpack.c.bf16 %v2420_v57, %v2416_v56 }
 0xfd6   :  { %8496 = vmatprep.subr.bf16.mxu0 %v8495_v60  ;;  %v8524_v60 = vpack.c.bf16 %v2998_v59, %v2995_v10 }
 0xfd7   :  { %8498 = vmatpush1.bf16.msra.mxu0 %v8497_v51  ;;  %8490 = vmatpush1.bf16.msra.mxu1 %v8489_v36  ;;  %v3004_v51 = vld [vmem:[%s14019_s5 + $0x58] sm:$0xff] }
 0xfd8   :  { %8500 = vmatprep.subr.bf16.mxu0 %v8499_v2  ;;  %8523 = vmatprep.subr.bf16.mxu1 %v9570_v40  ;;  %v8527_v61 = vpack.c.bf16 %v3004_v51, %v3001_v20  ;;  %v8530_v2 = vpack.c.bf16 %v3010_v5, %v3007_v49 }
 0xfda   :  { %2558 = vmatmul.mubr.f32.vlgmr.msra.gmra.mrb[10].mxu1 %v11019_v35 }
 0xfdb   :  { %8502 = vmatpush1.bf16.msra.mxu0 %v8501_v14  ;;  %8525 = vmatpush3.bf16.msra.mxu1 %v8524_v60  ;;  %v2906_v60 = vld [vmem:[%s14020_s0 + $0x20] sm:$0xff] }
 0xfdc   :  { %8504 = vmatprep.subr.bf16.mxu0 %v8503_v7  ;;  %7695 = vmatprep.mubr.msk.f32.mxu1 %vm9571_vm8, %v9567_v3 }
 0xfdd   :  { %8526 = vmatprep.subr.bf16.mxu1 %v9570_v40 }
 0xfdf   :  { %8506 = vmatpush1.bf16.msra.mxu0 %v8505_v48  ;;  %8528 = vmatpush3.bf16.msra.mxu1 %v8527_v61 }
 0xfe0   :  { %8508 = vmatprep.subr.bf16.mxu0 %v8507_v30  ;;  %8529 = vmatprep.subr.bf16.mxu1 %v9570_v40 }
 0xfe3   :  { %8531 = vmatpush3.bf16.msra.mxu1 %v8530_v2 }
 0xfe4   :  { %8532 = vmatprep.subr.bf16.mxu1 %v9570_v40 }
 0xfe7   :  { %8534 = vmatpush3.bf16.msra.mxu1 %v8533_v22 }
 0xfe8   :  { %8535 = vmatprep.subr.bf16.mxu1 %v9570_v40 }
 0xff7   :  { %2297 = vmin.xlane.f32.xlu1 %v11225_v43 }
0x1039   :  { %v2839_v13 = vpop.permute.xlu0 %2838 }
0x103a   :  { %v2919_v9 = vmul.f32 %v2903_v63, %v2839_v13  ;;  %v2836_v11 = vpop.permute.xlu1 %2835  ;;  %v2865_v63 = vrot.slane %v2839_v13, %v9805_v53  ;;  %v2908_v13 = vld [vmem:[%s14020_s0 + $0x30] sm:$0xff] }
0x103b   :  { %v2918_v14 = vmul.f32 %v2902_v4, %v2836_v11  ;;  %v2861_v4 = vrot.slane %v2836_v11, %v9805_v53 }
0x103c   :  { %v2932_v24 = vrot.slane %v2919_v9, 4 }
0x103d   :  { %v2926_v7 = vrot.slane %v2918_v14, 4 }
0x103e   :  { %v2933_v27 = vadd.f32 %v2932_v24, %v2919_v9  ;;  %v2842_v28 = vpop.permute.xlu1 %2841  ;;  %v2757_v24 = vsub.f32 -1e+30, %v11201_v46 }
0x103f   :  { %v2927_v12 = vadd.f32 %v2926_v7, %v2918_v14  ;;  %v2920_v34 = vmul.f32 %v2904_v47, %v2842_v28  ;;  %v2869_v47 = vrot.slane %v2842_v28, %v9805_v53  ;;  %v2890_v28 = vsel %vm458_vm0, %v2865_v63, %v2861_v4 }
0x1040   :  { %v2934_v25 = vrot.slane %v2933_v27, 2 }
0x1041   :  { %v2928_v32 = vrot.slane %v2927_v12, 2  ;;  %v2938_v45 = vrot.slane %v2920_v34, 4 }
0x1042   :  { %v2935_v48 = vadd.f32 %v2934_v25, %v2933_v27  ;;  %v2845_v58 = vpop.permute.xlu1 %2844 }
0x1043   :  { %v2929_v30 = vadd.f32 %v2928_v32, %v2927_v12  ;;  %v2939_v8 = vadd.f32 %v2938_v45, %v2920_v34  ;;  %v2921_v56 = vmul.f32 %v2905_v44, %v2845_v58  ;;  %v2873_v25 = vrot.slane %v2845_v58, %v9805_v53 }
0x1044   :  { %v2936_v57 = vrot.slane %v2935_v48, 1  ;;  %v2891_v58 = vsel %vm460_vm1, %v2869_v47, %v2890_v28 }
0x1045   :  { %v2930_v36 = vrot.slane %v2929_v30, 1  ;;  %v2940_v10 = vrot.slane %v2939_v8, 2  ;;  %v2944_v59 = vrot.slane %v2921_v56, 4 }
0x1046   :  { %v2848_v20 = vpop.permute.xlu1 %2847  ;;  %v2937_v49 = vadd.f32 %v2936_v57, %v2935_v48 }
0x1047   :  { %v2941_v51 = vadd.f32 %v2940_v10, %v2939_v8  ;;  %v2945_v61 = vadd.f32 %v2944_v59, %v2921_v56  ;;  %v2931_v5 = vadd.f32 %v2930_v36, %v2929_v30  ;;  %v2922_v2 = vmul.f32 %v2906_v60, %v2848_v20 }
0x1048   :  { %v2877_v45 = vrot.slane %v2848_v20, %v9805_v53  ;;  %v2758_v56 = vmul.f32 1.442695, %v2757_v24  ;;  %v2892_v59 = vsel %vm462_vm2, %v2873_v25, %v2891_v58  ;;  %v2909_v20 = vld [vmem:[%s14020_s0 + $0x38] sm:$0xff] }
0x1049   :  { %v2942_v1 = vrot.slane %v2941_v51, 1  ;;  %v2946_v22 = vrot.slane %v2945_v61, 2  ;;  %v2950_v9 = vrot.slane %v2922_v2, 4  ;;  %v2982_v34 = vsel %vm458_vm0, %v2937_v49, %v2931_v5 }
0x104a   :  { %v2851_v14 = vpop.permute.xlu1 %2850  ;;  %v2893_v5 = vsel %vm464_vm3, %v2877_v45, %v2892_v59  ;;  %9381 = vpow2.f32 %v2758_v56 }
0x104b   :  { %v2943_v7 = vadd.f32 %v2942_v1, %v2941_v51  ;;  %v2947_v27 = vadd.f32 %v2946_v22, %v2945_v61  ;;  %v2923_v12 = vmul.f32 %v2907_v0, %v2851_v14  ;;  %v2951_v44 = vadd.f32 %v2950_v9, %v2922_v2 }
0x104c   :  { %v2881_v30 = vrot.slane %v2851_v14, %v9805_v53 }
0x104d   :  { %v2983_v11 = vsel %vm460_vm1, %v2943_v7, %v2982_v34  ;;  %v2948_v32 = vrot.slane %v2947_v27, 1  ;;  %v2956_v46 = vrot.slane %v2923_v12, 4  ;;  %v2952_v48 = vrot.slane %v2951_v44, 2 }
0x104e   :  { %v2854_v8 = vpop.permute.xlu1 %2853  ;;  %v2894_v22 = vsel %vm466_vm4, %v2881_v30, %v2893_v5 }
0x104f   :  { %v2949_v57 = vadd.f32 %v2948_v32, %v2947_v27  ;;  %v2957_v36 = vadd.f32 %v2956_v46, %v2923_v12  ;;  %v2924_v10 = vmul.f32 %v2908_v13, %v2854_v8  ;;  %v2953_v60 = vadd.f32 %v2952_v48, %v2951_v44 }
0x1050   :  { %v2885_v51 = vrot.slane %v2854_v8, %v9805_v53 }
0x1051   :  { %v2958_v61 = vrot.slane %v2957_v36, 2  ;;  %v2962_v49 = vrot.slane %v2924_v10, 4  ;;  %v2984_v2 = vsel %vm462_vm2, %v2949_v57, %v2983_v11  ;;  %v2954_v0 = vrot.slane %v2953_v60, 1 }
0x1052   :  { %v2857_v1 = vpop.permute.xlu1 %2856  ;;  %v2895_v47 = vsel %vm468_vm5, %v2885_v51, %v2894_v22  ;;  %v3020_v51 = vld [vmem:[%s14019_s5 + $0xd8] sm:$0xff]  ;;  %v3023_v22 = vld [vmem:[%s14019_s5 + $0xf0] sm:$0xff] }
0x1053   :  { %v2959_v63 = vadd.f32 %v2958_v61, %v2957_v36  ;;  %v2963_v4 = vadd.f32 %v2962_v49, %v2924_v10  ;;  %v2889_v9 = vrot.slane %v2857_v1, %v9805_v53  ;;  %v2925_v14 = vmul.f32 %v2909_v20, %v2857_v1  ;;  %v3019_v20 = vld [vmem:[%s14019_s5 + $0xd0] sm:$0xff]  ;;  %v3022_v49 = vld [vmem:[%s14019_s5 + $0xe8] sm:$0xff] }
0x1054   :  { %v2955_v24 = vadd.f32 %v2954_v0, %v2953_v60  ;;  %v9382_v8 = vpop.eup %9381  ;;  %v3017_v60 = vld [vmem:[%s14019_s5 + $0xc0] sm:$0xff]  ;;  %v8536_v5 = vpack.c.bf16 %v3022_v49, %v3019_v20  ;;  %v3027_v0 = vld [vmem:[%s14019_s5 + $0x110] sm:$0xff] }
0x1055   :  { %v2960_v7 = vrot.slane %v2959_v63, 1  ;;  %v2964_v27 = vrot.slane %v2963_v4, 2  ;;  %v2968_v12 = vrot.slane %v2925_v14, 4  ;;  %v2896_v34 = vsel %vm470_vm6, %v2889_v9, %v2895_v47  ;;  %v3030_v47 = vld [vmem:[%s14019_s5 + $0x128] sm:$0xff] }
0x1056   :  { %v2898_v25 = vsel %vm473_vm7, %v2896_v34, 0.0  ;;  %v2985_v44 = vsel %vm464_vm3, %v2955_v24, %v2984_v2  ;;  %v2825_v36 = vmul.f32 0.0, %v9382_v8  ;;  %v8509_v61 = vpack.c.bf16 %v3020_v51, %v3017_v60  ;;  %v3024_v2 = vld [vmem:[%s14019_s5 + $0xf8] sm:$0xff]  ;;  %8537 = vmatpush3.bf16.msra.mxu1 %v8536_v5 }
0x1057   :  { %v2961_v13 = vadd.f32 %v2960_v7, %v2959_v63  ;;  %v2965_v11 = vadd.f32 %v2964_v27, %v2963_v4  ;;  %v2969_v32 = vadd.f32 %v2968_v12, %v2925_v14  ;;  %2899 = vadd.xlane.f32.xlu0 %v2898_v25  ;;  %v8511_v1 = vpack.c.bf16 %v3027_v0, %v3024_v2  ;;  %v3026_v63 = vld [vmem:[%s14019_s5 + $0x108] sm:$0xff]  ;;  %v3025_v4 = vld [vmem:[%s14019_s5 + $0x100] sm:$0xff]  ;;  %v3028_v14 = vld [vmem:[%s14019_s5 + $0x118] sm:$0xff] }
0x1058   :  { %8510 = vmatpush1.bf16.msra.mxu0 %v8509_v61  ;;  %8538 = vmatprep.subr.bf16.mxu1 %v9570_v40  ;;  %v8513_v9 = vpack.c.bf16 %v3026_v63, %v3023_v22  ;;  %v8539_v24 = vpack.c.bf16 %v3028_v14, %v3025_v4  ;;  %v3033_v7 = vld [vmem:[%s14019_s5 + $0x140] sm:$0xff]  ;;  %v3032_v34 = vld [vmem:[%s14019_s5 + $0x138] sm:$0xff]  ;;  %v3031_v25 = vld [vmem:[%s14019_s5 + $0x130] sm:$0xff]  ;;  %v2293_v51 = vand.u32 65535, %v11222_v6 }
0x1059   :  { %v2966_v45 = vrot.slane %v2965_v11, 1  ;;  %v2970_v46 = vrot.slane %v2969_v32, 2  ;;  %v2986_v28 = vsel %vm466_vm4, %v2961_v13, %v2985_v44  ;;  %8512 = vmatprep.subr.bf16.mxu0 %v8511_v1  ;;  %v3029_v27 = vld [vmem:[%s14019_s5 + $0x120] sm:$0xff]  ;;  %v8515_v12 = vpack.c.bf16 %v3033_v7, %v3030_v47  ;;  %v3034_v44 = vld [vmem:[%s14019_s5 + $0x148] sm:$0xff]  ;;  %v3040_v8 = vld [vmem:[%s14019_s5 + $0x178] sm:$0xff] }
0x105a   :  { %8540 = vmatpush3.bf16.msra.mxu1 %v8539_v24  ;;  %v8517_v13 = vpack.c.bf16 %v3032_v34, %v3029_v27  ;;  %v2295_v20 = vcvt.s32.f32 %v2293_v51  ;;  %v2310_v0 = vld [vmem:[%s14015_s9] sm:$0xff]  ;;  %v2313_v1 = vld [vmem:[%s14015_s9 + $0x18] sm:$0xff]  ;;  %v2312_v6 = vld [vmem:[%s14015_s9 + $0x10] sm:$0xff] }
0x105b   :  { %v2967_v48 = vadd.f32 %v2966_v45, %v2965_v11  ;;  %v2971_v30 = vadd.f32 %v2970_v46, %v2969_v32  ;;  %8541 = vmatprep.subr.bf16.mxu1 %v9570_v40  ;;  %v8542_v11 = vpack.c.bf16 %v3034_v44, %v3031_v25  ;;  %v3036_v32 = vld [vmem:[%s14019_s5 + $0x158] sm:$0xff]  ;;  %v3039_v45 = vld [vmem:[%s14019_s5 + $0x170] sm:$0xff]  ;;  %v8549_v4 = vpack.c.bf16 %v2313_v1, %v2310_v0  ;;  %v2319_v7 = vld [vmem:[%s14015_s9 + $0x48] sm:$0xff] }
0x105c   :  { %8514 = vmatpush1.bf16.msra.mxu0 %v8513_v9  ;;  %v3035_v46 = vld [vmem:[%s14019_s5 + $0x150] sm:$0xff]  ;;  %v2318_v27 = vld [vmem:[%s14015_s9 + $0x40] sm:$0xff]  ;;  %v2323_v34 = vld [vmem:[%s14015_s9 + $0x68] sm:$0xff] }
0x105d   :  { %v2972_v56 = vrot.slane %v2971_v30, 1  ;;  %v2987_v58 = vsel %vm468_vm5, %v2967_v48, %v2986_v28  ;;  %8516 = vmatprep.subr.bf16.mxu0 %v8515_v12  ;;  %v8519_v28 = vpack.c.bf16 %v3039_v45, %v3036_v32  ;;  %v3038_v48 = vld [vmem:[%s14019_s5 + $0x168] sm:$0xff]  ;;  %v2320_v22 = vld [vmem:[%s14015_s9 + $0x50] sm:$0xff]  ;;  %v2321_v12 = vld [vmem:[%s14015_s9 + $0x58] sm:$0xff] }
0x105e   :  { %8543 = vmatpush3.bf16.msra.mxu1 %v8542_v11  ;;  %v2316_v14 = vld [vmem:[%s14015_s9 + $0x30] sm:$0xff]  ;;  %v8583_v44 = vpack.c.bf16 %v2321_v12, %v2318_v27  ;;  %v2325_v32 = vld [vmem:[%s14015_s9 + $0x78] sm:$0xff]  ;;  %v2335_v51 = vld [vmem:[%s14015_s9 + $0xc8] sm:$0xff] }
0x105f   :  { %v2973_v57 = vadd.f32 %v2972_v56, %v2971_v30  ;;  %v3037_v30 = vld [vmem:[%s14019_s5 + $0x160] sm:$0xff]  ;;  %v8521_v56 = vpack.c.bf16 %v3038_v48, %v3035_v46  ;;  %8544 = vmatprep.subr.bf16.mxu1 %v9570_v40  ;;  %v8553_v25 = vpack.c.bf16 %v2319_v7, %v2316_v14  ;;  %v2324_v45 = vld [vmem:[%s14015_s9 + $0x70] sm:$0xff]  ;;  %v2327_v46 = vld [vmem:[%s14015_s9 + $0x88] sm:$0xff] }
0x1060   :  { %8518 = vmatpush1.bf16.msra.mxu0 %v8517_v13  ;;  %v2322_v13 = vld [vmem:[%s14015_s9 + $0x60] sm:$0xff]  ;;  %v2332_v48 = vld [vmem:[%s14015_s9 + $0xb0] sm:$0xff]  ;;  %v2343_v7 = vld [vmem:[%s14015_s9 + $0x108] sm:$0xff] }
0x1061   :  { %v2988_v10 = vsel %vm470_vm6, %v2973_v57, %v2987_v58  ;;  %v2311_v58 = vld [vmem:[%s14015_s9 + $0x8] sm:$0xff]  ;;  %v2314_v57 = vld [vmem:[%s14015_s9 + $0x20] sm:$0xff]  ;;  %8520 = vmatprep.subr.bf16.mxu0 %v8519_v28  ;;  %v2329_v28 = vld [vmem:[%s14015_s9 + $0x98] sm:$0xff] }
0x1062   :  { %v11458_v59 = vadd.f32 %v2988_v10, %v2825_v36  ;;  %v8545_v10 = vpack.c.bf16 %v3040_v8, %v3037_v30  ;;  %v8547_v60 = vpack.c.bf16 %v2314_v57, %v2311_v58  ;;  %v8557_v30 = vpack.c.bf16 %v2325_v32, %v2322_v13  ;;  %v2331_v57 = vld [vmem:[%s14015_s9 + $0xa8] sm:$0xff]  ;;  %v2342_v27 = vld [vmem:[%s14015_s9 + $0x100] sm:$0xff]  ;;  %v2345_v12 = vld [vmem:[%s14015_s9 + $0x118] sm:$0xff] }
0x1063   :  { %v8586_v8 = vpack.c.bf16 %v2327_v46, %v2324_v45  ;;  %v8559_v58 = vpack.c.bf16 %v2332_v48, %v2329_v28  ;;  %v2346_v13 = vld [vmem:[%s14015_s9 + $0x120] sm:$0xff]  ;;  %v2349_v32 = vld [vmem:[%s14015_s9 + $0x138] sm:$0xff]  ;;  %v2348_v45 = vld [vmem:[%s14015_s9 + $0x130] sm:$0xff] }
0x1064   :  { %8522 = vmatpush1.bf16.msra.mxu0 %v8521_v56  ;;  %8546 = vmatpush3.bf16.msra.mxu1 %v8545_v10  ;;  %v2328_v56 = vld [vmem:[%s14015_s9 + $0x90] sm:$0xff]  ;;  %v2330_v10 = vld [vmem:[%s14015_s9 + $0xa0] sm:$0xff]  ;;  %v2351_v46 = vld [vmem:[%s14015_s9 + $0x148] sm:$0xff] }
0x1065   :  { %8548 = vmatprep.subr.bf16.mxu0 %v8547_v60  ;;  %8579 = vmatprep.subr.bf16.mxu1 %v9570_v40  ;;  %v2333_v60 = vld [vmem:[%s14015_s9 + $0xb8] sm:$0xff]  ;;  %v2356_v48 = vld [vmem:[%s14015_s9 + $0x170] sm:$0xff] }
0x1066   :  { %v2353_v28 = vld [vmem:[%s14015_s9 + $0x158] sm:$0xff] }
0x1084   :  { %v11537_v61 = vpop.xlane.xlu1 %2297 }
0x1085   :  { %vm2299_vm13 = vcmp.eq.f32.partialorder %v11225_v43, %v11537_v61  ;;  %v2315_v43 = vld [vmem:[%s14015_s9 + $0x28] sm:$0xff] }
0x1086   :  { %v2300_v49 = vsel %vm2299_vm13, %v2295_v20, inf  ;;  %v8580_v9 = vpack.c.bf16 %v2315_v43, %v2312_v6  ;;  %v2338_v20 = vld [vmem:[%s14015_s9 + $0xe0] sm:$0xff]  ;;  %v2337_v6 = vld [vmem:[%s14015_s9 + $0xd8] sm:$0xff]  ;;  %v2336_v43 = vld [vmem:[%s14015_s9 + $0xd0] sm:$0xff] }
0x1087   :  { %2301 = vmin.xlane.f32.xlu1 %v2300_v49  ;;  %v8561_v49 = vpack.c.bf16 %v2331_v57, %v2328_v56  ;;  %v8563_v1 = vpack.c.bf16 %v2338_v20, %v2335_v51  ;;  %v2352_v56 = vld [vmem:[%s14015_s9 + $0x150] sm:$0xff]  ;;  %v2355_v57 = vld [vmem:[%s14015_s9 + $0x168] sm:$0xff] }
0x1088   :  { %v8577_v51 = vpack.c.bf16 %v2355_v57, %v2352_v56 }
0x10ad   :  { %v11622_v0 = vpop.f32.mrb[10].mxu1 }
0x10e4   :  { %v2900_v5 = vpop.xlane.xlu0 %2899 }
0x10e5   :  { %v2901_v2 = vadd.f32 %v2900_v5, %v2825_v36  ;;  %v2317_v36 = vld [vmem:[%s14015_s9 + $0x38] sm:$0xff]  ;;  %v8589_v5 = vpack.c.bf16 %v2333_v60, %v2330_v10  ;;  %v2354_v10 = vld [vmem:[%s14015_s9 + $0x160] sm:$0xff] }
0x10e6   :  { %v8551_v47 = vpack.c.bf16 %v2320_v22, %v2317_v36  ;;  %v2339_v36 = vld [vmem:[%s14015_s9 + $0xe8] sm:$0xff]  ;;  %v11634_v22 = vpop.f32.mrb[11].mxu1  ;;  %v2357_v60 = vld [vmem:[%s14015_s9 + $0x178] sm:$0xff] }
0x10e7   :  { %9383 = vrcp.f32 %v2901_v2  ;;  %v2334_v2 = vld [vmem:[%s14015_s9 + $0xc0] sm:$0xff]  ;;  %v8592_v14 = vpack.c.bf16 %v2339_v36, %v2336_v43  ;;  %v8601_v20 = vpack.c.bf16 %v2357_v60, %v2354_v10  ;;  %v3348_v43 = vld [vmem:[%s14021_s7 + $0x8] sm:$0xff]  ;;  %v2564_v10 = vadd.f32 %v11138_v38, %v10235_v15 }
0x10f1   :  { %v9384_v63 = vpop.eup %9383 }
0x10f2   :  { %v2992_v24 = vmul.f32 %v9384_v63, %v11458_v59  ;;  %v2326_v59 = vld [vmem:[%s14015_s9 + $0x80] sm:$0xff]  ;;  %v2341_v63 = vld [vmem:[%s14015_s9 + $0xf8] sm:$0xff] }
0x10f3   :  { %v8555_v11 = vpack.c.bf16 %v2326_v59, %v2323_v34  ;;  %v2347_v34 = vld [vmem:[%s14015_s9 + $0x128] sm:$0xff]  ;;  %v2350_v59 = vld [vmem:[%s14015_s9 + $0x140] sm:$0xff] }
0x10f4   :  { %3106 = vmatmul.mubr.f32.vlgmr.msra.gmra.mrb[14].mxu0 %v2992_v24  ;;  %7696 = vmatmul.mubr.f32.vlgmr.msra.gmra.mrb[12].mxu1 %v2992_v24  ;;  %v2340_v24 = vld [vmem:[%s14015_s9 + $0xf0] sm:$0xff] }
0x10f5   :  { %8550 = vmatpush1.bf16.msra.mxu0 %v8549_v4  ;;  %8581 = vmatpush3.bf16.msra.mxu1 %v8580_v9  ;;  %v2344_v4 = vld [vmem:[%s14015_s9 + $0x110] sm:$0xff]  ;;  %v8565_v9 = vpack.c.bf16 %v2337_v6, %v2334_v2 }
0x10f6   :  { %8552 = vmatprep.subr.bf16.mxu0 %v8551_v47  ;;  %8582 = vmatprep.subr.bf16.mxu1 %v9570_v40  ;;  %v8567_v47 = vpack.c.bf16 %v2344_v4, %v2341_v63  ;;  %v3349_v63 = vld [vmem:[%s14021_s7 + $0x10] sm:$0xff]  ;;  %v3350_v4 = vld [vmem:[%s14021_s7 + $0x18] sm:$0xff] }
0x10f7   :  { %3246 = vmatprep.mubr.f32.mxu0 %v9567_v3  ;;  %7730 = vmatprep.mubr.msk.f32.mxu1 %vm9571_vm8, %v9567_v3 }
0x10f9   :  { %8554 = vmatpush1.bf16.msra.mxu0 %v8553_v25  ;;  %8584 = vmatpush3.bf16.msra.mxu1 %v8583_v44  ;;  %v8569_v25 = vpack.c.bf16 %v2343_v7, %v2340_v24  ;;  %v8595_v44 = vpack.c.bf16 %v2345_v12, %v2342_v27  ;;  %v3352_v24 = vld [vmem:[%s14021_s7 + $0x28] sm:$0xff]  ;;  %v3353_v7 = vld [vmem:[%s14021_s7 + $0x30] sm:$0xff]  ;;  %v3354_v27 = vld [vmem:[%s14021_s7 + $0x38] sm:$0xff] }
0x10fa   :  { %8556 = vmatprep.subr.bf16.mxu0 %v8555_v11  ;;  %8585 = vmatprep.subr.bf16.mxu1 %v9570_v40  ;;  %v8571_v11 = vpack.c.bf16 %v2350_v59, %v2347_v34  ;;  %v8613_v12 = vpack.c.bf16 %v3354_v27, %v3353_v7  ;;  %v3355_v34 = vld [vmem:[%s14021_s7 + $0x40] sm:$0xff]  ;;  %v3356_v59 = vld [vmem:[%s14021_s7 + $0x48] sm:$0xff] }
0x10fd   :  { %8558 = vmatpush1.bf16.msra.mxu0 %v8557_v30  ;;  %8587 = vmatpush3.bf16.msra.mxu1 %v8586_v8  ;;  %v8573_v30 = vpack.c.bf16 %v2349_v32, %v2346_v13  ;;  %v8598_v8 = vpack.c.bf16 %v2351_v46, %v2348_v45  ;;  %v3358_v13 = vld [vmem:[%s14021_s7 + $0x58] sm:$0xff]  ;;  %v3359_v32 = vld [vmem:[%s14021_s7 + $0x60] sm:$0xff]  ;;  %v3360_v45 = vld [vmem:[%s14021_s7 + $0x68] sm:$0xff] }
0x10fe   :  { %8560 = vmatprep.subr.bf16.mxu0 %v8559_v58  ;;  %8588 = vmatprep.subr.bf16.mxu1 %v9570_v40  ;;  %v8575_v58 = vpack.c.bf16 %v2356_v48, %v2353_v28  ;;  %v8622_v46 = vpack.c.bf16 %v3360_v45, %v3359_v32  ;;  %v3361_v28 = vld [vmem:[%s14021_s7 + $0x70] sm:$0xff]  ;;  %v3362_v48 = vld [vmem:[%s14021_s7 + $0x78] sm:$0xff] }
0x1101   :  { %8562 = vmatpush1.bf16.msra.mxu0 %v8561_v49  ;;  %8590 = vmatpush3.bf16.msra.mxu1 %v8589_v5  ;;  %v2304_v49 = vcvt.f32.s32 %v11537_v61  ;;  %v3347_v61 = vld [vmem:[%s14021_s7] sm:$0xff] }
0x1102   :  { %8564 = vmatprep.subr.bf16.mxu0 %v8563_v1  ;;  %8591 = vmatprep.subr.bf16.mxu1 %v9570_v40  ;;  %v8604_v36 = vpack.c.bf16 %v3348_v43, %v3347_v61 }
0x1103   :  { %v2305_v2 = vshll.u32 %v2304_v49, 16 }
0x1105   :  { %8566 = vmatpush1.bf16.msra.mxu0 %v8565_v9  ;;  %8593 = vmatpush3.bf16.msra.mxu1 %v8592_v14  ;;  %v8607_v9 = vpack.c.bf16 %v3350_v4, %v3349_v63  ;;  %v3351_v14 = vld [vmem:[%s14021_s7 + $0x20] sm:$0xff] }
0x1106   :  { %8568 = vmatprep.subr.bf16.mxu0 %v8567_v47  ;;  %8594 = vmatprep.subr.bf16.mxu1 %v9570_v40  ;;  %v8610_v47 = vpack.c.bf16 %v3352_v24, %v3351_v14 }
0x1109   :  { %8570 = vmatpush1.bf16.msra.mxu0 %v8569_v25  ;;  %8596 = vmatpush3.bf16.msra.mxu1 %v8595_v44  ;;  %v8616_v25 = vpack.c.bf16 %v3356_v59, %v3355_v34  ;;  %v3357_v44 = vld [vmem:[%s14021_s7 + $0x50] sm:$0xff] }
0x110a   :  { %8572 = vmatprep.subr.bf16.mxu0 %v8571_v11  ;;  %8597 = vmatprep.subr.bf16.mxu1 %v9570_v40  ;;  %v8619_v11 = vpack.c.bf16 %v3358_v13, %v3357_v44 }
0x110d   :  { %8574 = vmatpush1.bf16.msra.mxu0 %v8573_v30  ;;  %8599 = vmatpush3.bf16.msra.mxu1 %v8598_v8  ;;  %v8625_v30 = vpack.c.bf16 %v3362_v48, %v3361_v28 }
0x110e   :  { %8576 = vmatprep.subr.bf16.mxu0 %v8575_v58  ;;  %8600 = vmatprep.subr.bf16.mxu1 %v9570_v40 }
0x1111   :  { %8578 = vmatpush1.bf16.msra.mxu0 %v8577_v51  ;;  %8602 = vmatpush3.bf16.msra.mxu1 %v8601_v20 }
0x1112   :  { %8603 = vmatprep.subr.bf16.mxu0 %v9570_v40 }
0x1114   :  { %v2302_v5 = vpop.xlane.xlu1 %2301 }
0x1115   :  { %v2303_v1 = vcvt.f32.s32 %v2302_v5  ;;  %v2565_v5 = vadd.f32 %v11622_v0, %v10244_v23 }
0x1117   :  { %v2306_v6 = vadd.s32 %v2305_v2, %v2303_v1 }
0x1119   :  { %vm2307_vm14 = vcmp.eq.s32.totalorder %v9801_v50, %v2306_v6 }
0x111a   :  { %7170 = vmatmul.mubr.msk.f32.vlgmr.msra.gmra.mrb[14].mxu0 %vm2307_vm14, %v9572_v39  ;;  %7731 = vmatmul.mubr.msk.f32.vlgmr.msra.gmra.mrb[14].mxu1 %vm2307_vm14, %v9572_v39 }
0x111b   :  { %7765 = vmatprep.mubr.msk.f32.mxu0 %vm9571_vm8, %v9567_v3  ;;  %8605 = vmatpush3.bf16.msra.mxu0 %v8604_v36 }
0x111c   :  { %8606 = vmatprep.subr.bf16.mxu0 %v9570_v40 }
0x111f   :  { %8608 = vmatpush3.bf16.msra.mxu0 %v8607_v9  ;;  %v2566_v9 = vadd.f32 %v11634_v22, %v10259_v55 }
0x1120   :  { %8609 = vmatprep.subr.bf16.mxu0 %v9570_v40 }
0x1123   :  { %8611 = vmatpush3.bf16.msra.mxu0 %v8610_v47 }
0x1124   :  { %8612 = vmatprep.subr.bf16.mxu0 %v9570_v40 }
0x1127   :  { %8614 = vmatpush3.bf16.msra.mxu0 %v8613_v12 }
0x1128   :  { %8615 = vmatprep.subr.bf16.mxu0 %v9570_v40 }
0x112b   :  { %8617 = vmatpush3.bf16.msra.mxu0 %v8616_v25 }
0x112c   :  { %8618 = vmatprep.subr.bf16.mxu0 %v9570_v40 }
0x112f   :  { %8620 = vmatpush3.bf16.msra.mxu0 %v8619_v11 }
0x1130   :  { %8621 = vmatprep.subr.bf16.mxu0 %v9570_v40 }
0x1133   :  { %8623 = vmatpush3.bf16.msra.mxu0 %v8622_v46 }
0x1134   :  { %8624 = vmatprep.subr.bf16.mxu0 %v9570_v40 }
0x1137   :  { %8626 = vmatpush3.bf16.msra.mxu0 %v8625_v30 }
0x11c7   :  { %v3178_v8 = vpop.f32.mrb[12].mxu1 }
0x11c8   :  { %v7697_v56 = vpop.f32.mrb[13].mxu1 }
0x11ed   :  { %v3248_v58 = vpop.f32.mrb[14].mxu0  ;;  %v3319_v57 = vpop.f32.mrb[14].mxu1 }
0x11ee   :  { %v3323_v60 = vadd.f32 %v3248_v58, %v10238_v19  ;;  %v3320_v51 = vadd.f32 %v3319_v57, %v3178_v8  ;;  %v3250_v20 = vpop.f32.mrb[15].mxu0  ;;  %v7732_v49 = vpop.f32.mrb[15].mxu1 }
0x11ef   :  { %v3324_v2 = vadd.f32 %v3250_v20, %v10247_v26 }
0x11f0   :  { %v3326_v1 = vadd.f32 %v3323_v60, %v2564_v10  ;;  %v3325_v24 = vadd.f32 %v3320_v51, %v10262_v52 }
0x11f1   :  { %v3333_v6 = vadd.f32 %v3324_v2, %v2565_v5 }
0x11f2   :  { %v7172_v61 = vmul.f32 -1.442695, %v3326_v1 }
0x11f3   :  { %v7173_v43 = vmul.f32 -1.442695, %v3333_v6 }
0x11f4   :  { %9385 = vpow2.f32 %v7172_v61 }
0x11f5   :  { %9387 = vpow2.f32 %v7173_v43 }
0x11fe   :  { %v9386_v36 = vpop.eup %9385 }
0x11ff   :  { %v3330_v63 = vadd.f32 1.0, %v9386_v36  ;;  %v9388_v38 = vpop.eup %9387 }
0x1200   :  { %v3337_v4 = vadd.f32 1.0, %v9388_v38 }
0x1201   :  { %9389 = vrcp.f32 %v3330_v63 }
0x1202   :  { %9391 = vrcp.f32 %v3337_v4 }
0x120b   :  { %v9390_v14 = vpop.eup %9389 }
0x120c   :  { %v3340_v0 = vmul.f32 %v9390_v14, %v2566_v9  ;;  %v9392_v7 = vpop.eup %9391 }
0x120d   :  { %v3343_v27 = vsub.f32 1.0, %v9392_v7  ;;  %v3345_v59 = vmul.f32 %v9392_v7, %v11019_v35 }
0x120e   :  { %v3341_v47 = vadd.f32 %v3340_v0, %v3325_v24 }
0x1210   :  { %9393 = vtanh.f32 %v3341_v47 }
0x121a   :  { %v9394_v12 = vpop.eup %9393 }
0x121b   :  { %v3344_v34 = vmul.f32 %v9394_v12, %v3343_v27 }
0x121d   :  { %v11766_v25 = vadd.f32 %v3345_v59, %v3344_v34 }
0x121f   :  { %7766 = vmatmul.mubr.f32.vlgmr.msra.gmra.mrb[16].mxu0 %v11766_v25 }
0x12f2   :  { %v3429_v44 = vpop.f32.mrb[16].mxu0 }
0x12f3   :  { %v11770_v22 = vadd.f32 %v10273_v42, %v3429_v44  ;;  %v7767_v13 = vpop.f32.mrb[17].mxu0 }
0x12f5   :  { %3433 = vmax.xlane.f32.xlu0 %v11770_v22 }
0x1382   :  { %v11773_v11 = vpop.xlane.xlu0 %3433 }
0x1383   :  { %v3435_v32 = vsub.f32 %v11770_v22, %v11773_v11 }
0x1385   :  { %v3436_v45 = vmul.f32 1.442695, %v3435_v32 }
0x1387   :  { %9395 = vpow2.f32 %v3436_v45 }
0x1391   :  { %v9396_v46 = vpop.eup %9395 }
0x1392   :  { %3438 = vadd.xlane.f32.xlu1 %v9396_v46 }
0x141f   :  { %v3439_v35 = vpop.xlane.xlu1 %3438 }
0x1420   :  { %9397 = vlog2.f32 %v3439_v35 }
0x142a   :  { %v9398_v28 = vpop.eup %9397 }
0x142b   :  { %v3441_v48 = vmul.f32 0.6931472, %v9398_v28 }
0x142d   :  { %v3442_v30 = vadd.f32 %v3441_v48, %v11773_v11 }
0x142f   :  { %v3443_v8 = vsub.f32 %v11770_v22, %v3442_v30 }
0x1430   :  { %9555 = dma.done.wait [#allocation3], 128 }
0x1431   :  { %9556 = vsyncadd [#allocation3], 4294967168  ;;  %7174 = vst [vmem:[%s14026_s11 + $0x10] sm:$0xff] %v3443_v8 }
0x1432   :  { %3490 = vsyncadd [#allocation3], 128  ;;  %v3559_v56 = vld [vmem:[%s14014_s3 + $0x8] sm:$0xff]  ;;  %3686 = vmatprep.mubr.f32.mxu1 %v9567_v3  ;;  %9400 = vset.pattern.permute.xlu0 %v9569_v16  ;;  %v3558_v10 = vld [vmem:[%s14014_s3] sm:$0xff]  ;;  %vm3491_vm15 = vcmp.ge.f32.partialorder %v11770_v22, %v11773_v11 }
0x1433   :  { %v3563_v58 = vld [vmem:[%s14014_s3 + $0x28] sm:$0xff]  ;;  %v3562_v60 = vld [vmem:[%s14014_s3 + $0x20] sm:$0xff]  ;;  %9399 = vset.pattern.permute.xlu1 %v9569_v16  ;;  %3757 = vmatprep.mubr.f32.mxu0 %v9567_v3  ;;  %v3560_v22 = vld [vmem:[%s14014_s3 + $0x10] sm:$0xff] }
0x1434   :  { %v8627_v57 = vpack.c.bf16 %v3563_v58, %v3559_v56  ;;  %v3567_v51 = vld [vmem:[%s14014_s3 + $0x48] sm:$0xff]  ;;  %v8629_v20 = vpack.c.bf16 %v3562_v60, %v3558_v10  ;;  %v3566_v5 = vld [vmem:[%s14014_s3 + $0x40] sm:$0xff] }
0x1435   :  { %v3571_v49 = vld [vmem:[%s14014_s3 + $0x68] sm:$0xff]  ;;  %v3570_v2 = vld [vmem:[%s14014_s3 + $0x60] sm:$0xff] }
0x1436   :  { %8628 = vmatprep.subr.bf16.mxu1 %v8627_v57  ;;  %v8631_v1 = vpack.c.bf16 %v3571_v49, %v3567_v51  ;;  %v3575_v6 = vld [vmem:[%s14014_s3 + $0x88] sm:$0xff]  ;;  %v8633_v43 = vpack.c.bf16 %v3570_v2, %v3566_v5  ;;  %v3574_v63 = vld [vmem:[%s14014_s3 + $0x80] sm:$0xff] }
0x1437   :  { %v3579_v61 = vld [vmem:[%s14014_s3 + $0xa8] sm:$0xff]  ;;  %8630 = vmatpush1.bf16.msra.mxu1 %v8629_v20  ;;  %v3578_v38 = vld [vmem:[%s14014_s3 + $0xa0] sm:$0xff] }
0x1438   :  { %8632 = vmatprep.subr.bf16.mxu1 %v8631_v1  ;;  %v8635_v36 = vpack.c.bf16 %v3579_v61, %v3575_v6  ;;  %v3583_v4 = vld [vmem:[%s14014_s3 + $0xc8] sm:$0xff]  ;;  %v8637_v14 = vpack.c.bf16 %v3578_v38, %v3574_v63  ;;  %v3582_v0 = vld [vmem:[%s14014_s3 + $0xc0] sm:$0xff] }
0x1439   :  { %v3587_v9 = vld [vmem:[%s14014_s3 + $0xe8] sm:$0xff]  ;;  %v3586_v47 = vld [vmem:[%s14014_s3 + $0xe0] sm:$0xff] }
0x143a   :  { %v8639_v24 = vpack.c.bf16 %v3587_v9, %v3583_v4  ;;  %v3591_v7 = vld [vmem:[%s14014_s3 + $0x108] sm:$0xff]  ;;  %v8641_v12 = vpack.c.bf16 %v3586_v47, %v3582_v0  ;;  %v3590_v59 = vld [vmem:[%s14014_s3 + $0x100] sm:$0xff] }
0x143b   :  { %8634 = vmatpush1.bf16.msra.mxu1 %v8633_v43  ;;  %v3595_v27 = vld [vmem:[%s14014_s3 + $0x128] sm:$0xff]  ;;  %v3594_v44 = vld [vmem:[%s14014_s3 + $0x120] sm:$0xff] }
0x143c   :  { %8636 = vmatprep.subr.bf16.mxu1 %v8635_v36  ;;  %v8643_v34 = vpack.c.bf16 %v3595_v27, %v3591_v7  ;;  %v3599_v13 = vld [vmem:[%s14014_s3 + $0x148] sm:$0xff]  ;;  %v8645_v45 = vpack.c.bf16 %v3594_v44, %v3590_v59  ;;  %v3598_v35 = vld [vmem:[%s14014_s3 + $0x140] sm:$0xff]  ;;  %v3819_v59 = vld [vmem:[%s14017_s1 + $0x10] sm:$0xff] }
0x143d   :  { %v3603_v32 = vld [vmem:[%s14014_s3 + $0x168] sm:$0xff]  ;;  %v3602_v28 = vld [vmem:[%s14014_s3 + $0x160] sm:$0xff] }
0x143e   :  { %v8647_v46 = vpack.c.bf16 %v3603_v32, %v3599_v13  ;;  %v3607_v48 = vld [vmem:[%s14014_s3 + $0x188] sm:$0xff]  ;;  %v8649_v8 = vpack.c.bf16 %v3602_v28, %v3598_v35  ;;  %v3606_v58 = vld [vmem:[%s14014_s3 + $0x180] sm:$0xff] }
0x143f   :  { %8638 = vmatpush1.bf16.msra.mxu1 %v8637_v14  ;;  %v3611_v30 = vld [vmem:[%s14014_s3 + $0x1a8] sm:$0xff]  ;;  %v3610_v57 = vld [vmem:[%s14014_s3 + $0x1a0] sm:$0xff] }
0x1440   :  { %8640 = vmatprep.subr.bf16.mxu1 %v8639_v24  ;;  %v8651_v56 = vpack.c.bf16 %v3611_v30, %v3607_v48  ;;  %v3615_v10 = vld [vmem:[%s14014_s3 + $0x1c8] sm:$0xff]  ;;  %v8653_v51 = vpack.c.bf16 %v3610_v57, %v3606_v58  ;;  %v3614_v49 = vld [vmem:[%s14014_s3 + $0x1c0] sm:$0xff] }
0x1441   :  { %v3619_v60 = vld [vmem:[%s14014_s3 + $0x1e8] sm:$0xff]  ;;  %v3618_v5 = vld [vmem:[%s14014_s3 + $0x1e0] sm:$0xff] }
0x1442   :  { %v8655_v20 = vpack.c.bf16 %v3619_v60, %v3615_v10  ;;  %v8657_v2 = vpack.c.bf16 %v3618_v5, %v3614_v49  ;;  %v3817_v24 = vld [vmem:[%s14017_s1] sm:$0xff]  ;;  %v3818_v7 = vld [vmem:[%s14017_s1 + $0x8] sm:$0xff]  ;;  %v3824_v5 = vld [vmem:[%s14017_s1 + $0x38] sm:$0xff] }
0x1443   :  { %8642 = vmatpush1.bf16.msra.mxu1 %v8641_v12  ;;  %v3821_v48 = vld [vmem:[%s14017_s1 + $0x20] sm:$0xff]  ;;  %v3822_v57 = vld [vmem:[%s14017_s1 + $0x28] sm:$0xff] }
0x1444   :  { %8644 = vmatprep.subr.bf16.mxu1 %v8643_v34 }
0x1447   :  { %8646 = vmatpush1.bf16.msra.mxu1 %v8645_v45 }
0x1448   :  { %8648 = vmatprep.subr.bf16.mxu1 %v8647_v46  ;;  %v3820_v46 = vld [vmem:[%s14017_s1 + $0x18] sm:$0xff] }
0x144b   :  { %8650 = vmatpush1.bf16.msra.mxu1 %v8649_v8 }
0x144c   :  { %8652 = vmatprep.subr.bf16.mxu1 %v8651_v56 }
0x144f   :  { %8654 = vmatpush1.bf16.msra.mxu1 %v8653_v51  ;;  %v3823_v51 = vld [vmem:[%s14017_s1 + $0x30] sm:$0xff] }
0x1450   :  { %8656 = vmatprep.subr.bf16.mxu1 %v8655_v20 }
0x1453   :  { %8658 = vmatpush1.bf16.msra.mxu1 %v8657_v2 }
0x1456   :  { %3687 = vmatmul.mubr.f32.vlgmr.msra.gmra.mrb[16].mxu1 %v11766_v25 }
0x1457   :  { %4305 = vmatprep.mubr.f32.mxu1 %v9567_v3 }
0x1529   :  { %v3688_v1 = vpop.f32.mrb[16].mxu1 }
0x152a   :  { %v3768_v6 = vcombine.high %v3688_v1, %v3688_v1  ;;  %v3775_v61 = vrot.slane %v3688_v1, %v9742_v54  ;;  %v11885_v43 = vpop.f32.mrb[17].mxu1 }
0x152c   :  { %v3782_v36 = vrot.slane %v3768_v6, %v9742_v54  ;;  %v3783_v63 = vcombine.high %v3775_v61, %v3775_v61  ;;  %v3791_v38 = vrot.slane %v3775_v61, %v9742_v54 }
0x152e   :  { %v3784_v4 = vcombine.high %v3782_v36, %v3782_v36  ;;  %v3798_v9 = vrot.slane %v3782_v36, %v9742_v54  ;;  %v3805_v14 = vrot.slane %v3783_v63, %v9742_v54  ;;  %v3828_v0 = vrot.slane %v3791_v38, %v9750_v62 }
0x152f   :  { %v3813_v47 = vcombine.high %v3791_v38, %v3791_v38 }
0x1530   :  { %v3812_v27 = vrot.slane %v3784_v4, %v9742_v54  ;;  %v3815_v12 = vcombine.high %v3805_v14, %v3805_v14  ;;  %v3832_v34 = vrot.slane %v3805_v14, %v9750_v62  ;;  %v3814_v44 = vcombine.high %v3798_v9, %v3798_v9 }
0x1531   :  { %v3844_v13 = vrot.slane %v3798_v9, %v9750_v62  ;;  %v3865_v32 = vadd.f32 %v3828_v0, %v3817_v24  ;;  %v3836_v45 = vrot.slane %v3813_v47, %v9750_v62 }
0x1532   :  { %v3866_v35 = vadd.f32 %v3832_v34, %v3818_v7  ;;  %v3840_v28 = vrot.slane %v3815_v12, %v9750_v62  ;;  %v3816_v30 = vcombine.high %v3812_v27, %v3812_v27  ;;  %v3848_v56 = vrot.slane %v3812_v27, %v9750_v62 }
0x1533   :  { %9401 = vtanh.f32 %v3865_v32  ;;  %v3867_v8 = vadd.f32 %v3836_v45, %v3819_v59  ;;  %v3869_v10 = vadd.f32 %v3844_v13, %v3821_v48  ;;  %v3852_v60 = vrot.slane %v3814_v44, %v9750_v62 }
0x1534   :  { %9403 = vtanh.f32 %v3866_v35  ;;  %v3868_v58 = vadd.f32 %v3840_v28, %v3820_v46  ;;  %v3870_v20 = vadd.f32 %v3848_v56, %v3822_v57  ;;  %v3856_v49 = vrot.slane %v3816_v30, %v9750_v62 }
0x1535   :  { %9405 = vtanh.f32 %v3867_v8  ;;  %v3871_v2 = vadd.f32 %v3852_v60, %v3823_v51 }
0x1536   :  { %9407 = vtanh.f32 %v3868_v58  ;;  %v3872_v1 = vadd.f32 %v3856_v49, %v3824_v5 }
0x1537   :  { %9409 = vtanh.f32 %v3869_v10 }
0x1538   :  { %9411 = vtanh.f32 %v3870_v20 }
0x1539   :  { %9413 = vtanh.f32 %v3871_v2 }
0x153a   :  { %9415 = vtanh.f32 %v3872_v1 }
0x153d   :  { %v9402_v6 = vpop.eup %9401 }
0x153e   :  { %v9404_v61 = vpop.eup %9403  ;;  %v3881_v36 = vmul.f32 %v9402_v6, %v9790_v31 }
0x153f   :  { %v9406_v63 = vpop.eup %9405  ;;  %v3882_v9 = vmul.f32 %v9404_v61, %v9790_v31 }
0x1540   :  { %3889 = vadd.xlane.f32.xlu0 %v3881_v36  ;;  %v3883_v38 = vmul.f32 %v9406_v63, %v9790_v31  ;;  %v9408_v4 = vpop.eup %9407 }
0x1541   :  { %v9410_v14 = vpop.eup %9409  ;;  %v3884_v24 = vmul.f32 %v9408_v4, %v9790_v31 }
0x1542   :  { %3893 = vadd.xlane.f32.xlu1 %v3883_v38  ;;  %v9412_v0 = vpop.eup %9411  ;;  %v3885_v47 = vmul.f32 %v9410_v14, %v9790_v31 }
0x1543   :  { %v9414_v7 = vpop.eup %9413  ;;  %v3886_v27 = vmul.f32 %v9412_v0, %v9790_v31 }
0x1544   :  { %3891 = vadd.xlane.f32.xlu0 %v3882_v9  ;;  %v9416_v12 = vpop.eup %9415  ;;  %v3887_v34 = vmul.f32 %v9414_v7, %v9790_v31 }
0x1545   :  { %v3888_v59 = vmul.f32 %v9416_v12, %v9790_v31 }
0x1546   :  { %3895 = vadd.xlane.f32.xlu1 %v3884_v24 }
0x1548   :  { %3897 = vadd.xlane.f32.xlu0 %v3885_v47 }
0x154a   :  { %3899 = vadd.xlane.f32.xlu1 %v3886_v27 }
0x154c   :  { %3901 = vadd.xlane.f32.xlu0 %v3887_v34 }
0x154e   :  { %3903 = vadd.xlane.f32.xlu1 %v3888_v59 }
0x15cd   :  { %v3890_v44 = vpop.xlane.xlu0 %3889 }
0x15ce   :  { %v3916_v45 = vrot.slane %v3890_v44, %v9805_v53 }
0x15cf   :  { %v3894_v13 = vpop.xlane.xlu1 %3893 }
0x15d0   :  { %v3924_v35 = vrot.slane %v3894_v13, %v9805_v53 }
0x15d1   :  { %v3892_v32 = vpop.xlane.xlu0 %3891 }
0x15d2   :  { %v3920_v46 = vrot.slane %v3892_v32, %v9805_v53 }
0x15d3   :  { %v3896_v28 = vpop.xlane.xlu1 %3895 }
0x15d4   :  { %v3945_v48 = vsel %vm458_vm0, %v3920_v46, %v3916_v45  ;;  %v3928_v30 = vrot.slane %v3896_v28, %v9805_v53 }
0x15d5   :  { %v3946_v8 = vsel %vm460_vm1, %v3924_v35, %v3945_v48  ;;  %v3898_v56 = vpop.xlane.xlu0 %3897 }
0x15d6   :  { %v3947_v58 = vsel %vm462_vm2, %v3928_v30, %v3946_v8  ;;  %v3932_v57 = vrot.slane %v3898_v56, %v9805_v53 }
0x15d7   :  { %v3900_v10 = vpop.xlane.xlu1 %3899 }
0x15d8   :  { %v3936_v60 = vrot.slane %v3900_v10, %v9805_v53  ;;  %v3948_v51 = vsel %vm464_vm3, %v3932_v57, %v3947_v58 }
0x15d9   :  { %v3902_v20 = vpop.xlane.xlu0 %3901 }
0x15da   :  { %v3940_v49 = vrot.slane %v3902_v20, %v9805_v53  ;;  %v3949_v5 = vsel %vm466_vm4, %v3936_v60, %v3948_v51 }
0x15db   :  { %v3904_v2 = vpop.xlane.xlu1 %3903 }
0x15dc   :  { %v3944_v1 = vrot.slane %v3904_v2, %v9805_v53  ;;  %v3950_v6 = vsel %vm468_vm5, %v3940_v49, %v3949_v5 }
0x15de   :  { %v3951_v61 = vsel %vm470_vm6, %v3944_v1, %v3950_v6 }
0x15df   :  { %v3953_v36 = vsel %vm473_vm7, %v3951_v61, -inf  ;;  %v11969_v61 = vsel %vm3491_vm15, %v9801_v50, 128 }
0x15e0   :  { %3954 = vmax.xlane.f32.xlu0 %v3953_v36 }
0x166d   :  { %v3955_v63 = vpop.xlane.xlu0 %3954 }
0x166e   :  { %v11948_v38 = vmax.f32 %v3955_v63, -1e+30  ;;  %v3561_v63 = vld [vmem:[%s14014_s3 + $0x18] sm:$0xff] }
0x1670   :  { %v3968_v4 = vrot.slane %v11948_v38, %v9826_v17  ;;  %v3964_v9 = vrot.slane %v11948_v38, %v9750_v62  ;;  %v3972_v14 = vrot.slane %v11948_v38, %v9829_v18  ;;  %v3976_v7 = vrot.slane %v11948_v38, %v9834_v21 }
0x1671   :  { %v3980_v45 = vrot.slane %v11948_v38, %v9845_v29  ;;  %v3988_v48 = vrot.slane %v11948_v38, %v9853_v37  ;;  %v3992_v57 = vrot.slane %v11948_v38, %v9858_v41 }
0x1672   :  { %v4002_v24 = vsub.f32 %v3892_v32, %v3968_v4  ;;  %v4001_v0 = vsub.f32 %v3890_v44, %v3964_v9  ;;  %v4003_v47 = vsub.f32 %v3894_v13, %v3972_v14  ;;  %v4004_v59 = vsub.f32 %v3896_v28, %v3976_v7  ;;  %v3565_v4 = vld [vmem:[%s14014_s3 + $0x38] sm:$0xff]  ;;  %v3564_v9 = vld [vmem:[%s14014_s3 + $0x30] sm:$0xff] }
0x1673   :  { %v4005_v35 = vsub.f32 %v3898_v56, %v3980_v45  ;;  %v3984_v32 = vrot.slane %v11948_v38, %v9848_v33  ;;  %v4007_v58 = vsub.f32 %v3902_v20, %v3988_v48  ;;  %v4008_v51 = vsub.f32 %v3904_v2, %v3992_v57  ;;  %v3569_v14 = vld [vmem:[%s14014_s3 + $0x58] sm:$0xff]  ;;  %v3568_v7 = vld [vmem:[%s14014_s3 + $0x50] sm:$0xff]  ;;  %v4194_v57 = vld [vmem:[%s14019_s5 + $0x8] sm:$0xff] }
0x1674   :  { %v4011_v27 = vmul.f32 1.442695, %v4002_v24  ;;  %v4009_v12 = vmul.f32 1.442695, %v4001_v0  ;;  %v4013_v34 = vmul.f32 1.442695, %v4003_v47  ;;  %v8659_v11 = vpack.c.bf16 %v3565_v4, %v3561_v63 }
0x1675   :  { %v4015_v46 = vmul.f32 1.442695, %v4004_v59  ;;  %v4017_v44 = vmul.f32 1.442695, %v4005_v35  ;;  %v4006_v13 = vsub.f32 %v3900_v10, %v3984_v32  ;;  %v4021_v60 = vmul.f32 1.442695, %v4007_v58 }
0x1676   :  { %9417 = vpow2.f32 %v4011_v27  ;;  %v4023_v10 = vmul.f32 1.442695, %v4008_v51  ;;  %v3494_v2 = vshra.s32 %v11969_v61, 16  ;;  %v3573_v24 = vld [vmem:[%s14014_s3 + $0x78] sm:$0xff]  ;;  %v8661_v0 = vpack.c.bf16 %v3564_v9, %v3560_v22  ;;  %v3572_v27 = vld [vmem:[%s14014_s3 + $0x70] sm:$0xff]  ;;  %8660 = vmatprep.subr.bf16.mxu0 %v8659_v11  ;;  %v4202_v22 = vld [vmem:[%s14019_s5 + $0x48] sm:$0xff] }
0x1677   :  { %9419 = vpow2.f32 %v4009_v12  ;;  %v4019_v28 = vmul.f32 1.442695, %v4006_v13  ;;  %v8663_v47 = vpack.c.bf16 %v3573_v24, %v3569_v14  ;;  %v3577_v12 = vld [vmem:[%s14014_s3 + $0x98] sm:$0xff]  ;;  %v8665_v59 = vpack.c.bf16 %v3572_v27, %v3568_v7  ;;  %v3580_v35 = vld [vmem:[%s14014_s3 + $0xb0] sm:$0xff]  ;;  %v4206_v24 = vld [vmem:[%s14019_s5 + $0x68] sm:$0xff] }
0x1678   :  { %9421 = vpow2.f32 %v4013_v34  ;;  %v11972_v36 = vcvt.s32.f32 %v3494_v2  ;;  %v3581_v34 = vld [vmem:[%s14014_s3 + $0xb8] sm:$0xff]  ;;  %8662 = vmatpush1.bf16.msra.mxu0 %v8661_v0  ;;  %v4203_v63 = vld [vmem:[%s14019_s5 + $0x50] sm:$0xff] }
0x1679   :  { %9423 = vpow2.f32 %v4015_v46  ;;  %8664 = vmatprep.subr.bf16.mxu0 %v8663_v47  ;;  %v8667_v45 = vpack.c.bf16 %v3581_v34, %v3577_v12  ;;  %v3576_v46 = vld [vmem:[%s14014_s3 + $0x90] sm:$0xff]  ;;  %v3585_v32 = vld [vmem:[%s14014_s3 + $0xd8] sm:$0xff]  ;;  %v4209_v47 = vld [vmem:[%s14019_s5 + $0x80] sm:$0xff] }
0x167a   :  { %9425 = vpow2.f32 %v4017_v44  ;;  %v3589_v44 = vld [vmem:[%s14014_s3 + $0xf8] sm:$0xff]  ;;  %v8669_v13 = vpack.c.bf16 %v3580_v35, %v3576_v46  ;;  %v4199_v4 = vld [vmem:[%s14019_s5 + $0x30] sm:$0xff]  ;;  %v8699_v12 = vpack.c.bf16 %v4209_v47, %v4206_v24  ;;  %v4205_v34 = vld [vmem:[%s14019_s5 + $0x60] sm:$0xff] }
0x167b   :  { %9427 = vpow2.f32 %v4019_v28  ;;  %v8671_v48 = vpack.c.bf16 %v3589_v44, %v3585_v32  ;;  %v3593_v28 = vld [vmem:[%s14014_s3 + $0x118] sm:$0xff]  ;;  %v8697_v0 = vpack.c.bf16 %v4202_v22, %v4199_v4  ;;  %v3600_v27 = vld [vmem:[%s14014_s3 + $0x150] sm:$0xff]  ;;  %v4201_v24 = vld [vmem:[%s14019_s5 + $0x40] sm:$0xff] }
0x167c   :  { %9429 = vpow2.f32 %v4021_v60  ;;  %8666 = vmatpush1.bf16.msra.mxu0 %v8665_v59  ;;  %v3597_v58 = vld [vmem:[%s14014_s3 + $0x138] sm:$0xff]  ;;  %v4193_v60 = vld [vmem:[%s14019_s5] sm:$0xff]  ;;  %v3604_v46 = vld [vmem:[%s14014_s3 + $0x170] sm:$0xff] }
0x167d   :  { %9431 = vpow2.f32 %v4023_v10  ;;  %8668 = vmatprep.subr.bf16.mxu0 %v8667_v45  ;;  %v4196_v51 = vld [vmem:[%s14019_s5 + $0x18] sm:$0xff]  ;;  %v3592_v10 = vld [vmem:[%s14014_s3 + $0x110] sm:$0xff]  ;;  %v8675_v2 = vpack.c.bf16 %v3597_v58, %v3593_v28 }
0x167e   :  { %v3601_v11 = vld [vmem:[%s14014_s3 + $0x158] sm:$0xff]  ;;  %v4215_v32 = vld [vmem:[%s14019_s5 + $0xb0] sm:$0xff] }
0x167f   :  { %v3605_v9 = vld [vmem:[%s14014_s3 + $0x178] sm:$0xff]  ;;  %v4211_v58 = vld [vmem:[%s14019_s5 + $0x90] sm:$0xff] }
0x1680   :  { %v9418_v30 = vpop.eup %9417  ;;  %8670 = vmatpush1.bf16.msra.mxu0 %v8669_v13  ;;  %v4208_v59 = vld [vmem:[%s14019_s5 + $0x78] sm:$0xff]  ;;  %v8679_v45 = vpack.c.bf16 %v3605_v9, %v3601_v11  ;;  %v3620_v4 = vld [vmem:[%s14014_s3 + $0x1f0] sm:$0xff]  ;;  %v4198_v9 = vld [vmem:[%s14019_s5 + $0x28] sm:$0xff] }
0x1681   :  { %v9420_v8 = vpop.eup %9419  ;;  %4038 = vperm.xlu0 %9400, %v9418_v30   ;;  %v3584_v30 = vld [vmem:[%s14014_s3 + $0xd0] sm:$0xff]  ;;  %8672 = vmatprep.subr.bf16.mxu0 %v8671_v48  ;;  %v4212_v35 = vld [vmem:[%s14019_s5 + $0x98] sm:$0xff]  ;;  %v8701_v48 = vpack.c.bf16 %v4208_v59, %v4205_v34  ;;  %v4213_v34 = vld [vmem:[%s14019_s5 + $0xa0] sm:$0xff] }
0x1682   :  { %4035 = vperm.xlu1 %9399, %v9420_v8   ;;  %v9422_v56 = vpop.eup %9421  ;;  %v3588_v8 = vld [vmem:[%s14014_s3 + $0xf0] sm:$0xff]  ;;  %v3609_v44 = vld [vmem:[%s14014_s3 + $0x198] sm:$0xff]  ;;  %v8703_v28 = vpack.c.bf16 %v4215_v32, %v4212_v35  ;;  %v4102_v35 = vld [vmem:[%s14020_s0] sm:$0xff] }
0x1683   :  { %v9424_v49 = vpop.eup %9423  ;;  %v3613_v13 = vld [vmem:[%s14014_s3 + $0x1b8] sm:$0xff]  ;;  %v4195_v11 = vld [vmem:[%s14019_s5 + $0x10] sm:$0xff] }
0x1684   :  { %v9426_v5 = vpop.eup %9425  ;;  %v4216_v59 = vld [vmem:[%s14019_s5 + $0xb8] sm:$0xff] }
0x1685   :  { %v9428_v1 = vpop.eup %9427 }
0x1686   :  { %4041 = vperm.xlu1 %9399, %v9422_v56   ;;  %v9430_v6 = vpop.eup %9429  ;;  %v4197_v56 = vld [vmem:[%s14019_s5 + $0x20] sm:$0xff] }
0x1687   :  { %v9432_v20 = vpop.eup %9431 }
0x168a   :  { %4044 = vperm.xlu1 %9399, %v9424_v49   ;;  %v8673_v49 = vpack.c.bf16 %v3588_v8, %v3584_v30  ;;  %v8681_v30 = vpack.c.bf16 %v3604_v46, %v3600_v27  ;;  %v3608_v8 = vld [vmem:[%s14014_s3 + $0x190] sm:$0xff]  ;;  %v4210_v27 = vld [vmem:[%s14019_s5 + $0x88] sm:$0xff] }
0x168b   :  { %v4103_v46 = vld [vmem:[%s14020_s0 + $0x8] sm:$0xff] }
0x168c   :  { %8674 = vmatpush1.bf16.msra.mxu0 %v8673_v49  ;;  %v4221_v49 = vld [vmem:[%s14019_s5 + $0xe0] sm:$0xff] }
0x168d   :  { %8676 = vmatprep.subr.bf16.mxu0 %v8675_v2 }
0x168e   :  { %4047 = vperm.xlu1 %9399, %v9426_v5   ;;  %v3596_v5 = vld [vmem:[%s14014_s3 + $0x130] sm:$0xff] }
0x168f   :  { %v8677_v7 = vpack.c.bf16 %v3596_v5, %v3592_v10  ;;  %v3617_v10 = vld [vmem:[%s14014_s3 + $0x1d8] sm:$0xff] }
0x1690   :  { %v3621_v5 = vld [vmem:[%s14014_s3 + $0x1f8] sm:$0xff] }
0x1691   :  { %8678 = vmatpush1.bf16.msra.mxu0 %v8677_v7  ;;  %v8687_v2 = vpack.c.bf16 %v3621_v5, %v3617_v10  ;;  %v4207_v7 = vld [vmem:[%s14019_s5 + $0x70] sm:$0xff] }
0x1692   :  { %4050 = vperm.xlu1 %9399, %v9428_v1   ;;  %v8691_v1 = vpack.c.bf16 %v4197_v56, %v4194_v57  ;;  %v4214_v57 = vld [vmem:[%s14019_s5 + $0xa8] sm:$0xff]  ;;  %8680 = vmatprep.subr.bf16.mxu0 %v8679_v45  ;;  %v8683_v56 = vpack.c.bf16 %v3613_v13, %v3609_v44  ;;  %v8733_v45 = vpack.c.bf16 %v4216_v59, %v4213_v34 }
0x1693   :  { %v4107_v34 = vld [vmem:[%s14020_s0 + $0x28] sm:$0xff] }
0x1694   :  { %8692 = vmatprep.subr.bf16.mxu1 %v8691_v1  ;;  %v8705_v1 = vpack.c.bf16 %v4214_v57, %v4211_v58 }
0x1695   :  { %8682 = vmatpush1.bf16.msra.mxu0 %v8681_v30 }
0x1696   :  { %4053 = vperm.xlu1 %9399, %v9430_v6   ;;  %v8693_v6 = vpack.c.bf16 %v4196_v51, %v4193_v60  ;;  %v3612_v60 = vld [vmem:[%s14014_s3 + $0x1b0] sm:$0xff]  ;;  %v4218_v51 = vld [vmem:[%s14019_s5 + $0xc8] sm:$0xff]  ;;  %8684 = vmatprep.subr.bf16.mxu0 %v8683_v56 }
0x1698   :  { %8694 = vmatpush1.bf16.msra.mxu1 %v8693_v6  ;;  %v8685_v6 = vpack.c.bf16 %v3612_v60, %v3608_v8  ;;  %v4104_v8 = vld [vmem:[%s14020_s0 + $0x10] sm:$0xff] }
0x169a   :  { %4056 = vperm.xlu1 %9399, %v9432_v20   ;;  %v4200_v20 = vld [vmem:[%s14019_s5 + $0x38] sm:$0xff]  ;;  %8686 = vmatpush1.bf16.msra.mxu0 %v8685_v6 }
0x169b   :  { %v8695_v14 = vpack.c.bf16 %v4203_v63, %v4200_v20  ;;  %v8707_v20 = vpack.c.bf16 %v4221_v49, %v4218_v51  ;;  %v3616_v63 = vld [vmem:[%s14014_s3 + $0x1d0] sm:$0xff]  ;;  %8688 = vmatprep.subr.bf16.mxu0 %v8687_v2  ;;  %v4105_v49 = vld [vmem:[%s14020_s0 + $0x18] sm:$0xff] }
0x169c   :  { %v8689_v22 = vpack.c.bf16 %v3620_v4, %v3616_v63 }
0x169d   :  { %8696 = vmatprep.subr.bf16.mxu1 %v8695_v14  ;;  %v8724_v14 = vpack.c.bf16 %v4198_v9, %v4195_v11 }
0x169e   :  { %8698 = vmatpush1.bf16.msra.mxu1 %v8697_v0  ;;  %8690 = vmatpush1.bf16.msra.mxu0 %v8689_v22  ;;  %v4204_v0 = vld [vmem:[%s14019_s5 + $0x58] sm:$0xff] }
0x169f   :  { %8700 = vmatprep.subr.bf16.mxu1 %v8699_v12  ;;  %8723 = vmatprep.subr.bf16.mxu0 %v9570_v40  ;;  %v8727_v47 = vpack.c.bf16 %v4204_v0, %v4201_v24  ;;  %v8730_v12 = vpack.c.bf16 %v4210_v27, %v4207_v7 }
0x16a1   :  { %3758 = vmatmul.mubr.f32.vlgmr.msra.gmra.mrb[18].mxu0 %v11766_v25 }
0x16a2   :  { %8702 = vmatpush1.bf16.msra.mxu1 %v8701_v48  ;;  %8725 = vmatpush3.bf16.msra.mxu0 %v8724_v14  ;;  %v4106_v14 = vld [vmem:[%s14020_s0 + $0x20] sm:$0xff] }
0x16a3   :  { %8704 = vmatprep.subr.bf16.mxu1 %v8703_v28  ;;  %7800 = vmatprep.mubr.msk.f32.mxu0 %vm9571_vm8, %v9567_v3 }
0x16a4   :  { %8726 = vmatprep.subr.bf16.mxu0 %v9570_v40 }
0x16a6   :  { %8706 = vmatpush1.bf16.msra.mxu1 %v8705_v1  ;;  %8728 = vmatpush3.bf16.msra.mxu0 %v8727_v47 }
0x16a7   :  { %8708 = vmatprep.subr.bf16.mxu1 %v8707_v20  ;;  %8729 = vmatprep.subr.bf16.mxu0 %v9570_v40 }
0x16aa   :  { %8731 = vmatpush3.bf16.msra.mxu0 %v8730_v12 }
0x16ab   :  { %8732 = vmatprep.subr.bf16.mxu0 %v9570_v40 }
0x16ae   :  { %8734 = vmatpush3.bf16.msra.mxu0 %v8733_v45 }
0x16af   :  { %8735 = vmatprep.subr.bf16.mxu0 %v9570_v40 }
0x16be   :  { %3497 = vmin.xlane.f32.xlu1 %v11972_v36 }
0x1700   :  { %v4039_v32 = vpop.permute.xlu0 %4038 }
0x1701   :  { %v4119_v44 = vmul.f32 %v4103_v46, %v4039_v32  ;;  %v4036_v13 = vpop.permute.xlu1 %4035  ;;  %v4065_v46 = vrot.slane %v4039_v32, %v9805_v53  ;;  %v4108_v32 = vld [vmem:[%s14020_s0 + $0x30] sm:$0xff] }
0x1702   :  { %v4118_v48 = vmul.f32 %v4102_v35, %v4036_v13  ;;  %v4061_v35 = vrot.slane %v4036_v13, %v9805_v53 }
0x1703   :  { %v4132_v30 = vrot.slane %v4119_v44, 4 }
0x1704   :  { %v4126_v28 = vrot.slane %v4118_v48, 4 }
0x1705   :  { %v4133_v58 = vadd.f32 %v4132_v30, %v4119_v44  ;;  %v4042_v57 = vpop.permute.xlu1 %4041  ;;  %v3957_v30 = vsub.f32 -1e+30, %v11948_v38 }
0x1706   :  { %v4127_v56 = vadd.f32 %v4126_v28, %v4118_v48  ;;  %v4120_v60 = vmul.f32 %v4104_v8, %v4042_v57  ;;  %v4069_v8 = vrot.slane %v4042_v57, %v9805_v53  ;;  %v4090_v57 = vsel %vm458_vm0, %v4065_v46, %v4061_v35 }
0x1707   :  { %v4134_v51 = vrot.slane %v4133_v58, 2 }
0x1708   :  { %v4128_v10 = vrot.slane %v4127_v56, 2  ;;  %v4138_v5 = vrot.slane %v4120_v60, 4 }
0x1709   :  { %v4135_v1 = vadd.f32 %v4134_v51, %v4133_v58  ;;  %v4045_v6 = vpop.permute.xlu1 %4044 }
0x170a   :  { %v4129_v20 = vadd.f32 %v4128_v10, %v4127_v56  ;;  %v4139_v2 = vadd.f32 %v4138_v5, %v4120_v60  ;;  %v4121_v63 = vmul.f32 %v4105_v49, %v4045_v6  ;;  %v4073_v51 = vrot.slane %v4045_v6, %v9805_v53 }
0x170b   :  { %v4136_v4 = vrot.slane %v4135_v1, 1  ;;  %v4091_v6 = vsel %vm460_vm1, %v4069_v8, %v4090_v57 }
0x170c   :  { %v4130_v22 = vrot.slane %v4129_v20, 1  ;;  %v4140_v11 = vrot.slane %v4139_v2, 2  ;;  %v4144_v9 = vrot.slane %v4121_v63, 4 }
0x170d   :  { %v4048_v24 = vpop.permute.xlu1 %4047  ;;  %v4137_v7 = vadd.f32 %v4136_v4, %v4135_v1 }
0x170e   :  { %v4141_v0 = vadd.f32 %v4140_v11, %v4139_v2  ;;  %v4145_v47 = vadd.f32 %v4144_v9, %v4121_v63  ;;  %v4131_v27 = vadd.f32 %v4130_v22, %v4129_v20  ;;  %v4122_v12 = vmul.f32 %v4106_v14, %v4048_v24 }
0x170f   :  { %v4077_v5 = vrot.slane %v4048_v24, %v9805_v53  ;;  %v3958_v63 = vmul.f32 1.442695, %v3957_v30  ;;  %v4092_v9 = vsel %vm462_vm2, %v4073_v51, %v4091_v6  ;;  %v4109_v24 = vld [vmem:[%s14020_s0 + $0x38] sm:$0xff] }
0x1710   :  { %v4142_v59 = vrot.slane %v4141_v0, 1  ;;  %v4146_v45 = vrot.slane %v4145_v47, 2  ;;  %v4150_v44 = vrot.slane %v4122_v12, 4  ;;  %v4182_v60 = vsel %vm458_vm0, %v4137_v7, %v4131_v27 }
0x1711   :  { %v4051_v48 = vpop.permute.xlu1 %4050  ;;  %v4093_v27 = vsel %vm464_vm3, %v4077_v5, %v4092_v9  ;;  %9433 = vpow2.f32 %v3958_v63 }
0x1712   :  { %v4143_v28 = vadd.f32 %v4142_v59, %v4141_v0  ;;  %v4147_v58 = vadd.f32 %v4146_v45, %v4145_v47  ;;  %v4123_v56 = vmul.f32 %v4107_v34, %v4051_v48  ;;  %v4151_v49 = vadd.f32 %v4150_v44, %v4122_v12 }
0x1713   :  { %v4081_v20 = vrot.slane %v4051_v48, %v9805_v53 }
0x1714   :  { %v4183_v13 = vsel %vm460_vm1, %v4143_v28, %v4182_v60  ;;  %v4148_v10 = vrot.slane %v4147_v58, 1  ;;  %v4156_v38 = vrot.slane %v4123_v56, 4  ;;  %v4152_v1 = vrot.slane %v4151_v49, 2 }
0x1715   :  { %v4054_v2 = vpop.permute.xlu1 %4053  ;;  %v4094_v45 = vsel %vm466_vm4, %v4081_v20, %v4093_v27 }
0x1716   :  { %v4149_v4 = vadd.f32 %v4148_v10, %v4147_v58  ;;  %v4157_v22 = vadd.f32 %v4156_v38, %v4123_v56  ;;  %v4124_v11 = vmul.f32 %v4108_v32, %v4054_v2  ;;  %v4153_v14 = vadd.f32 %v4152_v1, %v4151_v49 }
0x1717   :  { %v4085_v0 = vrot.slane %v4054_v2, %v9805_v53 }
0x1718   :  { %v4158_v47 = vrot.slane %v4157_v22, 2  ;;  %v4162_v7 = vrot.slane %v4124_v11, 4  ;;  %v4184_v12 = vsel %vm462_vm2, %v4149_v4, %v4183_v13  ;;  %v4154_v34 = vrot.slane %v4153_v14, 1 }
0x1719   :  { %v4057_v59 = vpop.permute.xlu1 %4056  ;;  %v4095_v8 = vsel %vm468_vm5, %v4085_v0, %v4094_v45  ;;  %v4220_v0 = vld [vmem:[%s14019_s5 + $0xd8] sm:$0xff]  ;;  %v4223_v45 = vld [vmem:[%s14019_s5 + $0xf0] sm:$0xff] }
0x171a   :  { %v4159_v46 = vadd.f32 %v4158_v47, %v4157_v22  ;;  %v4163_v35 = vadd.f32 %v4162_v7, %v4124_v11  ;;  %v4089_v44 = vrot.slane %v4057_v59, %v9805_v53  ;;  %v4125_v48 = vmul.f32 %v4109_v24, %v4057_v59  ;;  %v4219_v24 = vld [vmem:[%s14019_s5 + $0xd0] sm:$0xff]  ;;  %v4222_v7 = vld [vmem:[%s14019_s5 + $0xe8] sm:$0xff] }
0x171b   :  { %v4155_v30 = vadd.f32 %v4154_v34, %v4153_v14  ;;  %v9434_v2 = vpop.eup %9433  ;;  %v4217_v14 = vld [vmem:[%s14019_s5 + $0xc0] sm:$0xff]  ;;  %v8736_v27 = vpack.c.bf16 %v4222_v7, %v4219_v24  ;;  %v4227_v34 = vld [vmem:[%s14019_s5 + $0x110] sm:$0xff] }
0x171c   :  { %v4160_v28 = vrot.slane %v4159_v46, 1  ;;  %v4164_v58 = vrot.slane %v4163_v35, 2  ;;  %v4168_v56 = vrot.slane %v4125_v48, 4  ;;  %v4096_v60 = vsel %vm470_vm6, %v4089_v44, %v4095_v8  ;;  %v4230_v8 = vld [vmem:[%s14019_s5 + $0x128] sm:$0xff] }
0x171d   :  { %v4098_v51 = vsel %vm473_vm7, %v4096_v60, 0.0  ;;  %v4185_v49 = vsel %vm464_vm3, %v4155_v30, %v4184_v12  ;;  %v4025_v22 = vmul.f32 0.0, %v9434_v2  ;;  %v8709_v47 = vpack.c.bf16 %v4220_v0, %v4217_v14  ;;  %v4224_v12 = vld [vmem:[%s14019_s5 + $0xf8] sm:$0xff]  ;;  %8737 = vmatpush3.bf16.msra.mxu0 %v8736_v27 }
0x171e   :  { %v4161_v32 = vadd.f32 %v4160_v28, %v4159_v46  ;;  %v4165_v13 = vadd.f32 %v4164_v58, %v4163_v35  ;;  %v4169_v10 = vadd.f32 %v4168_v56, %v4125_v48  ;;  %4099 = vadd.xlane.f32.xlu0 %v4098_v51  ;;  %v8711_v59 = vpack.c.bf16 %v4227_v34, %v4224_v12  ;;  %v4226_v46 = vld [vmem:[%s14019_s5 + $0x108] sm:$0xff]  ;;  %v4225_v35 = vld [vmem:[%s14019_s5 + $0x100] sm:$0xff]  ;;  %v4228_v48 = vld [vmem:[%s14019_s5 + $0x118] sm:$0xff] }
0x171f   :  { %8710 = vmatpush1.bf16.msra.mxu1 %v8709_v47  ;;  %8738 = vmatprep.subr.bf16.mxu0 %v9570_v40  ;;  %v8713_v44 = vpack.c.bf16 %v4226_v46, %v4223_v45  ;;  %v8739_v30 = vpack.c.bf16 %v4228_v48, %v4225_v35  ;;  %v4233_v28 = vld [vmem:[%s14019_s5 + $0x140] sm:$0xff]  ;;  %v4232_v60 = vld [vmem:[%s14019_s5 + $0x138] sm:$0xff]  ;;  %v4231_v51 = vld [vmem:[%s14019_s5 + $0x130] sm:$0xff]  ;;  %v3493_v0 = vand.u32 65535, %v11969_v61 }
0x1720   :  { %v4166_v5 = vrot.slane %v4165_v13, 1  ;;  %v4170_v38 = vrot.slane %v4169_v10, 2  ;;  %v4186_v57 = vsel %vm466_vm4, %v4161_v32, %v4185_v49  ;;  %8712 = vmatprep.subr.bf16.mxu1 %v8711_v59  ;;  %v4229_v58 = vld [vmem:[%s14019_s5 + $0x120] sm:$0xff]  ;;  %v8715_v56 = vpack.c.bf16 %v4233_v28, %v4230_v8  ;;  %v4234_v49 = vld [vmem:[%s14019_s5 + $0x148] sm:$0xff]  ;;  %v4240_v2 = vld [vmem:[%s14019_s5 + $0x178] sm:$0xff] }
0x1721   :  { %8740 = vmatpush3.bf16.msra.mxu0 %v8739_v30  ;;  %v8717_v32 = vpack.c.bf16 %v4232_v60, %v4229_v58  ;;  %v3495_v24 = vcvt.s32.f32 %v3493_v0  ;;  %v3510_v34 = vld [vmem:[%s14015_s9] sm:$0xff]  ;;  %v3513_v59 = vld [vmem:[%s14015_s9 + $0x18] sm:$0xff]  ;;  %v3512_v61 = vld [vmem:[%s14015_s9 + $0x10] sm:$0xff] }
0x1722   :  { %v4167_v1 = vadd.f32 %v4166_v5, %v4165_v13  ;;  %v4171_v20 = vadd.f32 %v4170_v38, %v4169_v10  ;;  %8741 = vmatprep.subr.bf16.mxu0 %v9570_v40  ;;  %v8742_v13 = vpack.c.bf16 %v4234_v49, %v4231_v51  ;;  %v4236_v10 = vld [vmem:[%s14019_s5 + $0x158] sm:$0xff]  ;;  %v4239_v5 = vld [vmem:[%s14019_s5 + $0x170] sm:$0xff]  ;;  %v8749_v35 = vpack.c.bf16 %v3513_v59, %v3510_v34  ;;  %v3519_v28 = vld [vmem:[%s14015_s9 + $0x48] sm:$0xff] }
0x1723   :  { %8714 = vmatpush1.bf16.msra.mxu1 %v8713_v44  ;;  %v4235_v38 = vld [vmem:[%s14019_s5 + $0x150] sm:$0xff]  ;;  %v3518_v58 = vld [vmem:[%s14015_s9 + $0x40] sm:$0xff]  ;;  %v3523_v60 = vld [vmem:[%s14015_s9 + $0x68] sm:$0xff] }
0x1724   :  { %v4172_v63 = vrot.slane %v4171_v20, 1  ;;  %v4187_v6 = vsel %vm468_vm5, %v4167_v1, %v4186_v57  ;;  %8716 = vmatprep.subr.bf16.mxu1 %v8715_v56  ;;  %v8719_v57 = vpack.c.bf16 %v4239_v5, %v4236_v10  ;;  %v4238_v1 = vld [vmem:[%s14019_s5 + $0x168] sm:$0xff]  ;;  %v3520_v45 = vld [vmem:[%s14015_s9 + $0x50] sm:$0xff]  ;;  %v3521_v56 = vld [vmem:[%s14015_s9 + $0x58] sm:$0xff] }
0x1725   :  { %8743 = vmatpush3.bf16.msra.mxu0 %v8742_v13  ;;  %v3516_v48 = vld [vmem:[%s14015_s9 + $0x30] sm:$0xff]  ;;  %v8783_v49 = vpack.c.bf16 %v3521_v56, %v3518_v58  ;;  %v3525_v10 = vld [vmem:[%s14015_s9 + $0x78] sm:$0xff]  ;;  %v3535_v0 = vld [vmem:[%s14015_s9 + $0xc8] sm:$0xff] }
0x1726   :  { %v4173_v4 = vadd.f32 %v4172_v63, %v4171_v20  ;;  %v4237_v20 = vld [vmem:[%s14019_s5 + $0x160] sm:$0xff]  ;;  %v8721_v63 = vpack.c.bf16 %v4238_v1, %v4235_v38  ;;  %8744 = vmatprep.subr.bf16.mxu0 %v9570_v40  ;;  %v8753_v51 = vpack.c.bf16 %v3519_v28, %v3516_v48  ;;  %v3524_v5 = vld [vmem:[%s14015_s9 + $0x70] sm:$0xff]  ;;  %v3527_v38 = vld [vmem:[%s14015_s9 + $0x88] sm:$0xff] }
0x1727   :  { %8718 = vmatpush1.bf16.msra.mxu1 %v8717_v32  ;;  %v3522_v32 = vld [vmem:[%s14015_s9 + $0x60] sm:$0xff]  ;;  %v3532_v1 = vld [vmem:[%s14015_s9 + $0xb0] sm:$0xff]  ;;  %v3543_v28 = vld [vmem:[%s14015_s9 + $0x108] sm:$0xff] }
0x1728   :  { %v4188_v11 = vsel %vm470_vm6, %v4173_v4, %v4187_v6  ;;  %v3511_v6 = vld [vmem:[%s14015_s9 + $0x8] sm:$0xff]  ;;  %v3514_v4 = vld [vmem:[%s14015_s9 + $0x20] sm:$0xff]  ;;  %8720 = vmatprep.subr.bf16.mxu1 %v8719_v57  ;;  %v3529_v57 = vld [vmem:[%s14015_s9 + $0x98] sm:$0xff] }
0x1729   :  { %v12205_v9 = vadd.f32 %v4188_v11, %v4025_v22  ;;  %v8745_v11 = vpack.c.bf16 %v4240_v2, %v4237_v20  ;;  %v8747_v14 = vpack.c.bf16 %v3514_v4, %v3511_v6  ;;  %v8757_v20 = vpack.c.bf16 %v3525_v10, %v3522_v32  ;;  %v3531_v4 = vld [vmem:[%s14015_s9 + $0xa8] sm:$0xff]  ;;  %v3542_v58 = vld [vmem:[%s14015_s9 + $0x100] sm:$0xff]  ;;  %v3545_v56 = vld [vmem:[%s14015_s9 + $0x118] sm:$0xff] }
0x172a   :  { %v8786_v2 = vpack.c.bf16 %v3527_v38, %v3524_v5  ;;  %v8759_v6 = vpack.c.bf16 %v3532_v1, %v3529_v57  ;;  %v3546_v32 = vld [vmem:[%s14015_s9 + $0x120] sm:$0xff]  ;;  %v3549_v10 = vld [vmem:[%s14015_s9 + $0x138] sm:$0xff]  ;;  %v3548_v5 = vld [vmem:[%s14015_s9 + $0x130] sm:$0xff] }
0x172b   :  { %8722 = vmatpush1.bf16.msra.mxu1 %v8721_v63  ;;  %8746 = vmatpush3.bf16.msra.mxu0 %v8745_v11  ;;  %v3528_v63 = vld [vmem:[%s14015_s9 + $0x90] sm:$0xff]  ;;  %v3530_v11 = vld [vmem:[%s14015_s9 + $0xa0] sm:$0xff]  ;;  %v3551_v38 = vld [vmem:[%s14015_s9 + $0x148] sm:$0xff] }
0x172c   :  { %8748 = vmatprep.subr.bf16.mxu1 %v8747_v14  ;;  %8779 = vmatprep.subr.bf16.mxu0 %v9570_v40  ;;  %v3533_v14 = vld [vmem:[%s14015_s9 + $0xb8] sm:$0xff]  ;;  %v3556_v1 = vld [vmem:[%s14015_s9 + $0x170] sm:$0xff] }
0x172d   :  { %v3553_v57 = vld [vmem:[%s14015_s9 + $0x158] sm:$0xff] }
0x174b   :  { %v12284_v47 = vpop.xlane.xlu1 %3497 }
0x174c   :  { %vm3499_vm9 = vcmp.eq.f32.partialorder %v11972_v36, %v12284_v47  ;;  %v3515_v36 = vld [vmem:[%s14015_s9 + $0x28] sm:$0xff] }
0x174d   :  { %v3500_v7 = vsel %vm3499_vm9, %v3495_v24, inf  ;;  %v8780_v44 = vpack.c.bf16 %v3515_v36, %v3512_v61  ;;  %v3538_v24 = vld [vmem:[%s14015_s9 + $0xe0] sm:$0xff]  ;;  %v3537_v61 = vld [vmem:[%s14015_s9 + $0xd8] sm:$0xff]  ;;  %v3536_v36 = vld [vmem:[%s14015_s9 + $0xd0] sm:$0xff] }
0x174e   :  { %3501 = vmin.xlane.f32.xlu1 %v3500_v7  ;;  %v8761_v7 = vpack.c.bf16 %v3531_v4, %v3528_v63  ;;  %v8763_v59 = vpack.c.bf16 %v3538_v24, %v3535_v0  ;;  %v3552_v63 = vld [vmem:[%s14015_s9 + $0x150] sm:$0xff]  ;;  %v3555_v4 = vld [vmem:[%s14015_s9 + $0x168] sm:$0xff] }
0x174f   :  { %v8777_v0 = vpack.c.bf16 %v3555_v4, %v3552_v63 }
0x1774   :  { %v12369_v34 = vpop.f32.mrb[18].mxu0 }
0x17ab   :  { %v4100_v27 = vpop.xlane.xlu0 %4099 }
0x17ac   :  { %v4101_v12 = vadd.f32 %v4100_v27, %v4025_v22  ;;  %v3517_v22 = vld [vmem:[%s14015_s9 + $0x38] sm:$0xff]  ;;  %v8789_v27 = vpack.c.bf16 %v3533_v14, %v3530_v11  ;;  %v3554_v11 = vld [vmem:[%s14015_s9 + $0x160] sm:$0xff] }
0x17ad   :  { %v8751_v8 = vpack.c.bf16 %v3520_v45, %v3517_v22  ;;  %v3539_v22 = vld [vmem:[%s14015_s9 + $0xe8] sm:$0xff]  ;;  %v12381_v45 = vpop.f32.mrb[19].mxu0  ;;  %v3557_v14 = vld [vmem:[%s14015_s9 + $0x178] sm:$0xff] }
0x17ae   :  { %9435 = vrcp.f32 %v4101_v12  ;;  %v3534_v12 = vld [vmem:[%s14015_s9 + $0xc0] sm:$0xff]  ;;  %v8792_v48 = vpack.c.bf16 %v3539_v22, %v3536_v36  ;;  %v8801_v24 = vpack.c.bf16 %v3557_v14, %v3554_v11  ;;  %v4548_v36 = vld [vmem:[%s14021_s7 + $0x8] sm:$0xff]  ;;  %v3764_v11 = vadd.f32 %v11885_v43, %v10235_v15 }
0x17b8   :  { %v9436_v46 = vpop.eup %9435 }
0x17b9   :  { %v4192_v30 = vmul.f32 %v9436_v46, %v12205_v9  ;;  %v3526_v9 = vld [vmem:[%s14015_s9 + $0x80] sm:$0xff]  ;;  %v3541_v46 = vld [vmem:[%s14015_s9 + $0xf8] sm:$0xff] }
0x17ba   :  { %v8755_v13 = vpack.c.bf16 %v3526_v9, %v3523_v60  ;;  %v3547_v60 = vld [vmem:[%s14015_s9 + $0x128] sm:$0xff]  ;;  %v3550_v9 = vld [vmem:[%s14015_s9 + $0x140] sm:$0xff] }
0x17bb   :  { %4306 = vmatmul.mubr.f32.vlgmr.msra.gmra.mrb[18].mxu1 %v4192_v30  ;;  %7801 = vmatmul.mubr.f32.vlgmr.msra.gmra.mrb[20].mxu0 %v4192_v30  ;;  %v3540_v30 = vld [vmem:[%s14015_s9 + $0xf0] sm:$0xff] }
0x17bc   :  { %8750 = vmatpush1.bf16.msra.mxu1 %v8749_v35  ;;  %8781 = vmatpush3.bf16.msra.mxu0 %v8780_v44  ;;  %v3544_v35 = vld [vmem:[%s14015_s9 + $0x110] sm:$0xff]  ;;  %v8765_v44 = vpack.c.bf16 %v3537_v61, %v3534_v12 }
0x17bd   :  { %8752 = vmatprep.subr.bf16.mxu1 %v8751_v8  ;;  %8782 = vmatprep.subr.bf16.mxu0 %v9570_v40  ;;  %v8767_v8 = vpack.c.bf16 %v3544_v35, %v3541_v46  ;;  %v4549_v46 = vld [vmem:[%s14021_s7 + $0x10] sm:$0xff]  ;;  %v4550_v35 = vld [vmem:[%s14021_s7 + $0x18] sm:$0xff] }
0x17be   :  { %4446 = vmatprep.mubr.f32.mxu1 %v9567_v3  ;;  %7835 = vmatprep.mubr.msk.f32.mxu0 %vm9571_vm8, %v9567_v3 }
0x17c0   :  { %8754 = vmatpush1.bf16.msra.mxu1 %v8753_v51  ;;  %8784 = vmatpush3.bf16.msra.mxu0 %v8783_v49  ;;  %v8769_v51 = vpack.c.bf16 %v3543_v28, %v3540_v30  ;;  %v8795_v49 = vpack.c.bf16 %v3545_v56, %v3542_v58  ;;  %v4552_v30 = vld [vmem:[%s14021_s7 + $0x28] sm:$0xff]  ;;  %v4553_v28 = vld [vmem:[%s14021_s7 + $0x30] sm:$0xff]  ;;  %v4554_v58 = vld [vmem:[%s14021_s7 + $0x38] sm:$0xff] }
0x17c1   :  { %8756 = vmatprep.subr.bf16.mxu1 %v8755_v13  ;;  %8785 = vmatprep.subr.bf16.mxu0 %v9570_v40  ;;  %v8771_v13 = vpack.c.bf16 %v3550_v9, %v3547_v60  ;;  %v8813_v56 = vpack.c.bf16 %v4554_v58, %v4553_v28  ;;  %v4555_v60 = vld [vmem:[%s14021_s7 + $0x40] sm:$0xff]  ;;  %v4556_v9 = vld [vmem:[%s14021_s7 + $0x48] sm:$0xff] }
0x17c4   :  { %8758 = vmatpush1.bf16.msra.mxu1 %v8757_v20  ;;  %8787 = vmatpush3.bf16.msra.mxu0 %v8786_v2  ;;  %v8773_v20 = vpack.c.bf16 %v3549_v10, %v3546_v32  ;;  %v8798_v2 = vpack.c.bf16 %v3551_v38, %v3548_v5  ;;  %v4558_v32 = vld [vmem:[%s14021_s7 + $0x58] sm:$0xff]  ;;  %v4559_v10 = vld [vmem:[%s14021_s7 + $0x60] sm:$0xff]  ;;  %v4560_v5 = vld [vmem:[%s14021_s7 + $0x68] sm:$0xff] }
0x17c5   :  { %8760 = vmatprep.subr.bf16.mxu1 %v8759_v6  ;;  %8788 = vmatprep.subr.bf16.mxu0 %v9570_v40  ;;  %v8775_v6 = vpack.c.bf16 %v3556_v1, %v3553_v57  ;;  %v8822_v38 = vpack.c.bf16 %v4560_v5, %v4559_v10  ;;  %v4561_v57 = vld [vmem:[%s14021_s7 + $0x70] sm:$0xff]  ;;  %v4562_v1 = vld [vmem:[%s14021_s7 + $0x78] sm:$0xff] }
0x17c8   :  { %8762 = vmatpush1.bf16.msra.mxu1 %v8761_v7  ;;  %8790 = vmatpush3.bf16.msra.mxu0 %v8789_v27  ;;  %v3504_v7 = vcvt.f32.s32 %v12284_v47  ;;  %v4547_v47 = vld [vmem:[%s14021_s7] sm:$0xff] }
0x17c9   :  { %8764 = vmatprep.subr.bf16.mxu1 %v8763_v59  ;;  %8791 = vmatprep.subr.bf16.mxu0 %v9570_v40  ;;  %v8804_v22 = vpack.c.bf16 %v4548_v36, %v4547_v47 }
0x17ca   :  { %v3505_v12 = vshll.u32 %v3504_v7, 16 }
0x17cc   :  { %8766 = vmatpush1.bf16.msra.mxu1 %v8765_v44  ;;  %8793 = vmatpush3.bf16.msra.mxu0 %v8792_v48  ;;  %v8807_v44 = vpack.c.bf16 %v4550_v35, %v4549_v46  ;;  %v4551_v48 = vld [vmem:[%s14021_s7 + $0x20] sm:$0xff] }
0x17cd   :  { %8768 = vmatprep.subr.bf16.mxu1 %v8767_v8  ;;  %8794 = vmatprep.subr.bf16.mxu0 %v9570_v40  ;;  %v8810_v8 = vpack.c.bf16 %v4552_v30, %v4551_v48 }
0x17d0   :  { %8770 = vmatpush1.bf16.msra.mxu1 %v8769_v51  ;;  %8796 = vmatpush3.bf16.msra.mxu0 %v8795_v49  ;;  %v8816_v51 = vpack.c.bf16 %v4556_v9, %v4555_v60  ;;  %v4557_v49 = vld [vmem:[%s14021_s7 + $0x50] sm:$0xff] }
0x17d1   :  { %8772 = vmatprep.subr.bf16.mxu1 %v8771_v13  ;;  %8797 = vmatprep.subr.bf16.mxu0 %v9570_v40  ;;  %v8819_v13 = vpack.c.bf16 %v4558_v32, %v4557_v49 }
0x17d4   :  { %8774 = vmatpush1.bf16.msra.mxu1 %v8773_v20  ;;  %8799 = vmatpush3.bf16.msra.mxu0 %v8798_v2  ;;  %v8825_v20 = vpack.c.bf16 %v4562_v1, %v4561_v57 }
0x17d5   :  { %8776 = vmatprep.subr.bf16.mxu1 %v8775_v6  ;;  %8800 = vmatprep.subr.bf16.mxu0 %v9570_v40 }
0x17d8   :  { %8778 = vmatpush1.bf16.msra.mxu1 %v8777_v0  ;;  %8802 = vmatpush3.bf16.msra.mxu0 %v8801_v24 }
0x17d9   :  { %8803 = vmatprep.subr.bf16.mxu1 %v9570_v40 }
0x17db   :  { %v3502_v27 = vpop.xlane.xlu1 %3501 }
0x17dc   :  { %v3503_v59 = vcvt.f32.s32 %v3502_v27  ;;  %v3765_v27 = vadd.f32 %v12369_v34, %v10244_v23 }
0x17de   :  { %v3506_v61 = vadd.s32 %v3505_v12, %v3503_v59 }
0x17e0   :  { %vm3507_vm10 = vcmp.eq.s32.totalorder %v9801_v50, %v3506_v61 }
0x17e1   :  { %7177 = vmatmul.mubr.msk.f32.vlgmr.msra.gmra.mrb[18].mxu1 %vm3507_vm10, %v9572_v39  ;;  %7836 = vmatmul.mubr.msk.f32.vlgmr.msra.gmra.mrb[22].mxu0 %vm3507_vm10, %v9572_v39 }
0x17e2   :  { %7870 = vmatprep.mubr.msk.f32.mxu1 %vm9571_vm8, %v9567_v3  ;;  %8805 = vmatpush3.bf16.msra.mxu1 %v8804_v22 }
0x17e3   :  { %8806 = vmatprep.subr.bf16.mxu1 %v9570_v40 }
0x17e6   :  { %8808 = vmatpush3.bf16.msra.mxu1 %v8807_v44  ;;  %v3766_v44 = vadd.f32 %v12381_v45, %v10259_v55 }
0x17e7   :  { %8809 = vmatprep.subr.bf16.mxu1 %v9570_v40 }
0x17ea   :  { %8811 = vmatpush3.bf16.msra.mxu1 %v8810_v8 }
0x17eb   :  { %8812 = vmatprep.subr.bf16.mxu1 %v9570_v40 }
0x17ee   :  { %8814 = vmatpush3.bf16.msra.mxu1 %v8813_v56 }
0x17ef   :  { %8815 = vmatprep.subr.bf16.mxu1 %v9570_v40 }
0x17f2   :  { %8817 = vmatpush3.bf16.msra.mxu1 %v8816_v51 }
0x17f3   :  { %8818 = vmatprep.subr.bf16.mxu1 %v9570_v40 }
0x17f6   :  { %8820 = vmatpush3.bf16.msra.mxu1 %v8819_v13 }
0x17f7   :  { %8821 = vmatprep.subr.bf16.mxu1 %v9570_v40 }
0x17fa   :  { %8823 = vmatpush3.bf16.msra.mxu1 %v8822_v38 }
0x17fb   :  { %8824 = vmatprep.subr.bf16.mxu1 %v9570_v40 }
0x17fe   :  { %8826 = vmatpush3.bf16.msra.mxu1 %v8825_v20 }
0x188e   :  { %v4378_v2 = vpop.f32.mrb[20].mxu0 }
0x188f   :  { %v7802_v63 = vpop.f32.mrb[21].mxu0 }
0x18b4   :  { %v4448_v6 = vpop.f32.mrb[18].mxu1  ;;  %v4519_v4 = vpop.f32.mrb[22].mxu0 }
0x18b5   :  { %v4523_v14 = vadd.f32 %v4448_v6, %v10238_v19  ;;  %v4520_v0 = vadd.f32 %v4519_v4, %v4378_v2  ;;  %v4450_v24 = vpop.f32.mrb[19].mxu1  ;;  %v7837_v7 = vpop.f32.mrb[23].mxu0 }
0x18b6   :  { %v4524_v12 = vadd.f32 %v4450_v24, %v10247_v26 }
0x18b7   :  { %v4526_v59 = vadd.f32 %v4523_v14, %v3764_v11  ;;  %v4525_v30 = vadd.f32 %v4520_v0, %v10262_v52 }
0x18b8   :  { %v4533_v61 = vadd.f32 %v4524_v12, %v3765_v27 }
0x18b9   :  { %v7179_v47 = vmul.f32 -1.442695, %v4526_v59 }
0x18ba   :  { %v7180_v36 = vmul.f32 -1.442695, %v4533_v61 }
0x18bb   :  { %9437 = vpow2.f32 %v7179_v47 }
0x18bc   :  { %9439 = vpow2.f32 %v7180_v36 }
0x18c5   :  { %v9438_v22 = vpop.eup %9437 }
0x18c6   :  { %v4530_v46 = vadd.f32 1.0, %v9438_v22  ;;  %v9440_v43 = vpop.eup %9439 }
0x18c7   :  { %v4537_v35 = vadd.f32 1.0, %v9440_v43 }
0x18c8   :  { %9441 = vrcp.f32 %v4530_v46 }
0x18c9   :  { %9443 = vrcp.f32 %v4537_v35 }
0x18d2   :  { %v9442_v48 = vpop.eup %9441 }
0x18d3   :  { %v4540_v34 = vmul.f32 %v9442_v48, %v3766_v44  ;;  %v9444_v28 = vpop.eup %9443 }
0x18d4   :  { %v4543_v58 = vsub.f32 1.0, %v9444_v28  ;;  %v4545_v9 = vmul.f32 %v9444_v28, %v11766_v25 }
0x18d5   :  { %v4541_v8 = vadd.f32 %v4540_v34, %v4525_v30 }
0x18d7   :  { %9445 = vtanh.f32 %v4541_v8 }
0x18e1   :  { %v9446_v56 = vpop.eup %9445 }
0x18e2   :  { %v4544_v60 = vmul.f32 %v9446_v56, %v4543_v58 }
0x18e4   :  { %v12513_v51 = vadd.f32 %v4545_v9, %v4544_v60 }
0x18e6   :  { %7871 = vmatmul.mubr.f32.vlgmr.msra.gmra.mrb[20].mxu1 %v12513_v51 }
0x19b9   :  { %v4629_v49 = vpop.f32.mrb[20].mxu1 }
0x19ba   :  { %v12517_v45 = vadd.f32 %v10273_v42, %v4629_v49  ;;  %v7872_v32 = vpop.f32.mrb[21].mxu1 }
0x19bc   :  { %4633 = vmax.xlane.f32.xlu0 %v12517_v45 }
0x1a49   :  { %v12520_v13 = vpop.xlane.xlu0 %4633 }
0x1a4a   :  { %v4635_v10 = vsub.f32 %v12517_v45, %v12520_v13 }
0x1a4c   :  { %v4636_v5 = vmul.f32 1.442695, %v4635_v10 }
0x1a4e   :  { %9447 = vpow2.f32 %v4636_v5 }
0x1a58   :  { %v9448_v38 = vpop.eup %9447 }
0x1a59   :  { %4638 = vadd.xlane.f32.xlu1 %v9448_v38 }
0x1ae6   :  { %v4639_v25 = vpop.xlane.xlu1 %4638 }
0x1ae7   :  { %9449 = vlog2.f32 %v4639_v25 }
0x1af1   :  { %v9450_v57 = vpop.eup %9449 }
0x1af2   :  { %v4641_v1 = vmul.f32 0.6931472, %v9450_v57 }
0x1af4   :  { %v4642_v20 = vadd.f32 %v4641_v1, %v12520_v13 }
0x1af6   :  { %v4643_v2 = vsub.f32 %v12517_v45, %v4642_v20 }
0x1af7   :  { %9557 = dma.done.wait [#allocation3 + $0x1], 128 }
0x1af8   :  { %9558 = vsyncadd [#allocation3 + $0x1], 4294967168  ;;  %7181 = vst [vmem:[%s14026_s11 + $0x18] sm:$0xff] %v4643_v2 }
0x1af9   :  { %4689 = vsyncadd [#allocation3 + $0x1], 128  ;;  %v4758_v63 = vld [vmem:[%s14014_s3 + $0x8] sm:$0xff]  ;;  %4885 = vmatprep.mubr.f32.mxu0 %v9567_v3  ;;  %9452 = vset.pattern.permute.xlu0 %v9569_v16  ;;  %v4757_v11 = vld [vmem:[%s14014_s3] sm:$0xff]  ;;  %vm4690_vm11 = vcmp.ge.f32.partialorder %v12517_v45, %v12520_v13 }
0x1afa   :  { %v4762_v6 = vld [vmem:[%s14014_s3 + $0x28] sm:$0xff]  ;;  %v4761_v14 = vld [vmem:[%s14014_s3 + $0x20] sm:$0xff]  ;;  %9451 = vset.pattern.permute.xlu1 %v9569_v16  ;;  %4956 = vmatprep.mubr.f32.mxu1 %v9567_v3  ;;  %v4759_v45 = vld [vmem:[%s14014_s3 + $0x10] sm:$0xff] }
0x1afb   :  { %v8827_v4 = vpack.c.bf16 %v4762_v6, %v4758_v63  ;;  %v4766_v0 = vld [vmem:[%s14014_s3 + $0x48] sm:$0xff]  ;;  %v8829_v24 = vpack.c.bf16 %v4761_v14, %v4757_v11  ;;  %v4765_v27 = vld [vmem:[%s14014_s3 + $0x40] sm:$0xff] }
0x1afc   :  { %v4770_v7 = vld [vmem:[%s14014_s3 + $0x68] sm:$0xff]  ;;  %v4769_v12 = vld [vmem:[%s14014_s3 + $0x60] sm:$0xff] }
0x1afd   :  { %8828 = vmatprep.subr.bf16.mxu0 %v8827_v4  ;;  %v8831_v59 = vpack.c.bf16 %v4770_v7, %v4766_v0  ;;  %v4774_v61 = vld [vmem:[%s14014_s3 + $0x88] sm:$0xff]  ;;  %v8833_v36 = vpack.c.bf16 %v4769_v12, %v4765_v27  ;;  %v4773_v46 = vld [vmem:[%s14014_s3 + $0x80] sm:$0xff] }
0x1afe   :  { %v4778_v47 = vld [vmem:[%s14014_s3 + $0xa8] sm:$0xff]  ;;  %8830 = vmatpush1.bf16.msra.mxu0 %v8829_v24  ;;  %v4777_v43 = vld [vmem:[%s14014_s3 + $0xa0] sm:$0xff] }
0x1aff   :  { %8832 = vmatprep.subr.bf16.mxu0 %v8831_v59  ;;  %v8835_v22 = vpack.c.bf16 %v4778_v47, %v4774_v61  ;;  %v4782_v35 = vld [vmem:[%s14014_s3 + $0xc8] sm:$0xff]  ;;  %v8837_v48 = vpack.c.bf16 %v4777_v43, %v4773_v46  ;;  %v4781_v34 = vld [vmem:[%s14014_s3 + $0xc0] sm:$0xff] }
0x1b00   :  { %v4786_v44 = vld [vmem:[%s14014_s3 + $0xe8] sm:$0xff]  ;;  %v4785_v8 = vld [vmem:[%s14014_s3 + $0xe0] sm:$0xff] }
0x1b01   :  { %v8839_v30 = vpack.c.bf16 %v4786_v44, %v4782_v35  ;;  %v4790_v28 = vld [vmem:[%s14014_s3 + $0x108] sm:$0xff]  ;;  %v8841_v56 = vpack.c.bf16 %v4785_v8, %v4781_v34  ;;  %v4789_v9 = vld [vmem:[%s14014_s3 + $0x100] sm:$0xff] }
0x1b02   :  { %8834 = vmatpush1.bf16.msra.mxu0 %v8833_v36  ;;  %v4794_v58 = vld [vmem:[%s14014_s3 + $0x128] sm:$0xff]  ;;  %v4793_v49 = vld [vmem:[%s14014_s3 + $0x120] sm:$0xff] }
0x1b03   :  { %8836 = vmatprep.subr.bf16.mxu0 %v8835_v22  ;;  %v8843_v60 = vpack.c.bf16 %v4794_v58, %v4790_v28  ;;  %v4798_v32 = vld [vmem:[%s14014_s3 + $0x148] sm:$0xff]  ;;  %v8845_v5 = vpack.c.bf16 %v4793_v49, %v4789_v9  ;;  %v4797_v25 = vld [vmem:[%s14014_s3 + $0x140] sm:$0xff]  ;;  %v5018_v9 = vld [vmem:[%s14017_s1 + $0x10] sm:$0xff] }
0x1b04   :  { %v4802_v10 = vld [vmem:[%s14014_s3 + $0x168] sm:$0xff]  ;;  %v4801_v57 = vld [vmem:[%s14014_s3 + $0x160] sm:$0xff] }
0x1b05   :  { %v8847_v38 = vpack.c.bf16 %v4802_v10, %v4798_v32  ;;  %v4806_v1 = vld [vmem:[%s14014_s3 + $0x188] sm:$0xff]  ;;  %v8849_v2 = vpack.c.bf16 %v4801_v57, %v4797_v25  ;;  %v4805_v6 = vld [vmem:[%s14014_s3 + $0x180] sm:$0xff] }
0x1b06   :  { %8838 = vmatpush1.bf16.msra.mxu0 %v8837_v48  ;;  %v4810_v20 = vld [vmem:[%s14014_s3 + $0x1a8] sm:$0xff]  ;;  %v4809_v4 = vld [vmem:[%s14014_s3 + $0x1a0] sm:$0xff] }
0x1b07   :  { %8840 = vmatprep.subr.bf16.mxu0 %v8839_v30  ;;  %v8851_v63 = vpack.c.bf16 %v4810_v20, %v4806_v1  ;;  %v4814_v11 = vld [vmem:[%s14014_s3 + $0x1c8] sm:$0xff]  ;;  %v8853_v0 = vpack.c.bf16 %v4809_v4, %v4805_v6  ;;  %v4813_v7 = vld [vmem:[%s14014_s3 + $0x1c0] sm:$0xff] }
0x1b08   :  { %v4818_v14 = vld [vmem:[%s14014_s3 + $0x1e8] sm:$0xff]  ;;  %v4817_v27 = vld [vmem:[%s14014_s3 + $0x1e0] sm:$0xff] }
0x1b09   :  { %v8855_v24 = vpack.c.bf16 %v4818_v14, %v4814_v11  ;;  %v8857_v12 = vpack.c.bf16 %v4817_v27, %v4813_v7  ;;  %v5016_v30 = vld [vmem:[%s14017_s1] sm:$0xff]  ;;  %v5017_v28 = vld [vmem:[%s14017_s1 + $0x8] sm:$0xff]  ;;  %v5023_v27 = vld [vmem:[%s14017_s1 + $0x38] sm:$0xff] }
0x1b0a   :  { %8842 = vmatpush1.bf16.msra.mxu0 %v8841_v56  ;;  %v5020_v1 = vld [vmem:[%s14017_s1 + $0x20] sm:$0xff]  ;;  %v5021_v4 = vld [vmem:[%s14017_s1 + $0x28] sm:$0xff] }
0x1b0b   :  { %8844 = vmatprep.subr.bf16.mxu0 %v8843_v60 }
0x1b0e   :  { %8846 = vmatpush1.bf16.msra.mxu0 %v8845_v5 }
0x1b0f   :  { %8848 = vmatprep.subr.bf16.mxu0 %v8847_v38  ;;  %v5019_v38 = vld [vmem:[%s14017_s1 + $0x18] sm:$0xff] }
0x1b12   :  { %8850 = vmatpush1.bf16.msra.mxu0 %v8849_v2 }
0x1b13   :  { %8852 = vmatprep.subr.bf16.mxu0 %v8851_v63 }
0x1b16   :  { %8854 = vmatpush1.bf16.msra.mxu0 %v8853_v0  ;;  %v5022_v0 = vld [vmem:[%s14017_s1 + $0x30] sm:$0xff] }
0x1b17   :  { %8856 = vmatprep.subr.bf16.mxu0 %v8855_v24 }
0x1b1a   :  { %8858 = vmatpush1.bf16.msra.mxu0 %v8857_v12 }
0x1b1d   :  { %4886 = vmatmul.mubr.f32.vlgmr.msra.gmra.mrb[24].mxu0 %v12513_v51 }
0x1b1e   :  { %5504 = vmatprep.mubr.f32.mxu0 %v9567_v3 }
0x1bf0   :  { %v4887_v59 = vpop.f32.mrb[24].mxu0 }
0x1bf1   :  { %v4967_v61 = vcombine.high %v4887_v59, %v4887_v59  ;;  %v4974_v47 = vrot.slane %v4887_v59, %v9742_v54  ;;  %v12632_v36 = vpop.f32.mrb[25].mxu0 }
0x1bf3   :  { %v4981_v22 = vrot.slane %v4967_v61, %v9742_v54  ;;  %v4982_v46 = vcombine.high %v4974_v47, %v4974_v47  ;;  %v4990_v43 = vrot.slane %v4974_v47, %v9742_v54 }
0x1bf5   :  { %v4983_v35 = vcombine.high %v4981_v22, %v4981_v22  ;;  %v4997_v44 = vrot.slane %v4981_v22, %v9742_v54  ;;  %v5004_v48 = vrot.slane %v4982_v46, %v9742_v54  ;;  %v5027_v34 = vrot.slane %v4990_v43, %v9750_v62 }
0x1bf6   :  { %v5012_v8 = vcombine.high %v4990_v43, %v4990_v43 }
0x1bf7   :  { %v5011_v58 = vrot.slane %v4983_v35, %v9742_v54  ;;  %v5014_v56 = vcombine.high %v5004_v48, %v5004_v48  ;;  %v5031_v60 = vrot.slane %v5004_v48, %v9750_v62  ;;  %v5013_v49 = vcombine.high %v4997_v44, %v4997_v44 }
0x1bf8   :  { %v5043_v32 = vrot.slane %v4997_v44, %v9750_v62  ;;  %v5064_v10 = vadd.f32 %v5027_v34, %v5016_v30  ;;  %v5035_v5 = vrot.slane %v5012_v8, %v9750_v62 }
0x1bf9   :  { %v5065_v25 = vadd.f32 %v5031_v60, %v5017_v28  ;;  %v5039_v57 = vrot.slane %v5014_v56, %v9750_v62  ;;  %v5015_v20 = vcombine.high %v5011_v58, %v5011_v58  ;;  %v5047_v63 = vrot.slane %v5011_v58, %v9750_v62 }
0x1bfa   :  { %9453 = vtanh.f32 %v5064_v10  ;;  %v5066_v2 = vadd.f32 %v5035_v5, %v5018_v9  ;;  %v5068_v11 = vadd.f32 %v5043_v32, %v5020_v1  ;;  %v5051_v14 = vrot.slane %v5013_v49, %v9750_v62 }
0x1bfb   :  { %9455 = vtanh.f32 %v5065_v25  ;;  %v5067_v6 = vadd.f32 %v5039_v57, %v5019_v38  ;;  %v5069_v24 = vadd.f32 %v5047_v63, %v5021_v4  ;;  %v5055_v7 = vrot.slane %v5015_v20, %v9750_v62 }
0x1bfc   :  { %9457 = vtanh.f32 %v5066_v2  ;;  %v5070_v12 = vadd.f32 %v5051_v14, %v5022_v0 }
0x1bfd   :  { %9459 = vtanh.f32 %v5067_v6  ;;  %v5071_v59 = vadd.f32 %v5055_v7, %v5023_v27 }
0x1bfe   :  { %9461 = vtanh.f32 %v5068_v11 }
0x1bff   :  { %9463 = vtanh.f32 %v5069_v24 }
0x1c00   :  { %9465 = vtanh.f32 %v5070_v12 }
0x1c01   :  { %9467 = vtanh.f32 %v5071_v59 }
0x1c04   :  { %v9454_v61 = vpop.eup %9453 }
0x1c05   :  { %v9456_v47 = vpop.eup %9455  ;;  %v5080_v22 = vmul.f32 %v9454_v61, %v9790_v31 }
0x1c06   :  { %v9458_v46 = vpop.eup %9457  ;;  %v5081_v44 = vmul.f32 %v9456_v47, %v9790_v31 }
0x1c07   :  { %5088 = vadd.xlane.f32.xlu0 %v5080_v22  ;;  %v5082_v43 = vmul.f32 %v9458_v46, %v9790_v31  ;;  %v9460_v35 = vpop.eup %9459 }
0x1c08   :  { %v9462_v48 = vpop.eup %9461  ;;  %v5083_v30 = vmul.f32 %v9460_v35, %v9790_v31 }
0x1c09   :  { %5092 = vadd.xlane.f32.xlu1 %v5082_v43  ;;  %v9464_v34 = vpop.eup %9463  ;;  %v5084_v8 = vmul.f32 %v9462_v48, %v9790_v31 }
0x1c0a   :  { %v9466_v28 = vpop.eup %9465  ;;  %v5085_v58 = vmul.f32 %v9464_v34, %v9790_v31 }
0x1c0b   :  { %5090 = vadd.xlane.f32.xlu0 %v5081_v44  ;;  %v9468_v56 = vpop.eup %9467  ;;  %v5086_v60 = vmul.f32 %v9466_v28, %v9790_v31 }
0x1c0c   :  { %v5087_v9 = vmul.f32 %v9468_v56, %v9790_v31 }
0x1c0d   :  { %5094 = vadd.xlane.f32.xlu1 %v5083_v30 }
0x1c0f   :  { %5096 = vadd.xlane.f32.xlu0 %v5084_v8 }
0x1c11   :  { %5098 = vadd.xlane.f32.xlu1 %v5085_v58 }
0x1c13   :  { %5100 = vadd.xlane.f32.xlu0 %v5086_v60 }
0x1c15   :  { %5102 = vadd.xlane.f32.xlu1 %v5087_v9 }
0x1c94   :  { %v5089_v49 = vpop.xlane.xlu0 %5088 }
0x1c95   :  { %v5115_v5 = vrot.slane %v5089_v49, %v9805_v53 }
0x1c96   :  { %v5093_v32 = vpop.xlane.xlu1 %5092 }
0x1c97   :  { %v5123_v25 = vrot.slane %v5093_v32, %v9805_v53 }
0x1c98   :  { %v5091_v10 = vpop.xlane.xlu0 %5090 }
0x1c99   :  { %v5119_v38 = vrot.slane %v5091_v10, %v9805_v53 }
0x1c9a   :  { %v5095_v57 = vpop.xlane.xlu1 %5094 }
0x1c9b   :  { %v5144_v1 = vsel %vm458_vm0, %v5119_v38, %v5115_v5  ;;  %v5127_v20 = vrot.slane %v5095_v57, %v9805_v53 }
0x1c9c   :  { %v5145_v2 = vsel %vm460_vm1, %v5123_v25, %v5144_v1  ;;  %v5097_v63 = vpop.xlane.xlu0 %5096 }
0x1c9d   :  { %v5146_v6 = vsel %vm462_vm2, %v5127_v20, %v5145_v2  ;;  %v5131_v4 = vrot.slane %v5097_v63, %v9805_v53 }
0x1c9e   :  { %v5099_v11 = vpop.xlane.xlu1 %5098 }
0x1c9f   :  { %v5135_v14 = vrot.slane %v5099_v11, %v9805_v53  ;;  %v5147_v0 = vsel %vm464_vm3, %v5131_v4, %v5146_v6 }
0x1ca0   :  { %v5101_v24 = vpop.xlane.xlu0 %5100 }
0x1ca1   :  { %v5139_v7 = vrot.slane %v5101_v24, %v9805_v53  ;;  %v5148_v27 = vsel %vm466_vm4, %v5135_v14, %v5147_v0 }
0x1ca2   :  { %v5103_v12 = vpop.xlane.xlu1 %5102 }
0x1ca3   :  { %v5143_v59 = vrot.slane %v5103_v12, %v9805_v53  ;;  %v5149_v61 = vsel %vm468_vm5, %v5139_v7, %v5148_v27 }
0x1ca5   :  { %v5150_v47 = vsel %vm470_vm6, %v5143_v59, %v5149_v61 }
0x1ca6   :  { %v5152_v22 = vsel %vm473_vm7, %v5150_v47, -inf  ;;  %v12716_v47 = vsel %vm4690_vm11, %v9801_v50, 128 }
0x1ca7   :  { %5153 = vmax.xlane.f32.xlu0 %v5152_v22 }
0x1d34   :  { %v5154_v46 = vpop.xlane.xlu0 %5153 }
0x1d35   :  { %v12695_v43 = vmax.f32 %v5154_v46, -1e+30  ;;  %v4760_v46 = vld [vmem:[%s14014_s3 + $0x18] sm:$0xff] }
0x1d37   :  { %v5167_v35 = vrot.slane %v12695_v43, %v9826_v17  ;;  %v5163_v44 = vrot.slane %v12695_v43, %v9750_v62  ;;  %v5171_v48 = vrot.slane %v12695_v43, %v9829_v18  ;;  %v5175_v28 = vrot.slane %v12695_v43, %v9834_v21 }
0x1d38   :  { %v5179_v5 = vrot.slane %v12695_v43, %v9845_v29  ;;  %v5187_v1 = vrot.slane %v12695_v43, %v9853_v37  ;;  %v5191_v4 = vrot.slane %v12695_v43, %v9858_v41 }
0x1d39   :  { %v5201_v30 = vsub.f32 %v5091_v10, %v5167_v35  ;;  %v5200_v34 = vsub.f32 %v5089_v49, %v5163_v44  ;;  %v5202_v8 = vsub.f32 %v5093_v32, %v5171_v48  ;;  %v5203_v9 = vsub.f32 %v5095_v57, %v5175_v28  ;;  %v4764_v35 = vld [vmem:[%s14014_s3 + $0x38] sm:$0xff]  ;;  %v4763_v44 = vld [vmem:[%s14014_s3 + $0x30] sm:$0xff] }
0x1d3a   :  { %v5204_v25 = vsub.f32 %v5097_v63, %v5179_v5  ;;  %v5183_v10 = vrot.slane %v12695_v43, %v9848_v33  ;;  %v5206_v6 = vsub.f32 %v5101_v24, %v5187_v1  ;;  %v5207_v0 = vsub.f32 %v5103_v12, %v5191_v4  ;;  %v4768_v48 = vld [vmem:[%s14014_s3 + $0x58] sm:$0xff]  ;;  %v4767_v28 = vld [vmem:[%s14014_s3 + $0x50] sm:$0xff]  ;;  %v5393_v4 = vld [vmem:[%s14019_s5 + $0x8] sm:$0xff] }
0x1d3b   :  { %v5210_v58 = vmul.f32 1.442695, %v5201_v30  ;;  %v5208_v56 = vmul.f32 1.442695, %v5200_v34  ;;  %v5212_v60 = vmul.f32 1.442695, %v5202_v8  ;;  %v8859_v13 = vpack.c.bf16 %v4764_v35, %v4760_v46 }
0x1d3c   :  { %v5214_v38 = vmul.f32 1.442695, %v5203_v9  ;;  %v5216_v49 = vmul.f32 1.442695, %v5204_v25  ;;  %v5205_v32 = vsub.f32 %v5099_v11, %v5183_v10  ;;  %v5220_v14 = vmul.f32 1.442695, %v5206_v6 }
0x1d3d   :  { %9469 = vpow2.f32 %v5210_v58  ;;  %v5222_v11 = vmul.f32 1.442695, %v5207_v0  ;;  %v4693_v12 = vshra.s32 %v12716_v47, 16  ;;  %v4772_v30 = vld [vmem:[%s14014_s3 + $0x78] sm:$0xff]  ;;  %v8861_v34 = vpack.c.bf16 %v4763_v44, %v4759_v45  ;;  %v4771_v58 = vld [vmem:[%s14014_s3 + $0x70] sm:$0xff]  ;;  %8860 = vmatprep.subr.bf16.mxu1 %v8859_v13  ;;  %v5401_v45 = vld [vmem:[%s14019_s5 + $0x48] sm:$0xff] }
0x1d3e   :  { %9471 = vpow2.f32 %v5208_v56  ;;  %v5218_v57 = vmul.f32 1.442695, %v5205_v32  ;;  %v8863_v8 = vpack.c.bf16 %v4772_v30, %v4768_v48  ;;  %v4776_v56 = vld [vmem:[%s14014_s3 + $0x98] sm:$0xff]  ;;  %v8865_v9 = vpack.c.bf16 %v4771_v58, %v4767_v28  ;;  %v4779_v25 = vld [vmem:[%s14014_s3 + $0xb0] sm:$0xff]  ;;  %v5405_v30 = vld [vmem:[%s14019_s5 + $0x68] sm:$0xff] }
0x1d3f   :  { %9473 = vpow2.f32 %v5212_v60  ;;  %v12719_v22 = vcvt.s32.f32 %v4693_v12  ;;  %v4780_v60 = vld [vmem:[%s14014_s3 + $0xb8] sm:$0xff]  ;;  %8862 = vmatpush1.bf16.msra.mxu1 %v8861_v34  ;;  %v5402_v46 = vld [vmem:[%s14019_s5 + $0x50] sm:$0xff] }
0x1d40   :  { %9475 = vpow2.f32 %v5214_v38  ;;  %8864 = vmatprep.subr.bf16.mxu1 %v8863_v8  ;;  %v8867_v5 = vpack.c.bf16 %v4780_v60, %v4776_v56  ;;  %v4775_v38 = vld [vmem:[%s14014_s3 + $0x90] sm:$0xff]  ;;  %v4784_v10 = vld [vmem:[%s14014_s3 + $0xd8] sm:$0xff]  ;;  %v5408_v8 = vld [vmem:[%s14019_s5 + $0x80] sm:$0xff] }
0x1d41   :  { %9477 = vpow2.f32 %v5216_v49  ;;  %v4788_v49 = vld [vmem:[%s14014_s3 + $0xf8] sm:$0xff]  ;;  %v8869_v32 = vpack.c.bf16 %v4779_v25, %v4775_v38  ;;  %v5398_v35 = vld [vmem:[%s14019_s5 + $0x30] sm:$0xff]  ;;  %v8899_v56 = vpack.c.bf16 %v5408_v8, %v5405_v30  ;;  %v5404_v60 = vld [vmem:[%s14019_s5 + $0x60] sm:$0xff] }
0x1d42   :  { %9479 = vpow2.f32 %v5218_v57  ;;  %v8871_v1 = vpack.c.bf16 %v4788_v49, %v4784_v10  ;;  %v4792_v57 = vld [vmem:[%s14014_s3 + $0x118] sm:$0xff]  ;;  %v8897_v34 = vpack.c.bf16 %v5401_v45, %v5398_v35  ;;  %v4799_v58 = vld [vmem:[%s14014_s3 + $0x150] sm:$0xff]  ;;  %v5400_v30 = vld [vmem:[%s14019_s5 + $0x40] sm:$0xff] }
0x1d43   :  { %9481 = vpow2.f32 %v5220_v14  ;;  %8866 = vmatpush1.bf16.msra.mxu1 %v8865_v9  ;;  %v4796_v6 = vld [vmem:[%s14014_s3 + $0x138] sm:$0xff]  ;;  %v5392_v14 = vld [vmem:[%s14019_s5] sm:$0xff]  ;;  %v4803_v38 = vld [vmem:[%s14014_s3 + $0x170] sm:$0xff] }
0x1d44   :  { %9483 = vpow2.f32 %v5222_v11  ;;  %8868 = vmatprep.subr.bf16.mxu1 %v8867_v5  ;;  %v5395_v0 = vld [vmem:[%s14019_s5 + $0x18] sm:$0xff]  ;;  %v4791_v11 = vld [vmem:[%s14014_s3 + $0x110] sm:$0xff]  ;;  %v8875_v12 = vpack.c.bf16 %v4796_v6, %v4792_v57 }
0x1d45   :  { %v4800_v13 = vld [vmem:[%s14014_s3 + $0x158] sm:$0xff]  ;;  %v5414_v10 = vld [vmem:[%s14019_s5 + $0xb0] sm:$0xff] }
0x1d46   :  { %v4804_v44 = vld [vmem:[%s14014_s3 + $0x178] sm:$0xff]  ;;  %v5410_v6 = vld [vmem:[%s14019_s5 + $0x90] sm:$0xff] }
0x1d47   :  { %v9470_v20 = vpop.eup %9469  ;;  %8870 = vmatpush1.bf16.msra.mxu1 %v8869_v32  ;;  %v5407_v9 = vld [vmem:[%s14019_s5 + $0x78] sm:$0xff]  ;;  %v8879_v5 = vpack.c.bf16 %v4804_v44, %v4800_v13  ;;  %v4819_v35 = vld [vmem:[%s14014_s3 + $0x1f0] sm:$0xff]  ;;  %v5397_v44 = vld [vmem:[%s14019_s5 + $0x28] sm:$0xff] }
0x1d48   :  { %v9472_v2 = vpop.eup %9471  ;;  %5237 = vperm.xlu0 %9452, %v9470_v20   ;;  %v4783_v20 = vld [vmem:[%s14014_s3 + $0xd0] sm:$0xff]  ;;  %8872 = vmatprep.subr.bf16.mxu1 %v8871_v1  ;;  %v5411_v25 = vld [vmem:[%s14019_s5 + $0x98] sm:$0xff]  ;;  %v8901_v1 = vpack.c.bf16 %v5407_v9, %v5404_v60  ;;  %v5412_v60 = vld [vmem:[%s14019_s5 + $0xa0] sm:$0xff] }
0x1d49   :  { %5234 = vperm.xlu1 %9451, %v9472_v2   ;;  %v9474_v63 = vpop.eup %9473  ;;  %v4787_v2 = vld [vmem:[%s14014_s3 + $0xf0] sm:$0xff]  ;;  %v4808_v49 = vld [vmem:[%s14014_s3 + $0x198] sm:$0xff]  ;;  %v8903_v57 = vpack.c.bf16 %v5414_v10, %v5411_v25  ;;  %v5301_v25 = vld [vmem:[%s14020_s0] sm:$0xff] }
0x1d4a   :  { %v9476_v7 = vpop.eup %9475  ;;  %v4812_v32 = vld [vmem:[%s14014_s3 + $0x1b8] sm:$0xff]  ;;  %v5394_v13 = vld [vmem:[%s14019_s5 + $0x10] sm:$0xff] }
0x1d4b   :  { %v9478_v27 = vpop.eup %9477  ;;  %v5415_v9 = vld [vmem:[%s14019_s5 + $0xb8] sm:$0xff] }
0x1d4c   :  { %v9480_v59 = vpop.eup %9479 }
0x1d4d   :  { %5240 = vperm.xlu1 %9451, %v9474_v63   ;;  %v9482_v61 = vpop.eup %9481  ;;  %v5396_v63 = vld [vmem:[%s14019_s5 + $0x20] sm:$0xff] }
0x1d4e   :  { %v9484_v24 = vpop.eup %9483 }
0x1d51   :  { %5243 = vperm.xlu1 %9451, %v9476_v7   ;;  %v8873_v7 = vpack.c.bf16 %v4787_v2, %v4783_v20  ;;  %v8881_v20 = vpack.c.bf16 %v4803_v38, %v4799_v58  ;;  %v4807_v2 = vld [vmem:[%s14014_s3 + $0x190] sm:$0xff]  ;;  %v5409_v58 = vld [vmem:[%s14019_s5 + $0x88] sm:$0xff] }
0x1d52   :  { %v5302_v38 = vld [vmem:[%s14020_s0 + $0x8] sm:$0xff] }
0x1d53   :  { %8874 = vmatpush1.bf16.msra.mxu1 %v8873_v7  ;;  %v5420_v7 = vld [vmem:[%s14019_s5 + $0xe0] sm:$0xff] }
0x1d54   :  { %8876 = vmatprep.subr.bf16.mxu1 %v8875_v12 }
0x1d55   :  { %5246 = vperm.xlu1 %9451, %v9478_v27   ;;  %v4795_v27 = vld [vmem:[%s14014_s3 + $0x130] sm:$0xff] }
0x1d56   :  { %v8877_v28 = vpack.c.bf16 %v4795_v27, %v4791_v11  ;;  %v4816_v11 = vld [vmem:[%s14014_s3 + $0x1d8] sm:$0xff] }
0x1d57   :  { %v4820_v27 = vld [vmem:[%s14014_s3 + $0x1f8] sm:$0xff] }
0x1d58   :  { %8878 = vmatpush1.bf16.msra.mxu1 %v8877_v28  ;;  %v8887_v12 = vpack.c.bf16 %v4820_v27, %v4816_v11  ;;  %v5406_v28 = vld [vmem:[%s14019_s5 + $0x70] sm:$0xff] }
0x1d59   :  { %5249 = vperm.xlu1 %9451, %v9480_v59   ;;  %v8891_v59 = vpack.c.bf16 %v5396_v63, %v5393_v4  ;;  %v5413_v4 = vld [vmem:[%s14019_s5 + $0xa8] sm:$0xff]  ;;  %8880 = vmatprep.subr.bf16.mxu1 %v8879_v5  ;;  %v8883_v63 = vpack.c.bf16 %v4812_v32, %v4808_v49  ;;  %v8933_v5 = vpack.c.bf16 %v5415_v9, %v5412_v60 }
0x1d5a   :  { %v5306_v60 = vld [vmem:[%s14020_s0 + $0x28] sm:$0xff] }
0x1d5b   :  { %8892 = vmatprep.subr.bf16.mxu0 %v8891_v59  ;;  %v8905_v59 = vpack.c.bf16 %v5413_v4, %v5410_v6 }
0x1d5c   :  { %8882 = vmatpush1.bf16.msra.mxu1 %v8881_v20 }
0x1d5d   :  { %5252 = vperm.xlu1 %9451, %v9482_v61   ;;  %v8893_v61 = vpack.c.bf16 %v5395_v0, %v5392_v14  ;;  %v4811_v14 = vld [vmem:[%s14014_s3 + $0x1b0] sm:$0xff]  ;;  %v5417_v0 = vld [vmem:[%s14019_s5 + $0xc8] sm:$0xff]  ;;  %8884 = vmatprep.subr.bf16.mxu1 %v8883_v63 }
0x1d5f   :  { %8894 = vmatpush1.bf16.msra.mxu0 %v8893_v61  ;;  %v8885_v61 = vpack.c.bf16 %v4811_v14, %v4807_v2  ;;  %v5303_v2 = vld [vmem:[%s14020_s0 + $0x10] sm:$0xff] }
0x1d61   :  { %5255 = vperm.xlu1 %9451, %v9484_v24   ;;  %v5399_v24 = vld [vmem:[%s14019_s5 + $0x38] sm:$0xff]  ;;  %8886 = vmatpush1.bf16.msra.mxu1 %v8885_v61 }
0x1d62   :  { %v8895_v48 = vpack.c.bf16 %v5402_v46, %v5399_v24  ;;  %v8907_v24 = vpack.c.bf16 %v5420_v7, %v5417_v0  ;;  %v4815_v46 = vld [vmem:[%s14014_s3 + $0x1d0] sm:$0xff]  ;;  %8888 = vmatprep.subr.bf16.mxu1 %v8887_v12  ;;  %v5304_v7 = vld [vmem:[%s14020_s0 + $0x18] sm:$0xff] }
0x1d63   :  { %v8889_v45 = vpack.c.bf16 %v4819_v35, %v4815_v46 }
0x1d64   :  { %8896 = vmatprep.subr.bf16.mxu0 %v8895_v48  ;;  %v8924_v48 = vpack.c.bf16 %v5397_v44, %v5394_v13 }
0x1d65   :  { %8898 = vmatpush1.bf16.msra.mxu0 %v8897_v34  ;;  %8890 = vmatpush1.bf16.msra.mxu1 %v8889_v45  ;;  %v5403_v34 = vld [vmem:[%s14019_s5 + $0x58] sm:$0xff] }
0x1d66   :  { %8900 = vmatprep.subr.bf16.mxu0 %v8899_v56  ;;  %8923 = vmatprep.subr.bf16.mxu1 %v9570_v40  ;;  %v8927_v8 = vpack.c.bf16 %v5403_v34, %v5400_v30  ;;  %v8930_v56 = vpack.c.bf16 %v5409_v58, %v5406_v28 }
0x1d68   :  { %4957 = vmatmul.mubr.f32.vlgmr.msra.gmra.mrb[22].mxu1 %v12513_v51 }
0x1d69   :  { %8902 = vmatpush1.bf16.msra.mxu0 %v8901_v1  ;;  %8925 = vmatpush3.bf16.msra.mxu1 %v8924_v48  ;;  %v5305_v48 = vld [vmem:[%s14020_s0 + $0x20] sm:$0xff] }
0x1d6a   :  { %8904 = vmatprep.subr.bf16.mxu0 %v8903_v57  ;;  %7905 = vmatprep.mubr.msk.f32.mxu1 %vm9571_vm8, %v9567_v3 }
0x1d6b   :  { %8926 = vmatprep.subr.bf16.mxu1 %v9570_v40 }
0x1d6d   :  { %8906 = vmatpush1.bf16.msra.mxu0 %v8905_v59  ;;  %8928 = vmatpush3.bf16.msra.mxu1 %v8927_v8 }
0x1d6e   :  { %8908 = vmatprep.subr.bf16.mxu0 %v8907_v24  ;;  %8929 = vmatprep.subr.bf16.mxu1 %v9570_v40 }
0x1d71   :  { %8931 = vmatpush3.bf16.msra.mxu1 %v8930_v56 }
0x1d72   :  { %8932 = vmatprep.subr.bf16.mxu1 %v9570_v40 }
0x1d75   :  { %8934 = vmatpush3.bf16.msra.mxu1 %v8933_v5 }
0x1d76   :  { %8935 = vmatprep.subr.bf16.mxu1 %v9570_v40 }
0x1d85   :  { %4696 = vmin.xlane.f32.xlu1 %v12719_v22 }
0x1dc7   :  { %v5238_v10 = vpop.permute.xlu0 %5237 }
0x1dc8   :  { %v5318_v49 = vmul.f32 %v5302_v38, %v5238_v10  ;;  %v5235_v32 = vpop.permute.xlu1 %5234  ;;  %v5264_v38 = vrot.slane %v5238_v10, %v9805_v53  ;;  %v5307_v10 = vld [vmem:[%s14020_s0 + $0x30] sm:$0xff] }
0x1dc9   :  { %v5317_v1 = vmul.f32 %v5301_v25, %v5235_v32  ;;  %v5260_v25 = vrot.slane %v5235_v32, %v9805_v53 }
0x1dca   :  { %v5331_v20 = vrot.slane %v5318_v49, 4 }
0x1dcb   :  { %v5325_v57 = vrot.slane %v5317_v1, 4 }
0x1dcc   :  { %v5332_v6 = vadd.f32 %v5331_v20, %v5318_v49  ;;  %v5241_v4 = vpop.permute.xlu1 %5240  ;;  %v5156_v20 = vsub.f32 -1e+30, %v12695_v43 }
0x1dcd   :  { %v5326_v63 = vadd.f32 %v5325_v57, %v5317_v1  ;;  %v5319_v14 = vmul.f32 %v5303_v2, %v5241_v4  ;;  %v5268_v2 = vrot.slane %v5241_v4, %v9805_v53  ;;  %v5289_v4 = vsel %vm458_vm0, %v5264_v38, %v5260_v25 }
0x1dce   :  { %v5333_v0 = vrot.slane %v5332_v6, 2 }
0x1dcf   :  { %v5327_v11 = vrot.slane %v5326_v63, 2  ;;  %v5337_v27 = vrot.slane %v5319_v14, 4 }
0x1dd0   :  { %v5334_v59 = vadd.f32 %v5333_v0, %v5332_v6  ;;  %v5244_v61 = vpop.permute.xlu1 %5243 }
0x1dd1   :  { %v5328_v24 = vadd.f32 %v5327_v11, %v5326_v63  ;;  %v5338_v12 = vadd.f32 %v5337_v27, %v5319_v14  ;;  %v5320_v46 = vmul.f32 %v5304_v7, %v5244_v61  ;;  %v5272_v0 = vrot.slane %v5244_v61, %v9805_v53 }
0x1dd2   :  { %v5335_v35 = vrot.slane %v5334_v59, 1  ;;  %v5290_v61 = vsel %vm460_vm1, %v5268_v2, %v5289_v4 }
0x1dd3   :  { %v5329_v45 = vrot.slane %v5328_v24, 1  ;;  %v5339_v13 = vrot.slane %v5338_v12, 2  ;;  %v5343_v44 = vrot.slane %v5320_v46, 4 }
0x1dd4   :  { %v5247_v30 = vpop.permute.xlu1 %5246  ;;  %v5336_v28 = vadd.f32 %v5335_v35, %v5334_v59 }
0x1dd5   :  { %v5340_v34 = vadd.f32 %v5339_v13, %v5338_v12  ;;  %v5344_v8 = vadd.f32 %v5343_v44, %v5320_v46  ;;  %v5330_v58 = vadd.f32 %v5329_v45, %v5328_v24  ;;  %v5321_v56 = vmul.f32 %v5305_v48, %v5247_v30 }
0x1dd6   :  { %v5276_v27 = vrot.slane %v5247_v30, %v9805_v53  ;;  %v5157_v46 = vmul.f32 1.442695, %v5156_v20  ;;  %v5291_v44 = vsel %vm462_vm2, %v5272_v0, %v5290_v61  ;;  %v5308_v30 = vld [vmem:[%s14020_s0 + $0x38] sm:$0xff] }
0x1dd7   :  { %v5341_v9 = vrot.slane %v5340_v34, 1  ;;  %v5345_v5 = vrot.slane %v5344_v8, 2  ;;  %v5349_v49 = vrot.slane %v5321_v56, 4  ;;  %v5381_v14 = vsel %vm458_vm0, %v5336_v28, %v5330_v58 }
0x1dd8   :  { %v5250_v1 = vpop.permute.xlu1 %5249  ;;  %v5292_v58 = vsel %vm464_vm3, %v5276_v27, %v5291_v44  ;;  %9485 = vpow2.f32 %v5157_v46 }
0x1dd9   :  { %v5342_v57 = vadd.f32 %v5341_v9, %v5340_v34  ;;  %v5346_v6 = vadd.f32 %v5345_v5, %v5344_v8  ;;  %v5322_v63 = vmul.f32 %v5306_v60, %v5250_v1  ;;  %v5350_v7 = vadd.f32 %v5349_v49, %v5321_v56 }
0x1dda   :  { %v5280_v24 = vrot.slane %v5250_v1, %v9805_v53 }
0x1ddb   :  { %v5382_v32 = vsel %vm460_vm1, %v5342_v57, %v5381_v14  ;;  %v5347_v11 = vrot.slane %v5346_v6, 1  ;;  %v5355_v43 = vrot.slane %v5322_v63, 4  ;;  %v5351_v59 = vrot.slane %v5350_v7, 2 }
0x1ddc   :  { %v5253_v12 = vpop.permute.xlu1 %5252  ;;  %v5293_v5 = vsel %vm466_vm4, %v5280_v24, %v5292_v58 }
0x1ddd   :  { %v5348_v35 = vadd.f32 %v5347_v11, %v5346_v6  ;;  %v5356_v45 = vadd.f32 %v5355_v43, %v5322_v63  ;;  %v5323_v13 = vmul.f32 %v5307_v10, %v5253_v12  ;;  %v5352_v48 = vadd.f32 %v5351_v59, %v5350_v7 }
0x1dde   :  { %v5284_v34 = vrot.slane %v5253_v12, %v9805_v53 }
0x1ddf   :  { %v5357_v8 = vrot.slane %v5356_v45, 2  ;;  %v5361_v28 = vrot.slane %v5323_v13, 4  ;;  %v5383_v56 = vsel %vm462_vm2, %v5348_v35, %v5382_v32  ;;  %v5353_v60 = vrot.slane %v5352_v48, 1 }
0x1de0   :  { %v5256_v9 = vpop.permute.xlu1 %5255  ;;  %v5294_v2 = vsel %vm468_vm5, %v5284_v34, %v5293_v5  ;;  %v5419_v34 = vld [vmem:[%s14019_s5 + $0xd8] sm:$0xff]  ;;  %v5422_v5 = vld [vmem:[%s14019_s5 + $0xf0] sm:$0xff] }
0x1de1   :  { %v5358_v38 = vadd.f32 %v5357_v8, %v5356_v45  ;;  %v5362_v25 = vadd.f32 %v5361_v28, %v5323_v13  ;;  %v5288_v49 = vrot.slane %v5256_v9, %v9805_v53  ;;  %v5324_v1 = vmul.f32 %v5308_v30, %v5256_v9  ;;  %v5418_v30 = vld [vmem:[%s14019_s5 + $0xd0] sm:$0xff]  ;;  %v5421_v28 = vld [vmem:[%s14019_s5 + $0xe8] sm:$0xff] }
0x1de2   :  { %v5354_v20 = vadd.f32 %v5353_v60, %v5352_v48  ;;  %v9486_v12 = vpop.eup %9485  ;;  %v5416_v48 = vld [vmem:[%s14019_s5 + $0xc0] sm:$0xff]  ;;  %v8936_v58 = vpack.c.bf16 %v5421_v28, %v5418_v30  ;;  %v5426_v60 = vld [vmem:[%s14019_s5 + $0x110] sm:$0xff] }
0x1de3   :  { %v5359_v57 = vrot.slane %v5358_v38, 1  ;;  %v5363_v6 = vrot.slane %v5362_v25, 2  ;;  %v5367_v63 = vrot.slane %v5324_v1, 4  ;;  %v5295_v14 = vsel %vm470_vm6, %v5288_v49, %v5294_v2  ;;  %v5429_v2 = vld [vmem:[%s14019_s5 + $0x128] sm:$0xff] }
0x1de4   :  { %v5297_v0 = vsel %vm473_vm7, %v5295_v14, 0.0  ;;  %v5384_v7 = vsel %vm464_vm3, %v5354_v20, %v5383_v56  ;;  %v5224_v45 = vmul.f32 0.0, %v9486_v12  ;;  %v8909_v8 = vpack.c.bf16 %v5419_v34, %v5416_v48  ;;  %v5423_v56 = vld [vmem:[%s14019_s5 + $0xf8] sm:$0xff]  ;;  %8937 = vmatpush3.bf16.msra.mxu1 %v8936_v58 }
0x1de5   :  { %v5360_v10 = vadd.f32 %v5359_v57, %v5358_v38  ;;  %v5364_v32 = vadd.f32 %v5363_v6, %v5362_v25  ;;  %v5368_v11 = vadd.f32 %v5367_v63, %v5324_v1  ;;  %5298 = vadd.xlane.f32.xlu0 %v5297_v0  ;;  %v8911_v9 = vpack.c.bf16 %v5426_v60, %v5423_v56  ;;  %v5425_v38 = vld [vmem:[%s14019_s5 + $0x108] sm:$0xff]  ;;  %v5424_v25 = vld [vmem:[%s14019_s5 + $0x100] sm:$0xff]  ;;  %v5427_v1 = vld [vmem:[%s14019_s5 + $0x118] sm:$0xff] }
0x1de6   :  { %8910 = vmatpush1.bf16.msra.mxu0 %v8909_v8  ;;  %8938 = vmatprep.subr.bf16.mxu1 %v9570_v40  ;;  %v8913_v49 = vpack.c.bf16 %v5425_v38, %v5422_v5  ;;  %v8939_v20 = vpack.c.bf16 %v5427_v1, %v5424_v25  ;;  %v5432_v57 = vld [vmem:[%s14019_s5 + $0x140] sm:$0xff]  ;;  %v5431_v14 = vld [vmem:[%s14019_s5 + $0x138] sm:$0xff]  ;;  %v5430_v0 = vld [vmem:[%s14019_s5 + $0x130] sm:$0xff]  ;;  %v4692_v34 = vand.u32 65535, %v12716_v47 }
0x1de7   :  { %v5365_v27 = vrot.slane %v5364_v32, 1  ;;  %v5369_v43 = vrot.slane %v5368_v11, 2  ;;  %v5385_v4 = vsel %vm466_vm4, %v5360_v10, %v5384_v7  ;;  %8912 = vmatprep.subr.bf16.mxu0 %v8911_v9  ;;  %v5428_v6 = vld [vmem:[%s14019_s5 + $0x120] sm:$0xff]  ;;  %v8915_v63 = vpack.c.bf16 %v5432_v57, %v5429_v2  ;;  %v5433_v7 = vld [vmem:[%s14019_s5 + $0x148] sm:$0xff]  ;;  %v5439_v12 = vld [vmem:[%s14019_s5 + $0x178] sm:$0xff] }
0x1de8   :  { %8940 = vmatpush3.bf16.msra.mxu1 %v8939_v20  ;;  %v8917_v10 = vpack.c.bf16 %v5431_v14, %v5428_v6  ;;  %v4694_v30 = vcvt.s32.f32 %v4692_v34  ;;  %v4709_v60 = vld [vmem:[%s14015_s9] sm:$0xff]  ;;  %v4712_v9 = vld [vmem:[%s14015_s9 + $0x18] sm:$0xff]  ;;  %v4711_v47 = vld [vmem:[%s14015_s9 + $0x10] sm:$0xff] }
0x1de9   :  { %v5366_v59 = vadd.f32 %v5365_v27, %v5364_v32  ;;  %v5370_v24 = vadd.f32 %v5369_v43, %v5368_v11  ;;  %8941 = vmatprep.subr.bf16.mxu1 %v9570_v40  ;;  %v8942_v32 = vpack.c.bf16 %v5433_v7, %v5430_v0  ;;  %v5435_v11 = vld [vmem:[%s14019_s5 + $0x158] sm:$0xff]  ;;  %v5438_v27 = vld [vmem:[%s14019_s5 + $0x170] sm:$0xff]  ;;  %v8949_v25 = vpack.c.bf16 %v4712_v9, %v4709_v60  ;;  %v4718_v57 = vld [vmem:[%s14015_s9 + $0x48] sm:$0xff] }
0x1dea   :  { %8914 = vmatpush1.bf16.msra.mxu0 %v8913_v49  ;;  %v5434_v43 = vld [vmem:[%s14019_s5 + $0x150] sm:$0xff]  ;;  %v4717_v6 = vld [vmem:[%s14015_s9 + $0x40] sm:$0xff]  ;;  %v4722_v14 = vld [vmem:[%s14015_s9 + $0x68] sm:$0xff] }
0x1deb   :  { %v5371_v46 = vrot.slane %v5370_v24, 1  ;;  %v5386_v61 = vsel %vm468_vm5, %v5366_v59, %v5385_v4  ;;  %8916 = vmatprep.subr.bf16.mxu0 %v8915_v63  ;;  %v8919_v4 = vpack.c.bf16 %v5438_v27, %v5435_v11  ;;  %v5437_v59 = vld [vmem:[%s14019_s5 + $0x168] sm:$0xff]  ;;  %v4719_v5 = vld [vmem:[%s14015_s9 + $0x50] sm:$0xff]  ;;  %v4720_v63 = vld [vmem:[%s14015_s9 + $0x58] sm:$0xff] }
0x1dec   :  { %8943 = vmatpush3.bf16.msra.mxu1 %v8942_v32  ;;  %v4715_v1 = vld [vmem:[%s14015_s9 + $0x30] sm:$0xff]  ;;  %v8983_v7 = vpack.c.bf16 %v4720_v63, %v4717_v6  ;;  %v4724_v11 = vld [vmem:[%s14015_s9 + $0x78] sm:$0xff]  ;;  %v4734_v34 = vld [vmem:[%s14015_s9 + $0xc8] sm:$0xff] }
0x1ded   :  { %v5372_v35 = vadd.f32 %v5371_v46, %v5370_v24  ;;  %v5436_v24 = vld [vmem:[%s14019_s5 + $0x160] sm:$0xff]  ;;  %v8921_v46 = vpack.c.bf16 %v5437_v59, %v5434_v43  ;;  %8944 = vmatprep.subr.bf16.mxu1 %v9570_v40  ;;  %v8953_v0 = vpack.c.bf16 %v4718_v57, %v4715_v1  ;;  %v4723_v27 = vld [vmem:[%s14015_s9 + $0x70] sm:$0xff]  ;;  %v4726_v43 = vld [vmem:[%s14015_s9 + $0x88] sm:$0xff] }
0x1dee   :  { %8918 = vmatpush1.bf16.msra.mxu0 %v8917_v10  ;;  %v4721_v10 = vld [vmem:[%s14015_s9 + $0x60] sm:$0xff]  ;;  %v4731_v59 = vld [vmem:[%s14015_s9 + $0xb0] sm:$0xff]  ;;  %v4742_v57 = vld [vmem:[%s14015_s9 + $0x108] sm:$0xff] }
0x1def   :  { %v5387_v13 = vsel %vm470_vm6, %v5372_v35, %v5386_v61  ;;  %v4710_v61 = vld [vmem:[%s14015_s9 + $0x8] sm:$0xff]  ;;  %v4713_v35 = vld [vmem:[%s14015_s9 + $0x20] sm:$0xff]  ;;  %8920 = vmatprep.subr.bf16.mxu0 %v8919_v4  ;;  %v4728_v4 = vld [vmem:[%s14015_s9 + $0x98] sm:$0xff] }
0x1df0   :  { %v12952_v44 = vadd.f32 %v5387_v13, %v5224_v45  ;;  %v8945_v13 = vpack.c.bf16 %v5439_v12, %v5436_v24  ;;  %v8947_v48 = vpack.c.bf16 %v4713_v35, %v4710_v61  ;;  %v8957_v24 = vpack.c.bf16 %v4724_v11, %v4721_v10  ;;  %v4730_v35 = vld [vmem:[%s14015_s9 + $0xa8] sm:$0xff]  ;;  %v4741_v6 = vld [vmem:[%s14015_s9 + $0x100] sm:$0xff]  ;;  %v4744_v63 = vld [vmem:[%s14015_s9 + $0x118] sm:$0xff] }
0x1df1   :  { %v8986_v12 = vpack.c.bf16 %v4726_v43, %v4723_v27  ;;  %v8959_v61 = vpack.c.bf16 %v4731_v59, %v4728_v4  ;;  %v4745_v10 = vld [vmem:[%s14015_s9 + $0x120] sm:$0xff]  ;;  %v4748_v11 = vld [vmem:[%s14015_s9 + $0x138] sm:$0xff]  ;;  %v4747_v27 = vld [vmem:[%s14015_s9 + $0x130] sm:$0xff] }
0x1df2   :  { %8922 = vmatpush1.bf16.msra.mxu0 %v8921_v46  ;;  %8946 = vmatpush3.bf16.msra.mxu1 %v8945_v13  ;;  %v4727_v46 = vld [vmem:[%s14015_s9 + $0x90] sm:$0xff]  ;;  %v4729_v13 = vld [vmem:[%s14015_s9 + $0xa0] sm:$0xff]  ;;  %v4750_v43 = vld [vmem:[%s14015_s9 + $0x148] sm:$0xff] }
0x1df3   :  { %8948 = vmatprep.subr.bf16.mxu0 %v8947_v48  ;;  %8979 = vmatprep.subr.bf16.mxu1 %v9570_v40  ;;  %v4732_v48 = vld [vmem:[%s14015_s9 + $0xb8] sm:$0xff]  ;;  %v4755_v59 = vld [vmem:[%s14015_s9 + $0x170] sm:$0xff] }
0x1df4   :  { %v4752_v4 = vld [vmem:[%s14015_s9 + $0x158] sm:$0xff] }
0x1e12   :  { %v13031_v8 = vpop.xlane.xlu1 %4696 }
0x1e13   :  { %vm4698_vm12 = vcmp.eq.f32.partialorder %v12719_v22, %v13031_v8  ;;  %v4714_v22 = vld [vmem:[%s14015_s9 + $0x28] sm:$0xff] }
0x1e14   :  { %v4699_v28 = vsel %vm4698_vm12, %v4694_v30, inf  ;;  %v8980_v49 = vpack.c.bf16 %v4714_v22, %v4711_v47  ;;  %v4737_v30 = vld [vmem:[%s14015_s9 + $0xe0] sm:$0xff]  ;;  %v4736_v47 = vld [vmem:[%s14015_s9 + $0xd8] sm:$0xff]  ;;  %v4735_v22 = vld [vmem:[%s14015_s9 + $0xd0] sm:$0xff] }
0x1e15   :  { %4700 = vmin.xlane.f32.xlu1 %v4699_v28  ;;  %v8961_v28 = vpack.c.bf16 %v4730_v35, %v4727_v46  ;;  %v8963_v9 = vpack.c.bf16 %v4737_v30, %v4734_v34  ;;  %v4751_v46 = vld [vmem:[%s14015_s9 + $0x150] sm:$0xff]  ;;  %v4754_v35 = vld [vmem:[%s14015_s9 + $0x168] sm:$0xff] }
0x1e16   :  { %v8977_v34 = vpack.c.bf16 %v4754_v35, %v4751_v46 }
0x1e3b   :  { %v13116_v60 = vpop.f32.mrb[22].mxu1 }
0x1e72   :  { %v5299_v58 = vpop.xlane.xlu0 %5298 }
0x1e73   :  { %v5300_v56 = vadd.f32 %v5299_v58, %v5224_v45  ;;  %v4716_v45 = vld [vmem:[%s14015_s9 + $0x38] sm:$0xff]  ;;  %v8989_v58 = vpack.c.bf16 %v4732_v48, %v4729_v13  ;;  %v4753_v13 = vld [vmem:[%s14015_s9 + $0x160] sm:$0xff] }
0x1e74   :  { %v8951_v2 = vpack.c.bf16 %v4719_v5, %v4716_v45  ;;  %v4738_v45 = vld [vmem:[%s14015_s9 + $0xe8] sm:$0xff]  ;;  %v13128_v5 = vpop.f32.mrb[23].mxu1  ;;  %v4756_v48 = vld [vmem:[%s14015_s9 + $0x178] sm:$0xff] }
0x1e75   :  { %9487 = vrcp.f32 %v5300_v56  ;;  %v4733_v56 = vld [vmem:[%s14015_s9 + $0xc0] sm:$0xff]  ;;  %v8992_v1 = vpack.c.bf16 %v4738_v45, %v4735_v22  ;;  %v9001_v30 = vpack.c.bf16 %v4756_v48, %v4753_v13  ;;  %v5747_v22 = vld [vmem:[%s14021_s7 + $0x8] sm:$0xff]  ;;  %v4963_v13 = vadd.f32 %v12632_v36, %v10235_v15 }
0x1e7f   :  { %v9488_v38 = vpop.eup %9487 }
0x1e80   :  { %v5391_v20 = vmul.f32 %v9488_v38, %v12952_v44  ;;  %v4725_v44 = vld [vmem:[%s14015_s9 + $0x80] sm:$0xff]  ;;  %v4740_v38 = vld [vmem:[%s14015_s9 + $0xf8] sm:$0xff] }
0x1e81   :  { %v8955_v32 = vpack.c.bf16 %v4725_v44, %v4722_v14  ;;  %v4746_v14 = vld [vmem:[%s14015_s9 + $0x128] sm:$0xff]  ;;  %v4749_v44 = vld [vmem:[%s14015_s9 + $0x140] sm:$0xff] }
0x1e82   :  { %5505 = vmatmul.mubr.f32.vlgmr.msra.gmra.mrb[26].mxu0 %v5391_v20  ;;  %7906 = vmatmul.mubr.f32.vlgmr.msra.gmra.mrb[24].mxu1 %v5391_v20  ;;  %v4739_v20 = vld [vmem:[%s14015_s9 + $0xf0] sm:$0xff] }
0x1e83   :  { %8950 = vmatpush1.bf16.msra.mxu0 %v8949_v25  ;;  %8981 = vmatpush3.bf16.msra.mxu1 %v8980_v49  ;;  %v4743_v25 = vld [vmem:[%s14015_s9 + $0x110] sm:$0xff]  ;;  %v8965_v49 = vpack.c.bf16 %v4736_v47, %v4733_v56 }
0x1e84   :  { %8952 = vmatprep.subr.bf16.mxu0 %v8951_v2  ;;  %8982 = vmatprep.subr.bf16.mxu1 %v9570_v40  ;;  %v8967_v2 = vpack.c.bf16 %v4743_v25, %v4740_v38  ;;  %v5748_v38 = vld [vmem:[%s14021_s7 + $0x10] sm:$0xff]  ;;  %v5749_v25 = vld [vmem:[%s14021_s7 + $0x18] sm:$0xff] }
0x1e85   :  { %5645 = vmatprep.mubr.f32.mxu0 %v9567_v3  ;;  %7940 = vmatprep.mubr.msk.f32.mxu1 %vm9571_vm8, %v9567_v3 }
0x1e87   :  { %8954 = vmatpush1.bf16.msra.mxu0 %v8953_v0  ;;  %8984 = vmatpush3.bf16.msra.mxu1 %v8983_v7  ;;  %v8969_v0 = vpack.c.bf16 %v4742_v57, %v4739_v20  ;;  %v8995_v7 = vpack.c.bf16 %v4744_v63, %v4741_v6  ;;  %v5751_v20 = vld [vmem:[%s14021_s7 + $0x28] sm:$0xff]  ;;  %v5752_v57 = vld [vmem:[%s14021_s7 + $0x30] sm:$0xff]  ;;  %v5753_v6 = vld [vmem:[%s14021_s7 + $0x38] sm:$0xff] }
0x1e88   :  { %8956 = vmatprep.subr.bf16.mxu0 %v8955_v32  ;;  %8985 = vmatprep.subr.bf16.mxu1 %v9570_v40  ;;  %v8971_v32 = vpack.c.bf16 %v4749_v44, %v4746_v14  ;;  %v9013_v63 = vpack.c.bf16 %v5753_v6, %v5752_v57  ;;  %v5754_v14 = vld [vmem:[%s14021_s7 + $0x40] sm:$0xff]  ;;  %v5755_v44 = vld [vmem:[%s14021_s7 + $0x48] sm:$0xff] }
0x1e8b   :  { %8958 = vmatpush1.bf16.msra.mxu0 %v8957_v24  ;;  %8987 = vmatpush3.bf16.msra.mxu1 %v8986_v12  ;;  %v8973_v24 = vpack.c.bf16 %v4748_v11, %v4745_v10  ;;  %v8998_v12 = vpack.c.bf16 %v4750_v43, %v4747_v27  ;;  %v5757_v10 = vld [vmem:[%s14021_s7 + $0x58] sm:$0xff]  ;;  %v5758_v11 = vld [vmem:[%s14021_s7 + $0x60] sm:$0xff]  ;;  %v5759_v27 = vld [vmem:[%s14021_s7 + $0x68] sm:$0xff] }
0x1e8c   :  { %8960 = vmatprep.subr.bf16.mxu0 %v8959_v61  ;;  %8988 = vmatprep.subr.bf16.mxu1 %v9570_v40  ;;  %v8975_v61 = vpack.c.bf16 %v4755_v59, %v4752_v4  ;;  %v9022_v43 = vpack.c.bf16 %v5759_v27, %v5758_v11  ;;  %v5760_v4 = vld [vmem:[%s14021_s7 + $0x70] sm:$0xff]  ;;  %v5761_v59 = vld [vmem:[%s14021_s7 + $0x78] sm:$0xff] }
0x1e8f   :  { %8962 = vmatpush1.bf16.msra.mxu0 %v8961_v28  ;;  %8990 = vmatpush3.bf16.msra.mxu1 %v8989_v58  ;;  %v4703_v28 = vcvt.f32.s32 %v13031_v8  ;;  %v5746_v8 = vld [vmem:[%s14021_s7] sm:$0xff] }
0x1e90   :  { %8964 = vmatprep.subr.bf16.mxu0 %v8963_v9  ;;  %8991 = vmatprep.subr.bf16.mxu1 %v9570_v40  ;;  %v9004_v45 = vpack.c.bf16 %v5747_v22, %v5746_v8 }
0x1e91   :  { %v4704_v56 = vshll.u32 %v4703_v28, 16 }
0x1e93   :  { %8966 = vmatpush1.bf16.msra.mxu0 %v8965_v49  ;;  %8993 = vmatpush3.bf16.msra.mxu1 %v8992_v1  ;;  %v9007_v49 = vpack.c.bf16 %v5749_v25, %v5748_v38  ;;  %v5750_v1 = vld [vmem:[%s14021_s7 + $0x20] sm:$0xff] }
0x1e94   :  { %8968 = vmatprep.subr.bf16.mxu0 %v8967_v2  ;;  %8994 = vmatprep.subr.bf16.mxu1 %v9570_v40  ;;  %v9010_v2 = vpack.c.bf16 %v5751_v20, %v5750_v1 }
0x1e97   :  { %8970 = vmatpush1.bf16.msra.mxu0 %v8969_v0  ;;  %8996 = vmatpush3.bf16.msra.mxu1 %v8995_v7  ;;  %v9016_v0 = vpack.c.bf16 %v5755_v44, %v5754_v14  ;;  %v5756_v7 = vld [vmem:[%s14021_s7 + $0x50] sm:$0xff] }
0x1e98   :  { %8972 = vmatprep.subr.bf16.mxu0 %v8971_v32  ;;  %8997 = vmatprep.subr.bf16.mxu1 %v9570_v40  ;;  %v9019_v32 = vpack.c.bf16 %v5757_v10, %v5756_v7 }
0x1e9b   :  { %8974 = vmatpush1.bf16.msra.mxu0 %v8973_v24  ;;  %8999 = vmatpush3.bf16.msra.mxu1 %v8998_v12  ;;  %v9025_v24 = vpack.c.bf16 %v5761_v59, %v5760_v4 }
0x1e9c   :  { %8976 = vmatprep.subr.bf16.mxu0 %v8975_v61  ;;  %9000 = vmatprep.subr.bf16.mxu1 %v9570_v40 }
0x1e9f   :  { %8978 = vmatpush1.bf16.msra.mxu0 %v8977_v34  ;;  %9002 = vmatpush3.bf16.msra.mxu1 %v9001_v30 }
0x1ea0   :  { %9003 = vmatprep.subr.bf16.mxu0 %v9570_v40 }
0x1ea2   :  { %v4701_v58 = vpop.xlane.xlu1 %4700 }
0x1ea3   :  { %v4702_v9 = vcvt.f32.s32 %v4701_v58  ;;  %v4964_v58 = vadd.f32 %v13116_v60, %v10244_v23 }
0x1ea5   :  { %v4705_v47 = vadd.s32 %v4704_v56, %v4702_v9 }
0x1ea7   :  { %vm4706_vm13 = vcmp.eq.s32.totalorder %v9801_v50, %v4705_v47 }
0x1ea8   :  { %7184 = vmatmul.mubr.msk.f32.vlgmr.msra.gmra.mrb[26].mxu0 %vm4706_vm13, %v9572_v39  ;;  %7941 = vmatmul.mubr.msk.f32.vlgmr.msra.gmra.mrb[26].mxu1 %vm4706_vm13, %v9572_v39 }
0x1ea9   :  { %7975 = vmatprep.mubr.msk.f32.mxu0 %vm9571_vm8, %v9567_v3  ;;  %9005 = vmatpush3.bf16.msra.mxu0 %v9004_v45 }
0x1eaa   :  { %9006 = vmatprep.subr.bf16.mxu0 %v9570_v40 }
0x1ead   :  { %9008 = vmatpush3.bf16.msra.mxu0 %v9007_v49  ;;  %v4965_v49 = vadd.f32 %v13128_v5, %v10259_v55 }
0x1eae   :  { %9009 = vmatprep.subr.bf16.mxu0 %v9570_v40 }
0x1eb1   :  { %9011 = vmatpush3.bf16.msra.mxu0 %v9010_v2 }
0x1eb2   :  { %9012 = vmatprep.subr.bf16.mxu0 %v9570_v40 }
0x1eb5   :  { %9014 = vmatpush3.bf16.msra.mxu0 %v9013_v63 }
0x1eb6   :  { %9015 = vmatprep.subr.bf16.mxu0 %v9570_v40 }
0x1eb9   :  { %9017 = vmatpush3.bf16.msra.mxu0 %v9016_v0 }
0x1eba   :  { %9018 = vmatprep.subr.bf16.mxu0 %v9570_v40 }
0x1ebd   :  { %9020 = vmatpush3.bf16.msra.mxu0 %v9019_v32 }
0x1ebe   :  { %9021 = vmatprep.subr.bf16.mxu0 %v9570_v40 }
0x1ec1   :  { %9023 = vmatpush3.bf16.msra.mxu0 %v9022_v43 }
0x1ec2   :  { %9024 = vmatprep.subr.bf16.mxu0 %v9570_v40 }
0x1ec5   :  { %9026 = vmatpush3.bf16.msra.mxu0 %v9025_v24 }
0x1f55   :  { %v5577_v12 = vpop.f32.mrb[24].mxu1 }
0x1f56   :  { %v7907_v46 = vpop.f32.mrb[25].mxu1 }
0x1f7b   :  { %v5647_v61 = vpop.f32.mrb[26].mxu0  ;;  %v5718_v35 = vpop.f32.mrb[26].mxu1 }
0x1f7c   :  { %v5722_v48 = vadd.f32 %v5647_v61, %v10238_v19  ;;  %v5719_v34 = vadd.f32 %v5718_v35, %v5577_v12  ;;  %v5649_v30 = vpop.f32.mrb[27].mxu0  ;;  %v7942_v28 = vpop.f32.mrb[27].mxu1 }
0x1f7d   :  { %v5723_v56 = vadd.f32 %v5649_v30, %v10247_v26 }
0x1f7e   :  { %v5725_v9 = vadd.f32 %v5722_v48, %v4963_v13  ;;  %v5724_v20 = vadd.f32 %v5719_v34, %v10262_v52 }
0x1f7f   :  { %v5732_v47 = vadd.f32 %v5723_v56, %v4964_v58 }
0x1f80   :  { %v7186_v8 = vmul.f32 -1.442695, %v5725_v9 }
0x1f81   :  { %v7187_v22 = vmul.f32 -1.442695, %v5732_v47 }
0x1f82   :  { %9489 = vpow2.f32 %v7186_v8 }
0x1f83   :  { %9491 = vpow2.f32 %v7187_v22 }
0x1f8c   :  { %v9490_v45 = vpop.eup %9489 }
0x1f8d   :  { %v5729_v38 = vadd.f32 1.0, %v9490_v45  ;;  %v9492_v36 = vpop.eup %9491 }
0x1f8e   :  { %v5736_v25 = vadd.f32 1.0, %v9492_v36 }
0x1f8f   :  { %9493 = vrcp.f32 %v5729_v38 }
0x1f90   :  { %9495 = vrcp.f32 %v5736_v25 }
0x1f99   :  { %v9494_v1 = vpop.eup %9493 }
0x1f9a   :  { %v5739_v60 = vmul.f32 %v9494_v1, %v4965_v49  ;;  %v9496_v57 = vpop.eup %9495 }
0x1f9b   :  { %v5742_v6 = vsub.f32 1.0, %v9496_v57  ;;  %v5744_v44 = vmul.f32 %v9496_v57, %v12513_v51 }
0x1f9c   :  { %v5740_v2 = vadd.f32 %v5739_v60, %v5724_v20 }
0x1f9e   :  { %9497 = vtanh.f32 %v5740_v2 }
0x1fa8   :  { %v9498_v63 = vpop.eup %9497 }
0x1fa9   :  { %v5743_v14 = vmul.f32 %v9498_v63, %v5742_v6 }
0x1fab   :  { %v13260_v0 = vadd.f32 %v5744_v44, %v5743_v14 }
0x1fad   :  { %7976 = vmatmul.mubr.f32.vlgmr.msra.gmra.mrb[28].mxu0 %v13260_v0 }
0x2080   :  { %v5828_v7 = vpop.f32.mrb[28].mxu0 }
0x2081   :  { %v13264_v5 = vadd.f32 %v10273_v42, %v5828_v7  ;;  %v7977_v10 = vpop.f32.mrb[29].mxu0 }
0x2083   :  { %5832 = vmax.xlane.f32.xlu0 %v13264_v5 }
0x2110   :  { %v13267_v32 = vpop.xlane.xlu0 %5832 }
0x2111   :  { %v5834_v11 = vsub.f32 %v13264_v5, %v13267_v32 }
0x2113   :  { %v5835_v27 = vmul.f32 1.442695, %v5834_v11 }
0x2115   :  { %9499 = vpow2.f32 %v5835_v27 }
0x211f   :  { %v9500_v43 = vpop.eup %9499 }
0x2120   :  { %5837 = vadd.xlane.f32.xlu1 %v9500_v43 }
0x21ad   :  { %v5838_v51 = vpop.xlane.xlu1 %5837 }
0x21ae   :  { %9501 = vlog2.f32 %v5838_v51 }
0x21b8   :  { %v9502_v4 = vpop.eup %9501 }
0x21b9   :  { %v5840_v59 = vmul.f32 0.6931472, %v9502_v4 }
0x21bb   :  { %v5841_v24 = vadd.f32 %v5840_v59, %v13267_v32 }
0x21bd   :  { %v5842_v12 = vsub.f32 %v13264_v5, %v5841_v24 }
0x21be   :  { %9559 = dma.done.wait [#allocation3], 128 }
0x21bf   :  { %9560 = vsyncadd [#allocation3], 4294967168  ;;  %7188 = vst [vmem:[%s14026_s11 + $0x20] sm:$0xff] %v5842_v12 }
0x21c0   :  { %5888 = vsyncadd [#allocation3], 128  ;;  %v5957_v46 = vld [vmem:[%s14014_s3 + $0x8] sm:$0xff]  ;;  %6084 = vmatprep.mubr.f32.mxu1 %v9567_v3  ;;  %9504 = vset.pattern.permute.xlu0 %v9569_v16  ;;  %v5956_v13 = vld [vmem:[%s14014_s3] sm:$0xff]  ;;  %vm5889_vm14 = vcmp.ge.f32.partialorder %v13264_v5, %v13267_v32 }
0x21c1   :  { %v5961_v61 = vld [vmem:[%s14014_s3 + $0x28] sm:$0xff]  ;;  %v5960_v48 = vld [vmem:[%s14014_s3 + $0x20] sm:$0xff]  ;;  %9503 = vset.pattern.permute.xlu1 %v9569_v16  ;;  %6155 = vmatprep.mubr.f32.mxu0 %v9567_v3  ;;  %v5958_v5 = vld [vmem:[%s14014_s3 + $0x10] sm:$0xff] }
0x21c2   :  { %v9027_v35 = vpack.c.bf16 %v5961_v61, %v5957_v46  ;;  %v5965_v34 = vld [vmem:[%s14014_s3 + $0x48] sm:$0xff]  ;;  %v9029_v30 = vpack.c.bf16 %v5960_v48, %v5956_v13  ;;  %v5964_v58 = vld [vmem:[%s14014_s3 + $0x40] sm:$0xff] }
0x21c3   :  { %v5969_v28 = vld [vmem:[%s14014_s3 + $0x68] sm:$0xff]  ;;  %v5968_v56 = vld [vmem:[%s14014_s3 + $0x60] sm:$0xff] }
0x21c4   :  { %9028 = vmatprep.subr.bf16.mxu1 %v9027_v35  ;;  %v9031_v9 = vpack.c.bf16 %v5969_v28, %v5965_v34  ;;  %v5973_v16 = vld [vmem:[%s14014_s3 + $0x88] sm:$0xff]  ;;  %v9033_v8 = vpack.c.bf16 %v5968_v56, %v5964_v58  ;;  %v5972_v45 = vld [vmem:[%s14014_s3 + $0x80] sm:$0xff] }
0x21c5   :  { %v5977_v47 = vld [vmem:[%s14014_s3 + $0xa8] sm:$0xff]  ;;  %9030 = vmatpush1.bf16.msra.mxu1 %v9029_v30  ;;  %v5976_v38 = vld [vmem:[%s14014_s3 + $0xa0] sm:$0xff] }
0x21c6   :  { %9032 = vmatprep.subr.bf16.mxu1 %v9031_v9  ;;  %v9035_v22 = vpack.c.bf16 %v5977_v47, %v5973_v16  ;;  %v5981_v36 = vld [vmem:[%s14014_s3 + $0xc8] sm:$0xff]  ;;  %v9037_v49 = vpack.c.bf16 %v5976_v38, %v5972_v45  ;;  %v5980_v20 = vld [vmem:[%s14014_s3 + $0xc0] sm:$0xff] }
0x21c7   :  { %v5985_v25 = vld [vmem:[%s14014_s3 + $0xe8] sm:$0xff]  ;;  %v5984_v60 = vld [vmem:[%s14014_s3 + $0xe0] sm:$0xff] }
0x21c8   :  { %v9039_v1 = vpack.c.bf16 %v5985_v25, %v5981_v36  ;;  %v5989_v2 = vld [vmem:[%s14014_s3 + $0x108] sm:$0xff]  ;;  %v9041_v6 = vpack.c.bf16 %v5984_v60, %v5980_v20  ;;  %v5988_v14 = vld [vmem:[%s14014_s3 + $0x100] sm:$0xff] }
0x21c9   :  { %9034 = vmatpush1.bf16.msra.mxu1 %v9033_v8  ;;  %v5993_v57 = vld [vmem:[%s14014_s3 + $0x128] sm:$0xff]  ;;  %v5992_v44 = vld [vmem:[%s14014_s3 + $0x120] sm:$0xff] }
0x21ca   :  { %9036 = vmatprep.subr.bf16.mxu1 %v9035_v22  ;;  %v9043_v63 = vpack.c.bf16 %v5993_v57, %v5989_v2  ;;  %v5997_v7 = vld [vmem:[%s14014_s3 + $0x148] sm:$0xff]  ;;  %v9045_v11 = vpack.c.bf16 %v5992_v44, %v5988_v14  ;;  %v5996_v43 = vld [vmem:[%s14014_s3 + $0x140] sm:$0xff] }
0x21cb   :  { %v6001_v10 = vld [vmem:[%s14014_s3 + $0x168] sm:$0xff]  ;;  %v6000_v51 = vld [vmem:[%s14014_s3 + $0x160] sm:$0xff] }
0x21cc   :  { %v9047_v27 = vpack.c.bf16 %v6001_v10, %v5997_v7  ;;  %v6005_v4 = vld [vmem:[%s14014_s3 + $0x188] sm:$0xff]  ;;  %v9049_v24 = vpack.c.bf16 %v6000_v51, %v5996_v43  ;;  %v6004_v46 = vld [vmem:[%s14014_s3 + $0x180] sm:$0xff] }
0x21cd   :  { %9038 = vmatpush1.bf16.msra.mxu1 %v9037_v49  ;;  %v6009_v59 = vld [vmem:[%s14014_s3 + $0x1a8] sm:$0xff]  ;;  %v6008_v61 = vld [vmem:[%s14014_s3 + $0x1a0] sm:$0xff] }
0x21ce   :  { %9040 = vmatprep.subr.bf16.mxu1 %v9039_v1  ;;  %v9051_v12 = vpack.c.bf16 %v6009_v59, %v6005_v4  ;;  %v6013_v35 = vld [vmem:[%s14014_s3 + $0x1c8] sm:$0xff]  ;;  %v9053_v48 = vpack.c.bf16 %v6008_v61, %v6004_v46  ;;  %v6012_v30 = vld [vmem:[%s14014_s3 + $0x1c0] sm:$0xff] }
0x21cf   :  { %v6017_v13 = vld [vmem:[%s14014_s3 + $0x1e8] sm:$0xff]  ;;  %v6016_v28 = vld [vmem:[%s14014_s3 + $0x1e0] sm:$0xff] }
0x21d0   :  { %v9055_v34 = vpack.c.bf16 %v6017_v13, %v6013_v35  ;;  %v9057_v58 = vpack.c.bf16 %v6016_v28, %v6012_v30  ;;  %v6215_v49 = vld [vmem:[%s14017_s1] sm:$0xff]  ;;  %v6216_v60 = vld [vmem:[%s14017_s1 + $0x8] sm:$0xff]  ;;  %v6221_v35 = vld [vmem:[%s14017_s1 + $0x30] sm:$0xff] }
0x21d1   :  { %9042 = vmatpush1.bf16.msra.mxu1 %v9041_v6  ;;  %v6219_v43 = vld [vmem:[%s14017_s1 + $0x20] sm:$0xff] }
0x21d2   :  { %9044 = vmatprep.subr.bf16.mxu1 %v9043_v63  ;;  %v6217_v63 = vld [vmem:[%s14017_s1 + $0x10] sm:$0xff] }
0x21d5   :  { %9046 = vmatpush1.bf16.msra.mxu1 %v9045_v11  ;;  %v6218_v11 = vld [vmem:[%s14017_s1 + $0x18] sm:$0xff] }
0x21d6   :  { %9048 = vmatprep.subr.bf16.mxu1 %v9047_v27 }
0x21d9   :  { %9050 = vmatpush1.bf16.msra.mxu1 %v9049_v24 }
0x21da   :  { %9052 = vmatprep.subr.bf16.mxu1 %v9051_v12  ;;  %v6220_v12 = vld [vmem:[%s14017_s1 + $0x28] sm:$0xff] }
0x21dd   :  { %9054 = vmatpush1.bf16.msra.mxu1 %v9053_v48 }
0x21de   :  { %9056 = vmatprep.subr.bf16.mxu1 %v9055_v34  ;;  %v6222_v34 = vld [vmem:[%s14017_s1 + $0x38] sm:$0xff] }
0x21e1   :  { %9058 = vmatpush1.bf16.msra.mxu1 %v9057_v58 }
0x21e4   :  { %6085 = vmatmul.mubr.f32.vlgmr.msra.gmra.mrb[28].mxu1 %v13260_v0 }
0x21e5   :  { %6703 = vmatprep.mubr.f32.mxu1 %v9567_v3 }
0x22b7   :  { %v6086_v56 = vpop.f32.mrb[28].mxu1 }
0x22b8   :  { %v6166_v9 = vcombine.high %v6086_v56, %v6086_v56  ;;  %v6173_v16 = vrot.slane %v6086_v56, %v9742_v54  ;;  %v13379_v47 = vpop.f32.mrb[29].mxu1 }
0x22ba   :  { %v6180_v8 = vrot.slane %v6166_v9, %v9742_v54  ;;  %v6181_v22 = vcombine.high %v6173_v16, %v6173_v16  ;;  %v6189_v45 = vrot.slane %v6173_v16, %v9742_v54 }
0x22bc   :  { %v6182_v38 = vcombine.high %v6180_v8, %v6180_v8  ;;  %v6196_v36 = vrot.slane %v6180_v8, %v9742_v54  ;;  %v6203_v25 = vrot.slane %v6181_v22, %v9742_v54  ;;  %v6226_v1 = vrot.slane %v6189_v45, %v9750_v62 }
0x22bd   :  { %v6211_v20 = vcombine.high %v6189_v45, %v6189_v45 }
0x22be   :  { %v6210_v2 = vrot.slane %v6182_v38, %v9742_v54  ;;  %v6213_v57 = vcombine.high %v6203_v25, %v6203_v25  ;;  %v6230_v6 = vrot.slane %v6203_v25, %v9750_v62  ;;  %v6212_v14 = vcombine.high %v6196_v36, %v6196_v36 }
0x22bf   :  { %v6242_v44 = vrot.slane %v6196_v36, %v9750_v62  ;;  %v6263_v7 = vadd.f32 %v6226_v1, %v6215_v49  ;;  %v6234_v10 = vrot.slane %v6211_v20, %v9750_v62 }
0x22c0   :  { %v6264_v27 = vadd.f32 %v6230_v6, %v6216_v60  ;;  %v6238_v54 = vrot.slane %v6213_v57, %v9750_v62  ;;  %v6214_v51 = vcombine.high %v6210_v2, %v6210_v2  ;;  %v6246_v59 = vrot.slane %v6210_v2, %v9750_v62 }
0x22c1   :  { %9505 = vtanh.f32 %v6263_v7  ;;  %v6265_v4 = vadd.f32 %v6234_v10, %v6217_v63  ;;  %v6267_v46 = vadd.f32 %v6242_v44, %v6219_v43  ;;  %v6250_v61 = vrot.slane %v6212_v14, %v9750_v62 }
0x22c2   :  { %9507 = vtanh.f32 %v6264_v27  ;;  %v6266_v24 = vadd.f32 %v6238_v54, %v6218_v11  ;;  %v6268_v13 = vadd.f32 %v6246_v59, %v6220_v12  ;;  %v6254_v48 = vrot.slane %v6214_v51, %v9750_v62 }
0x22c3   :  { %9509 = vtanh.f32 %v6265_v4  ;;  %v6269_v30 = vadd.f32 %v6250_v61, %v6221_v35 }
0x22c4   :  { %9511 = vtanh.f32 %v6266_v24  ;;  %v6270_v28 = vadd.f32 %v6254_v48, %v6222_v34 }
0x22c5   :  { %9513 = vtanh.f32 %v6267_v46 }
0x22c6   :  { %9515 = vtanh.f32 %v6268_v13 }
0x22c7   :  { %9517 = vtanh.f32 %v6269_v30 }
0x22c8   :  { %9519 = vtanh.f32 %v6270_v28 }
0x22cb   :  { %v9506_v58 = vpop.eup %9505 }
0x22cc   :  { %v9508_v56 = vpop.eup %9507  ;;  %v6279_v9 = vmul.f32 %v9506_v58, %v9790_v31 }
0x22cd   :  { %v9510_v16 = vpop.eup %9509  ;;  %v6280_v45 = vmul.f32 %v9508_v56, %v9790_v31 }
0x22ce   :  { %6287 = vadd.xlane.f32.xlu0 %v6279_v9  ;;  %v6281_v8 = vmul.f32 %v9510_v16, %v9790_v31  ;;  %v9512_v22 = vpop.eup %9511 }
0x22cf   :  { %v9514_v38 = vpop.eup %9513  ;;  %v6282_v36 = vmul.f32 %v9512_v22, %v9790_v31 }
0x22d0   :  { %6291 = vadd.xlane.f32.xlu1 %v6281_v8  ;;  %v9516_v25 = vpop.eup %9515  ;;  %v6283_v49 = vmul.f32 %v9514_v38, %v9790_v31 }
0x22d1   :  { %v9518_v1 = vpop.eup %9517  ;;  %v6284_v20 = vmul.f32 %v9516_v25, %v9790_v31 }
0x22d2   :  { %6289 = vadd.xlane.f32.xlu0 %v6280_v45  ;;  %v9520_v60 = vpop.eup %9519  ;;  %v6285_v2 = vmul.f32 %v9518_v1, %v9790_v31 }
0x22d3   :  { %v6286_v57 = vmul.f32 %v9520_v60, %v9790_v31 }
0x22d4   :  { %6293 = vadd.xlane.f32.xlu1 %v6282_v36 }
0x22d6   :  { %6295 = vadd.xlane.f32.xlu0 %v6283_v49 }
0x22d8   :  { %6297 = vadd.xlane.f32.xlu1 %v6284_v20 }
0x22da   :  { %6299 = vadd.xlane.f32.xlu0 %v6285_v2 }
0x22dc   :  { %6301 = vadd.xlane.f32.xlu1 %v6286_v57 }
0x235b   :  { %v6288_v6 = vpop.xlane.xlu0 %6287 }
0x235c   :  { %v6314_v44 = vrot.slane %v6288_v6, %v9805_v53 }
0x235d   :  { %v6292_v63 = vpop.xlane.xlu1 %6291 }
0x235e   :  { %v6322_v10 = vrot.slane %v6292_v63, %v9805_v53 }
0x235f   :  { %v6290_v14 = vpop.xlane.xlu0 %6289 }
0x2360   :  { %v6318_v7 = vrot.slane %v6290_v14, %v9805_v53 }
0x2361   :  { %v6294_v11 = vpop.xlane.xlu1 %6293 }
0x2362   :  { %v6343_v27 = vsel %vm458_vm0, %v6318_v7, %v6314_v44  ;;  %v6326_v54 = vrot.slane %v6294_v11, %v9805_v53 }
0x2363   :  { %v6344_v43 = vsel %vm460_vm1, %v6322_v10, %v6343_v27  ;;  %v6296_v51 = vpop.xlane.xlu0 %6295 }
0x2364   :  { %v6345_v31 = vsel %vm462_vm2, %v6326_v54, %v6344_v43  ;;  %v6330_v4 = vrot.slane %v6296_v51, %v9805_v53 }
0x2365   :  { %v6298_v59 = vpop.xlane.xlu1 %6297 }
0x2366   :  { %v6334_v24 = vrot.slane %v6298_v59, %v9805_v53  ;;  %v6346_v12 = vsel %vm464_vm3, %v6330_v4, %v6345_v31 }
0x2367   :  { %v6300_v46 = vpop.xlane.xlu0 %6299 }
0x2368   :  { %v6338_v61 = vrot.slane %v6300_v46, %v9805_v53  ;;  %v6347_v35 = vsel %vm466_vm4, %v6334_v24, %v6346_v12  ;;  %v5963_v24 = vld [vmem:[%s14014_s3 + $0x38] sm:$0xff]  ;;  %v5962_v12 = vld [vmem:[%s14014_s3 + $0x30] sm:$0xff] }
0x2369   :  { %v6302_v13 = vpop.xlane.xlu1 %6301 }
0x236a   :  { %v6342_v48 = vrot.slane %v6302_v13, %v9805_v53  ;;  %v6348_v34 = vsel %vm468_vm5, %v6338_v61, %v6347_v35  ;;  %v5971_v61 = vld [vmem:[%s14014_s3 + $0x78] sm:$0xff]  ;;  %v9061_v35 = vpack.c.bf16 %v5962_v12, %v5958_v5  ;;  %v6002_v12 = vld [vmem:[%s14014_s3 + $0x170] sm:$0xff] }
0x236b   :  { %v6606_v5 = vld [vmem:[%s14019_s5 + $0x78] sm:$0xff] }
0x236c   :  { %v6349_v30 = vsel %vm470_vm6, %v6342_v48, %v6348_v34  ;;  %v5966_v48 = vld [vmem:[%s14014_s3 + $0x50] sm:$0xff] }
0x236d   :  { %v6351_v28 = vsel %vm473_vm7, %v6349_v30, -inf  ;;  %v5970_v34 = vld [vmem:[%s14014_s3 + $0x70] sm:$0xff]  ;;  %v5975_v30 = vld [vmem:[%s14014_s3 + $0x98] sm:$0xff] }
0x236e   :  { %6352 = vmax.xlane.f32.xlu0 %v6351_v28  ;;  %v5979_v28 = vld [vmem:[%s14014_s3 + $0xb8] sm:$0xff] }
0x23fb   :  { %v6353_v58 = vpop.xlane.xlu0 %6352 }
0x23fc   :  { %v13442_v56 = vmax.f32 %v6353_v58, -1e+30  ;;  %v9065_v58 = vpack.c.bf16 %v5970_v34, %v5966_v48 }
0x23fe   :  { %v6366_v9 = vrot.slane %v13442_v56, %v9826_v17  ;;  %v6362_v16 = vrot.slane %v13442_v56, %v9750_v62  ;;  %v6370_v8 = vrot.slane %v13442_v56, %v9829_v18  ;;  %v6374_v36 = vrot.slane %v13442_v56, %v9834_v21 }
0x23ff   :  { %v6378_v17 = vrot.slane %v13442_v56, %v9845_v29  ;;  %v6382_v18 = vrot.slane %v13442_v56, %v9848_v33  ;;  %v6386_v21 = vrot.slane %v13442_v56, %v9853_v37  ;;  %v6390_v29 = vrot.slane %v13442_v56, %v9858_v41 }
0x2400   :  { %v6400_v22 = vsub.f32 %v6290_v14, %v6366_v9  ;;  %v6399_v45 = vsub.f32 %v6288_v6, %v6362_v16  ;;  %v6401_v38 = vsub.f32 %v6292_v63, %v6370_v8  ;;  %v6402_v20 = vsub.f32 %v6294_v11, %v6374_v36  ;;  %v5974_v16 = vld [vmem:[%s14014_s3 + $0x90] sm:$0xff] }
0x2401   :  { %v6403_v60 = vsub.f32 %v6296_v51, %v6378_v17  ;;  %v6404_v57 = vsub.f32 %v6298_v59, %v6382_v18  ;;  %v6405_v44 = vsub.f32 %v6300_v46, %v6386_v21  ;;  %v6406_v10 = vsub.f32 %v6302_v13, %v6390_v29  ;;  %v5959_v59 = vld [vmem:[%s14014_s3 + $0x18] sm:$0xff]  ;;  %v5978_v8 = vld [vmem:[%s14014_s3 + $0xb0] sm:$0xff]  ;;  %v6592_v17 = vld [vmem:[%s14019_s5 + $0x8] sm:$0xff] }
0x2402   :  { %v6409_v25 = vmul.f32 1.442695, %v6400_v22  ;;  %v6407_v49 = vmul.f32 1.442695, %v6399_v45  ;;  %v6411_v1 = vmul.f32 1.442695, %v6401_v38  ;;  %v9059_v32 = vpack.c.bf16 %v5963_v24, %v5959_v59 }
0x2403   :  { %v6413_v62 = vmul.f32 1.442695, %v6402_v20  ;;  %v6415_v2 = vmul.f32 1.442695, %v6403_v60  ;;  %v6417_v14 = vmul.f32 1.442695, %v6404_v57  ;;  %v9067_v9 = vpack.c.bf16 %v5979_v28, %v5975_v30 }
0x2404   :  { %9521 = vpow2.f32 %v6409_v25  ;;  %v6419_v33 = vmul.f32 1.442695, %v6405_v44  ;;  %v6421_v27 = vmul.f32 1.442695, %v6406_v10  ;;  %v13463_v41 = vsel %vm5889_vm14, %v9801_v50, 128  ;;  %v5967_v46 = vld [vmem:[%s14014_s3 + $0x58] sm:$0xff]  ;;  %9060 = vmatprep.subr.bf16.mxu0 %v9059_v32 }
0x2405   :  { %9523 = vpow2.f32 %v6407_v49  ;;  %v5892_v31 = vshra.s32 %v13463_v41, 16  ;;  %v9063_v13 = vpack.c.bf16 %v5971_v61, %v5967_v46  ;;  %9062 = vmatpush1.bf16.msra.mxu0 %v9061_v35  ;;  %v5983_v22 = vld [vmem:[%s14014_s3 + $0xd8] sm:$0xff]  ;;  %v9069_v38 = vpack.c.bf16 %v5978_v8, %v5974_v16  ;;  %v5982_v25 = vld [vmem:[%s14014_s3 + $0xd0] sm:$0xff]  ;;  %v6591_v60 = vld [vmem:[%s14019_s5] sm:$0xff] }
0x2406   :  { %9525 = vpow2.f32 %v6411_v1  ;;  %v5987_v45 = vld [vmem:[%s14014_s3 + $0xf8] sm:$0xff]  ;;  %v5986_v49 = vld [vmem:[%s14014_s3 + $0xf0] sm:$0xff]  ;;  %v6603_v24 = vld [vmem:[%s14019_s5 + $0x60] sm:$0xff] }
0x2407   :  { %9527 = vpow2.f32 %v6413_v62  ;;  %v13466_v4 = vcvt.s32.f32 %v5892_v31  ;;  %9064 = vmatprep.subr.bf16.mxu0 %v9063_v13  ;;  %v9071_v36 = vpack.c.bf16 %v5987_v45, %v5983_v22  ;;  %v5991_v1 = vld [vmem:[%s14014_s3 + $0x118] sm:$0xff]  ;;  %v6595_v62 = vld [vmem:[%s14019_s5 + $0x20] sm:$0xff]  ;;  %v5990_v57 = vld [vmem:[%s14014_s3 + $0x110] sm:$0xff]  ;;  %v9101_v48 = vpack.c.bf16 %v6606_v5, %v6603_v24 }
0x2408   :  { %9529 = vpow2.f32 %v6415_v2  ;;  %v5995_v20 = vld [vmem:[%s14014_s3 + $0x138] sm:$0xff]  ;;  %v9073_v2 = vpack.c.bf16 %v5986_v49, %v5982_v25  ;;  %v5994_v21 = vld [vmem:[%s14014_s3 + $0x130] sm:$0xff]  ;;  %v6616_v22 = vld [vmem:[%s14019_s5 + $0xc8] sm:$0xff] }
0x2409   :  { %9531 = vpow2.f32 %v6417_v14  ;;  %9066 = vmatpush1.bf16.msra.mxu0 %v9065_v58  ;;  %v6594_v18 = vld [vmem:[%s14019_s5 + $0x18] sm:$0xff]  ;;  %v9075_v44 = vpack.c.bf16 %v5995_v20, %v5991_v1  ;;  %v6601_v29 = vld [vmem:[%s14019_s5 + $0x50] sm:$0xff]  ;;  %v6619_v45 = vld [vmem:[%s14019_s5 + $0xe0] sm:$0xff] }
0x240a   :  { %9533 = vpow2.f32 %v6419_v33  ;;  %9068 = vmatprep.subr.bf16.mxu0 %v9067_v9  ;;  %v6598_v14 = vld [vmem:[%s14019_s5 + $0x38] sm:$0xff]  ;;  %v6600_v33 = vld [vmem:[%s14019_s5 + $0x48] sm:$0xff]  ;;  %v5998_v31 = vld [vmem:[%s14014_s3 + $0x150] sm:$0xff]  ;;  %v9107_v1 = vpack.c.bf16 %v6619_v45, %v6616_v22 }
0x240b   :  { %9535 = vpow2.f32 %v6421_v27  ;;  %v5999_v10 = vld [vmem:[%s14014_s3 + $0x158] sm:$0xff]  ;;  %v9095_v27 = vpack.c.bf16 %v6601_v29, %v6598_v14  ;;  %v6613_v61 = vld [vmem:[%s14019_s5 + $0xb0] sm:$0xff]  ;;  %v9081_v34 = vpack.c.bf16 %v6002_v12, %v5998_v31  ;;  %v6612_v9 = vld [vmem:[%s14019_s5 + $0xa8] sm:$0xff] }
0x240c   :  { %v6610_v46 = vld [vmem:[%s14019_s5 + $0x98] sm:$0xff]  ;;  %v6006_v30 = vld [vmem:[%s14014_s3 + $0x190] sm:$0xff] }
0x240d   :  { %9070 = vmatpush1.bf16.msra.mxu0 %v9069_v38  ;;  %v6007_v35 = vld [vmem:[%s14014_s3 + $0x198] sm:$0xff]  ;;  %v9103_v28 = vpack.c.bf16 %v6613_v61, %v6610_v46  ;;  %v6609_v58 = vld [vmem:[%s14019_s5 + $0x90] sm:$0xff] }
0x240e   :  { %v9522_v6 = vpop.eup %9521  ;;  %9072 = vmatprep.subr.bf16.mxu0 %v9071_v36  ;;  %v6011_v13 = vld [vmem:[%s14014_s3 + $0x1b8] sm:$0xff]  ;;  %v6010_v8 = vld [vmem:[%s14014_s3 + $0x1b0] sm:$0xff]  ;;  %v9105_v25 = vpack.c.bf16 %v6612_v9, %v6609_v58 }
0x240f   :  { %v9524_v63 = vpop.eup %9523  ;;  %6436 = vperm.xlu0 %9504, %v9522_v6   ;;  %v9091_v6 = vpack.c.bf16 %v6595_v62, %v6592_v17  ;;  %v9083_v16 = vpack.c.bf16 %v6011_v13, %v6007_v35  ;;  %v6015_v38 = vld [vmem:[%s14014_s3 + $0x1d8] sm:$0xff]  ;;  %v9085_v49 = vpack.c.bf16 %v6010_v8, %v6006_v30  ;;  %v6014_v17 = vld [vmem:[%s14014_s3 + $0x1d0] sm:$0xff] }
0x2410   :  { %6433 = vperm.xlu1 %9503, %v9524_v63   ;;  %v9526_v7 = vpop.eup %9525  ;;  %v9093_v63 = vpack.c.bf16 %v6594_v18, %v6591_v60  ;;  %v6019_v36 = vld [vmem:[%s14014_s3 + $0x1f8] sm:$0xff]  ;;  %v6018_v62 = vld [vmem:[%s14014_s3 + $0x1f0] sm:$0xff] }
0x2411   :  { %v9528_v11 = vpop.eup %9527  ;;  %9092 = vmatprep.subr.bf16.mxu1 %v9091_v6  ;;  %9074 = vmatpush1.bf16.msra.mxu0 %v9073_v2  ;;  %v9087_v20 = vpack.c.bf16 %v6019_v36, %v6015_v38  ;;  %v9089_v60 = vpack.c.bf16 %v6018_v62, %v6014_v17  ;;  %v6593_v18 = vld [vmem:[%s14019_s5 + $0x10] sm:$0xff]  ;;  %v6596_v2 = vld [vmem:[%s14019_s5 + $0x28] sm:$0xff]  ;;  %v6602_v6 = vld [vmem:[%s14019_s5 + $0x58] sm:$0xff] }
0x2412   :  { %v9530_v37 = vpop.eup %9529  ;;  %9094 = vmatpush1.bf16.msra.mxu1 %v9093_v63  ;;  %9076 = vmatprep.subr.bf16.mxu0 %v9075_v44  ;;  %v6605_v14 = vld [vmem:[%s14019_s5 + $0x70] sm:$0xff]  ;;  %v6608_v44 = vld [vmem:[%s14019_s5 + $0x88] sm:$0xff]  ;;  %v6503_v35 = vld [vmem:[%s14020_s0 + $0x18] sm:$0xff] }
0x2413   :  { %v9532_v54 = vpop.eup %9531  ;;  %9096 = vmatprep.subr.bf16.mxu1 %v9095_v27  ;;  %v9130_v29 = vpack.c.bf16 %v6608_v44, %v6605_v14  ;;  %v6500_v27 = vld [vmem:[%s14020_s0] sm:$0xff]  ;;  %v6505_v62 = vld [vmem:[%s14020_s0 + $0x28] sm:$0xff] }
0x2414   :  { %6439 = vperm.xlu1 %9503, %v9526_v7   ;;  %v9534_v43 = vpop.eup %9533  ;;  %v6597_v7 = vld [vmem:[%s14019_s5 + $0x30] sm:$0xff]  ;;  %v6504_v38 = vld [vmem:[%s14020_s0 + $0x20] sm:$0xff] }
0x2415   :  { %v9536_v51 = vpop.eup %9535 }
0x2418   :  { %6442 = vperm.xlu1 %9503, %v9528_v11   ;;  %v6003_v11 = vld [vmem:[%s14014_s3 + $0x178] sm:$0xff] }
0x2419   :  { %v9079_v32 = vpack.c.bf16 %v6003_v11, %v5999_v10  ;;  %v6501_v11 = vld [vmem:[%s14020_s0 + $0x8] sm:$0xff] }
0x241c   :  { %6445 = vperm.xlu1 %9503, %v9530_v37   ;;  %v6604_v37 = vld [vmem:[%s14019_s5 + $0x68] sm:$0xff] }
0x2420   :  { %6448 = vperm.xlu1 %9503, %v9532_v54   ;;  %v9097_v54 = vpack.c.bf16 %v6600_v33, %v6597_v7  ;;  %v6611_v7 = vld [vmem:[%s14019_s5 + $0xa0] sm:$0xff]  ;;  %v6614_v33 = vld [vmem:[%s14019_s5 + $0xb8] sm:$0xff] }
0x2421   :  { %v9133_v10 = vpack.c.bf16 %v6614_v33, %v6611_v7 }
0x2422   :  { %9098 = vmatpush1.bf16.msra.mxu1 %v9097_v54 }
0x2424   :  { %6451 = vperm.xlu1 %9503, %v9534_v43   ;;  %v6607_v43 = vld [vmem:[%s14019_s5 + $0x80] sm:$0xff] }
0x2425   :  { %v9099_v59 = vpack.c.bf16 %v6607_v43, %v6604_v37 }
0x2427   :  { %9100 = vmatprep.subr.bf16.mxu1 %v9099_v59  ;;  %v6502_v59 = vld [vmem:[%s14020_s0 + $0x10] sm:$0xff] }
0x2428   :  { %6454 = vperm.xlu1 %9503, %v9536_v51   ;;  %v9077_v51 = vpack.c.bf16 %v5994_v21, %v5990_v57  ;;  %9102 = vmatpush1.bf16.msra.mxu1 %v9101_v48  ;;  %v9124_v57 = vpack.c.bf16 %v6596_v2, %v6593_v18  ;;  %v6599_v21 = vld [vmem:[%s14019_s5 + $0x40] sm:$0xff] }
0x2429   :  { %9104 = vmatprep.subr.bf16.mxu1 %v9103_v28  ;;  %v9127_v63 = vpack.c.bf16 %v6602_v6, %v6599_v21 }
0x242a   :  { %9078 = vmatpush1.bf16.msra.mxu0 %v9077_v51 }
0x242b   :  { %9080 = vmatprep.subr.bf16.mxu0 %v9079_v32 }
0x242c   :  { %9106 = vmatpush1.bf16.msra.mxu1 %v9105_v25 }
0x242d   :  { %9108 = vmatprep.subr.bf16.mxu1 %v9107_v1 }
0x242e   :  { %9082 = vmatpush1.bf16.msra.mxu0 %v9081_v34 }
0x242f   :  { %9084 = vmatprep.subr.bf16.mxu0 %v9083_v16 }
0x2432   :  { %9086 = vmatpush1.bf16.msra.mxu0 %v9085_v49 }
0x2433   :  { %9088 = vmatprep.subr.bf16.mxu0 %v9087_v20 }
0x2436   :  { %9090 = vmatpush1.bf16.msra.mxu0 %v9089_v60 }
0x2437   :  { %9123 = vmatprep.subr.bf16.mxu0 %v9570_v40 }
0x2439   :  { %6156 = vmatmul.mubr.f32.vlgmr.msra.gmra.mrb[30].mxu0 %v13260_v0 }
0x243a   :  { %9125 = vmatpush3.bf16.msra.mxu0 %v9124_v57  ;;  %8010 = vmatprep.mubr.msk.f32.mxu0 %vm9571_vm8, %v9567_v3 }
0x243b   :  { %9126 = vmatprep.subr.bf16.mxu0 %v9570_v40 }
0x243e   :  { %9128 = vmatpush3.bf16.msra.mxu0 %v9127_v63  ;;  %v6355_v63 = vsub.f32 -1e+30, %v13442_v56 }
0x243f   :  { %9129 = vmatprep.subr.bf16.mxu0 %v9570_v40 }
0x2442   :  { %9131 = vmatpush3.bf16.msra.mxu0 %v9130_v29 }
0x2443   :  { %9132 = vmatprep.subr.bf16.mxu0 %v9570_v40 }
0x2446   :  { %9134 = vmatpush3.bf16.msra.mxu0 %v9133_v10 }
0x2447   :  { %9135 = vmatprep.subr.bf16.mxu0 %v9570_v40 }
0x244c   :  { %5895 = vmin.xlane.f32.xlu1 %v13466_v4 }
0x248e   :  { %v6437_v37 = vpop.permute.xlu0 %6436 }
0x248f   :  { %v6517_v54 = vmul.f32 %v6501_v11, %v6437_v37  ;;  %v6434_v43 = vpop.permute.xlu1 %6433  ;;  %v6463_v2 = vrot.slane %v6437_v37, %v9805_v53 }
0x2490   :  { %v6516_v51 = vmul.f32 %v6500_v27, %v6434_v43  ;;  %v6459_v57 = vrot.slane %v6434_v43, %v9805_v53  ;;  %v6506_v27 = vld [vmem:[%s14020_s0 + $0x30] sm:$0xff] }
0x2491   :  { %v6530_v31 = vrot.slane %v6517_v54, 4 }
0x2492   :  { %v6524_v24 = vrot.slane %v6516_v51, 4 }
0x2493   :  { %v6531_v5 = vadd.f32 %v6530_v31, %v6517_v54  ;;  %v6440_v32 = vpop.permute.xlu1 %6439 }
0x2494   :  { %v6525_v12 = vadd.f32 %v6524_v24, %v6516_v51  ;;  %v6518_v46 = vmul.f32 %v6502_v59, %v6440_v32  ;;  %v6467_v14 = vrot.slane %v6440_v32, %v9805_v53  ;;  %v6488_v51 = vsel %vm458_vm0, %v6463_v2, %v6459_v57 }
0x2495   :  { %v6532_v61 = vrot.slane %v6531_v5, 2 }
0x2496   :  { %v6526_v13 = vrot.slane %v6525_v12, 2  ;;  %v6536_v48 = vrot.slane %v6518_v46, 4  ;;  %v6489_v32 = vsel %vm460_vm1, %v6467_v14, %v6488_v51  ;;  %v6617_v51 = vld [vmem:[%s14019_s5 + $0xd0] sm:$0xff] }
0x2497   :  { %v6533_v34 = vadd.f32 %v6532_v61, %v6531_v5  ;;  %v6443_v30 = vpop.permute.xlu1 %6442  ;;  %v6356_v5 = vmul.f32 1.442695, %v6355_v63 }
0x2498   :  { %v6527_v28 = vadd.f32 %v6526_v13, %v6525_v12  ;;  %v6537_v58 = vadd.f32 %v6536_v48, %v6518_v46  ;;  %v6519_v9 = vmul.f32 %v6503_v35, %v6443_v30  ;;  %v6471_v10 = vrot.slane %v6443_v30, %v9805_v53 }
0x2499   :  { %v6534_v16 = vrot.slane %v6533_v34, 1  ;;  %9537 = vpow2.f32 %v6356_v5  ;;  %v6622_v5 = vld [vmem:[%s14019_s5 + $0xf8] sm:$0xff] }
0x249a   :  { %v6528_v8 = vrot.slane %v6527_v28, 1  ;;  %v6538_v22 = vrot.slane %v6537_v58, 2  ;;  %v6542_v45 = vrot.slane %v6519_v9, 4  ;;  %v6490_v35 = vsel %vm462_vm2, %v6471_v10, %v6489_v32  ;;  %v6625_v32 = vld [vmem:[%s14019_s5 + $0x110] sm:$0xff] }
0x249b   :  { %v6446_v36 = vpop.permute.xlu1 %6445  ;;  %v6535_v1 = vadd.f32 %v6534_v16, %v6533_v34  ;;  %v6507_v34 = vld [vmem:[%s14020_s0 + $0x38] sm:$0xff] }
0x249c   :  { %v6539_v25 = vadd.f32 %v6538_v22, %v6537_v58  ;;  %v6543_v49 = vadd.f32 %v6542_v45, %v6519_v9  ;;  %v6529_v20 = vadd.f32 %v6528_v8, %v6527_v28  ;;  %v6520_v17 = vmul.f32 %v6504_v38, %v6446_v36 }
0x249d   :  { %v6475_v43 = vrot.slane %v6446_v36, %v9805_v53 }
0x249e   :  { %v6540_v60 = vrot.slane %v6539_v25, 1  ;;  %v6544_v18 = vrot.slane %v6543_v49, 2  ;;  %v6548_v21 = vrot.slane %v6520_v17, 4  ;;  %v6580_v33 = vsel %vm458_vm0, %v6535_v1, %v6529_v20 }
0x249f   :  { %v6449_v6 = vpop.permute.xlu1 %6448  ;;  %v6491_v58 = vsel %vm464_vm3, %v6475_v43, %v6490_v35  ;;  %v6615_v43 = vld [vmem:[%s14019_s5 + $0xc0] sm:$0xff] }
0x24a0   :  { %v6541_v44 = vadd.f32 %v6540_v60, %v6539_v25  ;;  %v6545_v29 = vadd.f32 %v6544_v18, %v6543_v49  ;;  %v6521_v7 = vmul.f32 %v6505_v62, %v6449_v6  ;;  %v6549_v11 = vadd.f32 %v6548_v21, %v6520_v17  ;;  %v6623_v35 = vld [vmem:[%s14019_s5 + $0x100] sm:$0xff] }
0x24a1   :  { %v6479_v59 = vrot.slane %v6449_v6, %v9805_v53 }
0x24a2   :  { %v6581_v37 = vsel %vm460_vm1, %v6541_v44, %v6580_v33  ;;  %v6546_v54 = vrot.slane %v6545_v29, 1  ;;  %v6554_v56 = vrot.slane %v6521_v7, 4  ;;  %v6550_v31 = vrot.slane %v6549_v11, 2 }
0x24a3   :  { %v6452_v24 = vpop.permute.xlu1 %6451  ;;  %v6492_v22 = vsel %vm466_vm4, %v6479_v59, %v6491_v58  ;;  %v6620_v59 = vld [vmem:[%s14019_s5 + $0xe8] sm:$0xff]  ;;  %v6627_v58 = vld [vmem:[%s14019_s5 + $0x120] sm:$0xff] }
0x24a4   :  { %v6547_v12 = vadd.f32 %v6546_v54, %v6545_v29  ;;  %v6555_v46 = vadd.f32 %v6554_v56, %v6521_v7  ;;  %v6522_v61 = vmul.f32 %v6506_v27, %v6452_v24  ;;  %v6551_v13 = vadd.f32 %v6550_v31, %v6549_v11  ;;  %v9538_v7 = vpop.eup %9537  ;;  %v6618_v56 = vld [vmem:[%s14019_s5 + $0xd8] sm:$0xff] }
0x24a5   :  { %v6483_v48 = vrot.slane %v6452_v24, %v9805_v53  ;;  %v6423_v27 = vmul.f32 0.0, %v9538_v7  ;;  %v9109_v31 = vpack.c.bf16 %v6618_v56, %v6615_v43  ;;  %v9136_v24 = vpack.c.bf16 %v6620_v59, %v6617_v51  ;;  %v5908_v7 = vld [vmem:[%s14015_s9] sm:$0xff]  ;;  %v5914_v56 = vld [vmem:[%s14015_s9 + $0x30] sm:$0xff]  ;;  %v5917_v59 = vld [vmem:[%s14015_s9 + $0x48] sm:$0xff] }
0x24a6   :  { %v6556_v30 = vrot.slane %v6555_v46, 2  ;;  %v6560_v28 = vrot.slane %v6522_v61, 4  ;;  %v6582_v9 = vsel %vm462_vm2, %v6547_v12, %v6581_v37  ;;  %v6552_v16 = vrot.slane %v6551_v13, 1 }
0x24a7   :  { %v6455_v8 = vpop.permute.xlu1 %6454  ;;  %v6493_v1 = vsel %vm468_vm5, %v6483_v48, %v6492_v22  ;;  %9110 = vmatpush1.bf16.msra.mxu1 %v9109_v31  ;;  %9137 = vmatpush3.bf16.msra.mxu0 %v9136_v24  ;;  %v9111_v12 = vpack.c.bf16 %v6625_v32, %v6622_v5  ;;  %v6626_v48 = vld [vmem:[%s14019_s5 + $0x118] sm:$0xff]  ;;  %v6632_v22 = vld [vmem:[%s14019_s5 + $0x148] sm:$0xff]  ;;  %v5916_v24 = vld [vmem:[%s14015_s9 + $0x40] sm:$0xff] }
0x24a8   :  { %v6557_v45 = vadd.f32 %v6556_v30, %v6555_v46  ;;  %v6561_v38 = vadd.f32 %v6560_v28, %v6522_v61  ;;  %v6487_v36 = vrot.slane %v6455_v8, %v9805_v53  ;;  %v6523_v25 = vmul.f32 %v6507_v34, %v6455_v8  ;;  %v6621_v46 = vld [vmem:[%s14019_s5 + $0xf0] sm:$0xff]  ;;  %v6624_v61 = vld [vmem:[%s14019_s5 + $0x108] sm:$0xff]  ;;  %9138 = vmatprep.subr.bf16.mxu0 %v9570_v40  ;;  %v6631_v28 = vld [vmem:[%s14019_s5 + $0x140] sm:$0xff] }
0x24a9   :  { %v6553_v49 = vadd.f32 %v6552_v16, %v6551_v13  ;;  %v9113_v13 = vpack.c.bf16 %v6624_v61, %v6621_v46  ;;  %9112 = vmatprep.subr.bf16.mxu1 %v9111_v12  ;;  %v9139_v34 = vpack.c.bf16 %v6626_v48, %v6623_v35  ;;  %v6628_v30 = vld [vmem:[%s14019_s5 + $0x128] sm:$0xff]  ;;  %v6630_v16 = vld [vmem:[%s14019_s5 + $0x138] sm:$0xff]  ;;  %v6629_v8 = vld [vmem:[%s14019_s5 + $0x130] sm:$0xff]  ;;  %v9153_v12 = vpack.c.bf16 %v5917_v59, %v5914_v56 }
0x24aa   :  { %v6558_v20 = vrot.slane %v6557_v45, 1  ;;  %v6562_v17 = vrot.slane %v6561_v38, 2  ;;  %v6566_v62 = vrot.slane %v6523_v25, 4  ;;  %v6494_v60 = vsel %vm470_vm6, %v6487_v36, %v6493_v1  ;;  %v6634_v36 = vld [vmem:[%s14019_s5 + $0x158] sm:$0xff]  ;;  %v5921_v32 = vld [vmem:[%s14015_s9 + $0x68] sm:$0xff]  ;;  %v5920_v61 = vld [vmem:[%s14015_s9 + $0x60] sm:$0xff] }
0x24ab   :  { %v6496_v18 = vsel %vm473_vm7, %v6494_v60, 0.0  ;;  %v6583_v2 = vsel %vm464_vm3, %v6553_v49, %v6582_v9  ;;  %9114 = vmatpush1.bf16.msra.mxu1 %v9113_v13  ;;  %9140 = vmatpush3.bf16.msra.mxu0 %v9139_v34  ;;  %v9115_v9 = vpack.c.bf16 %v6631_v28, %v6628_v30  ;;  %v6633_v49 = vld [vmem:[%s14019_s5 + $0x150] sm:$0xff]  ;;  %v5919_v5 = vld [vmem:[%s14015_s9 + $0x58] sm:$0xff]  ;;  %v5925_v34 = vld [vmem:[%s14015_s9 + $0x88] sm:$0xff] }
0x24ac   :  { %v6559_v57 = vadd.f32 %v6558_v20, %v6557_v45  ;;  %v6563_v21 = vadd.f32 %v6562_v17, %v6561_v38  ;;  %v6567_v6 = vadd.f32 %v6566_v62, %v6523_v25  ;;  %6497 = vadd.xlane.f32.xlu0 %v6496_v18  ;;  %9141 = vmatprep.subr.bf16.mxu0 %v9570_v40  ;;  %v6637_v25 = vld [vmem:[%s14019_s5 + $0x170] sm:$0xff]  ;;  %v6636_v20 = vld [vmem:[%s14019_s5 + $0x168] sm:$0xff]  ;;  %v6635_v17 = vld [vmem:[%s14019_s5 + $0x160] sm:$0xff] }
0x24ad   :  { %v9117_v45 = vpack.c.bf16 %v6630_v16, %v6627_v58  ;;  %v9142_v38 = vpack.c.bf16 %v6632_v22, %v6629_v8  ;;  %9116 = vmatprep.subr.bf16.mxu1 %v9115_v9  ;;  %v9119_v1 = vpack.c.bf16 %v6637_v25, %v6634_v36  ;;  %v6638_v62 = vld [vmem:[%s14019_s5 + $0x178] sm:$0xff]  ;;  %v9121_v60 = vpack.c.bf16 %v6636_v20, %v6633_v49  ;;  %v5909_v18 = vld [vmem:[%s14015_s9 + $0x8] sm:$0xff]  ;;  %v5922_v48 = vld [vmem:[%s14015_s9 + $0x70] sm:$0xff] }
0x24ae   :  { %v6564_v63 = vrot.slane %v6563_v21, 1  ;;  %v6568_v14 = vrot.slane %v6567_v6, 2  ;;  %v6584_v53 = vsel %vm466_vm4, %v6559_v57, %v6583_v2  ;;  %v5912_v2 = vld [vmem:[%s14015_s9 + $0x20] sm:$0xff]  ;;  %v9145_v57 = vpack.c.bf16 %v6638_v62, %v6635_v17  ;;  %v5923_v13 = vld [vmem:[%s14015_s9 + $0x78] sm:$0xff]  ;;  %v5930_v28 = vld [vmem:[%s14015_s9 + $0xb0] sm:$0xff] }
0x24af   :  { %9118 = vmatpush1.bf16.msra.mxu1 %v9117_v45  ;;  %9143 = vmatpush3.bf16.msra.mxu0 %v9142_v38  ;;  %v9183_v46 = vpack.c.bf16 %v5919_v5, %v5916_v24  ;;  %v5927_v30 = vld [vmem:[%s14015_s9 + $0x98] sm:$0xff]  ;;  %v9157_v58 = vpack.c.bf16 %v5923_v13, %v5920_v61  ;;  %v9186_v9 = vpack.c.bf16 %v5925_v34, %v5922_v48  ;;  %v5926_v16 = vld [vmem:[%s14015_s9 + $0x90] sm:$0xff]  ;;  %v5929_v22 = vld [vmem:[%s14015_s9 + $0xa8] sm:$0xff] }
0x24b0   :  { %v6565_v44 = vadd.f32 %v6564_v63, %v6563_v21  ;;  %v6569_v29 = vadd.f32 %v6568_v14, %v6567_v6  ;;  %9120 = vmatprep.subr.bf16.mxu1 %v9119_v1  ;;  %v9147_v21 = vpack.c.bf16 %v5912_v2, %v5909_v18  ;;  %9144 = vmatprep.subr.bf16.mxu0 %v9570_v40  ;;  %v5891_v6 = vand.u32 65535, %v13463_v41  ;;  %v5910_v41 = vld [vmem:[%s14015_s9 + $0x10] sm:$0xff]  ;;  %v5928_v45 = vld [vmem:[%s14015_s9 + $0xa0] sm:$0xff]  ;;  %v5931_v38 = vld [vmem:[%s14015_s9 + $0xb8] sm:$0xff] }
0x24b1   :  { %v9159_v8 = vpack.c.bf16 %v5930_v28, %v5927_v30  ;;  %v5933_v36 = vld [vmem:[%s14015_s9 + $0xc8] sm:$0xff]  ;;  %v5936_v25 = vld [vmem:[%s14015_s9 + $0xe0] sm:$0xff]  ;;  %v9161_v49 = vpack.c.bf16 %v5929_v22, %v5926_v16  ;;  %v9189_v1 = vpack.c.bf16 %v5931_v38, %v5928_v45  ;;  %v5934_v18 = vld [vmem:[%s14015_s9 + $0xd0] sm:$0xff] }
0x24b2   :  { %v6570_v33 = vrot.slane %v6569_v29, 1  ;;  %v6585_v10 = vsel %vm468_vm5, %v6565_v44, %v6584_v53  ;;  %v5893_v63 = vcvt.s32.f32 %v5891_v6  ;;  %v5932_v20 = vld [vmem:[%s14015_s9 + $0xc0] sm:$0xff]  ;;  %v9163_v62 = vpack.c.bf16 %v5936_v25, %v5933_v36  ;;  %v5937_v2 = vld [vmem:[%s14015_s9 + $0xe8] sm:$0xff]  ;;  %v5942_v6 = vld [vmem:[%s14015_s9 + $0x110] sm:$0xff] }
0x24b3   :  { %9122 = vmatpush1.bf16.msra.mxu1 %v9121_v60  ;;  %9146 = vmatpush3.bf16.msra.mxu0 %v9145_v57  ;;  %v5935_v60 = vld [vmem:[%s14015_s9 + $0xd8] sm:$0xff]  ;;  %v5954_v24 = vld [vmem:[%s14015_s9 + $0x170] sm:$0xff]  ;;  %v5952_v61 = vld [vmem:[%s14015_s9 + $0x160] sm:$0xff] }
0x24b4   :  { %v6571_v11 = vadd.f32 %v6570_v33, %v6569_v29  ;;  %9148 = vmatprep.subr.bf16.mxu1 %v9147_v21  ;;  %9179 = vmatprep.subr.bf16.mxu0 %v9570_v40  ;;  %v5911_v33 = vld [vmem:[%s14015_s9 + $0x18] sm:$0xff]  ;;  %v6946_v16 = vld [vmem:[%s14021_s7 + $0x8] sm:$0xff]  ;;  %v6949_v22 = vld [vmem:[%s14021_s7 + $0x20] sm:$0xff] }
0x24b5   :  { %v5939_v21 = vld [vmem:[%s14015_s9 + $0xf8] sm:$0xff]  ;;  %v6950_v45 = vld [vmem:[%s14021_s7 + $0x28] sm:$0xff]  ;;  %v6951_v36 = vld [vmem:[%s14021_s7 + $0x30] sm:$0xff] }
0x24b6   :  { %v6586_v37 = vsel %vm470_vm6, %v6571_v11, %v6585_v10  ;;  %v5915_v10 = vld [vmem:[%s14015_s9 + $0x38] sm:$0xff]  ;;  %v5918_v11 = vld [vmem:[%s14015_s9 + $0x50] sm:$0xff]  ;;  %v9210_v38 = vpack.c.bf16 %v6950_v45, %v6949_v22 }
0x24b7   :  { %v13699_v54 = vadd.f32 %v6586_v37, %v6423_v27  ;;  %v9149_v37 = vpack.c.bf16 %v5911_v33, %v5908_v7  ;;  %v9151_v31 = vpack.c.bf16 %v5918_v11, %v5915_v10  ;;  %v5941_v7 = vld [vmem:[%s14015_s9 + $0x108] sm:$0xff]  ;;  %v5940_v33 = vld [vmem:[%s14015_s9 + $0x100] sm:$0xff]  ;;  %v5947_v56 = vld [vmem:[%s14015_s9 + $0x138] sm:$0xff] }
0x24b8   :  { %v5948_v10 = vld [vmem:[%s14015_s9 + $0x140] sm:$0xff]  ;;  %v5951_v59 = vld [vmem:[%s14015_s9 + $0x158] sm:$0xff] }
0x24b9   :  { %v6952_v25 = vld [vmem:[%s14021_s7 + $0x38] sm:$0xff] }
0x24d9   :  { %v13778_v14 = vpop.xlane.xlu1 %5895 }
0x24da   :  { %vm5897_vm0 = vcmp.eq.f32.partialorder %v13466_v4, %v13778_v14  ;;  %v5913_v4 = vld [vmem:[%s14015_s9 + $0x28] sm:$0xff]  ;;  %v5902_v34 = vcvt.f32.s32 %v13778_v14  ;;  %v6945_v14 = vld [vmem:[%s14021_s7] sm:$0xff] }
0x24db   :  { %v5898_v53 = vsel %vm5897_vm0, %v5893_v63, inf  ;;  %v9180_v43 = vpack.c.bf16 %v5913_v4, %v5910_v41  ;;  %v9165_v63 = vpack.c.bf16 %v5935_v60, %v5932_v20  ;;  %v5943_v41 = vld [vmem:[%s14015_s9 + $0x118] sm:$0xff]  ;;  %v5945_v4 = vld [vmem:[%s14015_s9 + $0x128] sm:$0xff]  ;;  %v6955_v60 = vld [vmem:[%s14021_s7 + $0x50] sm:$0xff] }
0x24dc   :  { %5899 = vmin.xlane.f32.xlu1 %v5898_v53  ;;  %v9192_v53 = vpack.c.bf16 %v5937_v2, %v5934_v18  ;;  %v5903_v28 = vshll.u32 %v5902_v34, 16  ;;  %v6954_v20 = vld [vmem:[%s14021_s7 + $0x48] sm:$0xff]  ;;  %v6956_v18 = vld [vmem:[%s14021_s7 + $0x58] sm:$0xff] }
0x24dd   :  { %v9219_v2 = vpack.c.bf16 %v6956_v18, %v6955_v60 }
0x250c   :  { %v13863_v17 = vpop.f32.mrb[30].mxu0 }
0x250d   :  { %v13875_v57 = vpop.f32.mrb[31].mxu0 }
0x2539   :  { %v6498_v44 = vpop.xlane.xlu0 %6497 }
0x253a   :  { %v6499_v29 = vadd.f32 %v6498_v44, %v6423_v27  ;;  %v5938_v44 = vld [vmem:[%s14015_s9 + $0xf0] sm:$0xff] }
0x253b   :  { %v9169_v11 = vpack.c.bf16 %v5941_v7, %v5938_v44  ;;  %v6960_v44 = vld [vmem:[%s14021_s7 + $0x78] sm:$0xff] }
0x253c   :  { %9539 = vrcp.f32 %v6499_v29  ;;  %v9167_v29 = vpack.c.bf16 %v5942_v6, %v5939_v21  ;;  %v6957_v21 = vld [vmem:[%s14021_s7 + $0x60] sm:$0xff]  ;;  %v6958_v6 = vld [vmem:[%s14021_s7 + $0x68] sm:$0xff] }
0x2546   :  { %v9540_v27 = vpop.eup %9539 }
0x2547   :  { %v6590_v51 = vmul.f32 %v9540_v27, %v13699_v54  ;;  %v5924_v54 = vld [vmem:[%s14015_s9 + $0x80] sm:$0xff]  ;;  %v9195_v27 = vpack.c.bf16 %v5943_v41, %v5940_v33 }
0x2548   :  { %v9155_v35 = vpack.c.bf16 %v5924_v54, %v5921_v32  ;;  %v5950_v54 = vld [vmem:[%s14015_s9 + $0x150] sm:$0xff] }
0x2549   :  { %6704 = vmatmul.mubr.f32.vlgmr.msra.gmra.mrb[30].mxu1 %v6590_v51  ;;  %8011 = vmatmul.mubr.f32.vlgmr.msra.gmra.mrb[32].mxu0 %v6590_v51  ;;  %v5946_v51 = vld [vmem:[%s14015_s9 + $0x130] sm:$0xff] }
0x254a   :  { %9150 = vmatpush1.bf16.msra.mxu1 %v9149_v37  ;;  %9181 = vmatpush3.bf16.msra.mxu0 %v9180_v43  ;;  %v5944_v37 = vld [vmem:[%s14015_s9 + $0x120] sm:$0xff]  ;;  %v9171_v43 = vpack.c.bf16 %v5948_v10, %v5945_v4  ;;  %v6162_v10 = vadd.f32 %v13379_v47, %v10235_v15 }
0x254b   :  { %9152 = vmatprep.subr.bf16.mxu1 %v9151_v31  ;;  %9182 = vmatprep.subr.bf16.mxu0 %v9570_v40  ;;  %v5949_v31 = vld [vmem:[%s14015_s9 + $0x148] sm:$0xff]  ;;  %v9173_v5 = vpack.c.bf16 %v5947_v56, %v5944_v37  ;;  %v6163_v56 = vadd.f32 %v13863_v17, %v10244_v23 }
0x254c   :  { %6844 = vmatprep.mubr.f32.mxu1 %v9567_v3  ;;  %8045 = vmatprep.mubr.msk.f32.mxu0 %vm9571_vm8, %v9567_v3  ;;  %v9198_v32 = vpack.c.bf16 %v5949_v31, %v5946_v51 }
0x254e   :  { %9154 = vmatpush1.bf16.msra.mxu1 %v9153_v12  ;;  %9184 = vmatpush3.bf16.msra.mxu0 %v9183_v46  ;;  %v9175_v12 = vpack.c.bf16 %v5954_v24, %v5951_v59  ;;  %v5953_v46 = vld [vmem:[%s14015_s9 + $0x168] sm:$0xff] }
0x254f   :  { %9156 = vmatprep.subr.bf16.mxu1 %v9155_v35  ;;  %9185 = vmatprep.subr.bf16.mxu0 %v9570_v40  ;;  %v5955_v35 = vld [vmem:[%s14015_s9 + $0x178] sm:$0xff]  ;;  %v9177_v13 = vpack.c.bf16 %v5953_v46, %v5950_v54 }
0x2550   :  { %v9201_v48 = vpack.c.bf16 %v5955_v35, %v5952_v61 }
0x2552   :  { %9158 = vmatpush1.bf16.msra.mxu1 %v9157_v58  ;;  %9187 = vmatpush3.bf16.msra.mxu0 %v9186_v9 }
0x2553   :  { %9160 = vmatprep.subr.bf16.mxu1 %v9159_v8  ;;  %9188 = vmatprep.subr.bf16.mxu0 %v9570_v40  ;;  %v9204_v8 = vpack.c.bf16 %v6946_v16, %v6945_v14 }
0x2556   :  { %9162 = vmatpush1.bf16.msra.mxu1 %v9161_v49  ;;  %9190 = vmatpush3.bf16.msra.mxu0 %v9189_v1  ;;  %v9213_v49 = vpack.c.bf16 %v6952_v25, %v6951_v36  ;;  %v6953_v1 = vld [vmem:[%s14021_s7 + $0x40] sm:$0xff] }
0x2557   :  { %9164 = vmatprep.subr.bf16.mxu1 %v9163_v62  ;;  %9191 = vmatprep.subr.bf16.mxu0 %v9570_v40  ;;  %v9216_v62 = vpack.c.bf16 %v6954_v20, %v6953_v1 }
0x255a   :  { %9166 = vmatpush1.bf16.msra.mxu1 %v9165_v63  ;;  %9193 = vmatpush3.bf16.msra.mxu0 %v9192_v53  ;;  %v9222_v63 = vpack.c.bf16 %v6958_v6, %v6957_v21  ;;  %v6959_v53 = vld [vmem:[%s14021_s7 + $0x70] sm:$0xff] }
0x255b   :  { %9168 = vmatprep.subr.bf16.mxu1 %v9167_v29  ;;  %9194 = vmatprep.subr.bf16.mxu0 %v9570_v40  ;;  %v9225_v29 = vpack.c.bf16 %v6960_v44, %v6959_v53 }
0x255e   :  { %9170 = vmatpush1.bf16.msra.mxu1 %v9169_v11  ;;  %9196 = vmatpush3.bf16.msra.mxu0 %v9195_v27 }
0x255f   :  { %9172 = vmatprep.subr.bf16.mxu1 %v9171_v43  ;;  %9197 = vmatprep.subr.bf16.mxu0 %v9570_v40 }
0x2562   :  { %9174 = vmatpush1.bf16.msra.mxu1 %v9173_v5  ;;  %9199 = vmatpush3.bf16.msra.mxu0 %v9198_v32 }
0x2563   :  { %9176 = vmatprep.subr.bf16.mxu1 %v9175_v12  ;;  %9200 = vmatprep.subr.bf16.mxu0 %v9570_v40 }
0x2566   :  { %9178 = vmatpush1.bf16.msra.mxu1 %v9177_v13  ;;  %9202 = vmatpush3.bf16.msra.mxu0 %v9201_v48 }
0x2567   :  { %9203 = vmatprep.subr.bf16.mxu1 %v9570_v40 }
0x2569   :  { %v5900_v30 = vpop.xlane.xlu1 %5899 }
0x256a   :  { %v5901_v58 = vcvt.f32.s32 %v5900_v30 }
0x256c   :  { %v5904_v9 = vadd.s32 %v5903_v28, %v5901_v58 }
0x256e   :  { %vm5905_vm1 = vcmp.eq.s32.totalorder %v9801_v50, %v5904_v9  ;;  %v6947_v50 = vld [vmem:[%s14021_s7 + $0x10] sm:$0xff] }
0x256f   :  { %7191 = vmatmul.mubr.msk.f32.vlgmr.msra.gmra.mrb[30].mxu1 %vm5905_vm1, %v9572_v39  ;;  %8046 = vmatmul.mubr.msk.f32.vlgmr.msra.gmra.mrb[34].mxu0 %vm5905_vm1, %v9572_v39 }
0x2570   :  { %8080 = vmatprep.mubr.msk.f32.mxu1 %vm9571_vm8, %v9567_v3  ;;  %9205 = vmatpush3.bf16.msra.mxu1 %v9204_v8  ;;  %v6948_v3 = vld [vmem:[%s14021_s7 + $0x18] sm:$0xff] }
0x2571   :  { %9206 = vmatprep.subr.bf16.mxu1 %v9570_v40  ;;  %v9207_v39 = vpack.c.bf16 %v6948_v3, %v6947_v50 }
0x2574   :  { %9208 = vmatpush3.bf16.msra.mxu1 %v9207_v39 }
0x2575   :  { %9209 = vmatprep.subr.bf16.mxu1 %v9570_v40 }
0x2578   :  { %9211 = vmatpush3.bf16.msra.mxu1 %v9210_v38 }
0x2579   :  { %9212 = vmatprep.subr.bf16.mxu1 %v9570_v40 }
0x257c   :  { %9214 = vmatpush3.bf16.msra.mxu1 %v9213_v49 }
0x257d   :  { %9215 = vmatprep.subr.bf16.mxu1 %v9570_v40 }
0x2580   :  { %9217 = vmatpush3.bf16.msra.mxu1 %v9216_v62 }
0x2581   :  { %9218 = vmatprep.subr.bf16.mxu1 %v9570_v40 }
0x2584   :  { %9220 = vmatpush3.bf16.msra.mxu1 %v9219_v2 }
0x2585   :  { %9221 = vmatprep.subr.bf16.mxu1 %v9570_v40 }
0x2588   :  { %9223 = vmatpush3.bf16.msra.mxu1 %v9222_v63 }
0x2589   :  { %9224 = vmatprep.subr.bf16.mxu1 %v9570_v40 }
0x258c   :  { %9226 = vmatpush3.bf16.msra.mxu1 %v9225_v29 }
0x261c   :  { %v6776_v7 = vpop.f32.mrb[32].mxu0 }
0x261d   :  { %v8012_v33 = vpop.f32.mrb[33].mxu0 }
0x2642   :  { %v6846_v41 = vpop.f32.mrb[30].mxu1  ;;  %v6917_v4 = vpop.f32.mrb[34].mxu0 }
0x2643   :  { %v6921_v11 = vadd.f32 %v6846_v41, %v10238_v19  ;;  %v6918_v27 = vadd.f32 %v6917_v4, %v6776_v7  ;;  %v6848_v37 = vpop.f32.mrb[31].mxu1  ;;  %v8047_v43 = vpop.f32.mrb[35].mxu0  ;;  %v6164_v19 = vadd.f32 %v13875_v57, %v10259_v55 }
0x2644   :  { %v6922_v51 = vadd.f32 %v6848_v37, %v10247_v26 }
0x2645   :  { %v6924_v31 = vadd.f32 %v6921_v11, %v6162_v10  ;;  %v6923_v12 = vadd.f32 %v6918_v27, %v10262_v52 }
0x2646   :  { %v6931_v40 = vadd.f32 %v6922_v51, %v6163_v56 }
0x2647   :  { %v7193_v59 = vmul.f32 -1.442695, %v6924_v31 }
0x2648   :  { %v7194_v24 = vmul.f32 -1.442695, %v6931_v40 }
0x2649   :  { %9541 = vpow2.f32 %v7193_v59 }
0x264a   :  { %9543 = vpow2.f32 %v7194_v24 }
0x2653   :  { %v9542_v5 = vpop.eup %9541 }
0x2654   :  { %v6928_v32 = vadd.f32 1.0, %v9542_v5  ;;  %v9544_v15 = vpop.eup %9543 }
0x2655   :  { %v6935_v47 = vadd.f32 1.0, %v9544_v15 }
0x2656   :  { %9545 = vrcp.f32 %v6928_v32 }
0x2657   :  { %9547 = vrcp.f32 %v6935_v47 }
0x2660   :  { %v9546_v54 = vpop.eup %9545 }
0x2661   :  { %v6938_v23 = vmul.f32 %v9546_v54, %v6164_v19  ;;  %v9548_v17 = vpop.eup %9547 }
0x2662   :  { %v6941_v46 = vsub.f32 1.0, %v9548_v17  ;;  %v6943_v13 = vmul.f32 %v9548_v17, %v13260_v0 }
0x2663   :  { %v6939_v26 = vadd.f32 %v6938_v23, %v6923_v12 }
0x2665   :  { %9549 = vtanh.f32 %v6939_v26 }
0x266f   :  { %v9550_v61 = vpop.eup %9549 }
0x2670   :  { %v6942_v35 = vmul.f32 %v9550_v61, %v6941_v46 }
0x2672   :  { %v6944_v48 = vadd.f32 %v6943_v13, %v6942_v35 }
0x2674   :  { %8081 = vmatmul.mubr.f32.vlgmr.msra.gmra.mrb[32].mxu1 %v6944_v48 }
0x2747   :  { %v7027_v34 = vpop.f32.mrb[32].mxu1 }
0x2748   :  { %v7028_v30 = vadd.f32 %v10273_v42, %v7027_v34  ;;  %v8082_v28 = vpop.f32.mrb[33].mxu1 }
0x274a   :  { %7031 = vmax.xlane.f32.xlu0 %v7028_v30 }
0x27d7   :  { %v7032_v55 = vpop.xlane.xlu0 %7031 }
0x27d8   :  { %v7033_v57 = vsub.f32 %v7028_v30, %v7032_v55 }
0x27da   :  { %v7034_v52 = vmul.f32 1.442695, %v7033_v57 }
0x27dc   :  { %9551 = vpow2.f32 %v7034_v52 }
0x27e6   :  { %v9552_v58 = vpop.eup %9551 }
0x27e7   :  { %7036 = vadd.xlane.f32.xlu1 %v9552_v58 }
0x2874   :  { %v7037_v9 = vpop.xlane.xlu1 %7036 }
0x2875   :  { %9553 = vlog2.f32 %v7037_v9 }
0x287f   :  { %v9554_v14 = vpop.eup %9553 }
0x2880   :  { %v7039_v16 = vmul.f32 0.6931472, %v9554_v14 }
0x2882   :  { %v7040_v8 = vadd.f32 %v7039_v16, %v7032_v55 }
0x2884   :  { %v7041_v50 = vsub.f32 %v7028_v30, %v7040_v8 }
0x2885   :  { %9561 = dma.done.wait [#allocation3 + $0x1], 128 }
0x2886   :  { %9562 = vsyncadd [#allocation3 + $0x1], 4294967168  ;;  %7195 = vst [vmem:[%s14026_s11 + $0x28] sm:$0xff] %v7041_v50 }
0x2887   :  { %7087 = vsyncadd [#allocation3 + $0x1], 128  ;;  %7088 = vst [vmem:[%s14016_s12] sm:$0xff] %v6944_v48 }
0x2888   :  { %9563 = dma.done.wait [#allocation3], 128 }
0x2889   :  { %9564 = vsyncadd [#allocation3], 4294967168 }
0x288a   :  { %9565 = dma.done.wait [#allocation3 + $0x1], 128 }
0x288b   :  { %9566 = vsyncadd [#allocation3 + $0x1], 4294967168 }
0x288c   :  { %7097 = vsyncmov [#allocation3] }
0x288f   :  { %s7098_s13 = vpop.sfrf %7097 }
0x2890   :  { %p7197_p0 = scmp.ne.s32.totalorder %s7098_s13, 0 }
0x2892   :  { %7102 = shalt.err (%p7197_p0)  }
0x2893   :  { %7104 = vsyncmov [#allocation3 + $0x1] }
0x2896   :  { %s7105_s14 = vpop.sfrf %7104 }
0x2897   :  { %p7198_p1 = scmp.ne.s32.totalorder %s7105_s14, 0 }
0x2899   :  { %7109 = shalt.err (%p7198_p1)  }

</bundles_post_ra>
